<compile_context>
chip_gen: v6e
topology: v6e:2x2x1
jax: 0.10.0
libtpu: 0.0.40
codegen_flags: <defaults>
</compile_context>

<pallas_src>
import numpy as np
import jax
import jax.numpy as jnp
from jax.experimental import pallas as pl
from jax.experimental.pallas import tpu as pltpu


# ----------------------------------------------------------------------------
# Static helpers: PyTorch-exact 1-D linear interpolation (align_corners=False)
# ----------------------------------------------------------------------------
def _linear_interp_matrix_1d(out_size, in_size):
    """F.interpolate(mode='linear', align_corners=False) as a dense (out, in) matrix."""
    M = np.zeros((out_size, in_size), dtype=np.float32)
    scale = in_size / out_size
    for i in range(out_size):
        src = max((i + 0.5) * scale - 0.5, 0.0)          # PyTorch clamps src at 0
        i0 = min(int(np.floor(src)), in_size - 1)
        i1 = min(i0 + 1, in_size - 1)
        w1 = src - i0
        M[i, i0] += 1.0 - w1
        M[i, i1] += w1
    return M


def _linear_interp_lohi(out_size, in_size):
    """Same interpolation expressed as (lo_index, hi_index, hi_weight) tables."""
    lo = np.zeros(out_size, np.int32)
    hi = np.zeros(out_size, np.int32)
    w = np.zeros(out_size, np.float32)
    scale = in_size / out_size
    for i in range(out_size):
        src = max((i + 0.5) * scale - 0.5, 0.0)
        i0 = min(int(np.floor(src)), in_size - 1)
        i1 = min(i0 + 1, in_size - 1)
        lo[i], hi[i], w[i] = i0, i1, np.float32(src - i0)
    return lo, hi, w


def build_interp_matrix_3d(out_spatial, in_spatial):
    """Full kron (T*H*W, Tg*Hg*Wg) matrix — used only by the pure-JAX reference."""
    Mt = _linear_interp_matrix_1d(out_spatial[0], in_spatial[0])
    Mh = _linear_interp_matrix_1d(out_spatial[1], in_spatial[1])
    Mw = _linear_interp_matrix_1d(out_spatial[2], in_spatial[2])
    return np.kron(np.kron(Mt, Mh), Mw).astype(np.float32)


def _choose_tile_t(T, HW, Cin, itemsize, B, sub, target_bytes=4 << 20):
    """Largest T-tile (multiple of the sublane pack, dividing T) under the VMEM target."""
    cands = sorted(set([d for d in range(sub, T + 1, sub) if T % d == 0] + [T]))
    fitting = [d for d in cands if Cin * d * HW * itemsize <= target_bytes]
    tile = max(fitting) if fitting else min(cands)
    if B * (T // tile) < 2:                     # keep >=2 grid steps when possible
        smaller = [d for d in cands if d < tile]
        if smaller:
            tile = max(smaller)
    return tile


def _gate_vmem_bytes(Cin, Cint, Cg, Ng, HgWg, HW, Tg, tile_t, itemsize):
    io_tiles = 2 * (2 * Cin * tile_t * HW * itemsize + tile_t * HW * itemsize)
    resident = 2 * (Cg * Ng * 4 + HgWg * HW * 4)
    weights = 2 * 4 * (Cint * Cin + Cint * Cg + Cin * Cin + 4 * Cint + 4 * Cin)
    scratch = Tg * Cint * HW * 4
    return io_tiles + resident + weights + scratch


# ----------------------------------------------------------------------------
# Fused gate kernel: one (batch, T-tile) block per grid step
# ----------------------------------------------------------------------------
def _gate_kernel(t_lo_ref, t_hi_ref, t_w_ref, psi_b_ref,         # SMEM tables / scalar
                 x_ref, g_ref, mhw_t_ref,                         # VMEM tensors
                 theta_w_ref, phi_w_ref, phi_b_ref, psi_w_ref,
                 W_w_ref, W_scale_ref, W_shift_ref,
                 wy_ref, att_ref,                                 # outputs
                 phi_hw_ref):                                     # scratch (Tg, Cint, HW)
    j = pl.program_id(1)
    tile_t = x_ref.shape[2]
    n_tg = phi_hw_ref.shape[0]
    hg_wg = mhw_t_ref.shape[0]

    # ---- once-per-batch prologue: phi 1x1x1 conv + separable H/W upsample --------
    @pl.when(j == 0)
    def _():
        phi_c = jnp.dot(phi_w_ref[...], g_ref[0],
                        preferred_element_type=jnp.float32) + phi_b_ref[...]
        for tg in range(n_tg):                                    # static unroll, Tg small
            sl = phi_c[:, tg * hg_wg:(tg + 1) * hg_wg]            # (Cint, Hg*Wg)
            phi_hw_ref[tg] = jnp.dot(sl, mhw_t_ref[...],
                                     preferred_element_type=jnp.float32)

    # ---- hot path: one output time slice at a time (static unroll over the tile) --
    for t in range(tile_t):
        gt = j * tile_t + t
        lo = t_lo_ref[gt]
        hi = t_hi_ref[gt]
        w_hi = t_w_ref[gt]
        # fused T-axis trilinear upsample: 2-neighbour blend of H/W-upsampled phi
        phi_t = (1.0 - w_hi) * phi_hw_ref[lo] + w_hi * phi_hw_ref[hi]   # (Cint, HW) f32

        x_t = x_ref[0, :, t, :]                                          # (Cin, HW) bf16
        theta_x = jnp.dot(theta_w_ref[...], x_t,
                          preferred_element_type=jnp.float32)            # bf16 MXU
        f = jnp.maximum(theta_x + phi_t, 0.0)
        # psi (output width 1): VPU broadcast-multiply + sublane reduce, off the MXU
        logits = jnp.sum(f * psi_w_ref[...], axis=0, keepdims=True) + psi_b_ref[0]
        att = jax.nn.sigmoid(logits)                                     # (1, HW) f32
        # second F.interpolate in the module is an identity (theta has stride 1)
        y = (att * x_t.astype(jnp.float32)).astype(x_t.dtype)            # (Cin, HW)
        wy = jnp.dot(W_w_ref[...], y, preferred_element_type=jnp.float32)
        wy = wy * W_scale_ref[...] + W_shift_ref[...]                    # fused BN (eval)
        wy_ref[0, :, t, :] = wy.astype(wy_ref.dtype)
        att_ref[0, :, t, :] = att.astype(att_ref.dtype)


# ----------------------------------------------------------------------------
# Wrapper
# ----------------------------------------------------------------------------
def grid_attention_block(x, g, params, tile_t=None):
    """x: (B, Cin, T, H, W), g: (B, Cg, Tg, Hg, Wg)  (PyTorch NCDHW layout)."""
    B, Cin, T, H, W = x.shape
    Bg, Cg, Tg, Hg, Wg = g.shape
    assert B == Bg
    HW, HgWg = H * W, Hg * Wg
    Ng = Tg * HgWg
    Nx = T * HW
    Cint = params["theta_w"].shape[0]
    cdtype = x.dtype
    itemsize = x.dtype.itemsize

    # ---- static interpolation data (PyTorch trilinear, align_corners=False) ----
    t_lo, t_hi, t_w = _linear_interp_lohi(T, Tg)
    mhw_t = np.kron(_linear_interp_matrix_1d(H, Hg),
                    _linear_interp_matrix_1d(W, Wg)).T.astype(np.float32)  # (HgWg, HW)

    # ---- tile only the T axis: no spatial padding, lane-dense H*W last dim ----
    sub = 16 if itemsize < 4 else 8
    if tile_t is None:
        tile_t = _choose_tile_t(T, HW, Cin, itemsize, B, sub)
    assert T % tile_t == 0 and (tile_t % sub == 0 or tile_t == T)
    n_t = T // tile_t

    x4 = x.reshape(B, Cin, T, HW)                          # free reshape, no transpose
    g3 = g.reshape(B, Cg, Ng).astype(jnp.float32)          # tiny, stays f32
    theta_w = params["theta_w"].astype(cdtype)
    W_w = params["W_w"].astype(cdtype)

    vmem_est = _gate_vmem_bytes(Cin, Cint, Cg, Ng, HgWg, HW, Tg, tile_t, itemsize)
    vmem_limit = int(min(64 << 20, max(32 << 20, int(vmem_est * 1.5))))

    cost = pl.CostEstimate(
        flops=int(B * Nx * (2 * Cin * Cint + 2 * Cin * Cin + 4 * Cint + 3 * Cin)
                  + B * (2 * Cint * Cg * Ng + 2 * Tg * Cint * HgWg * HW)),
        transcendentals=int(B * Nx),
        bytes_accessed=int(itemsize * B * Nx * (2 * Cin + 1)
                           + 4 * B * Cg * Ng + 4 * HgWg * HW),
    )

    grid_spec = pltpu.PrefetchScalarGridSpec(
        num_scalar_prefetch=0,
        grid=(B, n_t),
        in_specs=[
            pl.BlockSpec(memory_space=pltpu.MemorySpace.SMEM),              # t_lo
            pl.BlockSpec(memory_space=pltpu.MemorySpace.SMEM),              # t_hi
            pl.BlockSpec(memory_space=pltpu.MemorySpace.SMEM),              # t_w
            pl.BlockSpec(memory_space=pltpu.MemorySpace.SMEM),              # psi_b
            pl.BlockSpec((1, Cin, tile_t, HW), lambda b, j: (b, 0, j, 0)),  # x tile
            pl.BlockSpec((1, Cg, Ng), lambda b, j: (b, 0, 0)),              # g (per-b resident)
            pl.BlockSpec((HgWg, HW), lambda b, j: (0, 0)),                  # kron(Mh,Mw)^T
            pl.BlockSpec((Cint, Cin), lambda b, j: (0, 0)),                 # theta_w (bf16)
            pl.BlockSpec((Cint, Cg), lambda b, j: (0, 0)),                  # phi_w
            pl.BlockSpec((Cint, 1), lambda b, j: (0, 0)),                   # phi_b
            pl.BlockSpec((Cint, 1), lambda b, j: (0, 0)),                   # psi_w
            pl.BlockSpec((Cin, Cin), lambda b, j: (0, 0)),                  # W_w (bf16)
            pl.BlockSpec((Cin, 1), lambda b, j: (0, 0)),                    # W_scale (BN)
            pl.BlockSpec((Cin, 1), lambda b, j: (0, 0)),                    # W_shift (bias+BN)
        ],
        out_specs=[
            pl.BlockSpec((1, Cin, tile_t, HW), lambda b, j: (b, 0, j, 0)),  # W_y
            pl.BlockSpec((1, 1, tile_t, HW), lambda b, j: (b, 0, j, 0)),    # sigm_psi_f
        ],
        scratch_shapes=[pltpu.VMEM((Tg, Cint, HW), jnp.float32)],           # phi (H/W up'd)
    )

    wy4, att4 = pl.pallas_call(
        _gate_kernel,
        out_shape=(
            jax.ShapeDtypeStruct((B, Cin, T, HW), cdtype),
            jax.ShapeDtypeStruct((B, 1, T, HW), cdtype),
        ),
        grid_spec=grid_spec,
        compiler_params=pltpu.CompilerParams(
            dimension_semantics=("parallel", "arbitrary"),
            vmem_limit_bytes=vmem_limit),
        cost_estimate=cost,
    )(jnp.asarray(t_lo), jnp.asarray(t_hi), jnp.asarray(t_w),
      params["psi_b"].astype(jnp.float32),
      x4, g3, jnp.asarray(mhw_t),
      theta_w, params["phi_w"], params["phi_b"], params["psi_w"],
      W_w, params["W_scale"], params["W_shift"])

    W_y = wy4.reshape(B, Cin, T, H, W)
    att = att4.reshape(B, 1, T, H, W)
    return W_y, att


# ----------------------------------------------------------------------------
# Pure-JAX reference (independent path: dense kron interpolation matrix)
# ----------------------------------------------------------------------------
def grid_attention_reference(x, g, params):
    B, Cin, T, H, W = x.shape
    _, Cg, Tg, Hg, Wg = g.shape
    Nx, Ng = T * H * W, Tg * Hg * Wg
    xf = x.reshape(B, Cin, Nx).astype(jnp.float32)
    gf = g.reshape(B, Cg, Ng).astype(jnp.float32)
    theta_w = params["theta_w"].astype(jnp.float32)
    W_w = params["W_w"].astype(jnp.float32)
    theta_x = jnp.einsum("ic,bcn->bin", theta_w, xf)
    phi = jnp.einsum("ic,bcn->bin", params["phi_w"], gf) + params["phi_b"][None]
    interp = jnp.asarray(build_interp_matrix_3d((T, H, W), (Tg, Hg, Wg)))
    phi_up = jnp.einsum("nm,bim->bin", interp, phi)
    f = jnp.maximum(theta_x + phi_up, 0.0)
    logits = jnp.einsum("bin,io->bon", f, params["psi_w"]) + params["psi_b"][0]
    att = jax.nn.sigmoid(logits)
    y = att * xf
    wy = (jnp.einsum("oc,bcn->bon", W_w, y)
          * params["W_scale"][None] + params["W_shift"][None])
    return wy.reshape(B, Cin, T, H, W), att.reshape(B, 1, T, H, W)


# ----------------------------------------------------------------------------
# Deterministic parameter init (shapes follow the module's __init__)
# ----------------------------------------------------------------------------
def init_params(key, in_channels, gating_channels, inter_channels,
                compute_dtype=jnp.bfloat16, eps=1e-5):
    ks = jax.random.split(key, 11)
    theta_w = (0.2 * jax.random.normal(ks[0], (inter_channels, in_channels),
                                       jnp.float32)).astype(compute_dtype)
    phi_w = 0.2 * jax.random.normal(ks[1], (inter_channels, gating_channels), jnp.float32)
    phi_b = 0.2 * jax.random.normal(ks[2], (inter_channels, 1), jnp.float32)
    psi_w = 0.2 * jax.random.normal(ks[3], (inter_channels, 1), jnp.float32)
    psi_b = 0.2 * jax.random.normal(ks[4], (1,), jnp.float32)
    W_w = (0.2 * jax.random.normal(ks[5], (in_channels, in_channels),
                                   jnp.float32)).astype(compute_dtype)
    W_b = 0.2 * jax.random.normal(ks[6], (in_channels,), jnp.float32)
    bn_gamma = 1.0 + 0.1 * jax.random.normal(ks[7], (in_channels,), jnp.float32)
    bn_beta = 0.1 * jax.random.normal(ks[8], (in_channels,), jnp.float32)
    bn_mean = 0.1 * jax.random.normal(ks[9], (in_channels,), jnp.float32)
    bn_var = 1.0 + jnp.abs(0.1 * jax.random.normal(ks[10], (in_channels,), jnp.float32))
    scale = bn_gamma / jnp.sqrt(bn_var + eps)
    shift = (W_b - bn_mean) * scale + bn_beta
    return dict(theta_w=theta_w, phi_w=phi_w, phi_b=phi_b,
                psi_w=psi_w, psi_b=psi_b,
                W_w=W_w, W_scale=scale[:, None], W_shift=shift[:, None])


if __name__ == "__main__":
    key = jax.random.PRNGKey(0)
    k_x, k_g, k_p = jax.random.split(key, 3)

    # Small shapes consistent with the module: theta/phi/psi/W are 1x1x1 stride-1 convs;
    # this module variant's phi expects in_channels inputs, so Cg == Cin.
    B, Cin = 2, 8
    Cg = Cin
    Cint = Cin // 2                       # inter_channels default = in_channels // 2
    x_spatial = (32, 8, 8)
    g_spatial = (16, 4, 4)                # gating signal at half resolution

    x = jax.random.normal(k_x, (B, Cin) + x_spatial, jnp.float32).astype(jnp.bfloat16)
    g = jax.random.normal(k_g, (B, Cg) + g_spatial, jnp.float32)
    params = init_params(k_p, Cin, Cg, Cint, compute_dtype=jnp.bfloat16)

    # tile_t=16 -> two T-tiles per batch element: exercises the grid and the per-batch
    # phi prologue/scratch reuse across T-tiles.
    W_y, att = grid_attention_block(x, g, params, tile_t=16)
    W_y = jax.block_until_ready(W_y)
    att = jax.block_until_ready(att)

    W_y_ref, att_ref = grid_attention_reference(x, g, params)
    assert W_y.shape == (B, Cin) + x_spatial and W_y.dtype == x.dtype
    assert att.shape == (B, 1) + x_spatial
    np.testing.assert_allclose(np.asarray(W_y.astype(jnp.float32)),
                               np.asarray(W_y_ref), rtol=2e-2, atol=2e-2)
    np.testing.assert_allclose(np.asarray(att.astype(jnp.float32)),
                               np.asarray(att_ref), rtol=2e-2, atol=2e-2)

    print("KERNEL_OK")
</pallas_src>

<mosaic_0001>
module attributes {stable_mosaic.version = 11 : i64} {
  func.func @_gate_kernel(%arg0: i32, %arg1: i32, %arg2: memref<32xi32, #tpu.memory_space<smem>>, %arg3: memref<32xi32, #tpu.memory_space<smem>>, %arg4: memref<32xf32, #tpu.memory_space<smem>>, %arg5: memref<1xf32, #tpu.memory_space<smem>>, %arg6: memref<1x8x16x64xbf16, #tpu.memory_space<vmem>>, %arg7: memref<1x8x256xf32, #tpu.memory_space<vmem>>, %arg8: memref<16x64xf32, #tpu.memory_space<vmem>>, %arg9: memref<4x8xbf16, #tpu.memory_space<vmem>>, %arg10: memref<4x8xf32, #tpu.memory_space<vmem>>, %arg11: memref<4x1xf32, #tpu.memory_space<vmem>>, %arg12: memref<4x1xf32, #tpu.memory_space<vmem>>, %arg13: memref<8x8xbf16, #tpu.memory_space<vmem>>, %arg14: memref<8x1xf32, #tpu.memory_space<vmem>>, %arg15: memref<8x1xf32, #tpu.memory_space<vmem>>, %arg16: memref<1x8x16x64xbf16, #tpu.memory_space<vmem>>, %arg17: memref<1x1x16x64xbf16, #tpu.memory_space<vmem>>, %arg18: memref<16x4x64xf32, #tpu.memory_space<vmem>>) attributes {dimension_semantics = [#tpu.dimension_semantics<parallel>, #tpu.dimension_semantics<arbitrary>], iteration_bounds = array<i64: 2, 2>, scalar_prefetch = 0 : i64, scratch_operands = 1 : i64, tpu.core_type = #tpu.core_type<tc>, window_params = [{transform_indices = @transform_0, window_bounds = array<i64: 32>}, {transform_indices = @transform_1, window_bounds = array<i64: 32>}, {transform_indices = @transform_2, window_bounds = array<i64: 32>}, {transform_indices = @transform_3, window_bounds = array<i64: 1>}, {transform_indices = @transform_4, window_bounds = array<i64: 1, 8, 16, 64>}, {transform_indices = @transform_5, window_bounds = array<i64: 1, 8, 256>}, {pipeline_mode = #tpu.pipeline_mode<synchronous>, transform_indices = @transform_6, window_bounds = array<i64: 16, 64>}, {pipeline_mode = #tpu.pipeline_mode<synchronous>, transform_indices = @transform_7, window_bounds = array<i64: 4, 8>}, {pipeline_mode = #tpu.pipeline_mode<synchronous>, transform_indices = @transform_8, window_bounds = array<i64: 4, 8>}, {pipeline_mode = #tpu.pipeline_mode<synchronous>, transform_indices = @transform_9, window_bounds = array<i64: 4, 1>}, {pipeline_mode = #tpu.pipeline_mode<synchronous>, transform_indices = @transform_10, window_bounds = array<i64: 4, 1>}, {pipeline_mode = #tpu.pipeline_mode<synchronous>, transform_indices = @transform_11, window_bounds = array<i64: 8, 8>}, {pipeline_mode = #tpu.pipeline_mode<synchronous>, transform_indices = @transform_12, window_bounds = array<i64: 8, 1>}, {pipeline_mode = #tpu.pipeline_mode<synchronous>, transform_indices = @transform_13, window_bounds = array<i64: 8, 1>}, {transform_indices = @transform_14, window_bounds = array<i64: 1, 8, 16, 64>}, {transform_indices = @transform_15, window_bounds = array<i64: 1, 1, 16, 64>}]} {
    %c0_i32 = arith.constant 0 : i32
    %0 = arith.cmpi eq, %arg1, %c0_i32 : i32
    %1 = arith.extui %0 : i1 to i32
    %c0_i32_0 = arith.constant 0 : i32
    %2 = arith.cmpi ne, %1, %c0_i32_0 : i32
    scf.if %2 {
      %c0_528 = arith.constant 0 : index
      %c0_529 = arith.constant 0 : index
      %963 = vector.load %arg10[%c0_528, %c0_529] : memref<4x8xf32, #tpu.memory_space<vmem>>, vector<4x8xf32>
      %c0_530 = arith.constant 0 : index
      %c0_531 = arith.constant 0 : index
      %c0_532 = arith.constant 0 : index
      %964 = vector.load %arg7[%c0_530, %c0_531, %c0_532] : memref<1x8x256xf32, #tpu.memory_space<vmem>>, vector<1x8x256xf32>
      %965 = vector.shape_cast %964 : vector<1x8x256xf32> to vector<8x256xf32>
      %cst_533 = arith.constant dense<0.000000e+00> : vector<4x256xf32>
      %966 = tpu.matmul %963, %965, %cst_533 {dimension_numbers = #tpu.dot_dimension_numbers<[1], [0], [0], [1], [0, 0, 1, 1], [], []>} : vector<4x8xf32>, vector<8x256xf32>, vector<4x256xf32> -> vector<4x256xf32>
      %c0_534 = arith.constant 0 : index
      %c0_535 = arith.constant 0 : index
      %967 = vector.load %arg11[%c0_534, %c0_535] : memref<4x1xf32, #tpu.memory_space<vmem>>, vector<4x1xf32>
      %968 = vector.broadcast %967 : vector<4x1xf32> to vector<4x256xf32>
      %969 = arith.addf %966, %968 : vector<4x256xf32>
      %970 = vector.extract_strided_slice %969 {offsets = [0, 0], sizes = [4, 16], strides = [1, 1]} : vector<4x256xf32> to vector<4x16xf32>
      %c0_536 = arith.constant 0 : index
      %c0_537 = arith.constant 0 : index
      %971 = vector.load %arg8[%c0_536, %c0_537] : memref<16x64xf32, #tpu.memory_space<vmem>>, vector<16x64xf32>
      %cst_538 = arith.constant dense<0.000000e+00> : vector<4x64xf32>
      %972 = tpu.matmul %970, %971, %cst_538 {dimension_numbers = #tpu.dot_dimension_numbers<[1], [0], [0], [1], [0, 0, 1, 1], [], []>} : vector<4x16xf32>, vector<16x64xf32>, vector<4x64xf32> -> vector<4x64xf32>
      %c0_539 = arith.constant 0 : index
      %c0_540 = arith.constant 0 : index
      %c0_541 = arith.constant 0 : index
      %973 = vector.load %arg18[%c0_539, %c0_540, %c0_541] : memref<16x4x64xf32, #tpu.memory_space<vmem>>, vector<1x4x64xf32>
      %974 = vector.shape_cast %973 : vector<1x4x64xf32> to vector<4x64xf32>
      %975 = vector.shape_cast %972 : vector<4x64xf32> to vector<1x4x64xf32>
      tpu.vector_store %arg18[%c0_539, %c0_540, %c0_541], %975 {strides = array<i32>} : memref<16x4x64xf32, #tpu.memory_space<vmem>>, vector<1x4x64xf32>,
      %976 = vector.extract_strided_slice %969 {offsets = [0, 16], sizes = [4, 16], strides = [1, 1]} : vector<4x256xf32> to vector<4x16xf32>
      %c0_542 = arith.constant 0 : index
      %c0_543 = arith.constant 0 : index
      %977 = vector.load %arg8[%c0_542, %c0_543] : memref<16x64xf32, #tpu.memory_space<vmem>>, vector<16x64xf32>
      %cst_544 = arith.constant dense<0.000000e+00> : vector<4x64xf32>
      %978 = tpu.matmul %976, %977, %cst_544 {dimension_numbers = #tpu.dot_dimension_numbers<[1], [0], [0], [1], [0, 0, 1, 1], [], []>} : vector<4x16xf32>, vector<16x64xf32>, vector<4x64xf32> -> vector<4x64xf32>
      %c1_545 = arith.constant 1 : index
      %c0_546 = arith.constant 0 : index
      %c0_547 = arith.constant 0 : index
      %979 = vector.load %arg18[%c1_545, %c0_546, %c0_547] : memref<16x4x64xf32, #tpu.memory_space<vmem>>, vector<1x4x64xf32>
      %980 = vector.shape_cast %979 : vector<1x4x64xf32> to vector<4x64xf32>
      %981 = vector.shape_cast %978 : vector<4x64xf32> to vector<1x4x64xf32>
      tpu.vector_store %arg18[%c1_545, %c0_546, %c0_547], %981 {strides = array<i32>} : memref<16x4x64xf32, #tpu.memory_space<vmem>>, vector<1x4x64xf32>,
      %982 = vector.extract_strided_slice %969 {offsets = [0, 32], sizes = [4, 16], strides = [1, 1]} : vector<4x256xf32> to vector<4x16xf32>
      %c0_548 = arith.constant 0 : index
      %c0_549 = arith.constant 0 : index
      %983 = vector.load %arg8[%c0_548, %c0_549] : memref<16x64xf32, #tpu.memory_space<vmem>>, vector<16x64xf32>
      %cst_550 = arith.constant dense<0.000000e+00> : vector<4x64xf32>
      %984 = tpu.matmul %982, %983, %cst_550 {dimension_numbers = #tpu.dot_dimension_numbers<[1], [0], [0], [1], [0, 0, 1, 1], [], []>} : vector<4x16xf32>, vector<16x64xf32>, vector<4x64xf32> -> vector<4x64xf32>
      %c2_551 = arith.constant 2 : index
      %c0_552 = arith.constant 0 : index
      %c0_553 = arith.constant 0 : index
      %985 = vector.load %arg18[%c2_551, %c0_552, %c0_553] : memref<16x4x64xf32, #tpu.memory_space<vmem>>, vector<1x4x64xf32>
      %986 = vector.shape_cast %985 : vector<1x4x64xf32> to vector<4x64xf32>
      %987 = vector.shape_cast %984 : vector<4x64xf32> to vector<1x4x64xf32>
      tpu.vector_store %arg18[%c2_551, %c0_552, %c0_553], %987 {strides = array<i32>} : memref<16x4x64xf32, #tpu.memory_space<vmem>>, vector<1x4x64xf32>,
      %988 = vector.extract_strided_slice %969 {offsets = [0, 48], sizes = [4, 16], strides = [1, 1]} : vector<4x256xf32> to vector<4x16xf32>
      %c0_554 = arith.constant 0 : index
      %c0_555 = arith.constant 0 : index
      %989 = vector.load %arg8[%c0_554, %c0_555] : memref<16x64xf32, #tpu.memory_space<vmem>>, vector<16x64xf32>
      %cst_556 = arith.constant dense<0.000000e+00> : vector<4x64xf32>
      %990 = tpu.matmul %988, %989, %cst_556 {dimension_numbers = #tpu.dot_dimension_numbers<[1], [0], [0], [1], [0, 0, 1, 1], [], []>} : vector<4x16xf32>, vector<16x64xf32>, vector<4x64xf32> -> vector<4x64xf32>
      %c3_557 = arith.constant 3 : index
      %c0_558 = arith.constant 0 : index
      %c0_559 = arith.constant 0 : index
      %991 = vector.load %arg18[%c3_557, %c0_558, %c0_559] : memref<16x4x64xf32, #tpu.memory_space<vmem>>, vector<1x4x64xf32>
      %992 = vector.shape_cast %991 : vector<1x4x64xf32> to vector<4x64xf32>
      %993 = vector.shape_cast %990 : vector<4x64xf32> to vector<1x4x64xf32>
      tpu.vector_store %arg18[%c3_557, %c0_558, %c0_559], %993 {strides = array<i32>} : memref<16x4x64xf32, #tpu.memory_space<vmem>>, vector<1x4x64xf32>,
      %994 = vector.extract_strided_slice %969 {offsets = [0, 64], sizes = [4, 16], strides = [1, 1]} : vector<4x256xf32> to vector<4x16xf32>
      %c0_560 = arith.constant 0 : index
      %c0_561 = arith.constant 0 : index
      %995 = vector.load %arg8[%c0_560, %c0_561] : memref<16x64xf32, #tpu.memory_space<vmem>>, vector<16x64xf32>
      %cst_562 = arith.constant dense<0.000000e+00> : vector<4x64xf32>
      %996 = tpu.matmul %994, %995, %cst_562 {dimension_numbers = #tpu.dot_dimension_numbers<[1], [0], [0], [1], [0, 0, 1, 1], [], []>} : vector<4x16xf32>, vector<16x64xf32>, vector<4x64xf32> -> vector<4x64xf32>
      %c4_563 = arith.constant 4 : index
      %c0_564 = arith.constant 0 : index
      %c0_565 = arith.constant 0 : index
      %997 = vector.load %arg18[%c4_563, %c0_564, %c0_565] : memref<16x4x64xf32, #tpu.memory_space<vmem>>, vector<1x4x64xf32>
      %998 = vector.shape_cast %997 : vector<1x4x64xf32> to vector<4x64xf32>
      %999 = vector.shape_cast %996 : vector<4x64xf32> to vector<1x4x64xf32>
      tpu.vector_store %arg18[%c4_563, %c0_564, %c0_565], %999 {strides = array<i32>} : memref<16x4x64xf32, #tpu.memory_space<vmem>>, vector<1x4x64xf32>,
      %1000 = vector.extract_strided_slice %969 {offsets = [0, 80], sizes = [4, 16], strides = [1, 1]} : vector<4x256xf32> to vector<4x16xf32>
      %c0_566 = arith.constant 0 : index
      %c0_567 = arith.constant 0 : index
      %1001 = vector.load %arg8[%c0_566, %c0_567] : memref<16x64xf32, #tpu.memory_space<vmem>>, vector<16x64xf32>
      %cst_568 = arith.constant dense<0.000000e+00> : vector<4x64xf32>
      %1002 = tpu.matmul %1000, %1001, %cst_568 {dimension_numbers = #tpu.dot_dimension_numbers<[1], [0], [0], [1], [0, 0, 1, 1], [], []>} : vector<4x16xf32>, vector<16x64xf32>, vector<4x64xf32> -> vector<4x64xf32>
      %c5_569 = arith.constant 5 : index
      %c0_570 = arith.constant 0 : index
      %c0_571 = arith.constant 0 : index
      %1003 = vector.load %arg18[%c5_569, %c0_570, %c0_571] : memref<16x4x64xf32, #tpu.memory_space<vmem>>, vector<1x4x64xf32>
      %1004 = vector.shape_cast %1003 : vector<1x4x64xf32> to vector<4x64xf32>
      %1005 = vector.shape_cast %1002 : vector<4x64xf32> to vector<1x4x64xf32>
      tpu.vector_store %arg18[%c5_569, %c0_570, %c0_571], %1005 {strides = array<i32>} : memref<16x4x64xf32, #tpu.memory_space<vmem>>, vector<1x4x64xf32>,
      %1006 = vector.extract_strided_slice %969 {offsets = [0, 96], sizes = [4, 16], strides = [1, 1]} : vector<4x256xf32> to vector<4x16xf32>
      %c0_572 = arith.constant 0 : index
      %c0_573 = arith.constant 0 : index
      %1007 = vector.load %arg8[%c0_572, %c0_573] : memref<16x64xf32, #tpu.memory_space<vmem>>, vector<16x64xf32>
      %cst_574 = arith.constant dense<0.000000e+00> : vector<4x64xf32>
      %1008 = tpu.matmul %1006, %1007, %cst_574 {dimension_numbers = #tpu.dot_dimension_numbers<[1], [0], [0], [1], [0, 0, 1, 1], [], []>} : vector<4x16xf32>, vector<16x64xf32>, vector<4x64xf32> -> vector<4x64xf32>
      %c6_575 = arith.constant 6 : index
      %c0_576 = arith.constant 0 : index
      %c0_577 = arith.constant 0 : index
      %1009 = vector.load %arg18[%c6_575, %c0_576, %c0_577] : memref<16x4x64xf32, #tpu.memory_space<vmem>>, vector<1x4x64xf32>
      %1010 = vector.shape_cast %1009 : vector<1x4x64xf32> to vector<4x64xf32>
      %1011 = vector.shape_cast %1008 : vector<4x64xf32> to vector<1x4x64xf32>
      tpu.vector_store %arg18[%c6_575, %c0_576, %c0_577], %1011 {strides = array<i32>} : memref<16x4x64xf32, #tpu.memory_space<vmem>>, vector<1x4x64xf32>,
      %1012 = vector.extract_strided_slice %969 {offsets = [0, 112], sizes = [4, 16], strides = [1, 1]} : vector<4x256xf32> to vector<4x16xf32>
      %c0_578 = arith.constant 0 : index
      %c0_579 = arith.constant 0 : index
      %1013 = vector.load %arg8[%c0_578, %c0_579] : memref<16x64xf32, #tpu.memory_space<vmem>>, vector<16x64xf32>
      %cst_580 = arith.constant dense<0.000000e+00> : vector<4x64xf32>
      %1014 = tpu.matmul %1012, %1013, %cst_580 {dimension_numbers = #tpu.dot_dimension_numbers<[1], [0], [0], [1], [0, 0, 1, 1], [], []>} : vector<4x16xf32>, vector<16x64xf32>, vector<4x64xf32> -> vector<4x64xf32>
      %c7_581 = arith.constant 7 : index
      %c0_582 = arith.constant 0 : index
      %c0_583 = arith.constant 0 : index
      %1015 = vector.load %arg18[%c7_581, %c0_582, %c0_583] : memref<16x4x64xf32, #tpu.memory_space<vmem>>, vector<1x4x64xf32>
      %1016 = vector.shape_cast %1015 : vector<1x4x64xf32> to vector<4x64xf32>
      %1017 = vector.shape_cast %1014 : vector<4x64xf32> to vector<1x4x64xf32>
      tpu.vector_store %arg18[%c7_581, %c0_582, %c0_583], %1017 {strides = array<i32>} : memref<16x4x64xf32, #tpu.memory_space<vmem>>, vector<1x4x64xf32>,
      %1018 = vector.extract_strided_slice %969 {offsets = [0, 128], sizes = [4, 16], strides = [1, 1]} : vector<4x256xf32> to vector<4x16xf32>
      %c0_584 = arith.constant 0 : index
      %c0_585 = arith.constant 0 : index
      %1019 = vector.load %arg8[%c0_584, %c0_585] : memref<16x64xf32, #tpu.memory_space<vmem>>, vector<16x64xf32>
      %cst_586 = arith.constant dense<0.000000e+00> : vector<4x64xf32>
      %1020 = tpu.matmul %1018, %1019, %cst_586 {dimension_numbers = #tpu.dot_dimension_numbers<[1], [0], [0], [1], [0, 0, 1, 1], [], []>} : vector<4x16xf32>, vector<16x64xf32>, vector<4x64xf32> -> vector<4x64xf32>
      %c8_587 = arith.constant 8 : index
      %c0_588 = arith.constant 0 : index
      %c0_589 = arith.constant 0 : index
      %1021 = vector.load %arg18[%c8_587, %c0_588, %c0_589] : memref<16x4x64xf32, #tpu.memory_space<vmem>>, vector<1x4x64xf32>
      %1022 = vector.shape_cast %1021 : vector<1x4x64xf32> to vector<4x64xf32>
      %1023 = vector.shape_cast %1020 : vector<4x64xf32> to vector<1x4x64xf32>
      tpu.vector_store %arg18[%c8_587, %c0_588, %c0_589], %1023 {strides = array<i32>} : memref<16x4x64xf32, #tpu.memory_space<vmem>>, vector<1x4x64xf32>,
      %1024 = vector.extract_strided_slice %969 {offsets = [0, 144], sizes = [4, 16], strides = [1, 1]} : vector<4x256xf32> to vector<4x16xf32>
      %c0_590 = arith.constant 0 : index
      %c0_591 = arith.constant 0 : index
      %1025 = vector.load %arg8[%c0_590, %c0_591] : memref<16x64xf32, #tpu.memory_space<vmem>>, vector<16x64xf32>
      %cst_592 = arith.constant dense<0.000000e+00> : vector<4x64xf32>
      %1026 = tpu.matmul %1024, %1025, %cst_592 {dimension_numbers = #tpu.dot_dimension_numbers<[1], [0], [0], [1], [0, 0, 1, 1], [], []>} : vector<4x16xf32>, vector<16x64xf32>, vector<4x64xf32> -> vector<4x64xf32>
      %c9_593 = arith.constant 9 : index
      %c0_594 = arith.constant 0 : index
      %c0_595 = arith.constant 0 : index
      %1027 = vector.load %arg18[%c9_593, %c0_594, %c0_595] : memref<16x4x64xf32, #tpu.memory_space<vmem>>, vector<1x4x64xf32>
      %1028 = vector.shape_cast %1027 : vector<1x4x64xf32> to vector<4x64xf32>
      %1029 = vector.shape_cast %1026 : vector<4x64xf32> to vector<1x4x64xf32>
      tpu.vector_store %arg18[%c9_593, %c0_594, %c0_595], %1029 {strides = array<i32>} : memref<16x4x64xf32, #tpu.memory_space<vmem>>, vector<1x4x64xf32>,
      %1030 = vector.extract_strided_slice %969 {offsets = [0, 160], sizes = [4, 16], strides = [1, 1]} : vector<4x256xf32> to vector<4x16xf32>
      %c0_596 = arith.constant 0 : index
      %c0_597 = arith.constant 0 : index
      %1031 = vector.load %arg8[%c0_596, %c0_597] : memref<16x64xf32, #tpu.memory_space<vmem>>, vector<16x64xf32>
      %cst_598 = arith.constant dense<0.000000e+00> : vector<4x64xf32>
      %1032 = tpu.matmul %1030, %1031, %cst_598 {dimension_numbers = #tpu.dot_dimension_numbers<[1], [0], [0], [1], [0, 0, 1, 1], [], []>} : vector<4x16xf32>, vector<16x64xf32>, vector<4x64xf32> -> vector<4x64xf32>
      %c10_599 = arith.constant 10 : index
      %c0_600 = arith.constant 0 : index
      %c0_601 = arith.constant 0 : index
      %1033 = vector.load %arg18[%c10_599, %c0_600, %c0_601] : memref<16x4x64xf32, #tpu.memory_space<vmem>>, vector<1x4x64xf32>
      %1034 = vector.shape_cast %1033 : vector<1x4x64xf32> to vector<4x64xf32>
      %1035 = vector.shape_cast %1032 : vector<4x64xf32> to vector<1x4x64xf32>
      tpu.vector_store %arg18[%c10_599, %c0_600, %c0_601], %1035 {strides = array<i32>} : memref<16x4x64xf32, #tpu.memory_space<vmem>>, vector<1x4x64xf32>,
      %1036 = vector.extract_strided_slice %969 {offsets = [0, 176], sizes = [4, 16], strides = [1, 1]} : vector<4x256xf32> to vector<4x16xf32>
      %c0_602 = arith.constant 0 : index
      %c0_603 = arith.constant 0 : index
      %1037 = vector.load %arg8[%c0_602, %c0_603] : memref<16x64xf32, #tpu.memory_space<vmem>>, vector<16x64xf32>
      %cst_604 = arith.constant dense<0.000000e+00> : vector<4x64xf32>
      %1038 = tpu.matmul %1036, %1037, %cst_604 {dimension_numbers = #tpu.dot_dimension_numbers<[1], [0], [0], [1], [0, 0, 1, 1], [], []>} : vector<4x16xf32>, vector<16x64xf32>, vector<4x64xf32> -> vector<4x64xf32>
      %c11_605 = arith.constant 11 : index
      %c0_606 = arith.constant 0 : index
      %c0_607 = arith.constant 0 : index
      %1039 = vector.load %arg18[%c11_605, %c0_606, %c0_607] : memref<16x4x64xf32, #tpu.memory_space<vmem>>, vector<1x4x64xf32>
      %1040 = vector.shape_cast %1039 : vector<1x4x64xf32> to vector<4x64xf32>
      %1041 = vector.shape_cast %1038 : vector<4x64xf32> to vector<1x4x64xf32>
      tpu.vector_store %arg18[%c11_605, %c0_606, %c0_607], %1041 {strides = array<i32>} : memref<16x4x64xf32, #tpu.memory_space<vmem>>, vector<1x4x64xf32>,
      %1042 = vector.extract_strided_slice %969 {offsets = [0, 192], sizes = [4, 16], strides = [1, 1]} : vector<4x256xf32> to vector<4x16xf32>
      %c0_608 = arith.constant 0 : index
      %c0_609 = arith.constant 0 : index
      %1043 = vector.load %arg8[%c0_608, %c0_609] : memref<16x64xf32, #tpu.memory_space<vmem>>, vector<16x64xf32>
      %cst_610 = arith.constant dense<0.000000e+00> : vector<4x64xf32>
      %1044 = tpu.matmul %1042, %1043, %cst_610 {dimension_numbers = #tpu.dot_dimension_numbers<[1], [0], [0], [1], [0, 0, 1, 1], [], []>} : vector<4x16xf32>, vector<16x64xf32>, vector<4x64xf32> -> vector<4x64xf32>
      %c12_611 = arith.constant 12 : index
      %c0_612 = arith.constant 0 : index
      %c0_613 = arith.constant 0 : index
      %1045 = vector.load %arg18[%c12_611, %c0_612, %c0_613] : memref<16x4x64xf32, #tpu.memory_space<vmem>>, vector<1x4x64xf32>
      %1046 = vector.shape_cast %1045 : vector<1x4x64xf32> to vector<4x64xf32>
      %1047 = vector.shape_cast %1044 : vector<4x64xf32> to vector<1x4x64xf32>
      tpu.vector_store %arg18[%c12_611, %c0_612, %c0_613], %1047 {strides = array<i32>} : memref<16x4x64xf32, #tpu.memory_space<vmem>>, vector<1x4x64xf32>,
      %1048 = vector.extract_strided_slice %969 {offsets = [0, 208], sizes = [4, 16], strides = [1, 1]} : vector<4x256xf32> to vector<4x16xf32>
      %c0_614 = arith.constant 0 : index
      %c0_615 = arith.constant 0 : index
      %1049 = vector.load %arg8[%c0_614, %c0_615] : memref<16x64xf32, #tpu.memory_space<vmem>>, vector<16x64xf32>
      %cst_616 = arith.constant dense<0.000000e+00> : vector<4x64xf32>
      %1050 = tpu.matmul %1048, %1049, %cst_616 {dimension_numbers = #tpu.dot_dimension_numbers<[1], [0], [0], [1], [0, 0, 1, 1], [], []>} : vector<4x16xf32>, vector<16x64xf32>, vector<4x64xf32> -> vector<4x64xf32>
      %c13_617 = arith.constant 13 : index
      %c0_618 = arith.constant 0 : index
      %c0_619 = arith.constant 0 : index
      %1051 = vector.load %arg18[%c13_617, %c0_618, %c0_619] : memref<16x4x64xf32, #tpu.memory_space<vmem>>, vector<1x4x64xf32>
      %1052 = vector.shape_cast %1051 : vector<1x4x64xf32> to vector<4x64xf32>
      %1053 = vector.shape_cast %1050 : vector<4x64xf32> to vector<1x4x64xf32>
      tpu.vector_store %arg18[%c13_617, %c0_618, %c0_619], %1053 {strides = array<i32>} : memref<16x4x64xf32, #tpu.memory_space<vmem>>, vector<1x4x64xf32>,
      %1054 = vector.extract_strided_slice %969 {offsets = [0, 224], sizes = [4, 16], strides = [1, 1]} : vector<4x256xf32> to vector<4x16xf32>
      %c0_620 = arith.constant 0 : index
      %c0_621 = arith.constant 0 : index
      %1055 = vector.load %arg8[%c0_620, %c0_621] : memref<16x64xf32, #tpu.memory_space<vmem>>, vector<16x64xf32>
      %cst_622 = arith.constant dense<0.000000e+00> : vector<4x64xf32>
      %1056 = tpu.matmul %1054, %1055, %cst_622 {dimension_numbers = #tpu.dot_dimension_numbers<[1], [0], [0], [1], [0, 0, 1, 1], [], []>} : vector<4x16xf32>, vector<16x64xf32>, vector<4x64xf32> -> vector<4x64xf32>
      %c14_623 = arith.constant 14 : index
      %c0_624 = arith.constant 0 : index
      %c0_625 = arith.constant 0 : index
      %1057 = vector.load %arg18[%c14_623, %c0_624, %c0_625] : memref<16x4x64xf32, #tpu.memory_space<vmem>>, vector<1x4x64xf32>
      %1058 = vector.shape_cast %1057 : vector<1x4x64xf32> to vector<4x64xf32>
      %1059 = vector.shape_cast %1056 : vector<4x64xf32> to vector<1x4x64xf32>
      tpu.vector_store %arg18[%c14_623, %c0_624, %c0_625], %1059 {strides = array<i32>} : memref<16x4x64xf32, #tpu.memory_space<vmem>>, vector<1x4x64xf32>,
      %1060 = vector.extract_strided_slice %969 {offsets = [0, 240], sizes = [4, 16], strides = [1, 1]} : vector<4x256xf32> to vector<4x16xf32>
      %c0_626 = arith.constant 0 : index
      %c0_627 = arith.constant 0 : index
      %1061 = vector.load %arg8[%c0_626, %c0_627] : memref<16x64xf32, #tpu.memory_space<vmem>>, vector<16x64xf32>
      %cst_628 = arith.constant dense<0.000000e+00> : vector<4x64xf32>
      %1062 = tpu.matmul %1060, %1061, %cst_628 {dimension_numbers = #tpu.dot_dimension_numbers<[1], [0], [0], [1], [0, 0, 1, 1], [], []>} : vector<4x16xf32>, vector<16x64xf32>, vector<4x64xf32> -> vector<4x64xf32>
      %c15_629 = arith.constant 15 : index
      %c0_630 = arith.constant 0 : index
      %c0_631 = arith.constant 0 : index
      %1063 = vector.load %arg18[%c15_629, %c0_630, %c0_631] : memref<16x4x64xf32, #tpu.memory_space<vmem>>, vector<1x4x64xf32>
      %1064 = vector.shape_cast %1063 : vector<1x4x64xf32> to vector<4x64xf32>
      %1065 = vector.shape_cast %1062 : vector<4x64xf32> to vector<1x4x64xf32>
      tpu.vector_store %arg18[%c15_629, %c0_630, %c0_631], %1065 {strides = array<i32>} : memref<16x4x64xf32, #tpu.memory_space<vmem>>, vector<1x4x64xf32>,
    } else {
    }
    %c16_i32 = arith.constant 16 : i32
    %3 = arith.muli %arg1, %c16_i32 : i32
    %c0_i32_1 = arith.constant 0 : i32
    %4 = arith.addi %3, %c0_i32_1 : i32
    %5 = arith.index_cast %4 : i32 to index
    %6 = memref.load %arg2[%5] : memref<32xi32, #tpu.memory_space<smem>>
    %7 = arith.index_cast %4 : i32 to index
    %8 = memref.load %arg3[%7] : memref<32xi32, #tpu.memory_space<smem>>
    %9 = arith.index_cast %4 : i32 to index
    %10 = memref.load %arg4[%9] : memref<32xf32, #tpu.memory_space<smem>>
    %cst = arith.constant 1.000000e+00 : f32
    %11 = arith.subf %cst, %10 : f32
    %12 = arith.index_cast %6 : i32 to index
    %c0 = arith.constant 0 : index
    %c0_2 = arith.constant 0 : index
    %13 = vector.load %arg18[%12, %c0, %c0_2] : memref<16x4x64xf32, #tpu.memory_space<vmem>>, vector<1x4x64xf32>
    %14 = vector.shape_cast %13 : vector<1x4x64xf32> to vector<4x64xf32>
    %15 = vector.broadcast %11 : f32 to vector<4x64xf32>
    %16 = arith.mulf %15, %14 : vector<4x64xf32>
    %17 = arith.index_cast %8 : i32 to index
    %c0_3 = arith.constant 0 : index
    %c0_4 = arith.constant 0 : index
    %18 = vector.load %arg18[%17, %c0_3, %c0_4] : memref<16x4x64xf32, #tpu.memory_space<vmem>>, vector<1x4x64xf32>
    %19 = vector.shape_cast %18 : vector<1x4x64xf32> to vector<4x64xf32>
    %20 = vector.broadcast %10 : f32 to vector<4x64xf32>
    %21 = arith.mulf %20, %19 : vector<4x64xf32>
    %22 = arith.addf %16, %21 : vector<4x64xf32>
    %c0_5 = arith.constant 0 : index
    %c0_6 = arith.constant 0 : index
    %c0_7 = arith.constant 0 : index
    %c0_8 = arith.constant 0 : index
    %23 = vector.load %arg6[%c0_5, %c0_6, %c0_7, %c0_8] : memref<1x8x16x64xbf16, #tpu.memory_space<vmem>>, vector<1x8x1x64xbf16>
    %24 = vector.shape_cast %23 : vector<1x8x1x64xbf16> to vector<8x64xbf16>
    %c0_9 = arith.constant 0 : index
    %c0_10 = arith.constant 0 : index
    %25 = vector.load %arg9[%c0_9, %c0_10] : memref<4x8xbf16, #tpu.memory_space<vmem>>, vector<4x8xbf16>
    %cst_11 = arith.constant dense<0.000000e+00> : vector<4x64xf32>
    %26 = tpu.matmul %25, %24, %cst_11 {dimension_numbers = #tpu.dot_dimension_numbers<[1], [0], [0], [1], [0, 0, 1, 1], [], []>} : vector<4x8xbf16>, vector<8x64xbf16>, vector<4x64xf32> -> vector<4x64xf32>
    %27 = arith.addf %26, %22 : vector<4x64xf32>
    %cst_12 = arith.constant 0.000000e+00 : f32
    %28 = vector.broadcast %cst_12 : f32 to vector<4x64xf32>
    %29 = arith.maximumf %27, %28 : vector<4x64xf32>
    %c0_13 = arith.constant 0 : index
    %c0_14 = arith.constant 0 : index
    %30 = vector.load %arg12[%c0_13, %c0_14] : memref<4x1xf32, #tpu.memory_space<vmem>>, vector<4x1xf32>
    %31 = vector.broadcast %30 : vector<4x1xf32> to vector<4x64xf32>
    %32 = arith.mulf %29, %31 : vector<4x64xf32>
    %cst_15 = arith.constant dense<0.000000e+00> : vector<64xf32>
    %33 = vector.multi_reduction <add>, %32, %cst_15 [0] : vector<4x64xf32> to vector<64xf32>
    %34 = vector.shape_cast %33 : vector<64xf32> to vector<1x64xf32>
    %c0_16 = arith.constant 0 : index
    %35 = memref.load %arg5[%c0_16] : memref<1xf32, #tpu.memory_space<smem>>
    %36 = vector.broadcast %35 : f32 to vector<1x64xf32>
    %37 = arith.addf %34, %36 : vector<1x64xf32>
    %38 = arith.negf %37 : vector<1x64xf32>
    %39 = math.exp %38 : vector<1x64xf32>
    %cst_17 = arith.constant 1.000000e+00 : f32
    %40 = vector.broadcast %cst_17 : f32 to vector<1x64xf32>
    %41 = arith.addf %40, %39 : vector<1x64xf32>
    %42 = arith.divf %40, %41 : vector<1x64xf32>
    %43 = arith.extf %24 : vector<8x64xbf16> to vector<8x64xf32>
    %44 = vector.broadcast %42 : vector<1x64xf32> to vector<8x64xf32>
    %45 = arith.mulf %44, %43 : vector<8x64xf32>
    %46 = arith.truncf %45 : vector<8x64xf32> to vector<8x64xbf16>
    %c0_18 = arith.constant 0 : index
    %c0_19 = arith.constant 0 : index
    %47 = vector.load %arg13[%c0_18, %c0_19] : memref<8x8xbf16, #tpu.memory_space<vmem>>, vector<8x8xbf16>
    %cst_20 = arith.constant dense<0.000000e+00> : vector<8x64xf32>
    %48 = tpu.matmul %47, %46, %cst_20 {dimension_numbers = #tpu.dot_dimension_numbers<[1], [0], [0], [1], [0, 0, 1, 1], [], []>} : vector<8x8xbf16>, vector<8x64xbf16>, vector<8x64xf32> -> vector<8x64xf32>
    %c0_21 = arith.constant 0 : index
    %c0_22 = arith.constant 0 : index
    %49 = vector.load %arg14[%c0_21, %c0_22] : memref<8x1xf32, #tpu.memory_space<vmem>>, vector<8x1xf32>
    %50 = vector.broadcast %49 : vector<8x1xf32> to vector<8x64xf32>
    %51 = arith.mulf %48, %50 : vector<8x64xf32>
    %c0_23 = arith.constant 0 : index
    %c0_24 = arith.constant 0 : index
    %52 = vector.load %arg15[%c0_23, %c0_24] : memref<8x1xf32, #tpu.memory_space<vmem>>, vector<8x1xf32>
    %53 = vector.broadcast %52 : vector<8x1xf32> to vector<8x64xf32>
    %54 = arith.addf %51, %53 : vector<8x64xf32>
    %55 = arith.truncf %54 : vector<8x64xf32> to vector<8x64xbf16>
    %c0_25 = arith.constant 0 : index
    %c0_26 = arith.constant 0 : index
    %c0_27 = arith.constant 0 : index
    %c0_28 = arith.constant 0 : index
    %56 = vector.load %arg16[%c0_25, %c0_26, %c0_27, %c0_28] : memref<1x8x16x64xbf16, #tpu.memory_space<vmem>>, vector<1x8x1x64xbf16>
    %57 = vector.shape_cast %56 : vector<1x8x1x64xbf16> to vector<8x64xbf16>
    %58 = vector.shape_cast %55 : vector<8x64xbf16> to vector<1x8x1x64xbf16>
    tpu.vector_store %arg16[%c0_25, %c0_26, %c0_27, %c0_28], %58 {strides = array<i32>} : memref<1x8x16x64xbf16, #tpu.memory_space<vmem>>, vector<1x8x1x64xbf16>,
    %59 = arith.truncf %42 : vector<1x64xf32> to vector<1x64xbf16>
    %c0_29 = arith.constant 0 : index
    %c0_30 = arith.constant 0 : index
    %c0_31 = arith.constant 0 : index
    %c0_32 = arith.constant 0 : index
    %60 = vector.load %arg17[%c0_29, %c0_30, %c0_31, %c0_32] : memref<1x1x16x64xbf16, #tpu.memory_space<vmem>>, vector<1x1x1x64xbf16>
    %61 = vector.shape_cast %60 : vector<1x1x1x64xbf16> to vector<1x64xbf16>
    %62 = vector.shape_cast %59 : vector<1x64xbf16> to vector<1x1x1x64xbf16>
    tpu.vector_store %arg17[%c0_29, %c0_30, %c0_31, %c0_32], %62 {strides = array<i32>} : memref<1x1x16x64xbf16, #tpu.memory_space<vmem>>, vector<1x1x1x64xbf16>,
    %c16_i32_33 = arith.constant 16 : i32
    %63 = arith.muli %arg1, %c16_i32_33 : i32
    %c1_i32 = arith.constant 1 : i32
    %64 = arith.addi %63, %c1_i32 : i32
    %65 = arith.index_cast %64 : i32 to index
    %66 = memref.load %arg2[%65] : memref<32xi32, #tpu.memory_space<smem>>
    %67 = arith.index_cast %64 : i32 to index
    %68 = memref.load %arg3[%67] : memref<32xi32, #tpu.memory_space<smem>>
    %69 = arith.index_cast %64 : i32 to index
    %70 = memref.load %arg4[%69] : memref<32xf32, #tpu.memory_space<smem>>
    %cst_34 = arith.constant 1.000000e+00 : f32
    %71 = arith.subf %cst_34, %70 : f32
    %72 = arith.index_cast %66 : i32 to index
    %c0_35 = arith.constant 0 : index
    %c0_36 = arith.constant 0 : index
    %73 = vector.load %arg18[%72, %c0_35, %c0_36] : memref<16x4x64xf32, #tpu.memory_space<vmem>>, vector<1x4x64xf32>
    %74 = vector.shape_cast %73 : vector<1x4x64xf32> to vector<4x64xf32>
    %75 = vector.broadcast %71 : f32 to vector<4x64xf32>
    %76 = arith.mulf %75, %74 : vector<4x64xf32>
    %77 = arith.index_cast %68 : i32 to index
    %c0_37 = arith.constant 0 : index
    %c0_38 = arith.constant 0 : index
    %78 = vector.load %arg18[%77, %c0_37, %c0_38] : memref<16x4x64xf32, #tpu.memory_space<vmem>>, vector<1x4x64xf32>
    %79 = vector.shape_cast %78 : vector<1x4x64xf32> to vector<4x64xf32>
    %80 = vector.broadcast %70 : f32 to vector<4x64xf32>
    %81 = arith.mulf %80, %79 : vector<4x64xf32>
    %82 = arith.addf %76, %81 : vector<4x64xf32>
    %c0_39 = arith.constant 0 : index
    %c0_40 = arith.constant 0 : index
    %c1 = arith.constant 1 : index
    %c0_41 = arith.constant 0 : index
    %83 = vector.load %arg6[%c0_39, %c0_40, %c1, %c0_41] : memref<1x8x16x64xbf16, #tpu.memory_space<vmem>>, vector<1x8x1x64xbf16>
    %84 = vector.shape_cast %83 : vector<1x8x1x64xbf16> to vector<8x64xbf16>
    %c0_42 = arith.constant 0 : index
    %c0_43 = arith.constant 0 : index
    %85 = vector.load %arg9[%c0_42, %c0_43] : memref<4x8xbf16, #tpu.memory_space<vmem>>, vector<4x8xbf16>
    %cst_44 = arith.constant dense<0.000000e+00> : vector<4x64xf32>
    %86 = tpu.matmul %85, %84, %cst_44 {dimension_numbers = #tpu.dot_dimension_numbers<[1], [0], [0], [1], [0, 0, 1, 1], [], []>} : vector<4x8xbf16>, vector<8x64xbf16>, vector<4x64xf32> -> vector<4x64xf32>
    %87 = arith.addf %86, %82 : vector<4x64xf32>
    %cst_45 = arith.constant 0.000000e+00 : f32
    %88 = vector.broadcast %cst_45 : f32 to vector<4x64xf32>
    %89 = arith.maximumf %87, %88 : vector<4x64xf32>
    %c0_46 = arith.constant 0 : index
    %c0_47 = arith.constant 0 : index
    %90 = vector.load %arg12[%c0_46, %c0_47] : memref<4x1xf32, #tpu.memory_space<vmem>>, vector<4x1xf32>
    %91 = vector.broadcast %90 : vector<4x1xf32> to vector<4x64xf32>
    %92 = arith.mulf %89, %91 : vector<4x64xf32>
    %cst_48 = arith.constant dense<0.000000e+00> : vector<64xf32>
    %93 = vector.multi_reduction <add>, %92, %cst_48 [0] : vector<4x64xf32> to vector<64xf32>
    %94 = vector.shape_cast %93 : vector<64xf32> to vector<1x64xf32>
    %c0_49 = arith.constant 0 : index
    %95 = memref.load %arg5[%c0_49] : memref<1xf32, #tpu.memory_space<smem>>
    %96 = vector.broadcast %95 : f32 to vector<1x64xf32>
    %97 = arith.addf %94, %96 : vector<1x64xf32>
    %98 = arith.negf %97 : vector<1x64xf32>
    %99 = math.exp %98 : vector<1x64xf32>
    %cst_50 = arith.constant 1.000000e+00 : f32
    %100 = vector.broadcast %cst_50 : f32 to vector<1x64xf32>
    %101 = arith.addf %100, %99 : vector<1x64xf32>
    %102 = arith.divf %100, %101 : vector<1x64xf32>
    %103 = arith.extf %84 : vector<8x64xbf16> to vector<8x64xf32>
    %104 = vector.broadcast %102 : vector<1x64xf32> to vector<8x64xf32>
    %105 = arith.mulf %104, %103 : vector<8x64xf32>
    %106 = arith.truncf %105 : vector<8x64xf32> to vector<8x64xbf16>
    %c0_51 = arith.constant 0 : index
    %c0_52 = arith.constant 0 : index
    %107 = vector.load %arg13[%c0_51, %c0_52] : memref<8x8xbf16, #tpu.memory_space<vmem>>, vector<8x8xbf16>
    %cst_53 = arith.constant dense<0.000000e+00> : vector<8x64xf32>
    %108 = tpu.matmul %107, %106, %cst_53 {dimension_numbers = #tpu.dot_dimension_numbers<[1], [0], [0], [1], [0, 0, 1, 1], [], []>} : vector<8x8xbf16>, vector<8x64xbf16>, vector<8x64xf32> -> vector<8x64xf32>
    %c0_54 = arith.constant 0 : index
    %c0_55 = arith.constant 0 : index
    %109 = vector.load %arg14[%c0_54, %c0_55] : memref<8x1xf32, #tpu.memory_space<vmem>>, vector<8x1xf32>
    %110 = vector.broadcast %109 : vector<8x1xf32> to vector<8x64xf32>
    %111 = arith.mulf %108, %110 : vector<8x64xf32>
    %c0_56 = arith.constant 0 : index
    %c0_57 = arith.constant 0 : index
    %112 = vector.load %arg15[%c0_56, %c0_57] : memref<8x1xf32, #tpu.memory_space<vmem>>, vector<8x1xf32>
    %113 = vector.broadcast %112 : vector<8x1xf32> to vector<8x64xf32>
    %114 = arith.addf %111, %113 : vector<8x64xf32>
    %115 = arith.truncf %114 : vector<8x64xf32> to vector<8x64xbf16>
    %c0_58 = arith.constant 0 : index
    %c0_59 = arith.constant 0 : index
    %c1_60 = arith.constant 1 : index
    %c0_61 = arith.constant 0 : index
    %116 = vector.load %arg16[%c0_58, %c0_59, %c1_60, %c0_61] : memref<1x8x16x64xbf16, #tpu.memory_space<vmem>>, vector<1x8x1x64xbf16>
    %117 = vector.shape_cast %116 : vector<1x8x1x64xbf16> to vector<8x64xbf16>
    %118 = vector.shape_cast %115 : vector<8x64xbf16> to vector<1x8x1x64xbf16>
    tpu.vector_store %arg16[%c0_58, %c0_59, %c1_60, %c0_61], %118 {strides = array<i32>} : memref<1x8x16x64xbf16, #tpu.memory_space<vmem>>, vector<1x8x1x64xbf16>,
    %119 = arith.truncf %102 : vector<1x64xf32> to vector<1x64xbf16>
    %c0_62 = arith.constant 0 : index
    %c0_63 = arith.constant 0 : index
    %c1_64 = arith.constant 1 : index
    %c0_65 = arith.constant 0 : index
    %120 = vector.load %arg17[%c0_62, %c0_63, %c1_64, %c0_65] : memref<1x1x16x64xbf16, #tpu.memory_space<vmem>>, vector<1x1x1x64xbf16>
    %121 = vector.shape_cast %120 : vector<1x1x1x64xbf16> to vector<1x64xbf16>
    %122 = vector.shape_cast %119 : vector<1x64xbf16> to vector<1x1x1x64xbf16>
    tpu.vector_store %arg17[%c0_62, %c0_63, %c1_64, %c0_65], %122 {strides = array<i32>} : memref<1x1x16x64xbf16, #tpu.memory_space<vmem>>, vector<1x1x1x64xbf16>,
    %c16_i32_66 = arith.constant 16 : i32
    %123 = arith.muli %arg1, %c16_i32_66 : i32
    %c2_i32 = arith.constant 2 : i32
    %124 = arith.addi %123, %c2_i32 : i32
    %125 = arith.index_cast %124 : i32 to index
    %126 = memref.load %arg2[%125] : memref<32xi32, #tpu.memory_space<smem>>
    %127 = arith.index_cast %124 : i32 to index
    %128 = memref.load %arg3[%127] : memref<32xi32, #tpu.memory_space<smem>>
    %129 = arith.index_cast %124 : i32 to index
    %130 = memref.load %arg4[%129] : memref<32xf32, #tpu.memory_space<smem>>
    %cst_67 = arith.constant 1.000000e+00 : f32
    %131 = arith.subf %cst_67, %130 : f32
    %132 = arith.index_cast %126 : i32 to index
    %c0_68 = arith.constant 0 : index
    %c0_69 = arith.constant 0 : index
    %133 = vector.load %arg18[%132, %c0_68, %c0_69] : memref<16x4x64xf32, #tpu.memory_space<vmem>>, vector<1x4x64xf32>
    %134 = vector.shape_cast %133 : vector<1x4x64xf32> to vector<4x64xf32>
    %135 = vector.broadcast %131 : f32 to vector<4x64xf32>
    %136 = arith.mulf %135, %134 : vector<4x64xf32>
    %137 = arith.index_cast %128 : i32 to index
    %c0_70 = arith.constant 0 : index
    %c0_71 = arith.constant 0 : index
    %138 = vector.load %arg18[%137, %c0_70, %c0_71] : memref<16x4x64xf32, #tpu.memory_space<vmem>>, vector<1x4x64xf32>
    %139 = vector.shape_cast %138 : vector<1x4x64xf32> to vector<4x64xf32>
    %140 = vector.broadcast %130 : f32 to vector<4x64xf32>
    %141 = arith.mulf %140, %139 : vector<4x64xf32>
    %142 = arith.addf %136, %141 : vector<4x64xf32>
    %c0_72 = arith.constant 0 : index
    %c0_73 = arith.constant 0 : index
    %c2 = arith.constant 2 : index
    %c0_74 = arith.constant 0 : index
    %143 = vector.load %arg6[%c0_72, %c0_73, %c2, %c0_74] : memref<1x8x16x64xbf16, #tpu.memory_space<vmem>>, vector<1x8x1x64xbf16>
    %144 = vector.shape_cast %143 : vector<1x8x1x64xbf16> to vector<8x64xbf16>
    %c0_75 = arith.constant 0 : index
    %c0_76 = arith.constant 0 : index
    %145 = vector.load %arg9[%c0_75, %c0_76] : memref<4x8xbf16, #tpu.memory_space<vmem>>, vector<4x8xbf16>
    %cst_77 = arith.constant dense<0.000000e+00> : vector<4x64xf32>
    %146 = tpu.matmul %145, %144, %cst_77 {dimension_numbers = #tpu.dot_dimension_numbers<[1], [0], [0], [1], [0, 0, 1, 1], [], []>} : vector<4x8xbf16>, vector<8x64xbf16>, vector<4x64xf32> -> vector<4x64xf32>
    %147 = arith.addf %146, %142 : vector<4x64xf32>
    %cst_78 = arith.constant 0.000000e+00 : f32
    %148 = vector.broadcast %cst_78 : f32 to vector<4x64xf32>
    %149 = arith.maximumf %147, %148 : vector<4x64xf32>
    %c0_79 = arith.constant 0 : index
    %c0_80 = arith.constant 0 : index
    %150 = vector.load %arg12[%c0_79, %c0_80] : memref<4x1xf32, #tpu.memory_space<vmem>>, vector<4x1xf32>
    %151 = vector.broadcast %150 : vector<4x1xf32> to vector<4x64xf32>
    %152 = arith.mulf %149, %151 : vector<4x64xf32>
    %cst_81 = arith.constant dense<0.000000e+00> : vector<64xf32>
    %153 = vector.multi_reduction <add>, %152, %cst_81 [0] : vector<4x64xf32> to vector<64xf32>
    %154 = vector.shape_cast %153 : vector<64xf32> to vector<1x64xf32>
    %c0_82 = arith.constant 0 : index
    %155 = memref.load %arg5[%c0_82] : memref<1xf32, #tpu.memory_space<smem>>
    %156 = vector.broadcast %155 : f32 to vector<1x64xf32>
    %157 = arith.addf %154, %156 : vector<1x64xf32>
    %158 = arith.negf %157 : vector<1x64xf32>
    %159 = math.exp %158 : vector<1x64xf32>
    %cst_83 = arith.constant 1.000000e+00 : f32
    %160 = vector.broadcast %cst_83 : f32 to vector<1x64xf32>
    %161 = arith.addf %160, %159 : vector<1x64xf32>
    %162 = arith.divf %160, %161 : vector<1x64xf32>
    %163 = arith.extf %144 : vector<8x64xbf16> to vector<8x64xf32>
    %164 = vector.broadcast %162 : vector<1x64xf32> to vector<8x64xf32>
    %165 = arith.mulf %164, %163 : vector<8x64xf32>
    %166 = arith.truncf %165 : vector<8x64xf32> to vector<8x64xbf16>
    %c0_84 = arith.constant 0 : index
    %c0_85 = arith.constant 0 : index
    %167 = vector.load %arg13[%c0_84, %c0_85] : memref<8x8xbf16, #tpu.memory_space<vmem>>, vector<8x8xbf16>
    %cst_86 = arith.constant dense<0.000000e+00> : vector<8x64xf32>
    %168 = tpu.matmul %167, %166, %cst_86 {dimension_numbers = #tpu.dot_dimension_numbers<[1], [0], [0], [1], [0, 0, 1, 1], [], []>} : vector<8x8xbf16>, vector<8x64xbf16>, vector<8x64xf32> -> vector<8x64xf32>
    %c0_87 = arith.constant 0 : index
    %c0_88 = arith.constant 0 : index
    %169 = vector.load %arg14[%c0_87, %c0_88] : memref<8x1xf32, #tpu.memory_space<vmem>>, vector<8x1xf32>
    %170 = vector.broadcast %169 : vector<8x1xf32> to vector<8x64xf32>
    %171 = arith.mulf %168, %170 : vector<8x64xf32>
    %c0_89 = arith.constant 0 : index
    %c0_90 = arith.constant 0 : index
    %172 = vector.load %arg15[%c0_89, %c0_90] : memref<8x1xf32, #tpu.memory_space<vmem>>, vector<8x1xf32>
    %173 = vector.broadcast %172 : vector<8x1xf32> to vector<8x64xf32>
    %174 = arith.addf %171, %173 : vector<8x64xf32>
    %175 = arith.truncf %174 : vector<8x64xf32> to vector<8x64xbf16>
    %c0_91 = arith.constant 0 : index
    %c0_92 = arith.constant 0 : index
    %c2_93 = arith.constant 2 : index
    %c0_94 = arith.constant 0 : index
    %176 = vector.load %arg16[%c0_91, %c0_92, %c2_93, %c0_94] : memref<1x8x16x64xbf16, #tpu.memory_space<vmem>>, vector<1x8x1x64xbf16>
    %177 = vector.shape_cast %176 : vector<1x8x1x64xbf16> to vector<8x64xbf16>
    %178 = vector.shape_cast %175 : vector<8x64xbf16> to vector<1x8x1x64xbf16>
    tpu.vector_store %arg16[%c0_91, %c0_92, %c2_93, %c0_94], %178 {strides = array<i32>} : memref<1x8x16x64xbf16, #tpu.memory_space<vmem>>, vector<1x8x1x64xbf16>,
    %179 = arith.truncf %162 : vector<1x64xf32> to vector<1x64xbf16>
    %c0_95 = arith.constant 0 : index
    %c0_96 = arith.constant 0 : index
    %c2_97 = arith.constant 2 : index
    %c0_98 = arith.constant 0 : index
    %180 = vector.load %arg17[%c0_95, %c0_96, %c2_97, %c0_98] : memref<1x1x16x64xbf16, #tpu.memory_space<vmem>>, vector<1x1x1x64xbf16>
    %181 = vector.shape_cast %180 : vector<1x1x1x64xbf16> to vector<1x64xbf16>
    %182 = vector.shape_cast %179 : vector<1x64xbf16> to vector<1x1x1x64xbf16>
    tpu.vector_store %arg17[%c0_95, %c0_96, %c2_97, %c0_98], %182 {strides = array<i32>} : memref<1x1x16x64xbf16, #tpu.memory_space<vmem>>, vector<1x1x1x64xbf16>,
    %c16_i32_99 = arith.constant 16 : i32
    %183 = arith.muli %arg1, %c16_i32_99 : i32
    %c3_i32 = arith.constant 3 : i32
    %184 = arith.addi %183, %c3_i32 : i32
    %185 = arith.index_cast %184 : i32 to index
    %186 = memref.load %arg2[%185] : memref<32xi32, #tpu.memory_space<smem>>
    %187 = arith.index_cast %184 : i32 to index
    %188 = memref.load %arg3[%187] : memref<32xi32, #tpu.memory_space<smem>>
    %189 = arith.index_cast %184 : i32 to index
    %190 = memref.load %arg4[%189] : memref<32xf32, #tpu.memory_space<smem>>
    %cst_100 = arith.constant 1.000000e+00 : f32
    %191 = arith.subf %cst_100, %190 : f32
    %192 = arith.index_cast %186 : i32 to index
    %c0_101 = arith.constant 0 : index
    %c0_102 = arith.constant 0 : index
    %193 = vector.load %arg18[%192, %c0_101, %c0_102] : memref<16x4x64xf32, #tpu.memory_space<vmem>>, vector<1x4x64xf32>
    %194 = vector.shape_cast %193 : vector<1x4x64xf32> to vector<4x64xf32>
    %195 = vector.broadcast %191 : f32 to vector<4x64xf32>
    %196 = arith.mulf %195, %194 : vector<4x64xf32>
    %197 = arith.index_cast %188 : i32 to index
    %c0_103 = arith.constant 0 : index
    %c0_104 = arith.constant 0 : index
    %198 = vector.load %arg18[%197, %c0_103, %c0_104] : memref<16x4x64xf32, #tpu.memory_space<vmem>>, vector<1x4x64xf32>
    %199 = vector.shape_cast %198 : vector<1x4x64xf32> to vector<4x64xf32>
    %200 = vector.broadcast %190 : f32 to vector<4x64xf32>
    %201 = arith.mulf %200, %199 : vector<4x64xf32>
    %202 = arith.addf %196, %201 : vector<4x64xf32>
    %c0_105 = arith.constant 0 : index
    %c0_106 = arith.constant 0 : index
    %c3 = arith.constant 3 : index
    %c0_107 = arith.constant 0 : index
    %203 = vector.load %arg6[%c0_105, %c0_106, %c3, %c0_107] : memref<1x8x16x64xbf16, #tpu.memory_space<vmem>>, vector<1x8x1x64xbf16>
    %204 = vector.shape_cast %203 : vector<1x8x1x64xbf16> to vector<8x64xbf16>
    %c0_108 = arith.constant 0 : index
    %c0_109 = arith.constant 0 : index
    %205 = vector.load %arg9[%c0_108, %c0_109] : memref<4x8xbf16, #tpu.memory_space<vmem>>, vector<4x8xbf16>
    %cst_110 = arith.constant dense<0.000000e+00> : vector<4x64xf32>
    %206 = tpu.matmul %205, %204, %cst_110 {dimension_numbers = #tpu.dot_dimension_numbers<[1], [0], [0], [1], [0, 0, 1, 1], [], []>} : vector<4x8xbf16>, vector<8x64xbf16>, vector<4x64xf32> -> vector<4x64xf32>
    %207 = arith.addf %206, %202 : vector<4x64xf32>
    %cst_111 = arith.constant 0.000000e+00 : f32
    %208 = vector.broadcast %cst_111 : f32 to vector<4x64xf32>
    %209 = arith.maximumf %207, %208 : vector<4x64xf32>
    %c0_112 = arith.constant 0 : index
    %c0_113 = arith.constant 0 : index
    %210 = vector.load %arg12[%c0_112, %c0_113] : memref<4x1xf32, #tpu.memory_space<vmem>>, vector<4x1xf32>
    %211 = vector.broadcast %210 : vector<4x1xf32> to vector<4x64xf32>
    %212 = arith.mulf %209, %211 : vector<4x64xf32>
    %cst_114 = arith.constant dense<0.000000e+00> : vector<64xf32>
    %213 = vector.multi_reduction <add>, %212, %cst_114 [0] : vector<4x64xf32> to vector<64xf32>
    %214 = vector.shape_cast %213 : vector<64xf32> to vector<1x64xf32>
    %c0_115 = arith.constant 0 : index
    %215 = memref.load %arg5[%c0_115] : memref<1xf32, #tpu.memory_space<smem>>
    %216 = vector.broadcast %215 : f32 to vector<1x64xf32>
    %217 = arith.addf %214, %216 : vector<1x64xf32>
    %218 = arith.negf %217 : vector<1x64xf32>
    %219 = math.exp %218 : vector<1x64xf32>
    %cst_116 = arith.constant 1.000000e+00 : f32
    %220 = vector.broadcast %cst_116 : f32 to vector<1x64xf32>
    %221 = arith.addf %220, %219 : vector<1x64xf32>
    %222 = arith.divf %220, %221 : vector<1x64xf32>
    %223 = arith.extf %204 : vector<8x64xbf16> to vector<8x64xf32>
    %224 = vector.broadcast %222 : vector<1x64xf32> to vector<8x64xf32>
    %225 = arith.mulf %224, %223 : vector<8x64xf32>
    %226 = arith.truncf %225 : vector<8x64xf32> to vector<8x64xbf16>
    %c0_117 = arith.constant 0 : index
    %c0_118 = arith.constant 0 : index
    %227 = vector.load %arg13[%c0_117, %c0_118] : memref<8x8xbf16, #tpu.memory_space<vmem>>, vector<8x8xbf16>
    %cst_119 = arith.constant dense<0.000000e+00> : vector<8x64xf32>
    %228 = tpu.matmul %227, %226, %cst_119 {dimension_numbers = #tpu.dot_dimension_numbers<[1], [0], [0], [1], [0, 0, 1, 1], [], []>} : vector<8x8xbf16>, vector<8x64xbf16>, vector<8x64xf32> -> vector<8x64xf32>
    %c0_120 = arith.constant 0 : index
    %c0_121 = arith.constant 0 : index
    %229 = vector.load %arg14[%c0_120, %c0_121] : memref<8x1xf32, #tpu.memory_space<vmem>>, vector<8x1xf32>
    %230 = vector.broadcast %229 : vector<8x1xf32> to vector<8x64xf32>
    %231 = arith.mulf %228, %230 : vector<8x64xf32>
    %c0_122 = arith.constant 0 : index
    %c0_123 = arith.constant 0 : index
    %232 = vector.load %arg15[%c0_122, %c0_123] : memref<8x1xf32, #tpu.memory_space<vmem>>, vector<8x1xf32>
    %233 = vector.broadcast %232 : vector<8x1xf32> to vector<8x64xf32>
    %234 = arith.addf %231, %233 : vector<8x64xf32>
    %235 = arith.truncf %234 : vector<8x64xf32> to vector<8x64xbf16>
    %c0_124 = arith.constant 0 : index
    %c0_125 = arith.constant 0 : index
    %c3_126 = arith.constant 3 : index
    %c0_127 = arith.constant 0 : index
    %236 = vector.load %arg16[%c0_124, %c0_125, %c3_126, %c0_127] : memref<1x8x16x64xbf16, #tpu.memory_space<vmem>>, vector<1x8x1x64xbf16>
    %237 = vector.shape_cast %236 : vector<1x8x1x64xbf16> to vector<8x64xbf16>
    %238 = vector.shape_cast %235 : vector<8x64xbf16> to vector<1x8x1x64xbf16>
    tpu.vector_store %arg16[%c0_124, %c0_125, %c3_126, %c0_127], %238 {strides = array<i32>} : memref<1x8x16x64xbf16, #tpu.memory_space<vmem>>, vector<1x8x1x64xbf16>,
    %239 = arith.truncf %222 : vector<1x64xf32> to vector<1x64xbf16>
    %c0_128 = arith.constant 0 : index
    %c0_129 = arith.constant 0 : index
    %c3_130 = arith.constant 3 : index
    %c0_131 = arith.constant 0 : index
    %240 = vector.load %arg17[%c0_128, %c0_129, %c3_130, %c0_131] : memref<1x1x16x64xbf16, #tpu.memory_space<vmem>>, vector<1x1x1x64xbf16>
    %241 = vector.shape_cast %240 : vector<1x1x1x64xbf16> to vector<1x64xbf16>
    %242 = vector.shape_cast %239 : vector<1x64xbf16> to vector<1x1x1x64xbf16>
    tpu.vector_store %arg17[%c0_128, %c0_129, %c3_130, %c0_131], %242 {strides = array<i32>} : memref<1x1x16x64xbf16, #tpu.memory_space<vmem>>, vector<1x1x1x64xbf16>,
    %c16_i32_132 = arith.constant 16 : i32
    %243 = arith.muli %arg1, %c16_i32_132 : i32
    %c4_i32 = arith.constant 4 : i32
    %244 = arith.addi %243, %c4_i32 : i32
    %245 = arith.index_cast %244 : i32 to index
    %246 = memref.load %arg2[%245] : memref<32xi32, #tpu.memory_space<smem>>
    %247 = arith.index_cast %244 : i32 to index
    %248 = memref.load %arg3[%247] : memref<32xi32, #tpu.memory_space<smem>>
    %249 = arith.index_cast %244 : i32 to index
    %250 = memref.load %arg4[%249] : memref<32xf32, #tpu.memory_space<smem>>
    %cst_133 = arith.constant 1.000000e+00 : f32
    %251 = arith.subf %cst_133, %250 : f32
    %252 = arith.index_cast %246 : i32 to index
    %c0_134 = arith.constant 0 : index
    %c0_135 = arith.constant 0 : index
    %253 = vector.load %arg18[%252, %c0_134, %c0_135] : memref<16x4x64xf32, #tpu.memory_space<vmem>>, vector<1x4x64xf32>
    %254 = vector.shape_cast %253 : vector<1x4x64xf32> to vector<4x64xf32>
    %255 = vector.broadcast %251 : f32 to vector<4x64xf32>
    %256 = arith.mulf %255, %254 : vector<4x64xf32>
    %257 = arith.index_cast %248 : i32 to index
    %c0_136 = arith.constant 0 : index
    %c0_137 = arith.constant 0 : index
    %258 = vector.load %arg18[%257, %c0_136, %c0_137] : memref<16x4x64xf32, #tpu.memory_space<vmem>>, vector<1x4x64xf32>
    %259 = vector.shape_cast %258 : vector<1x4x64xf32> to vector<4x64xf32>
    %260 = vector.broadcast %250 : f32 to vector<4x64xf32>
    %261 = arith.mulf %260, %259 : vector<4x64xf32>
    %262 = arith.addf %256, %261 : vector<4x64xf32>
    %c0_138 = arith.constant 0 : index
    %c0_139 = arith.constant 0 : index
    %c4 = arith.constant 4 : index
    %c0_140 = arith.constant 0 : index
    %263 = vector.load %arg6[%c0_138, %c0_139, %c4, %c0_140] : memref<1x8x16x64xbf16, #tpu.memory_space<vmem>>, vector<1x8x1x64xbf16>
    %264 = vector.shape_cast %263 : vector<1x8x1x64xbf16> to vector<8x64xbf16>
    %c0_141 = arith.constant 0 : index
    %c0_142 = arith.constant 0 : index
    %265 = vector.load %arg9[%c0_141, %c0_142] : memref<4x8xbf16, #tpu.memory_space<vmem>>, vector<4x8xbf16>
    %cst_143 = arith.constant dense<0.000000e+00> : vector<4x64xf32>
    %266 = tpu.matmul %265, %264, %cst_143 {dimension_numbers = #tpu.dot_dimension_numbers<[1], [0], [0], [1], [0, 0, 1, 1], [], []>} : vector<4x8xbf16>, vector<8x64xbf16>, vector<4x64xf32> -> vector<4x64xf32>
    %267 = arith.addf %266, %262 : vector<4x64xf32>
    %cst_144 = arith.constant 0.000000e+00 : f32
    %268 = vector.broadcast %cst_144 : f32 to vector<4x64xf32>
    %269 = arith.maximumf %267, %268 : vector<4x64xf32>
    %c0_145 = arith.constant 0 : index
    %c0_146 = arith.constant 0 : index
    %270 = vector.load %arg12[%c0_145, %c0_146] : memref<4x1xf32, #tpu.memory_space<vmem>>, vector<4x1xf32>
    %271 = vector.broadcast %270 : vector<4x1xf32> to vector<4x64xf32>
    %272 = arith.mulf %269, %271 : vector<4x64xf32>
    %cst_147 = arith.constant dense<0.000000e+00> : vector<64xf32>
    %273 = vector.multi_reduction <add>, %272, %cst_147 [0] : vector<4x64xf32> to vector<64xf32>
    %274 = vector.shape_cast %273 : vector<64xf32> to vector<1x64xf32>
    %c0_148 = arith.constant 0 : index
    %275 = memref.load %arg5[%c0_148] : memref<1xf32, #tpu.memory_space<smem>>
    %276 = vector.broadcast %275 : f32 to vector<1x64xf32>
    %277 = arith.addf %274, %276 : vector<1x64xf32>
    %278 = arith.negf %277 : vector<1x64xf32>
    %279 = math.exp %278 : vector<1x64xf32>
    %cst_149 = arith.constant 1.000000e+00 : f32
    %280 = vector.broadcast %cst_149 : f32 to vector<1x64xf32>
    %281 = arith.addf %280, %279 : vector<1x64xf32>
    %282 = arith.divf %280, %281 : vector<1x64xf32>
    %283 = arith.extf %264 : vector<8x64xbf16> to vector<8x64xf32>
    %284 = vector.broadcast %282 : vector<1x64xf32> to vector<8x64xf32>
    %285 = arith.mulf %284, %283 : vector<8x64xf32>
    %286 = arith.truncf %285 : vector<8x64xf32> to vector<8x64xbf16>
    %c0_150 = arith.constant 0 : index
    %c0_151 = arith.constant 0 : index
    %287 = vector.load %arg13[%c0_150, %c0_151] : memref<8x8xbf16, #tpu.memory_space<vmem>>, vector<8x8xbf16>
    %cst_152 = arith.constant dense<0.000000e+00> : vector<8x64xf32>
    %288 = tpu.matmul %287, %286, %cst_152 {dimension_numbers = #tpu.dot_dimension_numbers<[1], [0], [0], [1], [0, 0, 1, 1], [], []>} : vector<8x8xbf16>, vector<8x64xbf16>, vector<8x64xf32> -> vector<8x64xf32>
    %c0_153 = arith.constant 0 : index
    %c0_154 = arith.constant 0 : index
    %289 = vector.load %arg14[%c0_153, %c0_154] : memref<8x1xf32, #tpu.memory_space<vmem>>, vector<8x1xf32>
    %290 = vector.broadcast %289 : vector<8x1xf32> to vector<8x64xf32>
    %291 = arith.mulf %288, %290 : vector<8x64xf32>
    %c0_155 = arith.constant 0 : index
    %c0_156 = arith.constant 0 : index
    %292 = vector.load %arg15[%c0_155, %c0_156] : memref<8x1xf32, #tpu.memory_space<vmem>>, vector<8x1xf32>
    %293 = vector.broadcast %292 : vector<8x1xf32> to vector<8x64xf32>
    %294 = arith.addf %291, %293 : vector<8x64xf32>
    %295 = arith.truncf %294 : vector<8x64xf32> to vector<8x64xbf16>
    %c0_157 = arith.constant 0 : index
    %c0_158 = arith.constant 0 : index
    %c4_159 = arith.constant 4 : index
    %c0_160 = arith.constant 0 : index
    %296 = vector.load %arg16[%c0_157, %c0_158, %c4_159, %c0_160] : memref<1x8x16x64xbf16, #tpu.memory_space<vmem>>, vector<1x8x1x64xbf16>
    %297 = vector.shape_cast %296 : vector<1x8x1x64xbf16> to vector<8x64xbf16>
    %298 = vector.shape_cast %295 : vector<8x64xbf16> to vector<1x8x1x64xbf16>
    tpu.vector_store %arg16[%c0_157, %c0_158, %c4_159, %c0_160], %298 {strides = array<i32>} : memref<1x8x16x64xbf16, #tpu.memory_space<vmem>>, vector<1x8x1x64xbf16>,
    %299 = arith.truncf %282 : vector<1x64xf32> to vector<1x64xbf16>
    %c0_161 = arith.constant 0 : index
    %c0_162 = arith.constant 0 : index
    %c4_163 = arith.constant 4 : index
    %c0_164 = arith.constant 0 : index
    %300 = vector.load %arg17[%c0_161, %c0_162, %c4_163, %c0_164] : memref<1x1x16x64xbf16, #tpu.memory_space<vmem>>, vector<1x1x1x64xbf16>
    %301 = vector.shape_cast %300 : vector<1x1x1x64xbf16> to vector<1x64xbf16>
    %302 = vector.shape_cast %299 : vector<1x64xbf16> to vector<1x1x1x64xbf16>
    tpu.vector_store %arg17[%c0_161, %c0_162, %c4_163, %c0_164], %302 {strides = array<i32>} : memref<1x1x16x64xbf16, #tpu.memory_space<vmem>>, vector<1x1x1x64xbf16>,
    %c16_i32_165 = arith.constant 16 : i32
    %303 = arith.muli %arg1, %c16_i32_165 : i32
    %c5_i32 = arith.constant 5 : i32
    %304 = arith.addi %303, %c5_i32 : i32
    %305 = arith.index_cast %304 : i32 to index
    %306 = memref.load %arg2[%305] : memref<32xi32, #tpu.memory_space<smem>>
    %307 = arith.index_cast %304 : i32 to index
    %308 = memref.load %arg3[%307] : memref<32xi32, #tpu.memory_space<smem>>
    %309 = arith.index_cast %304 : i32 to index
    %310 = memref.load %arg4[%309] : memref<32xf32, #tpu.memory_space<smem>>
    %cst_166 = arith.constant 1.000000e+00 : f32
    %311 = arith.subf %cst_166, %310 : f32
    %312 = arith.index_cast %306 : i32 to index
    %c0_167 = arith.constant 0 : index
    %c0_168 = arith.constant 0 : index
    %313 = vector.load %arg18[%312, %c0_167, %c0_168] : memref<16x4x64xf32, #tpu.memory_space<vmem>>, vector<1x4x64xf32>
    %314 = vector.shape_cast %313 : vector<1x4x64xf32> to vector<4x64xf32>
    %315 = vector.broadcast %311 : f32 to vector<4x64xf32>
    %316 = arith.mulf %315, %314 : vector<4x64xf32>
    %317 = arith.index_cast %308 : i32 to index
    %c0_169 = arith.constant 0 : index
    %c0_170 = arith.constant 0 : index
    %318 = vector.load %arg18[%317, %c0_169, %c0_170] : memref<16x4x64xf32, #tpu.memory_space<vmem>>, vector<1x4x64xf32>
    %319 = vector.shape_cast %318 : vector<1x4x64xf32> to vector<4x64xf32>
    %320 = vector.broadcast %310 : f32 to vector<4x64xf32>
    %321 = arith.mulf %320, %319 : vector<4x64xf32>
    %322 = arith.addf %316, %321 : vector<4x64xf32>
    %c0_171 = arith.constant 0 : index
    %c0_172 = arith.constant 0 : index
    %c5 = arith.constant 5 : index
    %c0_173 = arith.constant 0 : index
    %323 = vector.load %arg6[%c0_171, %c0_172, %c5, %c0_173] : memref<1x8x16x64xbf16, #tpu.memory_space<vmem>>, vector<1x8x1x64xbf16>
    %324 = vector.shape_cast %323 : vector<1x8x1x64xbf16> to vector<8x64xbf16>
    %c0_174 = arith.constant 0 : index
    %c0_175 = arith.constant 0 : index
    %325 = vector.load %arg9[%c0_174, %c0_175] : memref<4x8xbf16, #tpu.memory_space<vmem>>, vector<4x8xbf16>
    %cst_176 = arith.constant dense<0.000000e+00> : vector<4x64xf32>
    %326 = tpu.matmul %325, %324, %cst_176 {dimension_numbers = #tpu.dot_dimension_numbers<[1], [0], [0], [1], [0, 0, 1, 1], [], []>} : vector<4x8xbf16>, vector<8x64xbf16>, vector<4x64xf32> -> vector<4x64xf32>
    %327 = arith.addf %326, %322 : vector<4x64xf32>
    %cst_177 = arith.constant 0.000000e+00 : f32
    %328 = vector.broadcast %cst_177 : f32 to vector<4x64xf32>
    %329 = arith.maximumf %327, %328 : vector<4x64xf32>
    %c0_178 = arith.constant 0 : index
    %c0_179 = arith.constant 0 : index
    %330 = vector.load %arg12[%c0_178, %c0_179] : memref<4x1xf32, #tpu.memory_space<vmem>>, vector<4x1xf32>
    %331 = vector.broadcast %330 : vector<4x1xf32> to vector<4x64xf32>
    %332 = arith.mulf %329, %331 : vector<4x64xf32>
    %cst_180 = arith.constant dense<0.000000e+00> : vector<64xf32>
    %333 = vector.multi_reduction <add>, %332, %cst_180 [0] : vector<4x64xf32> to vector<64xf32>
    %334 = vector.shape_cast %333 : vector<64xf32> to vector<1x64xf32>
    %c0_181 = arith.constant 0 : index
    %335 = memref.load %arg5[%c0_181] : memref<1xf32, #tpu.memory_space<smem>>
    %336 = vector.broadcast %335 : f32 to vector<1x64xf32>
    %337 = arith.addf %334, %336 : vector<1x64xf32>
    %338 = arith.negf %337 : vector<1x64xf32>
    %339 = math.exp %338 : vector<1x64xf32>
    %cst_182 = arith.constant 1.000000e+00 : f32
    %340 = vector.broadcast %cst_182 : f32 to vector<1x64xf32>
    %341 = arith.addf %340, %339 : vector<1x64xf32>
    %342 = arith.divf %340, %341 : vector<1x64xf32>
    %343 = arith.extf %324 : vector<8x64xbf16> to vector<8x64xf32>
    %344 = vector.broadcast %342 : vector<1x64xf32> to vector<8x64xf32>
    %345 = arith.mulf %344, %343 : vector<8x64xf32>
    %346 = arith.truncf %345 : vector<8x64xf32> to vector<8x64xbf16>
    %c0_183 = arith.constant 0 : index
    %c0_184 = arith.constant 0 : index
    %347 = vector.load %arg13[%c0_183, %c0_184] : memref<8x8xbf16, #tpu.memory_space<vmem>>, vector<8x8xbf16>
    %cst_185 = arith.constant dense<0.000000e+00> : vector<8x64xf32>
    %348 = tpu.matmul %347, %346, %cst_185 {dimension_numbers = #tpu.dot_dimension_numbers<[1], [0], [0], [1], [0, 0, 1, 1], [], []>} : vector<8x8xbf16>, vector<8x64xbf16>, vector<8x64xf32> -> vector<8x64xf32>
    %c0_186 = arith.constant 0 : index
    %c0_187 = arith.constant 0 : index
    %349 = vector.load %arg14[%c0_186, %c0_187] : memref<8x1xf32, #tpu.memory_space<vmem>>, vector<8x1xf32>
    %350 = vector.broadcast %349 : vector<8x1xf32> to vector<8x64xf32>
    %351 = arith.mulf %348, %350 : vector<8x64xf32>
    %c0_188 = arith.constant 0 : index
    %c0_189 = arith.constant 0 : index
    %352 = vector.load %arg15[%c0_188, %c0_189] : memref<8x1xf32, #tpu.memory_space<vmem>>, vector<8x1xf32>
    %353 = vector.broadcast %352 : vector<8x1xf32> to vector<8x64xf32>
    %354 = arith.addf %351, %353 : vector<8x64xf32>
    %355 = arith.truncf %354 : vector<8x64xf32> to vector<8x64xbf16>
    %c0_190 = arith.constant 0 : index
    %c0_191 = arith.constant 0 : index
    %c5_192 = arith.constant 5 : index
    %c0_193 = arith.constant 0 : index
    %356 = vector.load %arg16[%c0_190, %c0_191, %c5_192, %c0_193] : memref<1x8x16x64xbf16, #tpu.memory_space<vmem>>, vector<1x8x1x64xbf16>
    %357 = vector.shape_cast %356 : vector<1x8x1x64xbf16> to vector<8x64xbf16>
    %358 = vector.shape_cast %355 : vector<8x64xbf16> to vector<1x8x1x64xbf16>
    tpu.vector_store %arg16[%c0_190, %c0_191, %c5_192, %c0_193], %358 {strides = array<i32>} : memref<1x8x16x64xbf16, #tpu.memory_space<vmem>>, vector<1x8x1x64xbf16>,
    %359 = arith.truncf %342 : vector<1x64xf32> to vector<1x64xbf16>
    %c0_194 = arith.constant 0 : index
    %c0_195 = arith.constant 0 : index
    %c5_196 = arith.constant 5 : index
    %c0_197 = arith.constant 0 : index
    %360 = vector.load %arg17[%c0_194, %c0_195, %c5_196, %c0_197] : memref<1x1x16x64xbf16, #tpu.memory_space<vmem>>, vector<1x1x1x64xbf16>
    %361 = vector.shape_cast %360 : vector<1x1x1x64xbf16> to vector<1x64xbf16>
    %362 = vector.shape_cast %359 : vector<1x64xbf16> to vector<1x1x1x64xbf16>
    tpu.vector_store %arg17[%c0_194, %c0_195, %c5_196, %c0_197], %362 {strides = array<i32>} : memref<1x1x16x64xbf16, #tpu.memory_space<vmem>>, vector<1x1x1x64xbf16>,
    %c16_i32_198 = arith.constant 16 : i32
    %363 = arith.muli %arg1, %c16_i32_198 : i32
    %c6_i32 = arith.constant 6 : i32
    %364 = arith.addi %363, %c6_i32 : i32
    %365 = arith.index_cast %364 : i32 to index
    %366 = memref.load %arg2[%365] : memref<32xi32, #tpu.memory_space<smem>>
    %367 = arith.index_cast %364 : i32 to index
    %368 = memref.load %arg3[%367] : memref<32xi32, #tpu.memory_space<smem>>
    %369 = arith.index_cast %364 : i32 to index
    %370 = memref.load %arg4[%369] : memref<32xf32, #tpu.memory_space<smem>>
    %cst_199 = arith.constant 1.000000e+00 : f32
    %371 = arith.subf %cst_199, %370 : f32
    %372 = arith.index_cast %366 : i32 to index
    %c0_200 = arith.constant 0 : index
    %c0_201 = arith.constant 0 : index
    %373 = vector.load %arg18[%372, %c0_200, %c0_201] : memref<16x4x64xf32, #tpu.memory_space<vmem>>, vector<1x4x64xf32>
    %374 = vector.shape_cast %373 : vector<1x4x64xf32> to vector<4x64xf32>
    %375 = vector.broadcast %371 : f32 to vector<4x64xf32>
    %376 = arith.mulf %375, %374 : vector<4x64xf32>
    %377 = arith.index_cast %368 : i32 to index
    %c0_202 = arith.constant 0 : index
    %c0_203 = arith.constant 0 : index
    %378 = vector.load %arg18[%377, %c0_202, %c0_203] : memref<16x4x64xf32, #tpu.memory_space<vmem>>, vector<1x4x64xf32>
    %379 = vector.shape_cast %378 : vector<1x4x64xf32> to vector<4x64xf32>
    %380 = vector.broadcast %370 : f32 to vector<4x64xf32>
    %381 = arith.mulf %380, %379 : vector<4x64xf32>
    %382 = arith.addf %376, %381 : vector<4x64xf32>
    %c0_204 = arith.constant 0 : index
    %c0_205 = arith.constant 0 : index
    %c6 = arith.constant 6 : index
    %c0_206 = arith.constant 0 : index
    %383 = vector.load %arg6[%c0_204, %c0_205, %c6, %c0_206] : memref<1x8x16x64xbf16, #tpu.memory_space<vmem>>, vector<1x8x1x64xbf16>
    %384 = vector.shape_cast %383 : vector<1x8x1x64xbf16> to vector<8x64xbf16>
    %c0_207 = arith.constant 0 : index
    %c0_208 = arith.constant 0 : index
    %385 = vector.load %arg9[%c0_207, %c0_208] : memref<4x8xbf16, #tpu.memory_space<vmem>>, vector<4x8xbf16>
    %cst_209 = arith.constant dense<0.000000e+00> : vector<4x64xf32>
    %386 = tpu.matmul %385, %384, %cst_209 {dimension_numbers = #tpu.dot_dimension_numbers<[1], [0], [0], [1], [0, 0, 1, 1], [], []>} : vector<4x8xbf16>, vector<8x64xbf16>, vector<4x64xf32> -> vector<4x64xf32>
    %387 = arith.addf %386, %382 : vector<4x64xf32>
    %cst_210 = arith.constant 0.000000e+00 : f32
    %388 = vector.broadcast %cst_210 : f32 to vector<4x64xf32>
    %389 = arith.maximumf %387, %388 : vector<4x64xf32>
    %c0_211 = arith.constant 0 : index
    %c0_212 = arith.constant 0 : index
    %390 = vector.load %arg12[%c0_211, %c0_212] : memref<4x1xf32, #tpu.memory_space<vmem>>, vector<4x1xf32>
    %391 = vector.broadcast %390 : vector<4x1xf32> to vector<4x64xf32>
    %392 = arith.mulf %389, %391 : vector<4x64xf32>
    %cst_213 = arith.constant dense<0.000000e+00> : vector<64xf32>
    %393 = vector.multi_reduction <add>, %392, %cst_213 [0] : vector<4x64xf32> to vector<64xf32>
    %394 = vector.shape_cast %393 : vector<64xf32> to vector<1x64xf32>
    %c0_214 = arith.constant 0 : index
    %395 = memref.load %arg5[%c0_214] : memref<1xf32, #tpu.memory_space<smem>>
    %396 = vector.broadcast %395 : f32 to vector<1x64xf32>
    %397 = arith.addf %394, %396 : vector<1x64xf32>
    %398 = arith.negf %397 : vector<1x64xf32>
    %399 = math.exp %398 : vector<1x64xf32>
    %cst_215 = arith.constant 1.000000e+00 : f32
    %400 = vector.broadcast %cst_215 : f32 to vector<1x64xf32>
    %401 = arith.addf %400, %399 : vector<1x64xf32>
    %402 = arith.divf %400, %401 : vector<1x64xf32>
    %403 = arith.extf %384 : vector<8x64xbf16> to vector<8x64xf32>
    %404 = vector.broadcast %402 : vector<1x64xf32> to vector<8x64xf32>
    %405 = arith.mulf %404, %403 : vector<8x64xf32>
    %406 = arith.truncf %405 : vector<8x64xf32> to vector<8x64xbf16>
    %c0_216 = arith.constant 0 : index
    %c0_217 = arith.constant 0 : index
    %407 = vector.load %arg13[%c0_216, %c0_217] : memref<8x8xbf16, #tpu.memory_space<vmem>>, vector<8x8xbf16>
    %cst_218 = arith.constant dense<0.000000e+00> : vector<8x64xf32>
    %408 = tpu.matmul %407, %406, %cst_218 {dimension_numbers = #tpu.dot_dimension_numbers<[1], [0], [0], [1], [0, 0, 1, 1], [], []>} : vector<8x8xbf16>, vector<8x64xbf16>, vector<8x64xf32> -> vector<8x64xf32>
    %c0_219 = arith.constant 0 : index
    %c0_220 = arith.constant 0 : index
    %409 = vector.load %arg14[%c0_219, %c0_220] : memref<8x1xf32, #tpu.memory_space<vmem>>, vector<8x1xf32>
    %410 = vector.broadcast %409 : vector<8x1xf32> to vector<8x64xf32>
    %411 = arith.mulf %408, %410 : vector<8x64xf32>
    %c0_221 = arith.constant 0 : index
    %c0_222 = arith.constant 0 : index
    %412 = vector.load %arg15[%c0_221, %c0_222] : memref<8x1xf32, #tpu.memory_space<vmem>>, vector<8x1xf32>
    %413 = vector.broadcast %412 : vector<8x1xf32> to vector<8x64xf32>
    %414 = arith.addf %411, %413 : vector<8x64xf32>
    %415 = arith.truncf %414 : vector<8x64xf32> to vector<8x64xbf16>
    %c0_223 = arith.constant 0 : index
    %c0_224 = arith.constant 0 : index
    %c6_225 = arith.constant 6 : index
    %c0_226 = arith.constant 0 : index
    %416 = vector.load %arg16[%c0_223, %c0_224, %c6_225, %c0_226] : memref<1x8x16x64xbf16, #tpu.memory_space<vmem>>, vector<1x8x1x64xbf16>
    %417 = vector.shape_cast %416 : vector<1x8x1x64xbf16> to vector<8x64xbf16>
    %418 = vector.shape_cast %415 : vector<8x64xbf16> to vector<1x8x1x64xbf16>
    tpu.vector_store %arg16[%c0_223, %c0_224, %c6_225, %c0_226], %418 {strides = array<i32>} : memref<1x8x16x64xbf16, #tpu.memory_space<vmem>>, vector<1x8x1x64xbf16>,
    %419 = arith.truncf %402 : vector<1x64xf32> to vector<1x64xbf16>
    %c0_227 = arith.constant 0 : index
    %c0_228 = arith.constant 0 : index
    %c6_229 = arith.constant 6 : index
    %c0_230 = arith.constant 0 : index
    %420 = vector.load %arg17[%c0_227, %c0_228, %c6_229, %c0_230] : memref<1x1x16x64xbf16, #tpu.memory_space<vmem>>, vector<1x1x1x64xbf16>
    %421 = vector.shape_cast %420 : vector<1x1x1x64xbf16> to vector<1x64xbf16>
    %422 = vector.shape_cast %419 : vector<1x64xbf16> to vector<1x1x1x64xbf16>
    tpu.vector_store %arg17[%c0_227, %c0_228, %c6_229, %c0_230], %422 {strides = array<i32>} : memref<1x1x16x64xbf16, #tpu.memory_space<vmem>>, vector<1x1x1x64xbf16>,
    %c16_i32_231 = arith.constant 16 : i32
    %423 = arith.muli %arg1, %c16_i32_231 : i32
    %c7_i32 = arith.constant 7 : i32
    %424 = arith.addi %423, %c7_i32 : i32
    %425 = arith.index_cast %424 : i32 to index
    %426 = memref.load %arg2[%425] : memref<32xi32, #tpu.memory_space<smem>>
    %427 = arith.index_cast %424 : i32 to index
    %428 = memref.load %arg3[%427] : memref<32xi32, #tpu.memory_space<smem>>
    %429 = arith.index_cast %424 : i32 to index
    %430 = memref.load %arg4[%429] : memref<32xf32, #tpu.memory_space<smem>>
    %cst_232 = arith.constant 1.000000e+00 : f32
    %431 = arith.subf %cst_232, %430 : f32
    %432 = arith.index_cast %426 : i32 to index
    %c0_233 = arith.constant 0 : index
    %c0_234 = arith.constant 0 : index
    %433 = vector.load %arg18[%432, %c0_233, %c0_234] : memref<16x4x64xf32, #tpu.memory_space<vmem>>, vector<1x4x64xf32>
    %434 = vector.shape_cast %433 : vector<1x4x64xf32> to vector<4x64xf32>
    %435 = vector.broadcast %431 : f32 to vector<4x64xf32>
    %436 = arith.mulf %435, %434 : vector<4x64xf32>
    %437 = arith.index_cast %428 : i32 to index
    %c0_235 = arith.constant 0 : index
    %c0_236 = arith.constant 0 : index
    %438 = vector.load %arg18[%437, %c0_235, %c0_236] : memref<16x4x64xf32, #tpu.memory_space<vmem>>, vector<1x4x64xf32>
    %439 = vector.shape_cast %438 : vector<1x4x64xf32> to vector<4x64xf32>
    %440 = vector.broadcast %430 : f32 to vector<4x64xf32>
    %441 = arith.mulf %440, %439 : vector<4x64xf32>
    %442 = arith.addf %436, %441 : vector<4x64xf32>
    %c0_237 = arith.constant 0 : index
    %c0_238 = arith.constant 0 : index
    %c7 = arith.constant 7 : index
    %c0_239 = arith.constant 0 : index
    %443 = vector.load %arg6[%c0_237, %c0_238, %c7, %c0_239] : memref<1x8x16x64xbf16, #tpu.memory_space<vmem>>, vector<1x8x1x64xbf16>
    %444 = vector.shape_cast %443 : vector<1x8x1x64xbf16> to vector<8x64xbf16>
    %c0_240 = arith.constant 0 : index
    %c0_241 = arith.constant 0 : index
    %445 = vector.load %arg9[%c0_240, %c0_241] : memref<4x8xbf16, #tpu.memory_space<vmem>>, vector<4x8xbf16>
    %cst_242 = arith.constant dense<0.000000e+00> : vector<4x64xf32>
    %446 = tpu.matmul %445, %444, %cst_242 {dimension_numbers = #tpu.dot_dimension_numbers<[1], [0], [0], [1], [0, 0, 1, 1], [], []>} : vector<4x8xbf16>, vector<8x64xbf16>, vector<4x64xf32> -> vector<4x64xf32>
    %447 = arith.addf %446, %442 : vector<4x64xf32>
    %cst_243 = arith.constant 0.000000e+00 : f32
    %448 = vector.broadcast %cst_243 : f32 to vector<4x64xf32>
    %449 = arith.maximumf %447, %448 : vector<4x64xf32>
    %c0_244 = arith.constant 0 : index
    %c0_245 = arith.constant 0 : index
    %450 = vector.load %arg12[%c0_244, %c0_245] : memref<4x1xf32, #tpu.memory_space<vmem>>, vector<4x1xf32>
    %451 = vector.broadcast %450 : vector<4x1xf32> to vector<4x64xf32>
    %452 = arith.mulf %449, %451 : vector<4x64xf32>
    %cst_246 = arith.constant dense<0.000000e+00> : vector<64xf32>
    %453 = vector.multi_reduction <add>, %452, %cst_246 [0] : vector<4x64xf32> to vector<64xf32>
    %454 = vector.shape_cast %453 : vector<64xf32> to vector<1x64xf32>
    %c0_247 = arith.constant 0 : index
    %455 = memref.load %arg5[%c0_247] : memref<1xf32, #tpu.memory_space<smem>>
    %456 = vector.broadcast %455 : f32 to vector<1x64xf32>
    %457 = arith.addf %454, %456 : vector<1x64xf32>
    %458 = arith.negf %457 : vector<1x64xf32>
    %459 = math.exp %458 : vector<1x64xf32>
    %cst_248 = arith.constant 1.000000e+00 : f32
    %460 = vector.broadcast %cst_248 : f32 to vector<1x64xf32>
    %461 = arith.addf %460, %459 : vector<1x64xf32>
    %462 = arith.divf %460, %461 : vector<1x64xf32>
    %463 = arith.extf %444 : vector<8x64xbf16> to vector<8x64xf32>
    %464 = vector.broadcast %462 : vector<1x64xf32> to vector<8x64xf32>
    %465 = arith.mulf %464, %463 : vector<8x64xf32>
    %466 = arith.truncf %465 : vector<8x64xf32> to vector<8x64xbf16>
    %c0_249 = arith.constant 0 : index
    %c0_250 = arith.constant 0 : index
    %467 = vector.load %arg13[%c0_249, %c0_250] : memref<8x8xbf16, #tpu.memory_space<vmem>>, vector<8x8xbf16>
    %cst_251 = arith.constant dense<0.000000e+00> : vector<8x64xf32>
    %468 = tpu.matmul %467, %466, %cst_251 {dimension_numbers = #tpu.dot_dimension_numbers<[1], [0], [0], [1], [0, 0, 1, 1], [], []>} : vector<8x8xbf16>, vector<8x64xbf16>, vector<8x64xf32> -> vector<8x64xf32>
    %c0_252 = arith.constant 0 : index
    %c0_253 = arith.constant 0 : index
    %469 = vector.load %arg14[%c0_252, %c0_253] : memref<8x1xf32, #tpu.memory_space<vmem>>, vector<8x1xf32>
    %470 = vector.broadcast %469 : vector<8x1xf32> to vector<8x64xf32>
    %471 = arith.mulf %468, %470 : vector<8x64xf32>
    %c0_254 = arith.constant 0 : index
    %c0_255 = arith.constant 0 : index
    %472 = vector.load %arg15[%c0_254, %c0_255] : memref<8x1xf32, #tpu.memory_space<vmem>>, vector<8x1xf32>
    %473 = vector.broadcast %472 : vector<8x1xf32> to vector<8x64xf32>
    %474 = arith.addf %471, %473 : vector<8x64xf32>
    %475 = arith.truncf %474 : vector<8x64xf32> to vector<8x64xbf16>
    %c0_256 = arith.constant 0 : index
    %c0_257 = arith.constant 0 : index
    %c7_258 = arith.constant 7 : index
    %c0_259 = arith.constant 0 : index
    %476 = vector.load %arg16[%c0_256, %c0_257, %c7_258, %c0_259] : memref<1x8x16x64xbf16, #tpu.memory_space<vmem>>, vector<1x8x1x64xbf16>
    %477 = vector.shape_cast %476 : vector<1x8x1x64xbf16> to vector<8x64xbf16>
    %478 = vector.shape_cast %475 : vector<8x64xbf16> to vector<1x8x1x64xbf16>
    tpu.vector_store %arg16[%c0_256, %c0_257, %c7_258, %c0_259], %478 {strides = array<i32>} : memref<1x8x16x64xbf16, #tpu.memory_space<vmem>>, vector<1x8x1x64xbf16>,
    %479 = arith.truncf %462 : vector<1x64xf32> to vector<1x64xbf16>
    %c0_260 = arith.constant 0 : index
    %c0_261 = arith.constant 0 : index
    %c7_262 = arith.constant 7 : index
    %c0_263 = arith.constant 0 : index
    %480 = vector.load %arg17[%c0_260, %c0_261, %c7_262, %c0_263] : memref<1x1x16x64xbf16, #tpu.memory_space<vmem>>, vector<1x1x1x64xbf16>
    %481 = vector.shape_cast %480 : vector<1x1x1x64xbf16> to vector<1x64xbf16>
    %482 = vector.shape_cast %479 : vector<1x64xbf16> to vector<1x1x1x64xbf16>
    tpu.vector_store %arg17[%c0_260, %c0_261, %c7_262, %c0_263], %482 {strides = array<i32>} : memref<1x1x16x64xbf16, #tpu.memory_space<vmem>>, vector<1x1x1x64xbf16>,
    %c16_i32_264 = arith.constant 16 : i32
    %483 = arith.muli %arg1, %c16_i32_264 : i32
    %c8_i32 = arith.constant 8 : i32
    %484 = arith.addi %483, %c8_i32 : i32
    %485 = arith.index_cast %484 : i32 to index
    %486 = memref.load %arg2[%485] : memref<32xi32, #tpu.memory_space<smem>>
    %487 = arith.index_cast %484 : i32 to index
    %488 = memref.load %arg3[%487] : memref<32xi32, #tpu.memory_space<smem>>
    %489 = arith.index_cast %484 : i32 to index
    %490 = memref.load %arg4[%489] : memref<32xf32, #tpu.memory_space<smem>>
    %cst_265 = arith.constant 1.000000e+00 : f32
    %491 = arith.subf %cst_265, %490 : f32
    %492 = arith.index_cast %486 : i32 to index
    %c0_266 = arith.constant 0 : index
    %c0_267 = arith.constant 0 : index
    %493 = vector.load %arg18[%492, %c0_266, %c0_267] : memref<16x4x64xf32, #tpu.memory_space<vmem>>, vector<1x4x64xf32>
    %494 = vector.shape_cast %493 : vector<1x4x64xf32> to vector<4x64xf32>
    %495 = vector.broadcast %491 : f32 to vector<4x64xf32>
    %496 = arith.mulf %495, %494 : vector<4x64xf32>
    %497 = arith.index_cast %488 : i32 to index
    %c0_268 = arith.constant 0 : index
    %c0_269 = arith.constant 0 : index
    %498 = vector.load %arg18[%497, %c0_268, %c0_269] : memref<16x4x64xf32, #tpu.memory_space<vmem>>, vector<1x4x64xf32>
    %499 = vector.shape_cast %498 : vector<1x4x64xf32> to vector<4x64xf32>
    %500 = vector.broadcast %490 : f32 to vector<4x64xf32>
    %501 = arith.mulf %500, %499 : vector<4x64xf32>
    %502 = arith.addf %496, %501 : vector<4x64xf32>
    %c0_270 = arith.constant 0 : index
    %c0_271 = arith.constant 0 : index
    %c8 = arith.constant 8 : index
    %c0_272 = arith.constant 0 : index
    %503 = vector.load %arg6[%c0_270, %c0_271, %c8, %c0_272] : memref<1x8x16x64xbf16, #tpu.memory_space<vmem>>, vector<1x8x1x64xbf16>
    %504 = vector.shape_cast %503 : vector<1x8x1x64xbf16> to vector<8x64xbf16>
    %c0_273 = arith.constant 0 : index
    %c0_274 = arith.constant 0 : index
    %505 = vector.load %arg9[%c0_273, %c0_274] : memref<4x8xbf16, #tpu.memory_space<vmem>>, vector<4x8xbf16>
    %cst_275 = arith.constant dense<0.000000e+00> : vector<4x64xf32>
    %506 = tpu.matmul %505, %504, %cst_275 {dimension_numbers = #tpu.dot_dimension_numbers<[1], [0], [0], [1], [0, 0, 1, 1], [], []>} : vector<4x8xbf16>, vector<8x64xbf16>, vector<4x64xf32> -> vector<4x64xf32>
    %507 = arith.addf %506, %502 : vector<4x64xf32>
    %cst_276 = arith.constant 0.000000e+00 : f32
    %508 = vector.broadcast %cst_276 : f32 to vector<4x64xf32>
    %509 = arith.maximumf %507, %508 : vector<4x64xf32>
    %c0_277 = arith.constant 0 : index
    %c0_278 = arith.constant 0 : index
    %510 = vector.load %arg12[%c0_277, %c0_278] : memref<4x1xf32, #tpu.memory_space<vmem>>, vector<4x1xf32>
    %511 = vector.broadcast %510 : vector<4x1xf32> to vector<4x64xf32>
    %512 = arith.mulf %509, %511 : vector<4x64xf32>
    %cst_279 = arith.constant dense<0.000000e+00> : vector<64xf32>
    %513 = vector.multi_reduction <add>, %512, %cst_279 [0] : vector<4x64xf32> to vector<64xf32>
    %514 = vector.shape_cast %513 : vector<64xf32> to vector<1x64xf32>
    %c0_280 = arith.constant 0 : index
    %515 = memref.load %arg5[%c0_280] : memref<1xf32, #tpu.memory_space<smem>>
    %516 = vector.broadcast %515 : f32 to vector<1x64xf32>
    %517 = arith.addf %514, %516 : vector<1x64xf32>
    %518 = arith.negf %517 : vector<1x64xf32>
    %519 = math.exp %518 : vector<1x64xf32>
    %cst_281 = arith.constant 1.000000e+00 : f32
    %520 = vector.broadcast %cst_281 : f32 to vector<1x64xf32>
    %521 = arith.addf %520, %519 : vector<1x64xf32>
    %522 = arith.divf %520, %521 : vector<1x64xf32>
    %523 = arith.extf %504 : vector<8x64xbf16> to vector<8x64xf32>
    %524 = vector.broadcast %522 : vector<1x64xf32> to vector<8x64xf32>
    %525 = arith.mulf %524, %523 : vector<8x64xf32>
    %526 = arith.truncf %525 : vector<8x64xf32> to vector<8x64xbf16>
    %c0_282 = arith.constant 0 : index
    %c0_283 = arith.constant 0 : index
    %527 = vector.load %arg13[%c0_282, %c0_283] : memref<8x8xbf16, #tpu.memory_space<vmem>>, vector<8x8xbf16>
    %cst_284 = arith.constant dense<0.000000e+00> : vector<8x64xf32>
    %528 = tpu.matmul %527, %526, %cst_284 {dimension_numbers = #tpu.dot_dimension_numbers<[1], [0], [0], [1], [0, 0, 1, 1], [], []>} : vector<8x8xbf16>, vector<8x64xbf16>, vector<8x64xf32> -> vector<8x64xf32>
    %c0_285 = arith.constant 0 : index
    %c0_286 = arith.constant 0 : index
    %529 = vector.load %arg14[%c0_285, %c0_286] : memref<8x1xf32, #tpu.memory_space<vmem>>, vector<8x1xf32>
    %530 = vector.broadcast %529 : vector<8x1xf32> to vector<8x64xf32>
    %531 = arith.mulf %528, %530 : vector<8x64xf32>
    %c0_287 = arith.constant 0 : index
    %c0_288 = arith.constant 0 : index
    %532 = vector.load %arg15[%c0_287, %c0_288] : memref<8x1xf32, #tpu.memory_space<vmem>>, vector<8x1xf32>
    %533 = vector.broadcast %532 : vector<8x1xf32> to vector<8x64xf32>
    %534 = arith.addf %531, %533 : vector<8x64xf32>
    %535 = arith.truncf %534 : vector<8x64xf32> to vector<8x64xbf16>
    %c0_289 = arith.constant 0 : index
    %c0_290 = arith.constant 0 : index
    %c8_291 = arith.constant 8 : index
    %c0_292 = arith.constant 0 : index
    %536 = vector.load %arg16[%c0_289, %c0_290, %c8_291, %c0_292] : memref<1x8x16x64xbf16, #tpu.memory_space<vmem>>, vector<1x8x1x64xbf16>
    %537 = vector.shape_cast %536 : vector<1x8x1x64xbf16> to vector<8x64xbf16>
    %538 = vector.shape_cast %535 : vector<8x64xbf16> to vector<1x8x1x64xbf16>
    tpu.vector_store %arg16[%c0_289, %c0_290, %c8_291, %c0_292], %538 {strides = array<i32>} : memref<1x8x16x64xbf16, #tpu.memory_space<vmem>>, vector<1x8x1x64xbf16>,
    %539 = arith.truncf %522 : vector<1x64xf32> to vector<1x64xbf16>
    %c0_293 = arith.constant 0 : index
    %c0_294 = arith.constant 0 : index
    %c8_295 = arith.constant 8 : index
    %c0_296 = arith.constant 0 : index
    %540 = vector.load %arg17[%c0_293, %c0_294, %c8_295, %c0_296] : memref<1x1x16x64xbf16, #tpu.memory_space<vmem>>, vector<1x1x1x64xbf16>
    %541 = vector.shape_cast %540 : vector<1x1x1x64xbf16> to vector<1x64xbf16>
    %542 = vector.shape_cast %539 : vector<1x64xbf16> to vector<1x1x1x64xbf16>
    tpu.vector_store %arg17[%c0_293, %c0_294, %c8_295, %c0_296], %542 {strides = array<i32>} : memref<1x1x16x64xbf16, #tpu.memory_space<vmem>>, vector<1x1x1x64xbf16>,
    %c16_i32_297 = arith.constant 16 : i32
    %543 = arith.muli %arg1, %c16_i32_297 : i32
    %c9_i32 = arith.constant 9 : i32
    %544 = arith.addi %543, %c9_i32 : i32
    %545 = arith.index_cast %544 : i32 to index
    %546 = memref.load %arg2[%545] : memref<32xi32, #tpu.memory_space<smem>>
    %547 = arith.index_cast %544 : i32 to index
    %548 = memref.load %arg3[%547] : memref<32xi32, #tpu.memory_space<smem>>
    %549 = arith.index_cast %544 : i32 to index
    %550 = memref.load %arg4[%549] : memref<32xf32, #tpu.memory_space<smem>>
    %cst_298 = arith.constant 1.000000e+00 : f32
    %551 = arith.subf %cst_298, %550 : f32
    %552 = arith.index_cast %546 : i32 to index
    %c0_299 = arith.constant 0 : index
    %c0_300 = arith.constant 0 : index
    %553 = vector.load %arg18[%552, %c0_299, %c0_300] : memref<16x4x64xf32, #tpu.memory_space<vmem>>, vector<1x4x64xf32>
    %554 = vector.shape_cast %553 : vector<1x4x64xf32> to vector<4x64xf32>
    %555 = vector.broadcast %551 : f32 to vector<4x64xf32>
    %556 = arith.mulf %555, %554 : vector<4x64xf32>
    %557 = arith.index_cast %548 : i32 to index
    %c0_301 = arith.constant 0 : index
    %c0_302 = arith.constant 0 : index
    %558 = vector.load %arg18[%557, %c0_301, %c0_302] : memref<16x4x64xf32, #tpu.memory_space<vmem>>, vector<1x4x64xf32>
    %559 = vector.shape_cast %558 : vector<1x4x64xf32> to vector<4x64xf32>
    %560 = vector.broadcast %550 : f32 to vector<4x64xf32>
    %561 = arith.mulf %560, %559 : vector<4x64xf32>
    %562 = arith.addf %556, %561 : vector<4x64xf32>
    %c0_303 = arith.constant 0 : index
    %c0_304 = arith.constant 0 : index
    %c9 = arith.constant 9 : index
    %c0_305 = arith.constant 0 : index
    %563 = vector.load %arg6[%c0_303, %c0_304, %c9, %c0_305] : memref<1x8x16x64xbf16, #tpu.memory_space<vmem>>, vector<1x8x1x64xbf16>
    %564 = vector.shape_cast %563 : vector<1x8x1x64xbf16> to vector<8x64xbf16>
    %c0_306 = arith.constant 0 : index
    %c0_307 = arith.constant 0 : index
    %565 = vector.load %arg9[%c0_306, %c0_307] : memref<4x8xbf16, #tpu.memory_space<vmem>>, vector<4x8xbf16>
    %cst_308 = arith.constant dense<0.000000e+00> : vector<4x64xf32>
    %566 = tpu.matmul %565, %564, %cst_308 {dimension_numbers = #tpu.dot_dimension_numbers<[1], [0], [0], [1], [0, 0, 1, 1], [], []>} : vector<4x8xbf16>, vector<8x64xbf16>, vector<4x64xf32> -> vector<4x64xf32>
    %567 = arith.addf %566, %562 : vector<4x64xf32>
    %cst_309 = arith.constant 0.000000e+00 : f32
    %568 = vector.broadcast %cst_309 : f32 to vector<4x64xf32>
    %569 = arith.maximumf %567, %568 : vector<4x64xf32>
    %c0_310 = arith.constant 0 : index
    %c0_311 = arith.constant 0 : index
    %570 = vector.load %arg12[%c0_310, %c0_311] : memref<4x1xf32, #tpu.memory_space<vmem>>, vector<4x1xf32>
    %571 = vector.broadcast %570 : vector<4x1xf32> to vector<4x64xf32>
    %572 = arith.mulf %569, %571 : vector<4x64xf32>
    %cst_312 = arith.constant dense<0.000000e+00> : vector<64xf32>
    %573 = vector.multi_reduction <add>, %572, %cst_312 [0] : vector<4x64xf32> to vector<64xf32>
    %574 = vector.shape_cast %573 : vector<64xf32> to vector<1x64xf32>
    %c0_313 = arith.constant 0 : index
    %575 = memref.load %arg5[%c0_313] : memref<1xf32, #tpu.memory_space<smem>>
    %576 = vector.broadcast %575 : f32 to vector<1x64xf32>
    %577 = arith.addf %574, %576 : vector<1x64xf32>
    %578 = arith.negf %577 : vector<1x64xf32>
    %579 = math.exp %578 : vector<1x64xf32>
    %cst_314 = arith.constant 1.000000e+00 : f32
    %580 = vector.broadcast %cst_314 : f32 to vector<1x64xf32>
    %581 = arith.addf %580, %579 : vector<1x64xf32>
    %582 = arith.divf %580, %581 : vector<1x64xf32>
    %583 = arith.extf %564 : vector<8x64xbf16> to vector<8x64xf32>
    %584 = vector.broadcast %582 : vector<1x64xf32> to vector<8x64xf32>
    %585 = arith.mulf %584, %583 : vector<8x64xf32>
    %586 = arith.truncf %585 : vector<8x64xf32> to vector<8x64xbf16>
    %c0_315 = arith.constant 0 : index
    %c0_316 = arith.constant 0 : index
    %587 = vector.load %arg13[%c0_315, %c0_316] : memref<8x8xbf16, #tpu.memory_space<vmem>>, vector<8x8xbf16>
    %cst_317 = arith.constant dense<0.000000e+00> : vector<8x64xf32>
    %588 = tpu.matmul %587, %586, %cst_317 {dimension_numbers = #tpu.dot_dimension_numbers<[1], [0], [0], [1], [0, 0, 1, 1], [], []>} : vector<8x8xbf16>, vector<8x64xbf16>, vector<8x64xf32> -> vector<8x64xf32>
    %c0_318 = arith.constant 0 : index
    %c0_319 = arith.constant 0 : index
    %589 = vector.load %arg14[%c0_318, %c0_319] : memref<8x1xf32, #tpu.memory_space<vmem>>, vector<8x1xf32>
    %590 = vector.broadcast %589 : vector<8x1xf32> to vector<8x64xf32>
    %591 = arith.mulf %588, %590 : vector<8x64xf32>
    %c0_320 = arith.constant 0 : index
    %c0_321 = arith.constant 0 : index
    %592 = vector.load %arg15[%c0_320, %c0_321] : memref<8x1xf32, #tpu.memory_space<vmem>>, vector<8x1xf32>
    %593 = vector.broadcast %592 : vector<8x1xf32> to vector<8x64xf32>
    %594 = arith.addf %591, %593 : vector<8x64xf32>
    %595 = arith.truncf %594 : vector<8x64xf32> to vector<8x64xbf16>
    %c0_322 = arith.constant 0 : index
    %c0_323 = arith.constant 0 : index
    %c9_324 = arith.constant 9 : index
    %c0_325 = arith.constant 0 : index
    %596 = vector.load %arg16[%c0_322, %c0_323, %c9_324, %c0_325] : memref<1x8x16x64xbf16, #tpu.memory_space<vmem>>, vector<1x8x1x64xbf16>
    %597 = vector.shape_cast %596 : vector<1x8x1x64xbf16> to vector<8x64xbf16>
    %598 = vector.shape_cast %595 : vector<8x64xbf16> to vector<1x8x1x64xbf16>
    tpu.vector_store %arg16[%c0_322, %c0_323, %c9_324, %c0_325], %598 {strides = array<i32>} : memref<1x8x16x64xbf16, #tpu.memory_space<vmem>>, vector<1x8x1x64xbf16>,
    %599 = arith.truncf %582 : vector<1x64xf32> to vector<1x64xbf16>
    %c0_326 = arith.constant 0 : index
    %c0_327 = arith.constant 0 : index
    %c9_328 = arith.constant 9 : index
    %c0_329 = arith.constant 0 : index
    %600 = vector.load %arg17[%c0_326, %c0_327, %c9_328, %c0_329] : memref<1x1x16x64xbf16, #tpu.memory_space<vmem>>, vector<1x1x1x64xbf16>
    %601 = vector.shape_cast %600 : vector<1x1x1x64xbf16> to vector<1x64xbf16>
    %602 = vector.shape_cast %599 : vector<1x64xbf16> to vector<1x1x1x64xbf16>
    tpu.vector_store %arg17[%c0_326, %c0_327, %c9_328, %c0_329], %602 {strides = array<i32>} : memref<1x1x16x64xbf16, #tpu.memory_space<vmem>>, vector<1x1x1x64xbf16>,
    %c16_i32_330 = arith.constant 16 : i32
    %603 = arith.muli %arg1, %c16_i32_330 : i32
    %c10_i32 = arith.constant 10 : i32
    %604 = arith.addi %603, %c10_i32 : i32
    %605 = arith.index_cast %604 : i32 to index
    %606 = memref.load %arg2[%605] : memref<32xi32, #tpu.memory_space<smem>>
    %607 = arith.index_cast %604 : i32 to index
    %608 = memref.load %arg3[%607] : memref<32xi32, #tpu.memory_space<smem>>
    %609 = arith.index_cast %604 : i32 to index
    %610 = memref.load %arg4[%609] : memref<32xf32, #tpu.memory_space<smem>>
    %cst_331 = arith.constant 1.000000e+00 : f32
    %611 = arith.subf %cst_331, %610 : f32
    %612 = arith.index_cast %606 : i32 to index
    %c0_332 = arith.constant 0 : index
    %c0_333 = arith.constant 0 : index
    %613 = vector.load %arg18[%612, %c0_332, %c0_333] : memref<16x4x64xf32, #tpu.memory_space<vmem>>, vector<1x4x64xf32>
    %614 = vector.shape_cast %613 : vector<1x4x64xf32> to vector<4x64xf32>
    %615 = vector.broadcast %611 : f32 to vector<4x64xf32>
    %616 = arith.mulf %615, %614 : vector<4x64xf32>
    %617 = arith.index_cast %608 : i32 to index
    %c0_334 = arith.constant 0 : index
    %c0_335 = arith.constant 0 : index
    %618 = vector.load %arg18[%617, %c0_334, %c0_335] : memref<16x4x64xf32, #tpu.memory_space<vmem>>, vector<1x4x64xf32>
    %619 = vector.shape_cast %618 : vector<1x4x64xf32> to vector<4x64xf32>
    %620 = vector.broadcast %610 : f32 to vector<4x64xf32>
    %621 = arith.mulf %620, %619 : vector<4x64xf32>
    %622 = arith.addf %616, %621 : vector<4x64xf32>
    %c0_336 = arith.constant 0 : index
    %c0_337 = arith.constant 0 : index
    %c10 = arith.constant 10 : index
    %c0_338 = arith.constant 0 : index
    %623 = vector.load %arg6[%c0_336, %c0_337, %c10, %c0_338] : memref<1x8x16x64xbf16, #tpu.memory_space<vmem>>, vector<1x8x1x64xbf16>
    %624 = vector.shape_cast %623 : vector<1x8x1x64xbf16> to vector<8x64xbf16>
    %c0_339 = arith.constant 0 : index
    %c0_340 = arith.constant 0 : index
    %625 = vector.load %arg9[%c0_339, %c0_340] : memref<4x8xbf16, #tpu.memory_space<vmem>>, vector<4x8xbf16>
    %cst_341 = arith.constant dense<0.000000e+00> : vector<4x64xf32>
    %626 = tpu.matmul %625, %624, %cst_341 {dimension_numbers = #tpu.dot_dimension_numbers<[1], [0], [0], [1], [0, 0, 1, 1], [], []>} : vector<4x8xbf16>, vector<8x64xbf16>, vector<4x64xf32> -> vector<4x64xf32>
    %627 = arith.addf %626, %622 : vector<4x64xf32>
    %cst_342 = arith.constant 0.000000e+00 : f32
    %628 = vector.broadcast %cst_342 : f32 to vector<4x64xf32>
    %629 = arith.maximumf %627, %628 : vector<4x64xf32>
    %c0_343 = arith.constant 0 : index
    %c0_344 = arith.constant 0 : index
    %630 = vector.load %arg12[%c0_343, %c0_344] : memref<4x1xf32, #tpu.memory_space<vmem>>, vector<4x1xf32>
    %631 = vector.broadcast %630 : vector<4x1xf32> to vector<4x64xf32>
    %632 = arith.mulf %629, %631 : vector<4x64xf32>
    %cst_345 = arith.constant dense<0.000000e+00> : vector<64xf32>
    %633 = vector.multi_reduction <add>, %632, %cst_345 [0] : vector<4x64xf32> to vector<64xf32>
    %634 = vector.shape_cast %633 : vector<64xf32> to vector<1x64xf32>
    %c0_346 = arith.constant 0 : index
    %635 = memref.load %arg5[%c0_346] : memref<1xf32, #tpu.memory_space<smem>>
    %636 = vector.broadcast %635 : f32 to vector<1x64xf32>
    %637 = arith.addf %634, %636 : vector<1x64xf32>
    %638 = arith.negf %637 : vector<1x64xf32>
    %639 = math.exp %638 : vector<1x64xf32>
    %cst_347 = arith.constant 1.000000e+00 : f32
    %640 = vector.broadcast %cst_347 : f32 to vector<1x64xf32>
    %641 = arith.addf %640, %639 : vector<1x64xf32>
    %642 = arith.divf %640, %641 : vector<1x64xf32>
    %643 = arith.extf %624 : vector<8x64xbf16> to vector<8x64xf32>
    %644 = vector.broadcast %642 : vector<1x64xf32> to vector<8x64xf32>
    %645 = arith.mulf %644, %643 : vector<8x64xf32>
    %646 = arith.truncf %645 : vector<8x64xf32> to vector<8x64xbf16>
    %c0_348 = arith.constant 0 : index
    %c0_349 = arith.constant 0 : index
    %647 = vector.load %arg13[%c0_348, %c0_349] : memref<8x8xbf16, #tpu.memory_space<vmem>>, vector<8x8xbf16>
    %cst_350 = arith.constant dense<0.000000e+00> : vector<8x64xf32>
    %648 = tpu.matmul %647, %646, %cst_350 {dimension_numbers = #tpu.dot_dimension_numbers<[1], [0], [0], [1], [0, 0, 1, 1], [], []>} : vector<8x8xbf16>, vector<8x64xbf16>, vector<8x64xf32> -> vector<8x64xf32>
    %c0_351 = arith.constant 0 : index
    %c0_352 = arith.constant 0 : index
    %649 = vector.load %arg14[%c0_351, %c0_352] : memref<8x1xf32, #tpu.memory_space<vmem>>, vector<8x1xf32>
    %650 = vector.broadcast %649 : vector<8x1xf32> to vector<8x64xf32>
    %651 = arith.mulf %648, %650 : vector<8x64xf32>
    %c0_353 = arith.constant 0 : index
    %c0_354 = arith.constant 0 : index
    %652 = vector.load %arg15[%c0_353, %c0_354] : memref<8x1xf32, #tpu.memory_space<vmem>>, vector<8x1xf32>
    %653 = vector.broadcast %652 : vector<8x1xf32> to vector<8x64xf32>
    %654 = arith.addf %651, %653 : vector<8x64xf32>
    %655 = arith.truncf %654 : vector<8x64xf32> to vector<8x64xbf16>
    %c0_355 = arith.constant 0 : index
    %c0_356 = arith.constant 0 : index
    %c10_357 = arith.constant 10 : index
    %c0_358 = arith.constant 0 : index
    %656 = vector.load %arg16[%c0_355, %c0_356, %c10_357, %c0_358] : memref<1x8x16x64xbf16, #tpu.memory_space<vmem>>, vector<1x8x1x64xbf16>
    %657 = vector.shape_cast %656 : vector<1x8x1x64xbf16> to vector<8x64xbf16>
    %658 = vector.shape_cast %655 : vector<8x64xbf16> to vector<1x8x1x64xbf16>
    tpu.vector_store %arg16[%c0_355, %c0_356, %c10_357, %c0_358], %658 {strides = array<i32>} : memref<1x8x16x64xbf16, #tpu.memory_space<vmem>>, vector<1x8x1x64xbf16>,
    %659 = arith.truncf %642 : vector<1x64xf32> to vector<1x64xbf16>
    %c0_359 = arith.constant 0 : index
    %c0_360 = arith.constant 0 : index
    %c10_361 = arith.constant 10 : index
    %c0_362 = arith.constant 0 : index
    %660 = vector.load %arg17[%c0_359, %c0_360, %c10_361, %c0_362] : memref<1x1x16x64xbf16, #tpu.memory_space<vmem>>, vector<1x1x1x64xbf16>
    %661 = vector.shape_cast %660 : vector<1x1x1x64xbf16> to vector<1x64xbf16>
    %662 = vector.shape_cast %659 : vector<1x64xbf16> to vector<1x1x1x64xbf16>
    tpu.vector_store %arg17[%c0_359, %c0_360, %c10_361, %c0_362], %662 {strides = array<i32>} : memref<1x1x16x64xbf16, #tpu.memory_space<vmem>>, vector<1x1x1x64xbf16>,
    %c16_i32_363 = arith.constant 16 : i32
    %663 = arith.muli %arg1, %c16_i32_363 : i32
    %c11_i32 = arith.constant 11 : i32
    %664 = arith.addi %663, %c11_i32 : i32
    %665 = arith.index_cast %664 : i32 to index
    %666 = memref.load %arg2[%665] : memref<32xi32, #tpu.memory_space<smem>>
    %667 = arith.index_cast %664 : i32 to index
    %668 = memref.load %arg3[%667] : memref<32xi32, #tpu.memory_space<smem>>
    %669 = arith.index_cast %664 : i32 to index
    %670 = memref.load %arg4[%669] : memref<32xf32, #tpu.memory_space<smem>>
    %cst_364 = arith.constant 1.000000e+00 : f32
    %671 = arith.subf %cst_364, %670 : f32
    %672 = arith.index_cast %666 : i32 to index
    %c0_365 = arith.constant 0 : index
    %c0_366 = arith.constant 0 : index
    %673 = vector.load %arg18[%672, %c0_365, %c0_366] : memref<16x4x64xf32, #tpu.memory_space<vmem>>, vector<1x4x64xf32>
    %674 = vector.shape_cast %673 : vector<1x4x64xf32> to vector<4x64xf32>
    %675 = vector.broadcast %671 : f32 to vector<4x64xf32>
    %676 = arith.mulf %675, %674 : vector<4x64xf32>
    %677 = arith.index_cast %668 : i32 to index
    %c0_367 = arith.constant 0 : index
    %c0_368 = arith.constant 0 : index
    %678 = vector.load %arg18[%677, %c0_367, %c0_368] : memref<16x4x64xf32, #tpu.memory_space<vmem>>, vector<1x4x64xf32>
    %679 = vector.shape_cast %678 : vector<1x4x64xf32> to vector<4x64xf32>
    %680 = vector.broadcast %670 : f32 to vector<4x64xf32>
    %681 = arith.mulf %680, %679 : vector<4x64xf32>
    %682 = arith.addf %676, %681 : vector<4x64xf32>
    %c0_369 = arith.constant 0 : index
    %c0_370 = arith.constant 0 : index
    %c11 = arith.constant 11 : index
    %c0_371 = arith.constant 0 : index
    %683 = vector.load %arg6[%c0_369, %c0_370, %c11, %c0_371] : memref<1x8x16x64xbf16, #tpu.memory_space<vmem>>, vector<1x8x1x64xbf16>
    %684 = vector.shape_cast %683 : vector<1x8x1x64xbf16> to vector<8x64xbf16>
    %c0_372 = arith.constant 0 : index
    %c0_373 = arith.constant 0 : index
    %685 = vector.load %arg9[%c0_372, %c0_373] : memref<4x8xbf16, #tpu.memory_space<vmem>>, vector<4x8xbf16>
    %cst_374 = arith.constant dense<0.000000e+00> : vector<4x64xf32>
    %686 = tpu.matmul %685, %684, %cst_374 {dimension_numbers = #tpu.dot_dimension_numbers<[1], [0], [0], [1], [0, 0, 1, 1], [], []>} : vector<4x8xbf16>, vector<8x64xbf16>, vector<4x64xf32> -> vector<4x64xf32>
    %687 = arith.addf %686, %682 : vector<4x64xf32>
    %cst_375 = arith.constant 0.000000e+00 : f32
    %688 = vector.broadcast %cst_375 : f32 to vector<4x64xf32>
    %689 = arith.maximumf %687, %688 : vector<4x64xf32>
    %c0_376 = arith.constant 0 : index
    %c0_377 = arith.constant 0 : index
    %690 = vector.load %arg12[%c0_376, %c0_377] : memref<4x1xf32, #tpu.memory_space<vmem>>, vector<4x1xf32>
    %691 = vector.broadcast %690 : vector<4x1xf32> to vector<4x64xf32>
    %692 = arith.mulf %689, %691 : vector<4x64xf32>
    %cst_378 = arith.constant dense<0.000000e+00> : vector<64xf32>
    %693 = vector.multi_reduction <add>, %692, %cst_378 [0] : vector<4x64xf32> to vector<64xf32>
    %694 = vector.shape_cast %693 : vector<64xf32> to vector<1x64xf32>
    %c0_379 = arith.constant 0 : index
    %695 = memref.load %arg5[%c0_379] : memref<1xf32, #tpu.memory_space<smem>>
    %696 = vector.broadcast %695 : f32 to vector<1x64xf32>
    %697 = arith.addf %694, %696 : vector<1x64xf32>
    %698 = arith.negf %697 : vector<1x64xf32>
    %699 = math.exp %698 : vector<1x64xf32>
    %cst_380 = arith.constant 1.000000e+00 : f32
    %700 = vector.broadcast %cst_380 : f32 to vector<1x64xf32>
    %701 = arith.addf %700, %699 : vector<1x64xf32>
    %702 = arith.divf %700, %701 : vector<1x64xf32>
    %703 = arith.extf %684 : vector<8x64xbf16> to vector<8x64xf32>
    %704 = vector.broadcast %702 : vector<1x64xf32> to vector<8x64xf32>
    %705 = arith.mulf %704, %703 : vector<8x64xf32>
    %706 = arith.truncf %705 : vector<8x64xf32> to vector<8x64xbf16>
    %c0_381 = arith.constant 0 : index
    %c0_382 = arith.constant 0 : index
    %707 = vector.load %arg13[%c0_381, %c0_382] : memref<8x8xbf16, #tpu.memory_space<vmem>>, vector<8x8xbf16>
    %cst_383 = arith.constant dense<0.000000e+00> : vector<8x64xf32>
    %708 = tpu.matmul %707, %706, %cst_383 {dimension_numbers = #tpu.dot_dimension_numbers<[1], [0], [0], [1], [0, 0, 1, 1], [], []>} : vector<8x8xbf16>, vector<8x64xbf16>, vector<8x64xf32> -> vector<8x64xf32>
    %c0_384 = arith.constant 0 : index
    %c0_385 = arith.constant 0 : index
    %709 = vector.load %arg14[%c0_384, %c0_385] : memref<8x1xf32, #tpu.memory_space<vmem>>, vector<8x1xf32>
    %710 = vector.broadcast %709 : vector<8x1xf32> to vector<8x64xf32>
    %711 = arith.mulf %708, %710 : vector<8x64xf32>
    %c0_386 = arith.constant 0 : index
    %c0_387 = arith.constant 0 : index
    %712 = vector.load %arg15[%c0_386, %c0_387] : memref<8x1xf32, #tpu.memory_space<vmem>>, vector<8x1xf32>
    %713 = vector.broadcast %712 : vector<8x1xf32> to vector<8x64xf32>
    %714 = arith.addf %711, %713 : vector<8x64xf32>
    %715 = arith.truncf %714 : vector<8x64xf32> to vector<8x64xbf16>
    %c0_388 = arith.constant 0 : index
    %c0_389 = arith.constant 0 : index
    %c11_390 = arith.constant 11 : index
    %c0_391 = arith.constant 0 : index
    %716 = vector.load %arg16[%c0_388, %c0_389, %c11_390, %c0_391] : memref<1x8x16x64xbf16, #tpu.memory_space<vmem>>, vector<1x8x1x64xbf16>
    %717 = vector.shape_cast %716 : vector<1x8x1x64xbf16> to vector<8x64xbf16>
    %718 = vector.shape_cast %715 : vector<8x64xbf16> to vector<1x8x1x64xbf16>
    tpu.vector_store %arg16[%c0_388, %c0_389, %c11_390, %c0_391], %718 {strides = array<i32>} : memref<1x8x16x64xbf16, #tpu.memory_space<vmem>>, vector<1x8x1x64xbf16>,
    %719 = arith.truncf %702 : vector<1x64xf32> to vector<1x64xbf16>
    %c0_392 = arith.constant 0 : index
    %c0_393 = arith.constant 0 : index
    %c11_394 = arith.constant 11 : index
    %c0_395 = arith.constant 0 : index
    %720 = vector.load %arg17[%c0_392, %c0_393, %c11_394, %c0_395] : memref<1x1x16x64xbf16, #tpu.memory_space<vmem>>, vector<1x1x1x64xbf16>
    %721 = vector.shape_cast %720 : vector<1x1x1x64xbf16> to vector<1x64xbf16>
    %722 = vector.shape_cast %719 : vector<1x64xbf16> to vector<1x1x1x64xbf16>
    tpu.vector_store %arg17[%c0_392, %c0_393, %c11_394, %c0_395], %722 {strides = array<i32>} : memref<1x1x16x64xbf16, #tpu.memory_space<vmem>>, vector<1x1x1x64xbf16>,
    %c16_i32_396 = arith.constant 16 : i32
    %723 = arith.muli %arg1, %c16_i32_396 : i32
    %c12_i32 = arith.constant 12 : i32
    %724 = arith.addi %723, %c12_i32 : i32
    %725 = arith.index_cast %724 : i32 to index
    %726 = memref.load %arg2[%725] : memref<32xi32, #tpu.memory_space<smem>>
    %727 = arith.index_cast %724 : i32 to index
    %728 = memref.load %arg3[%727] : memref<32xi32, #tpu.memory_space<smem>>
    %729 = arith.index_cast %724 : i32 to index
    %730 = memref.load %arg4[%729] : memref<32xf32, #tpu.memory_space<smem>>
    %cst_397 = arith.constant 1.000000e+00 : f32
    %731 = arith.subf %cst_397, %730 : f32
    %732 = arith.index_cast %726 : i32 to index
    %c0_398 = arith.constant 0 : index
    %c0_399 = arith.constant 0 : index
    %733 = vector.load %arg18[%732, %c0_398, %c0_399] : memref<16x4x64xf32, #tpu.memory_space<vmem>>, vector<1x4x64xf32>
    %734 = vector.shape_cast %733 : vector<1x4x64xf32> to vector<4x64xf32>
    %735 = vector.broadcast %731 : f32 to vector<4x64xf32>
    %736 = arith.mulf %735, %734 : vector<4x64xf32>
    %737 = arith.index_cast %728 : i32 to index
    %c0_400 = arith.constant 0 : index
    %c0_401 = arith.constant 0 : index
    %738 = vector.load %arg18[%737, %c0_400, %c0_401] : memref<16x4x64xf32, #tpu.memory_space<vmem>>, vector<1x4x64xf32>
    %739 = vector.shape_cast %738 : vector<1x4x64xf32> to vector<4x64xf32>
    %740 = vector.broadcast %730 : f32 to vector<4x64xf32>
    %741 = arith.mulf %740, %739 : vector<4x64xf32>
    %742 = arith.addf %736, %741 : vector<4x64xf32>
    %c0_402 = arith.constant 0 : index
    %c0_403 = arith.constant 0 : index
    %c12 = arith.constant 12 : index
    %c0_404 = arith.constant 0 : index
    %743 = vector.load %arg6[%c0_402, %c0_403, %c12, %c0_404] : memref<1x8x16x64xbf16, #tpu.memory_space<vmem>>, vector<1x8x1x64xbf16>
    %744 = vector.shape_cast %743 : vector<1x8x1x64xbf16> to vector<8x64xbf16>
    %c0_405 = arith.constant 0 : index
    %c0_406 = arith.constant 0 : index
    %745 = vector.load %arg9[%c0_405, %c0_406] : memref<4x8xbf16, #tpu.memory_space<vmem>>, vector<4x8xbf16>
    %cst_407 = arith.constant dense<0.000000e+00> : vector<4x64xf32>
    %746 = tpu.matmul %745, %744, %cst_407 {dimension_numbers = #tpu.dot_dimension_numbers<[1], [0], [0], [1], [0, 0, 1, 1], [], []>} : vector<4x8xbf16>, vector<8x64xbf16>, vector<4x64xf32> -> vector<4x64xf32>
    %747 = arith.addf %746, %742 : vector<4x64xf32>
    %cst_408 = arith.constant 0.000000e+00 : f32
    %748 = vector.broadcast %cst_408 : f32 to vector<4x64xf32>
    %749 = arith.maximumf %747, %748 : vector<4x64xf32>
    %c0_409 = arith.constant 0 : index
    %c0_410 = arith.constant 0 : index
    %750 = vector.load %arg12[%c0_409, %c0_410] : memref<4x1xf32, #tpu.memory_space<vmem>>, vector<4x1xf32>
    %751 = vector.broadcast %750 : vector<4x1xf32> to vector<4x64xf32>
    %752 = arith.mulf %749, %751 : vector<4x64xf32>
    %cst_411 = arith.constant dense<0.000000e+00> : vector<64xf32>
    %753 = vector.multi_reduction <add>, %752, %cst_411 [0] : vector<4x64xf32> to vector<64xf32>
    %754 = vector.shape_cast %753 : vector<64xf32> to vector<1x64xf32>
    %c0_412 = arith.constant 0 : index
    %755 = memref.load %arg5[%c0_412] : memref<1xf32, #tpu.memory_space<smem>>
    %756 = vector.broadcast %755 : f32 to vector<1x64xf32>
    %757 = arith.addf %754, %756 : vector<1x64xf32>
    %758 = arith.negf %757 : vector<1x64xf32>
    %759 = math.exp %758 : vector<1x64xf32>
    %cst_413 = arith.constant 1.000000e+00 : f32
    %760 = vector.broadcast %cst_413 : f32 to vector<1x64xf32>
    %761 = arith.addf %760, %759 : vector<1x64xf32>
    %762 = arith.divf %760, %761 : vector<1x64xf32>
    %763 = arith.extf %744 : vector<8x64xbf16> to vector<8x64xf32>
    %764 = vector.broadcast %762 : vector<1x64xf32> to vector<8x64xf32>
    %765 = arith.mulf %764, %763 : vector<8x64xf32>
    %766 = arith.truncf %765 : vector<8x64xf32> to vector<8x64xbf16>
    %c0_414 = arith.constant 0 : index
    %c0_415 = arith.constant 0 : index
    %767 = vector.load %arg13[%c0_414, %c0_415] : memref<8x8xbf16, #tpu.memory_space<vmem>>, vector<8x8xbf16>
    %cst_416 = arith.constant dense<0.000000e+00> : vector<8x64xf32>
    %768 = tpu.matmul %767, %766, %cst_416 {dimension_numbers = #tpu.dot_dimension_numbers<[1], [0], [0], [1], [0, 0, 1, 1], [], []>} : vector<8x8xbf16>, vector<8x64xbf16>, vector<8x64xf32> -> vector<8x64xf32>
    %c0_417 = arith.constant 0 : index
    %c0_418 = arith.constant 0 : index
    %769 = vector.load %arg14[%c0_417, %c0_418] : memref<8x1xf32, #tpu.memory_space<vmem>>, vector<8x1xf32>
    %770 = vector.broadcast %769 : vector<8x1xf32> to vector<8x64xf32>
    %771 = arith.mulf %768, %770 : vector<8x64xf32>
    %c0_419 = arith.constant 0 : index
    %c0_420 = arith.constant 0 : index
    %772 = vector.load %arg15[%c0_419, %c0_420] : memref<8x1xf32, #tpu.memory_space<vmem>>, vector<8x1xf32>
    %773 = vector.broadcast %772 : vector<8x1xf32> to vector<8x64xf32>
    %774 = arith.addf %771, %773 : vector<8x64xf32>
    %775 = arith.truncf %774 : vector<8x64xf32> to vector<8x64xbf16>
    %c0_421 = arith.constant 0 : index
    %c0_422 = arith.constant 0 : index
    %c12_423 = arith.constant 12 : index
    %c0_424 = arith.constant 0 : index
    %776 = vector.load %arg16[%c0_421, %c0_422, %c12_423, %c0_424] : memref<1x8x16x64xbf16, #tpu.memory_space<vmem>>, vector<1x8x1x64xbf16>
    %777 = vector.shape_cast %776 : vector<1x8x1x64xbf16> to vector<8x64xbf16>
    %778 = vector.shape_cast %775 : vector<8x64xbf16> to vector<1x8x1x64xbf16>
    tpu.vector_store %arg16[%c0_421, %c0_422, %c12_423, %c0_424], %778 {strides = array<i32>} : memref<1x8x16x64xbf16, #tpu.memory_space<vmem>>, vector<1x8x1x64xbf16>,
    %779 = arith.truncf %762 : vector<1x64xf32> to vector<1x64xbf16>
    %c0_425 = arith.constant 0 : index
    %c0_426 = arith.constant 0 : index
    %c12_427 = arith.constant 12 : index
    %c0_428 = arith.constant 0 : index
    %780 = vector.load %arg17[%c0_425, %c0_426, %c12_427, %c0_428] : memref<1x1x16x64xbf16, #tpu.memory_space<vmem>>, vector<1x1x1x64xbf16>
    %781 = vector.shape_cast %780 : vector<1x1x1x64xbf16> to vector<1x64xbf16>
    %782 = vector.shape_cast %779 : vector<1x64xbf16> to vector<1x1x1x64xbf16>
    tpu.vector_store %arg17[%c0_425, %c0_426, %c12_427, %c0_428], %782 {strides = array<i32>} : memref<1x1x16x64xbf16, #tpu.memory_space<vmem>>, vector<1x1x1x64xbf16>,
    %c16_i32_429 = arith.constant 16 : i32
    %783 = arith.muli %arg1, %c16_i32_429 : i32
    %c13_i32 = arith.constant 13 : i32
    %784 = arith.addi %783, %c13_i32 : i32
    %785 = arith.index_cast %784 : i32 to index
    %786 = memref.load %arg2[%785] : memref<32xi32, #tpu.memory_space<smem>>
    %787 = arith.index_cast %784 : i32 to index
    %788 = memref.load %arg3[%787] : memref<32xi32, #tpu.memory_space<smem>>
    %789 = arith.index_cast %784 : i32 to index
    %790 = memref.load %arg4[%789] : memref<32xf32, #tpu.memory_space<smem>>
    %cst_430 = arith.constant 1.000000e+00 : f32
    %791 = arith.subf %cst_430, %790 : f32
    %792 = arith.index_cast %786 : i32 to index
    %c0_431 = arith.constant 0 : index
    %c0_432 = arith.constant 0 : index
    %793 = vector.load %arg18[%792, %c0_431, %c0_432] : memref<16x4x64xf32, #tpu.memory_space<vmem>>, vector<1x4x64xf32>
    %794 = vector.shape_cast %793 : vector<1x4x64xf32> to vector<4x64xf32>
    %795 = vector.broadcast %791 : f32 to vector<4x64xf32>
    %796 = arith.mulf %795, %794 : vector<4x64xf32>
    %797 = arith.index_cast %788 : i32 to index
    %c0_433 = arith.constant 0 : index
    %c0_434 = arith.constant 0 : index
    %798 = vector.load %arg18[%797, %c0_433, %c0_434] : memref<16x4x64xf32, #tpu.memory_space<vmem>>, vector<1x4x64xf32>
    %799 = vector.shape_cast %798 : vector<1x4x64xf32> to vector<4x64xf32>
    %800 = vector.broadcast %790 : f32 to vector<4x64xf32>
    %801 = arith.mulf %800, %799 : vector<4x64xf32>
    %802 = arith.addf %796, %801 : vector<4x64xf32>
    %c0_435 = arith.constant 0 : index
    %c0_436 = arith.constant 0 : index
    %c13 = arith.constant 13 : index
    %c0_437 = arith.constant 0 : index
    %803 = vector.load %arg6[%c0_435, %c0_436, %c13, %c0_437] : memref<1x8x16x64xbf16, #tpu.memory_space<vmem>>, vector<1x8x1x64xbf16>
    %804 = vector.shape_cast %803 : vector<1x8x1x64xbf16> to vector<8x64xbf16>
    %c0_438 = arith.constant 0 : index
    %c0_439 = arith.constant 0 : index
    %805 = vector.load %arg9[%c0_438, %c0_439] : memref<4x8xbf16, #tpu.memory_space<vmem>>, vector<4x8xbf16>
    %cst_440 = arith.constant dense<0.000000e+00> : vector<4x64xf32>
    %806 = tpu.matmul %805, %804, %cst_440 {dimension_numbers = #tpu.dot_dimension_numbers<[1], [0], [0], [1], [0, 0, 1, 1], [], []>} : vector<4x8xbf16>, vector<8x64xbf16>, vector<4x64xf32> -> vector<4x64xf32>
    %807 = arith.addf %806, %802 : vector<4x64xf32>
    %cst_441 = arith.constant 0.000000e+00 : f32
    %808 = vector.broadcast %cst_441 : f32 to vector<4x64xf32>
    %809 = arith.maximumf %807, %808 : vector<4x64xf32>
    %c0_442 = arith.constant 0 : index
    %c0_443 = arith.constant 0 : index
    %810 = vector.load %arg12[%c0_442, %c0_443] : memref<4x1xf32, #tpu.memory_space<vmem>>, vector<4x1xf32>
    %811 = vector.broadcast %810 : vector<4x1xf32> to vector<4x64xf32>
    %812 = arith.mulf %809, %811 : vector<4x64xf32>
    %cst_444 = arith.constant dense<0.000000e+00> : vector<64xf32>
    %813 = vector.multi_reduction <add>, %812, %cst_444 [0] : vector<4x64xf32> to vector<64xf32>
    %814 = vector.shape_cast %813 : vector<64xf32> to vector<1x64xf32>
    %c0_445 = arith.constant 0 : index
    %815 = memref.load %arg5[%c0_445] : memref<1xf32, #tpu.memory_space<smem>>
    %816 = vector.broadcast %815 : f32 to vector<1x64xf32>
    %817 = arith.addf %814, %816 : vector<1x64xf32>
    %818 = arith.negf %817 : vector<1x64xf32>
    %819 = math.exp %818 : vector<1x64xf32>
    %cst_446 = arith.constant 1.000000e+00 : f32
    %820 = vector.broadcast %cst_446 : f32 to vector<1x64xf32>
    %821 = arith.addf %820, %819 : vector<1x64xf32>
    %822 = arith.divf %820, %821 : vector<1x64xf32>
    %823 = arith.extf %804 : vector<8x64xbf16> to vector<8x64xf32>
    %824 = vector.broadcast %822 : vector<1x64xf32> to vector<8x64xf32>
    %825 = arith.mulf %824, %823 : vector<8x64xf32>
    %826 = arith.truncf %825 : vector<8x64xf32> to vector<8x64xbf16>
    %c0_447 = arith.constant 0 : index
    %c0_448 = arith.constant 0 : index
    %827 = vector.load %arg13[%c0_447, %c0_448] : memref<8x8xbf16, #tpu.memory_space<vmem>>, vector<8x8xbf16>
    %cst_449 = arith.constant dense<0.000000e+00> : vector<8x64xf32>
    %828 = tpu.matmul %827, %826, %cst_449 {dimension_numbers = #tpu.dot_dimension_numbers<[1], [0], [0], [1], [0, 0, 1, 1], [], []>} : vector<8x8xbf16>, vector<8x64xbf16>, vector<8x64xf32> -> vector<8x64xf32>
    %c0_450 = arith.constant 0 : index
    %c0_451 = arith.constant 0 : index
    %829 = vector.load %arg14[%c0_450, %c0_451] : memref<8x1xf32, #tpu.memory_space<vmem>>, vector<8x1xf32>
    %830 = vector.broadcast %829 : vector<8x1xf32> to vector<8x64xf32>
    %831 = arith.mulf %828, %830 : vector<8x64xf32>
    %c0_452 = arith.constant 0 : index
    %c0_453 = arith.constant 0 : index
    %832 = vector.load %arg15[%c0_452, %c0_453] : memref<8x1xf32, #tpu.memory_space<vmem>>, vector<8x1xf32>
    %833 = vector.broadcast %832 : vector<8x1xf32> to vector<8x64xf32>
    %834 = arith.addf %831, %833 : vector<8x64xf32>
    %835 = arith.truncf %834 : vector<8x64xf32> to vector<8x64xbf16>
    %c0_454 = arith.constant 0 : index
    %c0_455 = arith.constant 0 : index
    %c13_456 = arith.constant 13 : index
    %c0_457 = arith.constant 0 : index
    %836 = vector.load %arg16[%c0_454, %c0_455, %c13_456, %c0_457] : memref<1x8x16x64xbf16, #tpu.memory_space<vmem>>, vector<1x8x1x64xbf16>
    %837 = vector.shape_cast %836 : vector<1x8x1x64xbf16> to vector<8x64xbf16>
    %838 = vector.shape_cast %835 : vector<8x64xbf16> to vector<1x8x1x64xbf16>
    tpu.vector_store %arg16[%c0_454, %c0_455, %c13_456, %c0_457], %838 {strides = array<i32>} : memref<1x8x16x64xbf16, #tpu.memory_space<vmem>>, vector<1x8x1x64xbf16>,
    %839 = arith.truncf %822 : vector<1x64xf32> to vector<1x64xbf16>
    %c0_458 = arith.constant 0 : index
    %c0_459 = arith.constant 0 : index
    %c13_460 = arith.constant 13 : index
    %c0_461 = arith.constant 0 : index
    %840 = vector.load %arg17[%c0_458, %c0_459, %c13_460, %c0_461] : memref<1x1x16x64xbf16, #tpu.memory_space<vmem>>, vector<1x1x1x64xbf16>
    %841 = vector.shape_cast %840 : vector<1x1x1x64xbf16> to vector<1x64xbf16>
    %842 = vector.shape_cast %839 : vector<1x64xbf16> to vector<1x1x1x64xbf16>
    tpu.vector_store %arg17[%c0_458, %c0_459, %c13_460, %c0_461], %842 {strides = array<i32>} : memref<1x1x16x64xbf16, #tpu.memory_space<vmem>>, vector<1x1x1x64xbf16>,
    %c16_i32_462 = arith.constant 16 : i32
    %843 = arith.muli %arg1, %c16_i32_462 : i32
    %c14_i32 = arith.constant 14 : i32
    %844 = arith.addi %843, %c14_i32 : i32
    %845 = arith.index_cast %844 : i32 to index
    %846 = memref.load %arg2[%845] : memref<32xi32, #tpu.memory_space<smem>>
    %847 = arith.index_cast %844 : i32 to index
    %848 = memref.load %arg3[%847] : memref<32xi32, #tpu.memory_space<smem>>
    %849 = arith.index_cast %844 : i32 to index
    %850 = memref.load %arg4[%849] : memref<32xf32, #tpu.memory_space<smem>>
    %cst_463 = arith.constant 1.000000e+00 : f32
    %851 = arith.subf %cst_463, %850 : f32
    %852 = arith.index_cast %846 : i32 to index
    %c0_464 = arith.constant 0 : index
    %c0_465 = arith.constant 0 : index
    %853 = vector.load %arg18[%852, %c0_464, %c0_465] : memref<16x4x64xf32, #tpu.memory_space<vmem>>, vector<1x4x64xf32>
    %854 = vector.shape_cast %853 : vector<1x4x64xf32> to vector<4x64xf32>
    %855 = vector.broadcast %851 : f32 to vector<4x64xf32>
    %856 = arith.mulf %855, %854 : vector<4x64xf32>
    %857 = arith.index_cast %848 : i32 to index
    %c0_466 = arith.constant 0 : index
    %c0_467 = arith.constant 0 : index
    %858 = vector.load %arg18[%857, %c0_466, %c0_467] : memref<16x4x64xf32, #tpu.memory_space<vmem>>, vector<1x4x64xf32>
    %859 = vector.shape_cast %858 : vector<1x4x64xf32> to vector<4x64xf32>
    %860 = vector.broadcast %850 : f32 to vector<4x64xf32>
    %861 = arith.mulf %860, %859 : vector<4x64xf32>
    %862 = arith.addf %856, %861 : vector<4x64xf32>
    %c0_468 = arith.constant 0 : index
    %c0_469 = arith.constant 0 : index
    %c14 = arith.constant 14 : index
    %c0_470 = arith.constant 0 : index
    %863 = vector.load %arg6[%c0_468, %c0_469, %c14, %c0_470] : memref<1x8x16x64xbf16, #tpu.memory_space<vmem>>, vector<1x8x1x64xbf16>
    %864 = vector.shape_cast %863 : vector<1x8x1x64xbf16> to vector<8x64xbf16>
    %c0_471 = arith.constant 0 : index
    %c0_472 = arith.constant 0 : index
    %865 = vector.load %arg9[%c0_471, %c0_472] : memref<4x8xbf16, #tpu.memory_space<vmem>>, vector<4x8xbf16>
    %cst_473 = arith.constant dense<0.000000e+00> : vector<4x64xf32>
    %866 = tpu.matmul %865, %864, %cst_473 {dimension_numbers = #tpu.dot_dimension_numbers<[1], [0], [0], [1], [0, 0, 1, 1], [], []>} : vector<4x8xbf16>, vector<8x64xbf16>, vector<4x64xf32> -> vector<4x64xf32>
    %867 = arith.addf %866, %862 : vector<4x64xf32>
    %cst_474 = arith.constant 0.000000e+00 : f32
    %868 = vector.broadcast %cst_474 : f32 to vector<4x64xf32>
    %869 = arith.maximumf %867, %868 : vector<4x64xf32>
    %c0_475 = arith.constant 0 : index
    %c0_476 = arith.constant 0 : index
    %870 = vector.load %arg12[%c0_475, %c0_476] : memref<4x1xf32, #tpu.memory_space<vmem>>, vector<4x1xf32>
    %871 = vector.broadcast %870 : vector<4x1xf32> to vector<4x64xf32>
    %872 = arith.mulf %869, %871 : vector<4x64xf32>
    %cst_477 = arith.constant dense<0.000000e+00> : vector<64xf32>
    %873 = vector.multi_reduction <add>, %872, %cst_477 [0] : vector<4x64xf32> to vector<64xf32>
    %874 = vector.shape_cast %873 : vector<64xf32> to vector<1x64xf32>
    %c0_478 = arith.constant 0 : index
    %875 = memref.load %arg5[%c0_478] : memref<1xf32, #tpu.memory_space<smem>>
    %876 = vector.broadcast %875 : f32 to vector<1x64xf32>
    %877 = arith.addf %874, %876 : vector<1x64xf32>
    %878 = arith.negf %877 : vector<1x64xf32>
    %879 = math.exp %878 : vector<1x64xf32>
    %cst_479 = arith.constant 1.000000e+00 : f32
    %880 = vector.broadcast %cst_479 : f32 to vector<1x64xf32>
    %881 = arith.addf %880, %879 : vector<1x64xf32>
    %882 = arith.divf %880, %881 : vector<1x64xf32>
    %883 = arith.extf %864 : vector<8x64xbf16> to vector<8x64xf32>
    %884 = vector.broadcast %882 : vector<1x64xf32> to vector<8x64xf32>
    %885 = arith.mulf %884, %883 : vector<8x64xf32>
    %886 = arith.truncf %885 : vector<8x64xf32> to vector<8x64xbf16>
    %c0_480 = arith.constant 0 : index
    %c0_481 = arith.constant 0 : index
    %887 = vector.load %arg13[%c0_480, %c0_481] : memref<8x8xbf16, #tpu.memory_space<vmem>>, vector<8x8xbf16>
    %cst_482 = arith.constant dense<0.000000e+00> : vector<8x64xf32>
    %888 = tpu.matmul %887, %886, %cst_482 {dimension_numbers = #tpu.dot_dimension_numbers<[1], [0], [0], [1], [0, 0, 1, 1], [], []>} : vector<8x8xbf16>, vector<8x64xbf16>, vector<8x64xf32> -> vector<8x64xf32>
    %c0_483 = arith.constant 0 : index
    %c0_484 = arith.constant 0 : index
    %889 = vector.load %arg14[%c0_483, %c0_484] : memref<8x1xf32, #tpu.memory_space<vmem>>, vector<8x1xf32>
    %890 = vector.broadcast %889 : vector<8x1xf32> to vector<8x64xf32>
    %891 = arith.mulf %888, %890 : vector<8x64xf32>
    %c0_485 = arith.constant 0 : index
    %c0_486 = arith.constant 0 : index
    %892 = vector.load %arg15[%c0_485, %c0_486] : memref<8x1xf32, #tpu.memory_space<vmem>>, vector<8x1xf32>
    %893 = vector.broadcast %892 : vector<8x1xf32> to vector<8x64xf32>
    %894 = arith.addf %891, %893 : vector<8x64xf32>
    %895 = arith.truncf %894 : vector<8x64xf32> to vector<8x64xbf16>
    %c0_487 = arith.constant 0 : index
    %c0_488 = arith.constant 0 : index
    %c14_489 = arith.constant 14 : index
    %c0_490 = arith.constant 0 : index
    %896 = vector.load %arg16[%c0_487, %c0_488, %c14_489, %c0_490] : memref<1x8x16x64xbf16, #tpu.memory_space<vmem>>, vector<1x8x1x64xbf16>
    %897 = vector.shape_cast %896 : vector<1x8x1x64xbf16> to vector<8x64xbf16>
    %898 = vector.shape_cast %895 : vector<8x64xbf16> to vector<1x8x1x64xbf16>
    tpu.vector_store %arg16[%c0_487, %c0_488, %c14_489, %c0_490], %898 {strides = array<i32>} : memref<1x8x16x64xbf16, #tpu.memory_space<vmem>>, vector<1x8x1x64xbf16>,
    %899 = arith.truncf %882 : vector<1x64xf32> to vector<1x64xbf16>
    %c0_491 = arith.constant 0 : index
    %c0_492 = arith.constant 0 : index
    %c14_493 = arith.constant 14 : index
    %c0_494 = arith.constant 0 : index
    %900 = vector.load %arg17[%c0_491, %c0_492, %c14_493, %c0_494] : memref<1x1x16x64xbf16, #tpu.memory_space<vmem>>, vector<1x1x1x64xbf16>
    %901 = vector.shape_cast %900 : vector<1x1x1x64xbf16> to vector<1x64xbf16>
    %902 = vector.shape_cast %899 : vector<1x64xbf16> to vector<1x1x1x64xbf16>
    tpu.vector_store %arg17[%c0_491, %c0_492, %c14_493, %c0_494], %902 {strides = array<i32>} : memref<1x1x16x64xbf16, #tpu.memory_space<vmem>>, vector<1x1x1x64xbf16>,
    %c16_i32_495 = arith.constant 16 : i32
    %903 = arith.muli %arg1, %c16_i32_495 : i32
    %c15_i32 = arith.constant 15 : i32
    %904 = arith.addi %903, %c15_i32 : i32
    %905 = arith.index_cast %904 : i32 to index
    %906 = memref.load %arg2[%905] : memref<32xi32, #tpu.memory_space<smem>>
    %907 = arith.index_cast %904 : i32 to index
    %908 = memref.load %arg3[%907] : memref<32xi32, #tpu.memory_space<smem>>
    %909 = arith.index_cast %904 : i32 to index
    %910 = memref.load %arg4[%909] : memref<32xf32, #tpu.memory_space<smem>>
    %cst_496 = arith.constant 1.000000e+00 : f32
    %911 = arith.subf %cst_496, %910 : f32
    %912 = arith.index_cast %906 : i32 to index
    %c0_497 = arith.constant 0 : index
    %c0_498 = arith.constant 0 : index
    %913 = vector.load %arg18[%912, %c0_497, %c0_498] : memref<16x4x64xf32, #tpu.memory_space<vmem>>, vector<1x4x64xf32>
    %914 = vector.shape_cast %913 : vector<1x4x64xf32> to vector<4x64xf32>
    %915 = vector.broadcast %911 : f32 to vector<4x64xf32>
    %916 = arith.mulf %915, %914 : vector<4x64xf32>
    %917 = arith.index_cast %908 : i32 to index
    %c0_499 = arith.constant 0 : index
    %c0_500 = arith.constant 0 : index
    %918 = vector.load %arg18[%917, %c0_499, %c0_500] : memref<16x4x64xf32, #tpu.memory_space<vmem>>, vector<1x4x64xf32>
    %919 = vector.shape_cast %918 : vector<1x4x64xf32> to vector<4x64xf32>
    %920 = vector.broadcast %910 : f32 to vector<4x64xf32>
    %921 = arith.mulf %920, %919 : vector<4x64xf32>
    %922 = arith.addf %916, %921 : vector<4x64xf32>
    %c0_501 = arith.constant 0 : index
    %c0_502 = arith.constant 0 : index
    %c15 = arith.constant 15 : index
    %c0_503 = arith.constant 0 : index
    %923 = vector.load %arg6[%c0_501, %c0_502, %c15, %c0_503] : memref<1x8x16x64xbf16, #tpu.memory_space<vmem>>, vector<1x8x1x64xbf16>
    %924 = vector.shape_cast %923 : vector<1x8x1x64xbf16> to vector<8x64xbf16>
    %c0_504 = arith.constant 0 : index
    %c0_505 = arith.constant 0 : index
    %925 = vector.load %arg9[%c0_504, %c0_505] : memref<4x8xbf16, #tpu.memory_space<vmem>>, vector<4x8xbf16>
    %cst_506 = arith.constant dense<0.000000e+00> : vector<4x64xf32>
    %926 = tpu.matmul %925, %924, %cst_506 {dimension_numbers = #tpu.dot_dimension_numbers<[1], [0], [0], [1], [0, 0, 1, 1], [], []>} : vector<4x8xbf16>, vector<8x64xbf16>, vector<4x64xf32> -> vector<4x64xf32>
    %927 = arith.addf %926, %922 : vector<4x64xf32>
    %cst_507 = arith.constant 0.000000e+00 : f32
    %928 = vector.broadcast %cst_507 : f32 to vector<4x64xf32>
    %929 = arith.maximumf %927, %928 : vector<4x64xf32>
    %c0_508 = arith.constant 0 : index
    %c0_509 = arith.constant 0 : index
    %930 = vector.load %arg12[%c0_508, %c0_509] : memref<4x1xf32, #tpu.memory_space<vmem>>, vector<4x1xf32>
    %931 = vector.broadcast %930 : vector<4x1xf32> to vector<4x64xf32>
    %932 = arith.mulf %929, %931 : vector<4x64xf32>
    %cst_510 = arith.constant dense<0.000000e+00> : vector<64xf32>
    %933 = vector.multi_reduction <add>, %932, %cst_510 [0] : vector<4x64xf32> to vector<64xf32>
    %934 = vector.shape_cast %933 : vector<64xf32> to vector<1x64xf32>
    %c0_511 = arith.constant 0 : index
    %935 = memref.load %arg5[%c0_511] : memref<1xf32, #tpu.memory_space<smem>>
    %936 = vector.broadcast %935 : f32 to vector<1x64xf32>
    %937 = arith.addf %934, %936 : vector<1x64xf32>
    %938 = arith.negf %937 : vector<1x64xf32>
    %939 = math.exp %938 : vector<1x64xf32>
    %cst_512 = arith.constant 1.000000e+00 : f32
    %940 = vector.broadcast %cst_512 : f32 to vector<1x64xf32>
    %941 = arith.addf %940, %939 : vector<1x64xf32>
    %942 = arith.divf %940, %941 : vector<1x64xf32>
    %943 = arith.extf %924 : vector<8x64xbf16> to vector<8x64xf32>
    %944 = vector.broadcast %942 : vector<1x64xf32> to vector<8x64xf32>
    %945 = arith.mulf %944, %943 : vector<8x64xf32>
    %946 = arith.truncf %945 : vector<8x64xf32> to vector<8x64xbf16>
    %c0_513 = arith.constant 0 : index
    %c0_514 = arith.constant 0 : index
    %947 = vector.load %arg13[%c0_513, %c0_514] : memref<8x8xbf16, #tpu.memory_space<vmem>>, vector<8x8xbf16>
    %cst_515 = arith.constant dense<0.000000e+00> : vector<8x64xf32>
    %948 = tpu.matmul %947, %946, %cst_515 {dimension_numbers = #tpu.dot_dimension_numbers<[1], [0], [0], [1], [0, 0, 1, 1], [], []>} : vector<8x8xbf16>, vector<8x64xbf16>, vector<8x64xf32> -> vector<8x64xf32>
    %c0_516 = arith.constant 0 : index
    %c0_517 = arith.constant 0 : index
    %949 = vector.load %arg14[%c0_516, %c0_517] : memref<8x1xf32, #tpu.memory_space<vmem>>, vector<8x1xf32>
    %950 = vector.broadcast %949 : vector<8x1xf32> to vector<8x64xf32>
    %951 = arith.mulf %948, %950 : vector<8x64xf32>
    %c0_518 = arith.constant 0 : index
    %c0_519 = arith.constant 0 : index
    %952 = vector.load %arg15[%c0_518, %c0_519] : memref<8x1xf32, #tpu.memory_space<vmem>>, vector<8x1xf32>
    %953 = vector.broadcast %952 : vector<8x1xf32> to vector<8x64xf32>
    %954 = arith.addf %951, %953 : vector<8x64xf32>
    %955 = arith.truncf %954 : vector<8x64xf32> to vector<8x64xbf16>
    %c0_520 = arith.constant 0 : index
    %c0_521 = arith.constant 0 : index
    %c15_522 = arith.constant 15 : index
    %c0_523 = arith.constant 0 : index
    %956 = vector.load %arg16[%c0_520, %c0_521, %c15_522, %c0_523] : memref<1x8x16x64xbf16, #tpu.memory_space<vmem>>, vector<1x8x1x64xbf16>
    %957 = vector.shape_cast %956 : vector<1x8x1x64xbf16> to vector<8x64xbf16>
    %958 = vector.shape_cast %955 : vector<8x64xbf16> to vector<1x8x1x64xbf16>
    tpu.vector_store %arg16[%c0_520, %c0_521, %c15_522, %c0_523], %958 {strides = array<i32>} : memref<1x8x16x64xbf16, #tpu.memory_space<vmem>>, vector<1x8x1x64xbf16>,
    %959 = arith.truncf %942 : vector<1x64xf32> to vector<1x64xbf16>
    %c0_524 = arith.constant 0 : index
    %c0_525 = arith.constant 0 : index
    %c15_526 = arith.constant 15 : index
    %c0_527 = arith.constant 0 : index
    %960 = vector.load %arg17[%c0_524, %c0_525, %c15_526, %c0_527] : memref<1x1x16x64xbf16, #tpu.memory_space<vmem>>, vector<1x1x1x64xbf16>
    %961 = vector.shape_cast %960 : vector<1x1x1x64xbf16> to vector<1x64xbf16>
    %962 = vector.shape_cast %959 : vector<1x64xbf16> to vector<1x1x1x64xbf16>
    tpu.vector_store %arg17[%c0_524, %c0_525, %c15_526, %c0_527], %962 {strides = array<i32>} : memref<1x1x16x64xbf16, #tpu.memory_space<vmem>>, vector<1x1x1x64xbf16>,
    return
  }
  func.func @transform_0(%arg0: i32, %arg1: i32) -> i32 {
    %c0_i32 = arith.constant 0 : i32
    %c0_i32_0 = arith.constant 0 : i32
    return %c0_i32 : i32
  }
  func.func @transform_1(%arg0: i32, %arg1: i32) -> i32 {
    %c0_i32 = arith.constant 0 : i32
    %c0_i32_0 = arith.constant 0 : i32
    return %c0_i32 : i32
  }
  func.func @transform_2(%arg0: i32, %arg1: i32) -> i32 {
    %c0_i32 = arith.constant 0 : i32
    %c0_i32_0 = arith.constant 0 : i32
    return %c0_i32 : i32
  }
  func.func @transform_3(%arg0: i32, %arg1: i32) -> i32 {
    %c0_i32 = arith.constant 0 : i32
    %c0_i32_0 = arith.constant 0 : i32
    return %c0_i32 : i32
  }
  func.func @transform_4(%arg0: i32, %arg1: i32) -> (i32, i32, i32, i32) {
    %c0_i32 = arith.constant 0 : i32
    %c0_i32_0 = arith.constant 0 : i32
    %c0_i32_1 = arith.constant 0 : i32
    return %arg0, %c0_i32, %arg1, %c0_i32_0 : i32, i32, i32, i32
  }
  func.func @transform_5(%arg0: i32, %arg1: i32) -> (i32, i32, i32) {
    %c0_i32 = arith.constant 0 : i32
    %c0_i32_0 = arith.constant 0 : i32
    %c0_i32_1 = arith.constant 0 : i32
    return %arg0, %c0_i32, %c0_i32_0 : i32, i32, i32
  }
  func.func @transform_6(%arg0: i32, %arg1: i32) -> (i32, i32) {
    %c0_i32 = arith.constant 0 : i32
    %c0_i32_0 = arith.constant 0 : i32
    %c0_i32_1 = arith.constant 0 : i32
    return %c0_i32, %c0_i32_0 : i32, i32
  }
  func.func @transform_7(%arg0: i32, %arg1: i32) -> (i32, i32) {
    %c0_i32 = arith.constant 0 : i32
    %c0_i32_0 = arith.constant 0 : i32
    %c0_i32_1 = arith.constant 0 : i32
    return %c0_i32, %c0_i32_0 : i32, i32
  }
  func.func @transform_8(%arg0: i32, %arg1: i32) -> (i32, i32) {
    %c0_i32 = arith.constant 0 : i32
    %c0_i32_0 = arith.constant 0 : i32
    %c0_i32_1 = arith.constant 0 : i32
    return %c0_i32, %c0_i32_0 : i32, i32
  }
  func.func @transform_9(%arg0: i32, %arg1: i32) -> (i32, i32) {
    %c0_i32 = arith.constant 0 : i32
    %c0_i32_0 = arith.constant 0 : i32
    %c0_i32_1 = arith.constant 0 : i32
    return %c0_i32, %c0_i32_0 : i32, i32
  }
  func.func @transform_10(%arg0: i32, %arg1: i32) -> (i32, i32) {
    %c0_i32 = arith.constant 0 : i32
    %c0_i32_0 = arith.constant 0 : i32
    %c0_i32_1 = arith.constant 0 : i32
    return %c0_i32, %c0_i32_0 : i32, i32
  }
  func.func @transform_11(%arg0: i32, %arg1: i32) -> (i32, i32) {
    %c0_i32 = arith.constant 0 : i32
    %c0_i32_0 = arith.constant 0 : i32
    %c0_i32_1 = arith.constant 0 : i32
    return %c0_i32, %c0_i32_0 : i32, i32
  }
  func.func @transform_12(%arg0: i32, %arg1: i32) -> (i32, i32) {
    %c0_i32 = arith.constant 0 : i32
    %c0_i32_0 = arith.constant 0 : i32
    %c0_i32_1 = arith.constant 0 : i32
    return %c0_i32, %c0_i32_0 : i32, i32
  }
  func.func @transform_13(%arg0: i32, %arg1: i32) -> (i32, i32) {
    %c0_i32 = arith.constant 0 : i32
    %c0_i32_0 = arith.constant 0 : i32
    %c0_i32_1 = arith.constant 0 : i32
    return %c0_i32, %c0_i32_0 : i32, i32
  }
  func.func @transform_14(%arg0: i32, %arg1: i32) -> (i32, i32, i32, i32) {
    %c0_i32 = arith.constant 0 : i32
    %c0_i32_0 = arith.constant 0 : i32
    %c0_i32_1 = arith.constant 0 : i32
    return %arg0, %c0_i32, %arg1, %c0_i32_0 : i32, i32, i32, i32
  }
  func.func @transform_15(%arg0: i32, %arg1: i32) -> (i32, i32, i32, i32) {
    %c0_i32 = arith.constant 0 : i32
    %c0_i32_0 = arith.constant 0 : i32
    %c0_i32_1 = arith.constant 0 : i32
    return %arg0, %c0_i32, %arg1, %c0_i32_0 : i32, i32, i32, i32
  }
}

</mosaic_0001>

<bundles_post_ra>
// kernel: tpu_custom_call.1
= control target key start
LH: loop header
LB: loop body
LE: loop exit
PB: predicated region body
PF: predicated region fallthrough
CT: control target
= control target key end

     0   :  { %s12414_s0 = inlined_call_operand.hbm [shape: s32[32], index: 0, kind: input, shape index: {}]   ;;  %s12415_s1 = inlined_call_operand.hbm [shape: s32[32], index: 1, kind: input, shape index: {}]   ;;  %s12416_s2 = inlined_call_operand.hbm [shape: f32[32], index: 2, kind: input, shape index: {}]   ;;  %s12417_s3 = inlined_call_operand.<no memory space> [shape: f32[1], index: 3, kind: input, shape index: {}]   ;;  %s12418_s4 = inlined_call_operand.hbm [shape: bf16[2,8,32,64], index: 4, kind: input, shape index: {}]   ;;  %s12419_s5 = inlined_call_operand.vmem [shape: f32[2,8,256], index: 5, kind: input, shape index: {}]   ;;  %s12420_s6 = inlined_call_operand.hbm [shape: f32[16,64], index: 6, kind: input, shape index: {}]   ;;  %s12421_s7 = inlined_call_operand.hbm [shape: bf16[4,8], index: 7, kind: input, shape index: {}]   ;;  %s12422_s8 = inlined_call_operand.vmem [shape: f32[4,8], index: 8, kind: input, shape index: {}]   ;;  %s12423_s9 = inlined_call_operand.vmem [shape: f32[4,1], index: 9, kind: input, shape index: {}]   ;;  %s12424_s10 = inlined_call_operand.vmem [shape: f32[4,1], index: 10, kind: input, shape index: {}]   ;;  %s12425_s11 = inlined_call_operand.vmem [shape: bf16[8,8], index: 11, kind: input, shape index: {}]   ;;  %s12426_s12 = inlined_call_operand.vmem [shape: f32[8,1], index: 12, kind: input, shape index: {}]   ;;  %s12427_s13 = inlined_call_operand.vmem [shape: f32[8,1], index: 13, kind: input, shape index: {}]   ;;  %s12428_s14 = inlined_call_operand.hbm [shape: bf16[2,8,32,64], index: 14, kind: output, shape index: {0}]   ;;  %s12429_s15 = inlined_call_operand.hbm [shape: bf16[2,1,32,64], index: 15, kind: output, shape index: {1}]  }
   0x1   :  { %12462 = sst [smem:[#allocation46_spill]] %s12414_s0 }
   0x2   :  { %12463 = sst [smem:[#allocation47_spill]] %s12415_s1 }
   0x3   :  { %12464 = sst [smem:[#allocation48_spill]] %s12416_s2 }
   0x4   :  { %12465 = sst [smem:[#allocation49_spill]] %s12418_s4 }
   0x5   :  { %12466 = sst [smem:[#allocation50_spill]] %s12419_s5 }
   0x6   :  { %12467 = sst [smem:[#allocation51_spill]] %s12420_s6 }
   0x7   :  { %12468 = sst [smem:[#allocation52_spill]] %s12421_s7 }
   0x8   :  { %12469 = sst [smem:[#allocation53_spill]] %s12422_s8 }
   0x9   :  { %12470 = sst [smem:[#allocation54_spill]] %s12423_s9 }
   0xa   :  { %12471 = sst [smem:[#allocation55_spill]] %s12424_s10 }
   0xb   :  { %12472 = sst [smem:[#allocation56_spill]] %s12425_s11 }
   0xc   :  { %12473 = sst [smem:[#allocation57_spill]] %s12426_s12 }
   0xd   :  { %12474 = sst [smem:[#allocation58_spill]] %s12427_s13 }
   0xe   :  { %12475 = sst [smem:[#allocation59_spill]] %s12428_s14 }
   0xf   :  { %12476 = sst [smem:[#allocation60_spill]] %s12429_s15 }
  0x10   :  { %21 = sst [smem:[#allocation3]] %s12417_s3 }
  0x11   :  { %22 = vsyncpa [#allocation7], 0 }
  0x12   :  { %23 = vsyncpa [#allocation9], 0 }
  0x13   :  { %24 = vsyncpa [#allocation5], 0 }
  0x14   :  { %26 = vsyncpa [#allocation5 + $0x1], 0 }
  0x15   :  { %27 = vsyncpa [#allocation13], 0 }
  0x16   :  { %28 = vsyncpa [#allocation6], 0 }
  0x17   :  { %30 = vsyncpa [#allocation6 + $0x1], 0 }
  0x18   :  { %31 = vsyncpa [#allocation17], 0 }
  0x19   :  { %33 = vsyncpa [#allocation17 + $0x1], 0  ;;  %s9813_s20 = smov 0   ;;  %s9815_s21 = smov 0  }
  0x1a   :  { %s9817_s22 = smov 0   ;;  %s9819_s23 = smov 0  }
  0x1b   :  { %s9821_s24 = smov 0   ;;  %s9823_s3 = smov 0  }
  0x1c   :  { %s9825_s25 = smov 0   ;;  %s9827_s26 = smov 0  }
  0x1d LB: > { %12477 = sst [smem:[#allocation29_spill]] %s9662_s20  ;;  %s8252_s27 = sadd.s32 4294967295, %s9690_s26   ;;  %s9690_s26 = sphi %s9827_s26, %s39_s26   ;;  %s9686_s25 = sphi %s9825_s25, %s12611_s25   ;;  %s9682_s3 = sphi %s9823_s3, %s12610_s3   ;;  %s9678_s24 = sphi %s9821_s24, %s12609_s24   ;;  %s9674_s23 = sphi %s9819_s23, %s12608_s23   ;;  %s9670_s22 = sphi %s9817_s22, %s12607_s22   ;;  %s9666_s21 = sphi %s9815_s21, %s12606_s21   ;;  %s9662_s20 = sphi %s9813_s20, %s12605_s20  }
  0x1e   : > { %12478 = sst [smem:[#allocation30_spill]] %s9666_s21  ;;  %s8253_s28 = sadd.s32 4294967294, %s9690_s26  }
  0x1f   : > { %12479 = sst [smem:[#allocation31_spill]] %s9670_s22  ;;  %s48_s29 = sadd.s32 1, %s9682_s3 }
  0x20   : > { %12480 = sst [smem:[#allocation32_spill]] %s9674_s23  ;;  %s51_s30 = sadd.s32 1, %s9686_s25 }
  0x21   : > { %12481 = sst [smem:[#allocation33_spill]] %s9678_s24  ;;  %p49_p0 = scmp.ge.s32.totalorder %s48_s29, 2 }
  0x22   : > { %12482 = sst [smem:[#allocation34_spill]] %s9682_s3  ;;  %s144_s16 = sadd.s32 1, %s9670_s22 }
  0x23   : > { %12483 = sst [smem:[#allocation35_spill]] %s9686_s25  ;;  %p151_p1 = scmp.ne.s32.totalorder %s9670_s22, %s9666_s21 }
  0x24   : > { %12484 = sst [smem:[#allocation36_spill]] %s9690_s26  ;;  %p152_p2 = scmp.eq.s32.totalorder %s9690_s26, 0 }
  0x25   : > { %s12613_s29 = smov (%p49_p0, %s48_s29), 0  ;;  %s12615_s30 = smov (!%p49_p0, %s51_s30), %s9686_s25 }
  0x26   : > { %12485 = sst [smem:[#allocation37_spill]] %s12613_s29  ;;  %s140_s17 = ssub.s32 %s9682_s3, %s12613_s29 }
  0x27   : > { %p9866_p3 = por %p152_p2, %p151_p1  ;;  %p53_p4 = scmp.ge.s32.totalorder %s12615_s30, 2 }
  0x28   : > { %p157_p5 = scmp.ne.s32.totalorder %s9666_s21, %s9662_s20  ;;  %p9872_p6 = scmp.eq.s32.totalorder %s8252_s27, 0 }
  0x29   : > { %p377_p7 = scmp.eq.s32.totalorder %s8252_s27, 3  ;;  %s12617_s30 = smov (%p53_p4, %s12615_s30), 0 }
  0x2a   : > { %12488 = sst [smem:[#allocation38_spill]] %s12617_s30  ;;  %p9880_p8 = por %p9872_p6, %p157_p5 }
  0x2b   : > { %p9884_p9 = por %p377_p7, %p151_p1  ;;  %s139_s20 = ssub.s32 %s9686_s25, %s12617_s30 }
  0x2c   : > { %p383_p10 = scmp.eq.s32.totalorder %s8253_s28, 3  ;;  %s141_s14 = sor.u32 %s140_s17, %s139_s20 }
  0x2d   : > { %s12490_s15 = scalar_select %p9884_p9, 1, 0 }
  0x2e   : > { %p8254_p11 = scmp.ge.s32.totalorder %s9690_s26, 1  ;;  %p142_p12 = scmp.eq.s32.totalorder %s141_s14, 0 }
  0x2f   : > { %12491 = sst [smem:[#allocation39_spill]] %s12490_s15  ;;  %p9891_p13 = por %p383_p10, %p157_p5 }
  0x30   : > { %p418_p0 = scmp.lt.s32.totalorder %s9690_s26, 5  ;;  %s9692_s15 = smov [#allocation12]  }
  0x31   : > { %s12492_s27 = scalar_select %p9891_p13, 1, 0 }
  0x32   : > { %s9897_s11 = scalar_select %p142_p12, %s9670_s22, %s144_s16  }
  0x33   : > { %12493 = sst [smem:[#allocation40_spill]] %s12492_s27  ;;  %p9899_p2 = pnand %p8254_p11, %p418_p0 }
  0x34   : > { %12494 = sst [smem:[#allocation41_spill]] %s9897_s11  ;;  %s460_s30 = sshll.u32 %s9692_s15, 4  ;;  %s461_s30 = int_to_ptr.vmem [resolvable:$true] %s460_s30 }
  0x35   : > { %p9035_p1 = pneg %p9899_p2  ;;  %s9693_s20 = smov [#allocation8]  }
  0x36   : > { %s12497_s1 = sld [smem:[#allocation47_spill]]  ;;  %s9515_s17 = scalar_lea.vmem %s461_s30, 256 }
  0x37   : > { %p9907_p4 = pnand %p9035_p1, %p9872_p6  ;;  %p9516_p7 = scmp.ne.s32.totalorder %s461_s30, %s9515_s17 }
  0x38   : > { %p9523_p12 = scmp.lt.s32.totalorder %s461_s30, %s461_s30  ;;  %p9524_p0 = scmp.lt.s32.totalorder %s9515_s17, %s9515_s17 }
  0x39   : > { %p9506_p5 = pneg %p9907_p4 }
  0x3a   : > { %p9525_p1 = por %p9524_p0, %p9523_p12 }
  0x3b   : > { %p9518_p10 = pnand %p9516_p7, %p9506_p5 }
  0x3c   : > { %9041 = dma.hbm_to_smem (!%p9907_p4), %s12497_s1, 16, %s9693_s20, [#allocation9]  }
  0x3d   : > { %p9519_p11 = pneg %p9518_p10 }
  0x3f   : > { %p9526_p13 = pnand %p9525_p1, %p9519_p11 }
  0x41   : > { %9529 = shalt.err (!%p9526_p13)
}
  0x42   : > { %s9694_s15 = smov 128   ;;  %s9695_s28 = smov 8  }
  0x43   : > { %s12498_s6 = sld [smem:[#allocation51_spill]]  ;;  %s9696_s1 = smov [#allocation4]  }
  0x44   : > { %s12499_s0 = sld [smem:[#allocation46_spill]]  ;;  %s9697_s17 = smov [#allocation10]  }
  0x45   : > { %s12500_s2 = sld [smem:[#allocation48_spill]]  ;;  %s9698_s9 = smov [#allocation14]  }
  0x46   : > { %s474_s8 = sshll.u32 %s9698_s9, 4  ;;  %s475_s8 = int_to_ptr.vmem [resolvable:$true] %s474_s8 }
  0x47   : > { %s9563_s23 = scalar_lea.vmem %s475_s8, 32  ;;  %p9571_p11 = scmp.lt.s32.totalorder %s475_s8, %s475_s8 }
  0x48   : > { %p9564_p13 = scmp.ne.s32.totalorder %s475_s8, %s9563_s23  ;;  %p9572_p12 = scmp.lt.s32.totalorder %s9563_s23, %s9563_s23 }
  0x49   : > { %9047 = dma.hbm_to_vmem [thread:$0]  (!%p9907_p4), %s12498_s6, 256, %s461_s30, [#allocation13], %s9694_s15, %s9694_s15, %s9695_s28  }
  0x4a   : > { %9038 = dma.hbm_to_smem (!%p9907_p4), %s12499_s0, 16, %s9696_s1, [#allocation7]  }
  0x4b   : > { %9044 = dma.hbm_to_smem (!%p9907_p4), %s12500_s2, 16, %s9697_s17, [#allocation9]  }
  0x4c   : > { %p9566_p7 = pnand %p9564_p13, %p9506_p5  ;;  %p9573_p0 = por %p9572_p12, %p9571_p11 }
  0x4e   : > { %p9567_p10 = pneg %p9566_p7 }
  0x50   : > { %p9574_p1 = pnand %p9573_p0, %p9567_p10 }
  0x52   : > { %9577 = shalt.err (!%p9574_p1)
}
  0x53   : > { %s12501_s7 = sld [smem:[#allocation52_spill]]  ;;  %p8260_p9 = scmp.ge.s32.totalorder %s9690_s26, 4 }
  0x55   : > { %499 = sbr.rel (%p8260_p9) target bundleno = 109 (0x6d), region = 64 }
  0x59   : > { %9050 = dma.hbm_to_vmem [thread:$0]  (!%p9907_p4), %s12501_s7, 32, %s475_s8, [#allocation13]  }
  0x5a   : > { %s503_s9 = sand.u32 1, %s9670_s22   ;;  %s8262_s10 = sshll.u32 %s9682_s3, 1 }
  0x5b   : > { %s8261_s12 = sshll.u32 %s503_s9, 6  ;;  %s8263_s23 = sshll.u32 %s9686_s25, 5 }
  0x5c   : > { %s513_s30 = sadd.s32 %s8263_s23, %s8262_s10  ;;  %s507_s27 = scalar_lea.vmem [#allocation11], %s8261_s12 }
  0x5d   : > { %s528_s14 = sshll.u32 %s507_s27, 4  ;;  %s8264_s8 = sshll.u32 %s513_s30, 6  ;;  %s529_s14 = int_to_ptr.vmem [resolvable:$true] %s528_s14 }
  0x5e   : > { %s9006_s15 = scalar_select %p9866_p3, [#allocation0], [#allocation22] }
  0x5f   : > { %s9699_s28 = smov 256   ;;  %s9700_s16 = smov 128  }
  0x60   : > { %9007 = sst [smem:[#allocation19]] (%p9866_p3), %s9699_s28  ;;  %s9701_s17 = smov 2  }
  0x61   : > { %s520_s20 = sld [smem:[%s9006_s15]]   ;;  %s9702_s1 = smov 64  }
  0x62   : > { %9008 = sst [smem:[#allocation19 + $0x1]] (%p9866_p3), %s9700_s16  ;;  %s9703_s23 = smov 4  }
  0x63   : > { %9009 = sst [smem:[#allocation19 + $0x2]] (%p9866_p3), %s9701_s17  ;;  %s504_s15 = scalar_lea.sflag [#allocation5], %s503_s9 }
  0x64   : > { %9010 = sst [smem:[#allocation19 + $0x3]] (%p9866_p3), %s9702_s1  ;;  %s9704_s28 = smov 131072  }
  0x65   : > { %s12502_s4 = sld [smem:[#allocation49_spill]] }
  0x66   : > { %9011 = sst [smem:[#allocation19 + $0x4]] (%p9866_p3), %s9702_s1 }
  0x67   : > { %9012 = sst [smem:[#allocation19 + $0x5]] (%p9866_p3), %s9703_s23  ;;  %s8265_s30 = sshll.u32 %s520_s20, 26 }
  0x68   : > { %s8266_s27 = sadd.s32 134217728, %s8265_s30 }
  0x6b   : > { %s515_s12 = scalar_lea.hbm %s12502_s4, %s8264_s8 }
  0x6c   : > { %9013 = dma.general (%p9866_p3), %s515_s12, 1024, %s529_s14, %s504_s15, %s9704_s28, [#allocation19], %s8266_s27, 0  }
  0x6d PF: > { %561 = sbr.rel (%p9899_p2) target bundleno = 1381 (0x565), region = 76 }
  0x72   : > { %9637 = dma.done.wait (%p9872_p6), [#allocation7], 16  }
  0x73   : > { %9639 = vsyncadd (%p9872_p6), [#allocation7], 4294967280 }
  0x74   : > { %9641 = dma.done.wait (%p9872_p6), [#allocation9], 32  }
  0x75   : > { %9643 = vsyncadd (%p9872_p6), [#allocation9], 4294967264  ;;  %s9978_s18 = sand.u32 1, %s9666_s21  }
  0x76   : > { %12503 = sst [smem:[#allocation42_spill]] %s9978_s18  ;;  %s8271_s13 = sshll.u32 %s9978_s18, 6 }
  0x77   : > { %s576_s9 = scalar_lea.sflag [#allocation5], %s9978_s18  ;;  %s9982_s14 = scalar_lea.vmem [#allocation11], %s8271_s13 }
  0x78   : > { %9645 = dma.done.wait (%p9880_p8), %s576_s9, 1024  }
  0x79   : > { %9647 = vsyncadd (%p9880_p8), %s576_s9, 4294966272 }
  0x7a   : > { %9649 = dma.done.wait (%p9872_p6), [#allocation13], 288  }
  0x7b   : > { %9651 = vsyncadd (%p9872_p6), [#allocation13], 4294967008 }
  0x7c   : > { %592 = sfence }
  0x7d   : > { %s8275_s8 = sshll.u32 %s9978_s18, 3  ;;  %p646_p3 = scmp.lt.s32.totalorder %s9678_s24, 1 }
  0x7e   : > { %s12504_s5 = sld [smem:[#allocation50_spill]]  ;;  %s9998_s29 = scalar_lea.vmem [#allocation15], %s8271_s13 }
  0x7f   : > { %s647_s20 = scalar_select %p646_p3, %s9678_s24, 1 }
  0x80   : > { %12505 = sst [smem:[#allocation43_spill]] %s9998_s29  ;;  %s10000_s10 = scalar_lea.vmem [#allocation16], %s8275_s8 }
  0x81   : > { %s8579_s16 = sshll.u32 %s647_s20, 4  ;;  %12506 = sst [smem:[#allocation44_spill]] %s10000_s10 }
  0x82   : > { %s12507_s12 = sld [smem:[#allocation32_spill]] }
  0x84   : > { %s650_s11 = scalar_lea.vmem %s12504_s5, %s8579_s16 }
  0x88   : > { %p8278_p8 = scmp.ne.s32.totalorder %s12507_s12, 0 }
  0x89   : > { %s12508_s30 = sld [smem:[#allocation53_spill]] (!%p8278_p8)  ;;  %s9708_s13 = smov (!%p8278_p8), 96  }
  0x8a   : > { %657 = sbr.rel (%p8278_p8) target bundleno = 690 (0x2b2), region = 104  ;;  %s12509_s28 = sld [smem:[#allocation54_spill]] (!%p8278_p8) }
  0x8b   : > { %s9709_s9 = smov (!%p8278_p8), 112   ;;  %s9710_s8 = smov (!%p8278_p8), 80  }
  0x8c   : > { %s9711_s20 = smov (!%p8278_p8), 64   ;;  %s9712_s16 = smov (!%p8278_p8), 48  }
  0x8d   : > { %s9713_s17 = smov (!%p8278_p8), 32   ;;  %s9714_s1 = smov (!%p8278_p8), 16  }
  0x8f   : > { %v660_v0 = vld [vmem:[%s650_s11 + $0x8] sm:$0xff]  ;;  %v659_v1 = vld [vmem:[%s650_s11] sm:$0xff]  ;;  %vm667_vm0 = vcmask 64512   ;;  %v9705_v3 = vmov 0.0   ;;  %v9706_v5 = vmov 0   ;;  %vm9707_vm1 = vmmov 0  }
  0x90   : > { %v658_v2 = vld [vmem:[%s12508_s30] sm:$0xf]  ;;  %701 = vmatprep.subr.mxu0 %v660_v0  ;;  %735 = vmatprep.mubr.f32.mxu0 %v9705_v3  ;;  %v10010_v6 = vld [vmem:[#allocation12 + $0x8] sm:$0xff]  ;;  %vm744_vm2 = vcmask 130048   ;;  %vm818_vm3 = vcmask 519168  }
  0x91   : > { %v661_v4 = vld [vmem:[%s12509_s28] sm:$0xf]  ;;  %702 = vmatpush1.msra.mxu0 %v659_v1  ;;  %9170 = vset.pattern.permute.xlu0 %v9706_v5 }
  0x92   : > { %8279 = vmatmul.mubr.msk.f32.vlgmr.msra.gmra.mxu0 %vm667_vm0, %v658_v2  ;;  %664 = vperm.xlu0 %9170, %v661_v4   ;;  %v10018_v7 = vld [vmem:[#allocation12] sm:$0xff] }
  0x93   : > { %8692 = vmatprep.subr.mxu1 %v9705_v3  ;;  %8699 = vmatprep.subr.mxu0 %v9705_v3 }
  0x94   : > { %8693 = vmatpush3.msra.mxu1 %v10010_v6  ;;  %8700 = vmatpush3.msra.mxu0 %v10010_v6 }
  0x95   : > { %8694 = vmatprep.subr.mxu1 %v9705_v3  ;;  %8701 = vmatprep.subr.mxu0 %v9705_v3 }
  0x96   : > { %8695 = vmatpush3.msra.mxu1 %v10018_v7  ;;  %8696 = vmatprep.mubr.msk.f32.mxu1 %vm9707_vm1, %v9705_v3 }
  0x97   : > { %8706 = vmatprep.subr.mxu1 %v9705_v3  ;;  %8702 = vmatpush3.msra.mxu0 %v10018_v7 }
  0x98   : > { %8703 = vmatprep.mubr.msk.f32.mxu0 %vm9707_vm1, %v9705_v3  ;;  %8713 = vmatprep.subr.mxu0 %v9705_v3 }
 0x10d   : > { %v665_v8 = vpop.permute.xlu0 %664 }
 0x152   : > { %v737_v9 = vpop.f32.mrf.mxu0 }
 0x153   : > { %v738_v10 = vadd.f32 %v737_v9, %v665_v8 }
 0x154   : > { %v739_v11 = vpop.f32.mrf.mxu0 }
 0x155   : > { %900 = vrot.lane.b32.xlu1 %v738_v10, %s9708_s13  ;;  %822 = vrot.lane.b32.xlu0 %v738_v10, %s9709_s9  ;;  %v740_v12 = vadd.f32 %v739_v11, %v665_v8 }
 0x156   : > { %8697 = vmatmul.mubr.msk.f32.vlgmr.msra.gmra.mxu1 %vm744_vm2, %v738_v10 }
 0x157   : > { %8707 = vmatpush3.msra.mxu1 %v10010_v6  ;;  %8710 = vmatprep.mubr.msk.f32.mxu1 %vm9707_vm1, %v9705_v3 }
 0x158   : > { %8708 = vmatprep.subr.mxu1 %v9705_v3 }
 0x159   : > { %978 = vrot.lane.b32.xlu1 %v738_v10, %s9710_s8  ;;  %1056 = vrot.lane.b32.xlu0 %v738_v10, %s9711_s20 }
 0x15a   : > { %8709 = vmatpush3.msra.mxu1 %v10018_v7 }
 0x15b   : > { %8720 = vmatprep.subr.mxu1 %v9705_v3 }
 0x15d   : > { %1134 = vrot.lane.b32.xlu1 %v738_v10, %s9712_s16  ;;  %1212 = vrot.lane.b32.xlu0 %v738_v10, %s9713_s17 }
 0x161   : > { %1290 = vrot.lane.b32.xlu1 %v738_v10, %s9714_s1  ;;  %1445 = vrot.lane.b32.xlu0 %v740_v12, %s9709_s9 }
 0x165   : > { %1523 = vrot.lane.b32.xlu1 %v740_v12, %s9708_s13  ;;  %1601 = vrot.lane.b32.xlu0 %v740_v12, %s9710_s8 }
 0x169   : > { %1679 = vrot.lane.b32.xlu1 %v740_v12, %s9711_s20  ;;  %1757 = vrot.lane.b32.xlu0 %v740_v12, %s9712_s16 }
 0x16d   : > { %1835 = vrot.lane.b32.xlu1 %v740_v12, %s9713_s17  ;;  %1913 = vrot.lane.b32.xlu0 %v740_v12, %s9714_s1 }
 0x1c7   : > { %v901_v13 = vpop.permute.xlu1 %900  ;;  %v823_v14 = vpop.permute.xlu0 %822 }
 0x1c8   : > { %8704 = vmatmul.mubr.msk.f32.vlgmr.msra.gmra.mxu0 %vm744_vm2, %v823_v14  ;;  %8711 = vmatmul.mubr.msk.f32.vlgmr.msra.gmra.mxu1 %vm744_vm2, %v901_v13 }
 0x1c9   : > { %8714 = vmatpush3.msra.mxu0 %v10010_v6  ;;  %8721 = vmatpush3.msra.mxu1 %v10010_v6 }
 0x1ca   : > { %8715 = vmatprep.subr.mxu0 %v9705_v3  ;;  %8722 = vmatprep.subr.mxu1 %v9705_v3 }
 0x1cb   : > { %8716 = vmatpush3.msra.mxu0 %v10018_v7  ;;  %v979_v15 = vpop.permute.xlu1 %978  ;;  %8717 = vmatprep.mubr.msk.f32.mxu0 %vm9707_vm1, %v9705_v3  ;;  %v1057_v16 = vpop.permute.xlu0 %1056 }
 0x1cc   : > { %8727 = vmatprep.subr.mxu0 %v9705_v3  ;;  %8723 = vmatpush3.msra.mxu1 %v10018_v7 }
 0x1cd   : > { %8724 = vmatprep.mubr.msk.f32.mxu1 %vm9707_vm1, %v9705_v3  ;;  %8718 = vmatmul.mubr.msk.f32.vlgmr.msra.gmra.mxu0 %vm744_vm2, %v979_v15 }
 0x1ce   : > { %8725 = vmatmul.mubr.msk.f32.vlgmr.msra.gmra.mxu1 %vm744_vm2, %v1057_v16  ;;  %8728 = vmatpush3.msra.mxu0 %v10010_v6 }
 0x1cf   : > { %8734 = vmatprep.subr.mxu1 %v9705_v3  ;;  %8729 = vmatprep.subr.mxu0 %v9705_v3  ;;  %v1135_v17 = vpop.permute.xlu1 %1134  ;;  %v1213_v18 = vpop.permute.xlu0 %1212 }
 0x1d0   : > { %8735 = vmatpush3.msra.mxu1 %v10010_v6  ;;  %8730 = vmatpush3.msra.mxu0 %v10018_v7 }
 0x1d1   : > { %8736 = vmatprep.subr.mxu1 %v9705_v3  ;;  %8731 = vmatprep.mubr.msk.f32.mxu0 %vm9707_vm1, %v9705_v3 }
 0x1d2   : > { %8741 = vmatprep.subr.mxu0 %v9705_v3  ;;  %8737 = vmatpush3.msra.mxu1 %v10018_v7 }
 0x1d3   : > { %8738 = vmatprep.mubr.msk.f32.mxu1 %vm9707_vm1, %v9705_v3  ;;  %8732 = vmatmul.mubr.msk.f32.vlgmr.msra.gmra.mxu0 %vm744_vm2, %v1135_v17  ;;  %v1291_v19 = vpop.permute.xlu1 %1290  ;;  %v1446_v20 = vpop.permute.xlu0 %1445 }
 0x1d4   : > { %8739 = vmatmul.mubr.msk.f32.vlgmr.msra.gmra.mxu1 %vm744_vm2, %v1213_v18  ;;  %8742 = vmatpush3.msra.mxu0 %v10010_v6 }
 0x1d5   : > { %8748 = vmatprep.subr.mxu1 %v9705_v3  ;;  %8743 = vmatprep.subr.mxu0 %v9705_v3 }
 0x1d6   : > { %8749 = vmatpush3.msra.mxu1 %v10010_v6  ;;  %8744 = vmatpush3.msra.mxu0 %v10018_v7 }
 0x1d7   : > { %8750 = vmatprep.subr.mxu1 %v9705_v3  ;;  %8745 = vmatprep.mubr.msk.f32.mxu0 %vm9707_vm1, %v9705_v3  ;;  %v1524_v21 = vpop.permute.xlu1 %1523  ;;  %v1602_v22 = vpop.permute.xlu0 %1601 }
 0x1d8   : > { %8755 = vmatprep.subr.mxu0 %v9705_v3  ;;  %8751 = vmatpush3.msra.mxu1 %v10018_v7 }
 0x1d9   : > { %8752 = vmatprep.mubr.msk.f32.mxu1 %vm9707_vm1, %v9705_v3  ;;  %8746 = vmatmul.mubr.msk.f32.vlgmr.msra.gmra.mxu0 %vm744_vm2, %v1291_v19 }
 0x1da   : > { %8753 = vmatmul.mubr.msk.f32.vlgmr.msra.gmra.mxu1 %vm744_vm2, %v740_v12  ;;  %8756 = vmatpush3.msra.mxu0 %v10010_v6 }
 0x1db   : > { %8762 = vmatprep.subr.mxu1 %v9705_v3  ;;  %8757 = vmatprep.subr.mxu0 %v9705_v3  ;;  %v1680_v23 = vpop.permute.xlu1 %1679  ;;  %v1758_v24 = vpop.permute.xlu0 %1757 }
 0x1dc   : > { %8763 = vmatpush3.msra.mxu1 %v10010_v6  ;;  %8758 = vmatpush3.msra.mxu0 %v10018_v7 }
 0x1dd   : > { %8764 = vmatprep.subr.mxu1 %v9705_v3  ;;  %8759 = vmatprep.mubr.msk.f32.mxu0 %vm9707_vm1, %v9705_v3 }
 0x1de   : > { %8769 = vmatprep.subr.mxu0 %v9705_v3  ;;  %8765 = vmatpush3.msra.mxu1 %v10018_v7 }
 0x1df   : > { %8766 = vmatprep.mubr.msk.f32.mxu1 %vm9707_vm1, %v9705_v3  ;;  %8760 = vmatmul.mubr.msk.f32.vlgmr.msra.gmra.mxu0 %vm744_vm2, %v1446_v20  ;;  %v1836_v25 = vpop.permute.xlu1 %1835  ;;  %v1914_v26 = vpop.permute.xlu0 %1913 }
 0x1e0   : > { %8767 = vmatmul.mubr.msk.f32.vlgmr.msra.gmra.mxu1 %vm744_vm2, %v1524_v21  ;;  %8770 = vmatpush3.msra.mxu0 %v10010_v6 }
 0x1e1   : > { %8776 = vmatprep.subr.mxu1 %v9705_v3  ;;  %8771 = vmatprep.subr.mxu0 %v9705_v3 }
 0x1e2   : > { %8777 = vmatpush3.msra.mxu1 %v10010_v6  ;;  %8772 = vmatpush3.msra.mxu0 %v10018_v7 }
 0x1e3   : > { %8778 = vmatprep.subr.mxu1 %v9705_v3  ;;  %8773 = vmatprep.mubr.msk.f32.mxu0 %vm9707_vm1, %v9705_v3 }
 0x1e4   : > { %8783 = vmatprep.subr.mxu0 %v9705_v3  ;;  %8779 = vmatpush3.msra.mxu1 %v10018_v7 }
 0x1e5   : > { %8780 = vmatprep.mubr.msk.f32.mxu1 %vm9707_vm1, %v9705_v3  ;;  %8774 = vmatmul.mubr.msk.f32.vlgmr.msra.gmra.mxu0 %vm744_vm2, %v1602_v22 }
 0x1e6   : > { %8781 = vmatmul.mubr.msk.f32.vlgmr.msra.gmra.mxu1 %vm744_vm2, %v1680_v23  ;;  %8784 = vmatpush3.msra.mxu0 %v10010_v6 }
 0x1e7   : > { %8790 = vmatprep.subr.mxu1 %v9705_v3  ;;  %8785 = vmatprep.subr.mxu0 %v9705_v3 }
 0x1e8   : > { %8791 = vmatpush3.msra.mxu1 %v10010_v6  ;;  %8786 = vmatpush3.msra.mxu0 %v10018_v7 }
 0x1e9   : > { %8792 = vmatprep.subr.mxu1 %v9705_v3  ;;  %8787 = vmatprep.mubr.msk.f32.mxu0 %vm9707_vm1, %v9705_v3 }
 0x1ea   : > { %8797 = vmatprep.subr.mxu0 %v9705_v3  ;;  %8793 = vmatpush3.msra.mxu1 %v10018_v7 }
 0x1eb   : > { %8794 = vmatprep.mubr.msk.f32.mxu1 %vm9707_vm1, %v9705_v3  ;;  %8788 = vmatmul.mubr.msk.f32.vlgmr.msra.gmra.mxu0 %vm744_vm2, %v1758_v24 }
 0x1ec   : > { %8795 = vmatmul.mubr.msk.f32.vlgmr.msra.gmra.mxu1 %vm744_vm2, %v1836_v25  ;;  %8798 = vmatpush3.msra.mxu0 %v10010_v6 }
 0x1ed   : > { %8799 = vmatprep.subr.mxu0 %v9705_v3  ;;  %8801 = vmatprep.mubr.msk.f32.mxu0 %vm9707_vm1, %v9705_v3 }
 0x1ee   : > { %8800 = vmatpush3.msra.mxu0 %v10018_v7 }
 0x1ef   : > { %8802 = vmatmul.mubr.msk.f32.vlgmr.msra.gmra.mxu0 %vm744_vm2, %v1914_v26 }
 0x216   : > { %v814_v27 = vpop.f32.mrf.mxu1 }
 0x217   : > { %819 = vst.msk [vmem:[#allocation2] sm:$0xf] %vm818_vm3, %v814_v27 }
 0x218   : > { %v8698_v28 = vpop.f32.mrf.mxu1 }
 0x288   : > { %v892_v29 = vpop.f32.mrf.mxu0  ;;  %v970_v30 = vpop.f32.mrf.mxu1 }
 0x289   : > { %897 = vst.msk [vmem:[#allocation2 + $0x4] sm:$0xf] %vm818_vm3, %v892_v29  ;;  %975 = vst.msk [vmem:[#allocation2 + $0x8] sm:$0xf] %vm818_vm3, %v970_v30 }
 0x28a   : > { %v8705_v31 = vpop.f32.mrf.mxu0  ;;  %v8712_v32 = vpop.f32.mrf.mxu1 }
 0x28d   : > { %v1048_v33 = vpop.f32.mrf.mxu0 }
 0x28e   : > { %1053 = vst.msk [vmem:[#allocation2 + $0xc] sm:$0xf] %vm818_vm3, %v1048_v33  ;;  %v1126_v34 = vpop.f32.mrf.mxu1 }
 0x28f   : > { %1131 = vst.msk [vmem:[#allocation2 + $0x10] sm:$0xf] %vm818_vm3, %v1126_v34  ;;  %v8719_v35 = vpop.f32.mrf.mxu0 }
 0x290   : > { %v8726_v36 = vpop.f32.mrf.mxu1 }
 0x293   : > { %v1204_v37 = vpop.f32.mrf.mxu0 }
 0x294   : > { %1209 = vst.msk [vmem:[#allocation2 + $0x14] sm:$0xf] %vm818_vm3, %v1204_v37  ;;  %v1282_v38 = vpop.f32.mrf.mxu1 }
 0x295   : > { %1287 = vst.msk [vmem:[#allocation2 + $0x18] sm:$0xf] %vm818_vm3, %v1282_v38  ;;  %v8733_v39 = vpop.f32.mrf.mxu0 }
 0x296   : > { %v8740_v40 = vpop.f32.mrf.mxu1 }
 0x299   : > { %v1360_v41 = vpop.f32.mrf.mxu0 }
 0x29a   : > { %1365 = vst.msk [vmem:[#allocation2 + $0x1c] sm:$0xf] %vm818_vm3, %v1360_v41  ;;  %v1437_v42 = vpop.f32.mrf.mxu1 }
 0x29b   : > { %1442 = vst.msk [vmem:[#allocation2 + $0x20] sm:$0xf] %vm818_vm3, %v1437_v42  ;;  %v8747_v43 = vpop.f32.mrf.mxu0 }
 0x29c   : > { %v8754_v44 = vpop.f32.mrf.mxu1 }
 0x29f   : > { %v1515_v45 = vpop.f32.mrf.mxu0 }
 0x2a0   : > { %1520 = vst.msk [vmem:[#allocation2 + $0x24] sm:$0xf] %vm818_vm3, %v1515_v45  ;;  %v1593_v46 = vpop.f32.mrf.mxu1 }
 0x2a1   : > { %1598 = vst.msk [vmem:[#allocation2 + $0x28] sm:$0xf] %vm818_vm3, %v1593_v46  ;;  %v8761_v47 = vpop.f32.mrf.mxu0 }
 0x2a2   : > { %v8768_v48 = vpop.f32.mrf.mxu1 }
 0x2a5   : > { %v1671_v49 = vpop.f32.mrf.mxu0 }
 0x2a6   : > { %1676 = vst.msk [vmem:[#allocation2 + $0x2c] sm:$0xf] %vm818_vm3, %v1671_v49  ;;  %v1749_v50 = vpop.f32.mrf.mxu1 }
 0x2a7   : > { %1754 = vst.msk [vmem:[#allocation2 + $0x30] sm:$0xf] %vm818_vm3, %v1749_v50  ;;  %v8775_v51 = vpop.f32.mrf.mxu0 }
 0x2a8   : > { %v8782_v52 = vpop.f32.mrf.mxu1 }
 0x2ab   : > { %v1827_v53 = vpop.f32.mrf.mxu0 }
 0x2ac   : > { %1832 = vst.msk [vmem:[#allocation2 + $0x34] sm:$0xf] %vm818_vm3, %v1827_v53  ;;  %v1905_v54 = vpop.f32.mrf.mxu1 }
 0x2ad   : > { %1910 = vst.msk [vmem:[#allocation2 + $0x38] sm:$0xf] %vm818_vm3, %v1905_v54  ;;  %v8789_v55 = vpop.f32.mrf.mxu0 }
 0x2ae   : > { %v8796_v56 = vpop.f32.mrf.mxu1 }
 0x2af   : > { %v1983_v57 = vpop.f32.mrf.mxu0 }
 0x2b0   : > { %1988 = vst.msk [vmem:[#allocation2 + $0x3c] sm:$0xf] %vm818_vm3, %v1983_v57 }
 0x2b1   : > { %v8803_v58 = vpop.f32.mrf.mxu0 }
 0x2b2 PF: > { %s12510_s19 = sld [smem:[#allocation55_spill]]  ;;  %v9715_v60 = vmov 0   ;;  %v9716_v63 = vmov 0.0   ;;  %v2005_v0 = vld [vmem:[%s9982_s14] sm:$0x1]  ;;  %vm12461_vm4 = vcmask 1041409  }
 0x2b3   : > { %9171 = vset.pattern.permute.xlu0 %v9715_v60  ;;  %9172 = vset.pattern.permute.xlu1 %v9715_v60  ;;  %v2006_v1 = vld [vmem:[%s9982_s14 + $0x8] sm:$0x1]  ;;  %v2007_v2 = vld [vmem:[%s9982_s14 + $0x10] sm:$0x1]  ;;  %v2008_v3 = vld [vmem:[%s9982_s14 + $0x18] sm:$0x1]  ;;  %v8299_v6 = vcombine.low %v2005_v0, %v2005_v0 }
 0x2b4   : > { %8804 = vmatprep.subr.bf16.mxu0 %v9716_v63  ;;  %v2009_v4 = vld [vmem:[%s9982_s14 + $0x20] sm:$0x1]  ;;  %v2010_v5 = vld [vmem:[%s9982_s14 + $0x28] sm:$0x1]  ;;  %v8300_v7 = vcombine.low %v2006_v1, %v2006_v1  ;;  %v8301_v8 = vcombine.low %v2007_v2, %v2007_v2  ;;  %8810 = vmatprep.subr.bf16.mxu1 %v9716_v63  ;;  %v2011_v9 = vld [vmem:[%s9982_s14 + $0x30] sm:$0x1]  ;;  %v8302_v11 = vcombine.low %v2008_v3, %v2008_v3 }
 0x2b5   : > { %v2012_v10 = vld [vmem:[%s9982_s14 + $0x38] sm:$0x1]  ;;  %v8303_v12 = vcombine.low %v2009_v4, %v2009_v4  ;;  %v8304_v13 = vcombine.low %v2010_v5, %v2010_v5  ;;  %v8305_v14 = vcombine.low %v2011_v9, %v2011_v9  ;;  %v2038_v16 = vunpack.c.l.b16 %v8299_v6  ;;  %v2388_v28 = vld [vmem:[%s9982_s14] sm:$0x1]  ;;  %v2389_v29 = vld [vmem:[%s9982_s14 + $0x8] sm:$0x1] }
 0x2b6   : > { %v8306_v15 = vcombine.low %v2012_v10, %v2012_v10  ;;  %v2039_v17 = vunpack.c.l.b16 %v8300_v7  ;;  %v2040_v20 = vunpack.c.l.b16 %v8301_v8  ;;  %v2041_v21 = vunpack.c.l.b16 %v8302_v11  ;;  %v2390_v33 = vld [vmem:[%s9982_s14 + $0x10] sm:$0x1]  ;;  %v2391_v34 = vld [vmem:[%s9982_s14 + $0x18] sm:$0x1]  ;;  %v2392_v38 = vld [vmem:[%s9982_s14 + $0x20] sm:$0x1] }
 0x2b7   : > { %v2042_v22 = vunpack.c.l.b16 %v8303_v12  ;;  %v2043_v23 = vunpack.c.l.b16 %v8304_v13  ;;  %v2044_v25 = vunpack.c.l.b16 %v8305_v14  ;;  %vm12460_vm5 = vcmask 1042434   ;;  %v2393_v42 = vld [vmem:[%s9982_s14 + $0x28] sm:$0x1]  ;;  %v2394_v44 = vld [vmem:[%s9982_s14 + $0x30] sm:$0x1]  ;;  %s12511_s28 = sld [smem:[#allocation57_spill]] }
 0x2b8   : > { %v2117_v59 = vld [vmem:[%s12510_s19] sm:$0xf]  ;;  %v2045_v26 = vunpack.c.l.b16 %v8306_v15  ;;  %v2046_v27 = vrot.slane %v2039_v17, 7  ;;  %v2049_v30 = vrot.slane %v2040_v20, 6  ;;  %v2052_v31 = vrot.slane %v2041_v21, 5  ;;  %s12512_s8 = sld [smem:[#allocation58_spill]] }
 0x2b9   : > { %v2491_v61 = vld [vmem:[%s12510_s19] sm:$0xf]  ;;  %2120 = vperm.xlu0 %9171, %v2117_v59   ;;  %vm12457_vm6 = vcmask 1043459   ;;  %v2055_v32 = vrot.slane %v2042_v22, 4  ;;  %vm12455_vm7 = vcmask 1044484   ;;  %v2058_v37 = vrot.slane %v2043_v23, 3 }
 0x2ba   : > { %v2863_v62 = vld [vmem:[%s12510_s19] sm:$0xf]  ;;  %v2048_v36 = vsel %vm12461_vm4, %v2046_v27, %v2038_v16  ;;  %vm12459_vm8 = vcmask 1045509   ;;  %v2061_v40 = vrot.slane %v2044_v25, 2  ;;  %vm12458_vm9 = vcmask 1046534   ;;  %s12513_s20 = sld [smem:[#allocation32_spill]] }
 0x2bb   : > { %2866 = vperm.xlu1 %9172, %v2863_v62   ;;  %v3236_v18 = vld [vmem:[%s12510_s19] sm:$0xf]  ;;  %v2051_v39 = vsel %vm12460_vm5, %v2049_v30, %v2048_v36  ;;  %v2064_v41 = vrot.slane %v2045_v26, 1  ;;  %vm12456_vm10 = vcmask 1047559   ;;  %vm2072_vm11 = vcmask 1043456   ;;  %s10590_s15 = sld [smem:[#allocation3]] }
 0x2bc   : > { %v3608_v19 = vld [vmem:[%s12510_s19] sm:$0xf]  ;;  %v2054_v43 = vsel %vm12457_vm6, %v2052_v31, %v2051_v39  ;;  %vm9717_vm12 = vmmov 0   ;;  %vm2068_vm13 = vcmask 64512   ;;  %v2395_v46 = vld [vmem:[%s9982_s14 + $0x38] sm:$0x1]  ;;  %v8316_v47 = vcombine.low %v2388_v28, %v2388_v28 }
 0x2bd   : > { %2494 = vperm.xlu0 %9171, %v2491_v61   ;;  %v3981_v24 = vld [vmem:[%s12510_s19] sm:$0xf]  ;;  %v2057_v45 = vsel %vm12455_vm7, %v2055_v32, %v2054_v43  ;;  %8806 = vmatprep.mubr.msk.bf16.mxu0 %vm9717_vm12, %v9716_v63  ;;  %v8317_v48 = vcombine.low %v2389_v29, %v2389_v29  ;;  %v8318_v50 = vcombine.low %v2390_v33, %v2390_v33  ;;  %v2761_v6 = vld [vmem:[%s9982_s14 + $0x8] sm:$0x2]  ;;  %v2762_v7 = vld [vmem:[%s9982_s14 + $0x10] sm:$0x2] }
 0x2be   : > { %v4353_v35 = vld [vmem:[%s12510_s19] sm:$0xf]  ;;  %8812 = vmatprep.mubr.msk.bf16.mxu1 %vm9717_vm12, %v9716_v63  ;;  %v2060_v49 = vsel %vm12459_vm8, %v2058_v37, %v2057_v45  ;;  %v8319_v51 = vcombine.low %v2391_v34, %v2391_v34  ;;  %v8320_v52 = vcombine.low %v2392_v38, %v2392_v38  ;;  %v8321_v55 = vcombine.low %v2393_v42, %v2393_v42  ;;  %v2763_v8 = vld [vmem:[%s9982_s14 + $0x18] sm:$0x2]  ;;  %v2013_v9 = vld [vmem:[#allocation14] sm:$0x3] }
 0x2bf   : > { %3239 = vperm.xlu1 %9172, %v3236_v18   ;;  %v4726_v53 = vld [vmem:[%s12510_s19] sm:$0xf]  ;;  %v2063_v54 = vsel %vm12458_vm9, %v2061_v40, %v2060_v49  ;;  %v8322_v56 = vcombine.low %v2394_v44, %v2394_v44  ;;  %v8323_v57 = vcombine.low %v2395_v46, %v2395_v46  ;;  %v2421_v60 = vunpack.c.l.b16 %v8316_v47  ;;  %v2765_v15 = vld [vmem:[%s9982_s14 + $0x28] sm:$0x2]  ;;  %v2766_v20 = vld [vmem:[%s9982_s14 + $0x30] sm:$0x2] }
 0x2c0   : > { %v2066_v58 = vsel %vm12456_vm10, %v2064_v41, %v2063_v54  ;;  %v5098_v59 = vld [vmem:[%s12510_s19] sm:$0xf]  ;;  %v2422_v61 = vunpack.c.l.b16 %v8317_v48  ;;  %v2423_v62 = vunpack.c.l.b16 %v8318_v50  ;;  %v2424_v3 = vunpack.c.l.b16 %v8319_v51  ;;  %v2767_v25 = vld [vmem:[%s9982_s14 + $0x38] sm:$0x2]  ;;  %v3134_v47 = vld [vmem:[%s9982_s14 + $0x8] sm:$0x2] }
 0x2c1   : > { %3611 = vperm.xlu0 %9171, %v3608_v19   ;;  %v5468_v0 = vld [vmem:[%s12510_s19] sm:$0xf]  ;;  %v2067_v2 = vpack.c.b16 %v2066_v58, %v2066_v58  ;;  %v2425_v4 = vunpack.c.l.b16 %v8320_v52  ;;  %v2426_v5 = vunpack.c.l.b16 %v8321_v55  ;;  %v2427_v10 = vunpack.c.l.b16 %v8322_v56  ;;  %v3135_v52 = vld [vmem:[%s9982_s14 + $0x10] sm:$0x2]  ;;  %s10556_s16 = sshll.u32 %s12513_s20, 4 }
 0x2c2   : > { %v2760_v1 = vld [vmem:[%s9982_s14] sm:$0x2]  ;;  %v2428_v11 = vunpack.c.l.b16 %v8323_v57  ;;  %v2429_v12 = vrot.slane %v2421_v60, 1  ;;  %v2431_v13 = vrot.slane %v2423_v62, 7  ;;  %v2433_v17 = vrot.slane %v2424_v3, 6  ;;  %s10559_s17 = sld [smem:[#allocation4 + %s10556_s16]] }
 0x2c3   : > { %3984 = vperm.xlu1 %9172, %v3981_v24   ;;  %v2764_v14 = vld [vmem:[%s9982_s14 + $0x20] sm:$0x2]  ;;  %v2074_v16 = vsel %vm2072_vm11, %v2067_v2, 0  ;;  %v2435_v18 = vrot.slane %v2425_v4, 5  ;;  %v2437_v19 = vrot.slane %v2426_v5, 4  ;;  %v2439_v23 = vrot.slane %v2427_v10, 3 }
 0x2c4   : > { %8805 = vmatpush3.bf16.msra.mxu0 %v2074_v16  ;;  %v5838_v21 = vld [vmem:[%s12510_s19] sm:$0xf]  ;;  %v2430_v22 = vsel %vm12461_vm4, %v2422_v61, %v2429_v12  ;;  %v2441_v24 = vrot.slane %v2428_v11, 2  ;;  %v8333_v26 = vcombine.low %v2760_v1, %v2760_v1  ;;  %v8334_v28 = vcombine.low %v2761_v6, %v2761_v6  ;;  %v3139_v1 = vld [vmem:[%s9982_s14 + $0x30] sm:$0x2]  ;;  %s2372_s1 = sadd.s32 1, %s10556_s16 }
 0x2c5   : > { %4356 = vperm.xlu0 %9171, %v4353_v35   ;;  %8816 = vmatprep.subr.bf16.mxu0 %v9716_v63  ;;  %v2432_v27 = vsel %vm12460_vm5, %v2431_v13, %v2430_v22  ;;  %v8335_v29 = vcombine.low %v2762_v7, %v2762_v7  ;;  %v8336_v30 = vcombine.low %v2763_v8, %v2763_v8  ;;  %v6208_v31 = vld [vmem:[%s12510_s19] sm:$0xf]  ;;  %v3140_v5 = vld [vmem:[%s9982_s14 + $0x38] sm:$0x2]  ;;  %v2396_v13 = vld [vmem:[#allocation14] sm:$0x3] }
 0x2c6   : > { %v2434_v32 = vsel %vm12457_vm6, %v2433_v17, %v2432_v27  ;;  %v8337_v33 = vcombine.low %v2764_v14, %v2764_v14  ;;  %v8338_v34 = vcombine.low %v2765_v15, %v2765_v15  ;;  %v8339_v35 = vcombine.low %v2766_v20, %v2766_v20  ;;  %v6578_v37 = vld [vmem:[%s12510_s19] sm:$0xf]  ;;  %s10563_s11 = sld [smem:[#allocation8 + %s10556_s16]]  ;;  %s2744_s27 = sadd.s32 2, %s10556_s16 }
 0x2c7   : > { %4729 = vperm.xlu1 %9172, %v4726_v53   ;;  %8807 = vmatmul.mubr.msk.bf16.vlgmr.msra.gmra.mxu0 %vm2068_vm13, %v2013_v9  ;;  %v2436_v36 = vsel %vm12455_vm7, %v2435_v18, %v2434_v32  ;;  %v8340_v38 = vcombine.low %v2767_v25, %v2767_v25  ;;  %v2793_v39 = vunpack.c.l.b16 %v8333_v26  ;;  %v2794_v40 = vunpack.c.l.b16 %v8334_v28  ;;  %v6948_v45 = vld [vmem:[%s12510_s19] sm:$0xf]  ;;  %v3136_v53 = vld [vmem:[%s9982_s14 + $0x18] sm:$0x2]  ;;  %s10566_s12 = sld [smem:[#allocation10 + %s10556_s16]]  ;;  %s3117_s0 = sadd.s32 3, %s10556_s16 }
 0x2c8   : > { %v2438_v41 = vsel %vm12459_vm8, %v2437_v19, %v2436_v36  ;;  %8818 = vmatprep.mubr.msk.bf16.mxu0 %vm9717_vm12, %v9716_v63  ;;  %v2795_v42 = vunpack.c.l.b16 %v8335_v29  ;;  %v2796_v43 = vunpack.c.l.b16 %v8336_v30  ;;  %v2797_v44 = vunpack.c.l.b16 %v8337_v33  ;;  %v3133_v46 = vld [vmem:[%s9982_s14] sm:$0x2]  ;;  %v3505_v28 = vld [vmem:[%s9982_s14] sm:$0x4]  ;;  %v3506_v29 = vld [vmem:[%s9982_s14 + $0x8] sm:$0x4] }
 0x2c9   : > { %5101 = vperm.xlu0 %9171, %v5098_v59   ;;  %v2440_v48 = vsel %vm12458_vm9, %v2439_v23, %v2438_v41  ;;  %v2798_v49 = vunpack.c.l.b16 %v8338_v34  ;;  %v2799_v50 = vunpack.c.l.b16 %v8339_v35  ;;  %v2800_v51 = vunpack.c.l.b16 %v8340_v38  ;;  %v3137_v54 = vld [vmem:[%s9982_s14 + $0x20] sm:$0x2]  ;;  %v3138_v59 = vld [vmem:[%s9982_s14 + $0x28] sm:$0x2]  ;;  %v3507_v34 = vld [vmem:[%s9982_s14 + $0x10] sm:$0x4] }
 0x2ca   : > { %v2442_v55 = vsel %vm12456_vm10, %v2441_v24, %v2440_v48  ;;  %v2801_v56 = vrot.slane %v2793_v39, 2  ;;  %v2802_v57 = vrot.slane %v2794_v40, 1  ;;  %v2805_v58 = vrot.slane %v2796_v43, 7  ;;  %v7318_v2 = vld [vmem:[%s12510_s19] sm:$0xf]  ;;  %s10568_s23 = sld [smem:[#allocation10 + %s2372_s1]] }
 0x2cb   : > { %5471 = vperm.xlu1 %9172, %v5468_v0   ;;  %v2443_v60 = vpack.c.b16 %v2442_v55, %v2442_v55  ;;  %v2807_v61 = vrot.slane %v2797_v44, 6  ;;  %v2809_v62 = vrot.slane %v2798_v49, 5  ;;  %v2811_v0 = vrot.slane %v2799_v50, 4  ;;  %v7688_v12 = vld [vmem:[%s12510_s19] sm:$0xf]  ;;  %s10570_s30 = sld [smem:[#allocation4 + %s2372_s1]] }
 0x2cc   : > { %v2803_v3 = vsel %vm12461_vm4, %v2802_v57, %v2801_v56  ;;  %v2813_v4 = vrot.slane %v2800_v51, 3  ;;  %v8350_v6 = vcombine.low %v3133_v46, %v3133_v46  ;;  %v8351_v7 = vcombine.low %v3134_v47, %v3134_v47  ;;  %v10256_v19 = vld [vmem:[%s12511_s28] sm:$0xff]  ;;  %v3508_v35 = vld [vmem:[%s9982_s14 + $0x18] sm:$0x4]  ;;  %v3510_v41 = vld [vmem:[%s9982_s14 + $0x28] sm:$0x4] }
 0x2cd   : > { %5841 = vperm.xlu0 %9171, %v5838_v21   ;;  %v2448_v8 = vsel %vm2072_vm11, %v2443_v60, 0  ;;  %v2804_v9 = vsel %vm12460_vm5, %v2795_v42, %v2803_v3  ;;  %v8352_v10 = vcombine.low %v3135_v52, %v3135_v52  ;;  %v8353_v11 = vcombine.low %v3136_v53, %v3136_v53  ;;  %v10262_v27 = vld [vmem:[%s12512_s8] sm:$0xff]  ;;  %v3511_v46 = vld [vmem:[%s9982_s14 + $0x30] sm:$0x4]  ;;  %v3512_v49 = vld [vmem:[%s9982_s14 + $0x38] sm:$0x4] }
 0x2ce   : > { %8817 = vmatpush3.bf16.msra.mxu0 %v2448_v8  ;;  %v2806_v14 = vsel %vm12457_vm6, %v2805_v58, %v2804_v9  ;;  %v8354_v15 = vcombine.low %v3137_v54, %v3137_v54  ;;  %v8355_v16 = vcombine.low %v3138_v59, %v3138_v59  ;;  %v8356_v17 = vcombine.low %v3139_v1, %v3139_v1  ;;  %v3509_v36 = vld [vmem:[%s9982_s14 + $0x20] sm:$0x4]  ;;  %v2768_v56 = vld [vmem:[#allocation14] sm:$0x3]  ;;  %s10574_s28 = sld [smem:[#allocation8 + %s2372_s1]]  ;;  %s3489_s1 = sadd.s32 4, %s10556_s16 }
 0x2cf   : > { %6211 = vperm.xlu1 %9172, %v6208_v31   ;;  %8828 = vmatprep.subr.bf16.mxu0 %v9716_v63  ;;  %v2808_v18 = vsel %vm12455_vm7, %v2807_v61, %v2806_v14  ;;  %v8357_v20 = vcombine.low %v3140_v5, %v3140_v5  ;;  %v3166_v21 = vunpack.c.l.b16 %v8350_v6  ;;  %v3167_v22 = vunpack.c.l.b16 %v8351_v7  ;;  %v3878_v6 = vld [vmem:[%s9982_s14] sm:$0x4]  ;;  %v3879_v7 = vld [vmem:[%s9982_s14 + $0x8] sm:$0x4]  ;;  %s10576_s13 = sld [smem:[#allocation4 + %s2744_s27]]  ;;  %s4234_s20 = sadd.s32 6, %s10556_s16 }
 0x2d0   : > { %v2810_v23 = vsel %vm12459_vm8, %v2809_v62, %v2808_v18  ;;  %v3168_v24 = vunpack.c.l.b16 %v8352_v10  ;;  %v3169_v25 = vunpack.c.l.b16 %v8353_v11  ;;  %v3170_v26 = vunpack.c.l.b16 %v8354_v15  ;;  %v3882_v14 = vld [vmem:[%s9982_s14 + $0x20] sm:$0x4]  ;;  %s10578_s9 = sld [smem:[#allocation10 + %s2744_s27]]  ;;  %s10626_s10 = sadd.s32 7, %s10556_s16 }
 0x2d1   : > { %6581 = vperm.xlu0 %9171, %v6578_v37   ;;  %8819 = vmatmul.mubr.msk.bf16.vlgmr.msra.gmra.mxu0 %vm2068_vm13, %v2396_v13  ;;  %v2812_v30 = vsel %vm12458_vm9, %v2811_v0, %v2810_v23  ;;  %v3171_v31 = vunpack.c.l.b16 %v8355_v16  ;;  %v3172_v32 = vunpack.c.l.b16 %v8356_v17  ;;  %v3173_v33 = vunpack.c.l.b16 %v8357_v20  ;;  %v3881_v13 = vld [vmem:[%s9982_s14 + $0x18] sm:$0x4]  ;;  %v3883_v20 = vld [vmem:[%s9982_s14 + $0x28] sm:$0x4]  ;;  %s10585_s6 = sld [smem:[#allocation8 + %s2744_s27]]  ;;  %s3862_s27 = sadd.s32 5, %s10556_s16 }
 0x2d2   : > { %v2814_v37 = vsel %vm12456_vm10, %v2813_v4, %v2812_v30  ;;  %8830 = vmatprep.mubr.msk.bf16.mxu0 %vm9717_vm12, %v9716_v63  ;;  %v3174_v38 = vrot.slane %v3166_v21, 3  ;;  %v3175_v39 = vrot.slane %v3167_v22, 2  ;;  %v3177_v40 = vrot.slane %v3168_v24, 1  ;;  %s10587_s7 = sld [smem:[#allocation4 + %s3117_s0]]  ;;  %s12517_s18 = sshll.u32 %s10563_s11, 2 }
 0x2d3   : > { %6951 = vperm.xlu1 %9172, %v6948_v45   ;;  %v2815_v42 = vpack.c.b16 %v2814_v37, %v2814_v37  ;;  %v3180_v43 = vrot.slane %v3170_v26, 7  ;;  %v3182_v44 = vrot.slane %v3171_v31, 6  ;;  %v3184_v45 = vrot.slane %v3172_v32, 5  ;;  %s10592_s19 = sld [smem:[#allocation8 + %s3117_s0]] }
 0x2d4   : > { %v3176_v47 = vsel %vm12461_vm4, %v3175_v39, %v3174_v38  ;;  %v3186_v48 = vrot.slane %v3173_v33, 4  ;;  %v8367_v50 = vcombine.low %v3505_v28, %v3505_v28  ;;  %v8368_v51 = vcombine.low %v3506_v29, %v3506_v29  ;;  %v3885_v29 = vld [vmem:[%s9982_s14 + $0x38] sm:$0x4]  ;;  %s10595_s3 = sld [smem:[#allocation4 + %s3489_s1]] }
 0x2d5   : > { %7321 = vperm.xlu0 %9171, %v7318_v2   ;;  %v2820_v52 = vsel %vm2072_vm11, %v2815_v42, 0  ;;  %v3178_v53 = vsel %vm12460_vm5, %v3177_v40, %v3176_v47  ;;  %v8369_v54 = vcombine.low %v3507_v34, %v3507_v34  ;;  %v8370_v55 = vcombine.low %v3508_v35, %v3508_v35  ;;  %s10599_s5 = sld [smem:[#allocation10 + %s3117_s0]]  ;;  %s12515_s0 = sshll.u32 %s10559_s17, 2 }
 0x2d6   : > { %8829 = vmatpush3.bf16.msra.mxu0 %v2820_v52  ;;  %v3179_v57 = vsel %vm12457_vm6, %v3169_v25, %v3178_v53  ;;  %v8371_v58 = vcombine.low %v3509_v36, %v3509_v36  ;;  %v8372_v59 = vcombine.low %v3510_v41, %v3510_v41  ;;  %v8373_v60 = vcombine.low %v3511_v46, %v3511_v46  ;;  %v3884_v25 = vld [vmem:[%s9982_s14 + $0x30] sm:$0x4]  ;;  %v3141_v36 = vld [vmem:[#allocation14] sm:$0x3]  ;;  %s10602_s8 = sld [smem:[#allocation8 + %s3489_s1]]  ;;  %s12518_s17 = sshll.u32 %s10570_s30, 2 }
 0x2d7   : > { %7691 = vperm.xlu1 %9172, %v7688_v12   ;;  %8840 = vmatprep.subr.bf16.mxu0 %v9716_v63  ;;  %v3181_v61 = vsel %vm12455_vm7, %v3180_v43, %v3179_v57  ;;  %v8374_v62 = vcombine.low %v3512_v49, %v3512_v49  ;;  %v3538_v0 = vunpack.c.l.b16 %v8367_v50  ;;  %v3539_v1 = vunpack.c.l.b16 %v8368_v51  ;;  %v3880_v12 = vld [vmem:[%s9982_s14 + $0x10] sm:$0x4]  ;;  %v4250_v49 = vld [vmem:[%s9982_s14] sm:$0x8]  ;;  %v4251_v50 = vld [vmem:[%s9982_s14 + $0x8] sm:$0x8] }
 0x2d8   : > { %v3183_v2 = vsel %vm12459_vm8, %v3182_v44, %v3181_v61  ;;  %v3540_v3 = vunpack.c.l.b16 %v8369_v54  ;;  %v3541_v4 = vunpack.c.l.b16 %v8370_v55  ;;  %v3542_v5 = vunpack.c.l.b16 %v8371_v58  ;;  %v4252_v55 = vld [vmem:[%s9982_s14 + $0x10] sm:$0x8]  ;;  %v4254_v57 = vld [vmem:[%s9982_s14 + $0x20] sm:$0x8]  ;;  %s10604_s22 = sld [smem:[#allocation10 + %s3489_s1]]  ;;  %s12523_s30 = sshll.u32 %s10585_s6, 2 }
 0x2d9   : > { %2224 = vperm.xlu0 %9171, %v10256_v19   ;;  %8831 = vmatmul.mubr.msk.bf16.vlgmr.msra.gmra.mxu0 %vm2068_vm13, %v2768_v56  ;;  %v3185_v8 = vsel %vm12458_vm9, %v3184_v45, %v3183_v2  ;;  %v3543_v9 = vunpack.c.l.b16 %v8372_v59  ;;  %v3544_v10 = vunpack.c.l.b16 %v8373_v60  ;;  %v3545_v11 = vunpack.c.l.b16 %v8374_v62  ;;  %v4253_v56 = vld [vmem:[%s9982_s14 + $0x18] sm:$0x8]  ;;  %v4255_v62 = vld [vmem:[%s9982_s14 + $0x28] sm:$0x8]  ;;  %s10607_s26 = sld [smem:[#allocation4 + %s3862_s27]] }
 0x2da   : > { %v3187_v15 = vsel %vm12456_vm10, %v3186_v48, %v3185_v8  ;;  %8842 = vmatprep.mubr.msk.bf16.mxu0 %vm9717_vm12, %v9716_v63  ;;  %v3546_v16 = vrot.slane %v3538_v0, 4  ;;  %v3547_v17 = vrot.slane %v3539_v1, 3  ;;  %v3549_v18 = vrot.slane %v3540_v3, 2  ;;  %12514 = sst [smem:[#allocation45_spill]] %s10595_s3  ;;  %s2000_s3 = scalar_lea.vmem [#allocation2], %s12517_s18 }
 0x2db   : > { %2231 = vperm.xlu1 %9172, %v10262_v27   ;;  %v3188_v21 = vpack.c.b16 %v3187_v15, %v3187_v15  ;;  %v3551_v22 = vrot.slane %v3541_v4, 1  ;;  %v3554_v23 = vrot.slane %v3543_v9, 7  ;;  %v3556_v24 = vrot.slane %v3544_v10, 6  ;;  %v4256_v4 = vld [vmem:[%s9982_s14 + $0x30] sm:$0x8]  ;;  %s10610_s24 = sld [smem:[#allocation8 + %s3862_s27]] }
 0x2dc   : > { %v3548_v26 = vsel %vm12461_vm4, %v3547_v17, %v3546_v16  ;;  %v3558_v28 = vrot.slane %v3545_v11, 5  ;;  %v8384_v30 = vcombine.low %v3878_v6, %v3878_v6  ;;  %v8385_v31 = vcombine.low %v3879_v7, %v3879_v7  ;;  %v4257_v7 = vld [vmem:[%s9982_s14 + $0x38] sm:$0x8]  ;;  %s10613_s2 = sld [smem:[#allocation10 + %s3862_s27]]  ;;  %s1995_s27 = scalar_lea.vmem [#allocation2], %s12515_s0 }
 0x2dd   : > { %2597 = vperm.xlu0 %9171, %v10256_v19   ;;  %v3193_v32 = vsel %vm2072_vm11, %v3188_v21, 0  ;;  %v3550_v33 = vsel %vm12460_vm5, %v3549_v18, %v3548_v26  ;;  %v8386_v34 = vcombine.low %v3880_v12, %v3880_v12  ;;  %v8387_v35 = vcombine.low %v3881_v13, %v3881_v13  ;;  %s10618_s1 = sld [smem:[#allocation4 + %s4234_s20]]  ;;  %s2378_s0 = scalar_lea.vmem [#allocation2], %s12518_s17 }
 0x2de   : > { %8841 = vmatpush3.bf16.msra.mxu0 %v3193_v32  ;;  %v3552_v37 = vsel %vm12457_vm6, %v3551_v22, %v3550_v33  ;;  %v8388_v38 = vcombine.low %v3882_v14, %v3882_v14  ;;  %v8389_v39 = vcombine.low %v3883_v20, %v3883_v20  ;;  %v8390_v40 = vcombine.low %v3884_v25, %v3884_v25  ;;  %v3513_v14 = vld [vmem:[#allocation14] sm:$0x3]  ;;  %s10621_s29 = sld [smem:[#allocation8 + %s4234_s20]]  ;;  %s2755_s17 = scalar_lea.vmem [#allocation2], %s12523_s30 }
 0x2df   : > { %2604 = vperm.xlu1 %9172, %v10262_v27   ;;  %8852 = vmatprep.subr.bf16.mxu0 %v9716_v63  ;;  %v3553_v41 = vsel %vm12455_vm7, %v3542_v5, %v3552_v37  ;;  %v8391_v42 = vcombine.low %v3885_v29, %v3885_v29  ;;  %v3911_v43 = vunpack.c.l.b16 %v8384_v30  ;;  %v3912_v44 = vunpack.c.l.b16 %v8385_v31  ;;  %v4623_v29 = vld [vmem:[%s9982_s14] sm:$0x8]  ;;  %v4624_v30 = vld [vmem:[%s9982_s14 + $0x8] sm:$0x8]  ;;  %s10623_s25 = sld [smem:[#allocation10 + %s4234_s20]] }
 0x2e0   : > { %v3555_v45 = vsel %vm12459_vm8, %v3554_v23, %v3553_v41  ;;  %v3913_v46 = vunpack.c.l.b16 %v8386_v34  ;;  %v3914_v47 = vunpack.c.l.b16 %v8387_v35  ;;  %v3915_v48 = vunpack.c.l.b16 %v8388_v38  ;;  %v4625_v35 = vld [vmem:[%s9982_s14 + $0x10] sm:$0x8]  ;;  %v4627_v37 = vld [vmem:[%s9982_s14 + $0x20] sm:$0x8]  ;;  %s12516_s4 = ssub.f32 1.0, %s10566_s12 }
 0x2e1   : > { %2969 = vperm.xlu0 %9171, %v10256_v19   ;;  %8843 = vmatmul.mubr.msk.bf16.vlgmr.msra.gmra.mxu0 %vm2068_vm13, %v3141_v36  ;;  %v3557_v51 = vsel %vm12458_vm9, %v3556_v24, %v3555_v45  ;;  %v3916_v52 = vunpack.c.l.b16 %v8389_v39  ;;  %v3917_v53 = vunpack.c.l.b16 %v8390_v40  ;;  %v3918_v54 = vunpack.c.l.b16 %v8391_v42  ;;  %v4626_v36 = vld [vmem:[%s9982_s14 + $0x18] sm:$0x8]  ;;  %v4628_v42 = vld [vmem:[%s9982_s14 + $0x28] sm:$0x8]  ;;  %s8383_s18 = sshll.u32 %s10610_s24, 2  ;;  %s12522_s21 = ssub.f32 1.0, %s10578_s9 }
 0x2e2   : > { %v3559_v58 = vsel %vm12456_vm10, %v3558_v28, %v3557_v51  ;;  %8854 = vmatprep.mubr.msk.bf16.mxu0 %vm9717_vm12, %v9716_v63  ;;  %v3919_v59 = vrot.slane %v3911_v43, 5  ;;  %v3920_v60 = vrot.slane %v3912_v44, 4  ;;  %v3922_v61 = vrot.slane %v3913_v46, 3  ;;  %s10665_s6 = sld [smem:[#allocation10 + %s10626_s10]]  ;;  %s10719_s24 = sadd.s32 9, %s10556_s16 }
 0x2e3   : > { %2976 = vperm.xlu1 %9172, %v10262_v27   ;;  %v3560_v0 = vpack.c.b16 %v3559_v58, %v3559_v58  ;;  %v3924_v1 = vrot.slane %v3914_v47, 2  ;;  %v3926_v2 = vrot.slane %v3915_v48, 1  ;;  %v3929_v3 = vrot.slane %v3917_v53, 7  ;;  %v4629_v47 = vld [vmem:[%s9982_s14 + $0x30] sm:$0x8]  ;;  %s12529_s30 = ssub.f32 1.0, %s10604_s22 }
 0x2e4   : > { %v3921_v5 = vsel %vm12461_vm4, %v3920_v60, %v3919_v59  ;;  %v3931_v6 = vrot.slane %v3918_v54, 6  ;;  %v8401_v8 = vcombine.low %v4250_v49, %v4250_v49  ;;  %v8402_v9 = vcombine.low %v4251_v50, %v4251_v50  ;;  %v4630_v50 = vld [vmem:[%s9982_s14 + $0x38] sm:$0x8] }
 0x2e5   : > { %3342 = vperm.xlu0 %9171, %v10256_v19   ;;  %v3565_v10 = vsel %vm2072_vm11, %v3560_v0, 0  ;;  %v3923_v11 = vsel %vm12460_vm5, %v3922_v61, %v3921_v5  ;;  %v8403_v12 = vcombine.low %v4252_v55, %v4252_v55  ;;  %v8404_v13 = vcombine.low %v4253_v56, %v4253_v56 }
 0x2e6   : > { %8853 = vmatpush3.bf16.msra.mxu0 %v3565_v10  ;;  %v3925_v15 = vsel %vm12457_vm6, %v3924_v1, %v3923_v11  ;;  %v8405_v16 = vcombine.low %v4254_v57, %v4254_v57  ;;  %v8406_v17 = vcombine.low %v4255_v62, %v4255_v62  ;;  %v8407_v18 = vcombine.low %v4256_v4, %v4256_v4  ;;  %v3886_v57 = vld [vmem:[#allocation14] sm:$0x3] }
 0x2e7   : > { %3349 = vperm.xlu1 %9172, %v10262_v27   ;;  %8864 = vmatprep.subr.bf16.mxu0 %v9716_v63  ;;  %v3927_v20 = vsel %vm12455_vm7, %v3926_v2, %v3925_v15  ;;  %v8408_v21 = vcombine.low %v4257_v7, %v4257_v7  ;;  %v4283_v22 = vunpack.c.l.b16 %v8401_v8  ;;  %v4284_v23 = vunpack.c.l.b16 %v8402_v9  ;;  %v4995_v7 = vld [vmem:[%s9982_s14 + $0x4] sm:$0x1]  ;;  %v4996_v8 = vld [vmem:[%s9982_s14 + $0xc] sm:$0x1] }
 0x2e8   : > { %v3928_v24 = vsel %vm12459_vm8, %v3916_v52, %v3927_v20  ;;  %v4285_v25 = vunpack.c.l.b16 %v8403_v12  ;;  %v4286_v26 = vunpack.c.l.b16 %v8404_v13  ;;  %v4287_v28 = vunpack.c.l.b16 %v8405_v16  ;;  %v4997_v13 = vld [vmem:[%s9982_s14 + $0x14] sm:$0x1]  ;;  %v4999_v15 = vld [vmem:[%s9982_s14 + $0x24] sm:$0x1] }
 0x2e9   : > { %3714 = vperm.xlu0 %9171, %v10256_v19   ;;  %8855 = vmatmul.mubr.msk.bf16.vlgmr.msra.gmra.mxu0 %vm2068_vm13, %v3513_v14  ;;  %v3930_v31 = vsel %vm12458_vm9, %v3929_v3, %v3928_v24  ;;  %v4288_v32 = vunpack.c.l.b16 %v8406_v17  ;;  %v4289_v33 = vunpack.c.l.b16 %v8407_v18  ;;  %v4290_v34 = vunpack.c.l.b16 %v8408_v21  ;;  %v4998_v14 = vld [vmem:[%s9982_s14 + $0x1c] sm:$0x1]  ;;  %v5000_v21 = vld [vmem:[%s9982_s14 + $0x2c] sm:$0x1] }
 0x2ea   : > { %v3932_v38 = vsel %vm12456_vm10, %v3931_v6, %v3930_v31  ;;  %8866 = vmatprep.mubr.msk.bf16.mxu0 %vm9717_vm12, %v9716_v63  ;;  %v4291_v39 = vrot.slane %v4283_v22, 6  ;;  %v4292_v40 = vrot.slane %v4284_v23, 5  ;;  %v4294_v41 = vrot.slane %v4285_v25, 4 }
 0x2eb   : > { %4459 = vperm.xlu1 %9172, %v10256_v19   ;;  %v3933_v43 = vpack.c.b16 %v3932_v38, %v3932_v38  ;;  %v4296_v44 = vrot.slane %v4286_v26, 3  ;;  %v4298_v45 = vrot.slane %v4287_v28, 2  ;;  %v4300_v46 = vrot.slane %v4288_v32, 1  ;;  %v5001_v26 = vld [vmem:[%s9982_s14 + $0x34] sm:$0x1] }
 0x2ec   : > { %v4293_v48 = vsel %vm12461_vm4, %v4292_v40, %v4291_v39  ;;  %v4303_v49 = vrot.slane %v4290_v34, 7  ;;  %v8418_v51 = vcombine.low %v4623_v29, %v4623_v29  ;;  %v8419_v52 = vcombine.low %v4624_v30, %v4624_v30  ;;  %v5002_v30 = vld [vmem:[%s9982_s14 + $0x3c] sm:$0x1] }
 0x2ed   : > { %5204 = vperm.xlu0 %9171, %v10256_v19   ;;  %v3938_v53 = vsel %vm2072_vm11, %v3933_v43, 0  ;;  %v4295_v54 = vsel %vm12460_vm5, %v4294_v41, %v4293_v48  ;;  %v8420_v55 = vcombine.low %v4625_v35, %v4625_v35  ;;  %v8421_v56 = vcombine.low %v4626_v36, %v4626_v36 }
 0x2ee   : > { %8865 = vmatpush3.bf16.msra.mxu0 %v3938_v53  ;;  %v4297_v58 = vsel %vm12457_vm6, %v4296_v44, %v4295_v54  ;;  %v8422_v59 = vcombine.low %v4627_v37, %v4627_v37  ;;  %v8423_v60 = vcombine.low %v4628_v42, %v4628_v42  ;;  %v8424_v61 = vcombine.low %v4629_v47, %v4629_v47  ;;  %v4258_v37 = vld [vmem:[#allocation14] sm:$0x3] }
 0x2ef   : > { %5944 = vperm.xlu1 %9172, %v10256_v19   ;;  %8876 = vmatprep.subr.bf16.mxu0 %v9716_v63  ;;  %v4299_v62 = vsel %vm12455_vm7, %v4298_v45, %v4297_v58  ;;  %v8425_v0 = vcombine.low %v4630_v50, %v4630_v50  ;;  %v4656_v1 = vunpack.c.l.b16 %v8418_v51  ;;  %v4657_v2 = vunpack.c.l.b16 %v8419_v52  ;;  %v5365_v50 = vld [vmem:[%s9982_s14 + $0x4] sm:$0x1]  ;;  %v5366_v51 = vld [vmem:[%s9982_s14 + $0xc] sm:$0x1] }
 0x2f0   : > { %v4301_v3 = vsel %vm12459_vm8, %v4300_v46, %v4299_v62  ;;  %v4658_v4 = vunpack.c.l.b16 %v8420_v55  ;;  %v4659_v5 = vunpack.c.l.b16 %v8421_v56  ;;  %v4660_v6 = vunpack.c.l.b16 %v8422_v59  ;;  %v5367_v56 = vld [vmem:[%s9982_s14 + $0x14] sm:$0x1]  ;;  %v5369_v58 = vld [vmem:[%s9982_s14 + $0x24] sm:$0x1] }
 0x2f1   : > { %6684 = vperm.xlu0 %9171, %v10256_v19   ;;  %8867 = vmatmul.mubr.msk.bf16.vlgmr.msra.gmra.mxu0 %vm2068_vm13, %v3886_v57  ;;  %v4302_v9 = vsel %vm12458_vm9, %v4289_v33, %v4301_v3  ;;  %v4661_v10 = vunpack.c.l.b16 %v8423_v60  ;;  %v4662_v11 = vunpack.c.l.b16 %v8424_v61  ;;  %v4663_v12 = vunpack.c.l.b16 %v8425_v0  ;;  %v5368_v57 = vld [vmem:[%s9982_s14 + $0x1c] sm:$0x1]  ;;  %v5370_v0 = vld [vmem:[%s9982_s14 + $0x2c] sm:$0x1] }
 0x2f2   : > { %v4304_v16 = vsel %vm12456_vm10, %v4303_v49, %v4302_v9  ;;  %8878 = vmatprep.mubr.msk.bf16.mxu0 %vm9717_vm12, %v9716_v63  ;;  %v4664_v17 = vrot.slane %v4656_v1, 7  ;;  %v4665_v18 = vrot.slane %v4657_v2, 6  ;;  %v4667_v20 = vrot.slane %v4658_v4, 5 }
 0x2f3   : > { %7424 = vperm.xlu1 %9172, %v10256_v19   ;;  %v4305_v22 = vpack.c.b16 %v4304_v16, %v4304_v16  ;;  %v4669_v23 = vrot.slane %v4659_v5, 4  ;;  %v4671_v24 = vrot.slane %v4660_v6, 3  ;;  %v4673_v25 = vrot.slane %v4661_v10, 2  ;;  %v5371_v5 = vld [vmem:[%s9982_s14 + $0x34] sm:$0x1] }
 0x2f4   : > { %v4666_v28 = vsel %vm12461_vm4, %v4665_v18, %v4664_v17  ;;  %v4675_v29 = vrot.slane %v4662_v11, 1  ;;  %v8435_v31 = vcombine.low %v4995_v7, %v4995_v7  ;;  %v8436_v32 = vcombine.low %v4996_v8, %v4996_v8  ;;  %v5372_v8 = vld [vmem:[%s9982_s14 + $0x3c] sm:$0x1] }
 0x2f5   : > { %3721 = vperm.xlu0 %9171, %v10262_v27   ;;  %v4310_v33 = vsel %vm2072_vm11, %v4305_v22, 0  ;;  %v4668_v34 = vsel %vm12460_vm5, %v4667_v20, %v4666_v28  ;;  %v8437_v35 = vcombine.low %v4997_v13, %v4997_v13  ;;  %v8438_v36 = vcombine.low %v4998_v14, %v4998_v14 }
 0x2f6   : > { %8877 = vmatpush3.bf16.msra.mxu0 %v4310_v33  ;;  %v4670_v38 = vsel %vm12457_vm6, %v4669_v23, %v4668_v34  ;;  %v8439_v39 = vcombine.low %v4999_v15, %v4999_v15  ;;  %v8440_v40 = vcombine.low %v5000_v21, %v5000_v21  ;;  %v8441_v41 = vcombine.low %v5001_v26, %v5001_v26  ;;  %v4631_v15 = vld [vmem:[#allocation14] sm:$0x3] }
 0x2f7   : > { %4466 = vperm.xlu1 %9172, %v10262_v27   ;;  %8888 = vmatprep.subr.bf16.mxu0 %v9716_v63  ;;  %v4672_v42 = vsel %vm12455_vm7, %v4671_v24, %v4670_v38  ;;  %v8442_v43 = vcombine.low %v5002_v30, %v5002_v30  ;;  %v5028_v44 = vunpack.c.l.b16 %v8435_v31  ;;  %v5029_v45 = vunpack.c.l.b16 %v8436_v32  ;;  %v5735_v30 = vld [vmem:[%s9982_s14 + $0x4] sm:$0x2]  ;;  %v5736_v31 = vld [vmem:[%s9982_s14 + $0xc] sm:$0x2] }
 0x2f8   : > { %v4674_v46 = vsel %vm12459_vm8, %v4673_v25, %v4672_v42  ;;  %v5030_v47 = vunpack.c.l.b16 %v8437_v35  ;;  %v5031_v48 = vunpack.c.l.b16 %v8438_v36  ;;  %v5032_v49 = vunpack.c.l.b16 %v8439_v39  ;;  %v5737_v36 = vld [vmem:[%s9982_s14 + $0x14] sm:$0x2]  ;;  %v5739_v38 = vld [vmem:[%s9982_s14 + $0x24] sm:$0x2] }
 0x2f9   : > { %5211 = vperm.xlu0 %9171, %v10262_v27   ;;  %8879 = vmatmul.mubr.msk.bf16.vlgmr.msra.gmra.mxu0 %vm2068_vm13, %v4258_v37  ;;  %v4676_v52 = vsel %vm12458_vm9, %v4675_v29, %v4674_v46  ;;  %v5033_v53 = vunpack.c.l.b16 %v8440_v40  ;;  %v5034_v54 = vunpack.c.l.b16 %v8441_v41  ;;  %v5035_v55 = vunpack.c.l.b16 %v8442_v43  ;;  %v5738_v37 = vld [vmem:[%s9982_s14 + $0x1c] sm:$0x2]  ;;  %v5740_v43 = vld [vmem:[%s9982_s14 + $0x2c] sm:$0x2] }
 0x2fa   : > { %v4677_v59 = vsel %vm12456_vm10, %v4663_v12, %v4676_v52  ;;  %8890 = vmatprep.mubr.msk.bf16.mxu0 %vm9717_vm12, %v9716_v63  ;;  %v5036_v60 = vrot.slane %v5029_v45, 7  ;;  %v5038_v61 = vrot.slane %v5030_v47, 6  ;;  %v5040_v62 = vrot.slane %v5031_v48, 5  ;;  %v5741_v48 = vld [vmem:[%s9982_s14 + $0x34] sm:$0x2] }
 0x2fb   : > { %5951 = vperm.xlu1 %9172, %v10262_v27   ;;  %v4678_v1 = vpack.c.b16 %v4677_v59, %v4677_v59  ;;  %v5042_v2 = vrot.slane %v5032_v49, 4  ;;  %v5044_v3 = vrot.slane %v5033_v53, 3  ;;  %v5046_v4 = vrot.slane %v5034_v54, 2 }
 0x2fc   : > { %v5037_v6 = vsel %vm12461_vm4, %v5036_v60, %v5028_v44  ;;  %v5048_v7 = vrot.slane %v5035_v55, 1  ;;  %v8452_v9 = vcombine.low %v5365_v50, %v5365_v50  ;;  %v8453_v10 = vcombine.low %v5366_v51, %v5366_v51  ;;  %v5742_v51 = vld [vmem:[%s9982_s14 + $0x3c] sm:$0x2] }
 0x2fd   : > { %6691 = vperm.xlu0 %9171, %v10262_v27   ;;  %v4683_v11 = vsel %vm2072_vm11, %v4678_v1, 0  ;;  %v5039_v12 = vsel %vm12460_vm5, %v5038_v61, %v5037_v6  ;;  %v8454_v13 = vcombine.low %v5367_v56, %v5367_v56  ;;  %v8455_v14 = vcombine.low %v5368_v57, %v5368_v57 }
 0x2fe   : > { %8889 = vmatpush3.bf16.msra.mxu0 %v4683_v11  ;;  %v5041_v16 = vsel %vm12457_vm6, %v5040_v62, %v5039_v12  ;;  %v8456_v17 = vcombine.low %v5369_v58, %v5369_v58  ;;  %v8457_v18 = vcombine.low %v5370_v0, %v5370_v0  ;;  %v8458_v20 = vcombine.low %v5371_v5, %v5371_v5  ;;  %v5003_v58 = vld [vmem:[#allocation14] sm:$0x3] }
 0x2ff   : > { %7431 = vperm.xlu1 %9172, %v10262_v27   ;;  %8900 = vmatprep.subr.bf16.mxu0 %v9716_v63  ;;  %v5043_v21 = vsel %vm12455_vm7, %v5042_v2, %v5041_v16  ;;  %v8459_v22 = vcombine.low %v5372_v8, %v5372_v8  ;;  %v5398_v23 = vunpack.c.l.b16 %v8452_v9  ;;  %v5399_v24 = vunpack.c.l.b16 %v8453_v10  ;;  %v6106_v8 = vld [vmem:[%s9982_s14 + $0xc] sm:$0x2] }
 0x300   : > { %v5045_v25 = vsel %vm12459_vm8, %v5044_v3, %v5043_v21  ;;  %v5400_v26 = vunpack.c.l.b16 %v8454_v13  ;;  %v5401_v28 = vunpack.c.l.b16 %v8455_v14  ;;  %v5402_v29 = vunpack.c.l.b16 %v8456_v17  ;;  %v6107_v13 = vld [vmem:[%s9982_s14 + $0x14] sm:$0x2]  ;;  %v6108_v14 = vld [vmem:[%s9982_s14 + $0x1c] sm:$0x2]  ;;  %v6110_v21 = vld [vmem:[%s9982_s14 + $0x2c] sm:$0x2] }
 0x301   : > { %4087 = vperm.xlu0 %9171, %v10256_v19   ;;  %8891 = vmatmul.mubr.msk.bf16.vlgmr.msra.gmra.mxu0 %vm2068_vm13, %v4631_v15  ;;  %v5047_v32 = vsel %vm12458_vm9, %v5046_v4, %v5045_v25  ;;  %v5403_v33 = vunpack.c.l.b16 %v8457_v18  ;;  %v5404_v34 = vunpack.c.l.b16 %v8458_v20  ;;  %v5405_v35 = vunpack.c.l.b16 %v8459_v22  ;;  %v6109_v15 = vld [vmem:[%s9982_s14 + $0x24] sm:$0x2] }
 0x302   : > { %v5049_v39 = vsel %vm12456_vm10, %v5048_v7, %v5047_v32  ;;  %8902 = vmatprep.mubr.msk.bf16.mxu0 %vm9717_vm12, %v9716_v63  ;;  %v5406_v40 = vrot.slane %v5398_v23, 1  ;;  %v5408_v41 = vrot.slane %v5400_v26, 7  ;;  %v5410_v42 = vrot.slane %v5401_v28, 6  ;;  %v6105_v7 = vld [vmem:[%s9982_s14 + $0x4] sm:$0x2] }
 0x303   : > { %4832 = vperm.xlu1 %9172, %v10256_v19   ;;  %v5050_v44 = vpack.c.b16 %v5049_v39, %v5049_v39  ;;  %v5412_v45 = vrot.slane %v5402_v29, 5  ;;  %v5414_v46 = vrot.slane %v5403_v33, 4  ;;  %v5416_v47 = vrot.slane %v5404_v34, 3  ;;  %v6111_v26 = vld [vmem:[%s9982_s14 + $0x34] sm:$0x2] }
 0x304   : > { %v5407_v49 = vsel %vm12461_vm4, %v5399_v24, %v5406_v40  ;;  %v5418_v50 = vrot.slane %v5405_v35, 2  ;;  %v8469_v52 = vcombine.low %v5735_v30, %v5735_v30  ;;  %v8470_v53 = vcombine.low %v5736_v31, %v5736_v31  ;;  %v6112_v30 = vld [vmem:[%s9982_s14 + $0x3c] sm:$0x2] }
 0x305   : > { %5574 = vperm.xlu0 %9171, %v10256_v19   ;;  %v5055_v54 = vsel %vm2072_vm11, %v5050_v44, 0  ;;  %v5409_v55 = vsel %vm12460_vm5, %v5408_v41, %v5407_v49  ;;  %v8471_v56 = vcombine.low %v5737_v36, %v5737_v36  ;;  %v8472_v57 = vcombine.low %v5738_v37, %v5738_v37  ;;  %v5373_v37 = vld [vmem:[#allocation14] sm:$0x3] }
 0x306   : > { %8901 = vmatpush3.bf16.msra.mxu0 %v5055_v54  ;;  %v5411_v59 = vsel %vm12457_vm6, %v5410_v42, %v5409_v55  ;;  %v8473_v60 = vcombine.low %v5739_v38, %v5739_v38  ;;  %v8474_v61 = vcombine.low %v5740_v43, %v5740_v43  ;;  %v8475_v62 = vcombine.low %v5741_v48, %v5741_v48 }
 0x307   : > { %6314 = vperm.xlu1 %9172, %v10256_v19   ;;  %8912 = vmatprep.subr.bf16.mxu0 %v9716_v63  ;;  %v8476_v0 = vcombine.low %v5742_v51, %v5742_v51  ;;  %v5768_v1 = vunpack.c.l.b16 %v8469_v52  ;;  %v5769_v2 = vunpack.c.l.b16 %v8470_v53  ;;  %v5770_v4 = vunpack.c.l.b16 %v8471_v56  ;;  %v6476_v51 = vld [vmem:[%s9982_s14 + $0xc] sm:$0x4]  ;;  %v6477_v56 = vld [vmem:[%s9982_s14 + $0x14] sm:$0x4] }
 0x308   : > { %v5771_v5 = vunpack.c.l.b16 %v8472_v57  ;;  %v5772_v6 = vunpack.c.l.b16 %v8473_v60  ;;  %v5773_v10 = vunpack.c.l.b16 %v8474_v61  ;;  %v5774_v11 = vunpack.c.l.b16 %v8475_v62  ;;  %v6478_v57 = vld [vmem:[%s9982_s14 + $0x1c] sm:$0x4]  ;;  %v6480_v62 = vld [vmem:[%s9982_s14 + $0x2c] sm:$0x4] }
 0x309   : > { %7054 = vperm.xlu0 %9171, %v10256_v19   ;;  %8903 = vmatmul.mubr.msk.bf16.vlgmr.msra.gmra.mxu0 %vm2068_vm13, %v5003_v58  ;;  %v5775_v12 = vunpack.c.l.b16 %v8476_v0  ;;  %v5776_v17 = vrot.slane %v5768_v1, 2  ;;  %v5777_v18 = vrot.slane %v5769_v2, 1  ;;  %v8486_v31 = vcombine.low %v6105_v7, %v6105_v7  ;;  %v6479_v58 = vld [vmem:[%s9982_s14 + $0x24] sm:$0x4] }
 0x30a   : > { %8914 = vmatprep.mubr.msk.bf16.mxu0 %vm9717_vm12, %v9716_v63  ;;  %v5780_v20 = vrot.slane %v5771_v5, 7  ;;  %v5782_v23 = vrot.slane %v5772_v6, 6  ;;  %v5784_v24 = vrot.slane %v5773_v10, 5  ;;  %v5786_v25 = vrot.slane %v5774_v11, 4  ;;  %v6482_v6 = vld [vmem:[%s9982_s14 + $0x3c] sm:$0x4] }
 0x30b   : > { %7794 = vperm.xlu1 %9172, %v10256_v19   ;;  %v5413_v19 = vsel %vm12455_vm7, %v5412_v45, %v5411_v59  ;;  %v5778_v28 = vsel %vm12461_vm4, %v5777_v18, %v5776_v17  ;;  %v5788_v29 = vrot.slane %v5775_v12, 3  ;;  %v8487_v32 = vcombine.low %v6106_v8, %v6106_v8 }
 0x30c   : > { %v5415_v3 = vsel %vm12459_vm8, %v5414_v46, %v5413_v19  ;;  %v5779_v34 = vsel %vm12460_vm5, %v5770_v4, %v5778_v28  ;;  %v8488_v35 = vcombine.low %v6107_v13, %v6107_v13  ;;  %v8489_v36 = vcombine.low %v6108_v14, %v6108_v14  ;;  %v5743_v13 = vld [vmem:[#allocation14] sm:$0x3]  ;;  %v6845_v28 = vld [vmem:[%s9982_s14 + $0x4] sm:$0x4] }
 0x30d   : > { %4094 = vperm.xlu0 %9171, %v10262_v27   ;;  %v5417_v9 = vsel %vm12458_vm9, %v5416_v47, %v5415_v3  ;;  %v5781_v38 = vsel %vm12457_vm6, %v5780_v20, %v5779_v34  ;;  %v8490_v39 = vcombine.low %v6109_v15, %v6109_v15  ;;  %v8491_v40 = vcombine.low %v6110_v21, %v6110_v21  ;;  %v6481_v3 = vld [vmem:[%s9982_s14 + $0x34] sm:$0x4] }
 0x30e   : > { %v5419_v16 = vsel %vm12456_vm10, %v5418_v50, %v5417_v9  ;;  %v8492_v41 = vcombine.low %v6111_v26, %v6111_v26  ;;  %v5783_v42 = vsel %vm12455_vm7, %v5782_v23, %v5781_v38  ;;  %v8493_v43 = vcombine.low %v6112_v30, %v6112_v30  ;;  %v6475_v50 = vld [vmem:[%s9982_s14 + $0x4] sm:$0x4]  ;;  %v6847_v34 = vld [vmem:[%s9982_s14 + $0x14] sm:$0x4] }
 0x30f   : > { %4839 = vperm.xlu1 %9172, %v10262_v27   ;;  %v5420_v22 = vpack.c.b16 %v5419_v16, %v5419_v16  ;;  %v6138_v44 = vunpack.c.l.b16 %v8486_v31  ;;  %v6139_v45 = vunpack.c.l.b16 %v8487_v32  ;;  %v5785_v46 = vsel %vm12459_vm8, %v5784_v24, %v5783_v42 }
 0x310   : > { %v6140_v47 = vunpack.c.l.b16 %v8488_v35  ;;  %v6141_v48 = vunpack.c.l.b16 %v8489_v36  ;;  %v6142_v49 = vunpack.c.l.b16 %v8490_v39  ;;  %v5787_v52 = vsel %vm12458_vm9, %v5786_v25, %v5785_v46  ;;  %v6848_v35 = vld [vmem:[%s9982_s14 + $0x1c] sm:$0x4]  ;;  %v6849_v36 = vld [vmem:[%s9982_s14 + $0x24] sm:$0x4]  ;;  %v6851_v46 = vld [vmem:[%s9982_s14 + $0x34] sm:$0x4] }
 0x311   : > { %5581 = vperm.xlu0 %9171, %v10262_v27   ;;  %v5425_v33 = vsel %vm2072_vm11, %v5420_v22, 0  ;;  %v6143_v53 = vunpack.c.l.b16 %v8491_v40  ;;  %v6144_v54 = vunpack.c.l.b16 %v8492_v41  ;;  %v6145_v55 = vunpack.c.l.b16 %v8493_v43  ;;  %v6850_v41 = vld [vmem:[%s9982_s14 + $0x2c] sm:$0x4] }
 0x312   : > { %8913 = vmatpush3.bf16.msra.mxu0 %v5425_v33  ;;  %v5789_v59 = vsel %vm12456_vm10, %v5788_v29, %v5787_v52  ;;  %v6147_v60 = vrot.slane %v6139_v45, 2  ;;  %v6149_v61 = vrot.slane %v6140_v47, 1  ;;  %v6152_v0 = vrot.slane %v6142_v49, 7  ;;  %v6846_v29 = vld [vmem:[%s9982_s14 + $0xc] sm:$0x4] }
 0x313   : > { %6321 = vperm.xlu1 %9172, %v10262_v27   ;;  %8924 = vmatprep.subr.bf16.mxu0 %v9716_v63  ;;  %v5790_v19 = vpack.c.b16 %v5789_v59, %v5789_v59  ;;  %v6154_v1 = vrot.slane %v6143_v53, 6  ;;  %v6156_v2 = vrot.slane %v6144_v54, 5  ;;  %v6158_v5 = vrot.slane %v6145_v55, 4  ;;  %v6852_v49 = vld [vmem:[%s9982_s14 + $0x3c] sm:$0x4] }
 0x314   : > { %v8503_v7 = vcombine.low %v6475_v50, %v6475_v50  ;;  %v8504_v8 = vcombine.low %v6476_v51, %v6476_v51  ;;  %v8505_v11 = vcombine.low %v6477_v56, %v6477_v56  ;;  %v8506_v12 = vcombine.low %v6478_v57, %v6478_v57  ;;  %v6113_v56 = vld [vmem:[#allocation14] sm:$0x3] }
 0x315   : > { %7061 = vperm.xlu0 %9171, %v10262_v27   ;;  %8915 = vmatmul.mubr.msk.bf16.vlgmr.msra.gmra.mxu0 %vm2068_vm13, %v5373_v37  ;;  %v5795_v9 = vsel %vm2072_vm11, %v5790_v19, 0  ;;  %v8507_v15 = vcombine.low %v6479_v58, %v6479_v58  ;;  %v8508_v16 = vcombine.low %v6480_v62, %v6480_v62  ;;  %v8509_v17 = vcombine.low %v6481_v3, %v6481_v3 }
 0x316   : > { %8926 = vmatprep.mubr.msk.bf16.mxu0 %vm9717_vm12, %v9716_v63  ;;  %8925 = vmatpush3.bf16.msra.mxu0 %v5795_v9  ;;  %v8510_v20 = vcombine.low %v6482_v6, %v6482_v6  ;;  %v6508_v21 = vunpack.c.l.b16 %v8503_v7  ;;  %v6509_v22 = vunpack.c.l.b16 %v8504_v8  ;;  %v6510_v24 = vunpack.c.l.b16 %v8505_v11  ;;  %v7218_v11 = vld [vmem:[%s9982_s14 + $0x1c] sm:$0x8] }
 0x317   : > { %7801 = vperm.xlu1 %9172, %v10262_v27   ;;  %v6146_v27 = vrot.slane %v6138_v44, 3  ;;  %8936 = vmatprep.subr.bf16.mxu0 %v9716_v63  ;;  %v6511_v25 = vunpack.c.l.b16 %v8506_v12  ;;  %v6512_v26 = vunpack.c.l.b16 %v8507_v15  ;;  %v6513_v31 = vunpack.c.l.b16 %v8508_v16  ;;  %v7219_v12 = vld [vmem:[%s9982_s14 + $0x24] sm:$0x8] }
 0x318   : > { %v6514_v32 = vunpack.c.l.b16 %v8509_v17  ;;  %v6515_v33 = vunpack.c.l.b16 %v8510_v20  ;;  %v6516_v38 = vrot.slane %v6508_v21, 4  ;;  %v6517_v39 = vrot.slane %v6509_v22, 3  ;;  %v7220_v17 = vld [vmem:[%s9982_s14 + $0x2c] sm:$0x8] }
 0x319   : > { %v6148_v4 = vsel %vm12461_vm4, %v6147_v60, %v6146_v27  ;;  %v6519_v40 = vrot.slane %v6510_v24, 2  ;;  %v6521_v43 = vrot.slane %v6511_v25, 1  ;;  %v6524_v44 = vrot.slane %v6513_v31, 7 }
 0x31a   : > { %v6150_v10 = vsel %vm12460_vm5, %v6149_v61, %v6148_v4  ;;  %v6526_v45 = vrot.slane %v6514_v32, 6  ;;  %v6518_v47 = vsel %vm12461_vm4, %v6517_v39, %v6516_v38  ;;  %v8520_v50 = vcombine.low %v6845_v28, %v6845_v28  ;;  %v7215_v4 = vld [vmem:[%s9982_s14 + $0x4] sm:$0x8] }
 0x31b   : > { %v6151_v14 = vsel %vm12457_vm6, %v6141_v48, %v6150_v10  ;;  %v6528_v48 = vrot.slane %v6515_v33, 5  ;;  %v8521_v51 = vcombine.low %v6846_v29, %v6846_v29  ;;  %v6520_v53 = vsel %vm12460_vm5, %v6519_v40, %v6518_v47  ;;  %v7217_v10 = vld [vmem:[%s9982_s14 + $0x14] sm:$0x8]  ;;  %v7585_v47 = vld [vmem:[%s9982_s14 + $0x4] sm:$0x8] }
 0x31c   : > { %v6153_v18 = vsel %vm12455_vm7, %v6152_v0, %v6151_v14  ;;  %v8522_v54 = vcombine.low %v6847_v34, %v6847_v34  ;;  %v8523_v55 = vcombine.low %v6848_v35, %v6848_v35  ;;  %v6522_v57 = vsel %vm12457_vm6, %v6521_v43, %v6520_v53  ;;  %v6483_v34 = vld [vmem:[#allocation14] sm:$0x3]  ;;  %v7587_v53 = vld [vmem:[%s9982_s14 + $0x14] sm:$0x8] }
 0x31d   : > { %v6155_v23 = vsel %vm12459_vm8, %v6154_v1, %v6153_v18  ;;  %8927 = vmatmul.mubr.msk.bf16.vlgmr.msra.gmra.mxu0 %vm2068_vm13, %v5743_v13  ;;  %v8524_v58 = vcombine.low %v6849_v36, %v6849_v36  ;;  %v8525_v59 = vcombine.low %v6850_v41, %v6850_v41  ;;  %v8526_v27 = vcombine.low %v6851_v46, %v6851_v46 }
 0x31e   : > { %v6157_v30 = vsel %vm12458_vm9, %v6156_v2, %v6155_v23  ;;  %8938 = vmatprep.mubr.msk.bf16.mxu0 %vm9717_vm12, %v9716_v63  ;;  %v6523_v60 = vsel %vm12455_vm7, %v6512_v26, %v6522_v57  ;;  %v8527_v61 = vcombine.low %v6852_v49, %v6852_v49  ;;  %v6878_v62 = vunpack.c.l.b16 %v8520_v50  ;;  %v7221_v23 = vld [vmem:[%s9982_s14 + $0x34] sm:$0x8]  ;;  %v7222_v26 = vld [vmem:[%s9982_s14 + $0x3c] sm:$0x8] }
 0x31f   : > { %v6159_v37 = vsel %vm12456_vm10, %v6158_v5, %v6157_v30  ;;  %v6879_v19 = vunpack.c.l.b16 %v8521_v51  ;;  %v6525_v0 = vsel %vm12459_vm8, %v6524_v44, %v6523_v60  ;;  %v6880_v1 = vunpack.c.l.b16 %v8522_v54  ;;  %v7216_v5 = vld [vmem:[%s9982_s14 + $0xc] sm:$0x8]  ;;  %v7588_v54 = vld [vmem:[%s9982_s14 + $0x1c] sm:$0x8] }
 0x320   : > { %v6160_v42 = vpack.c.b16 %v6159_v37, %v6159_v37  ;;  %v6881_v2 = vunpack.c.l.b16 %v8523_v55  ;;  %v6882_v3 = vunpack.c.l.b16 %v8524_v58  ;;  %v6527_v6 = vsel %vm12458_vm9, %v6526_v45, %v6525_v0  ;;  %v7589_v55 = vld [vmem:[%s9982_s14 + $0x24] sm:$0x8]  ;;  %v7591_v0 = vld [vmem:[%s9982_s14 + $0x34] sm:$0x8] }
 0x321   : > { %v6883_v7 = vunpack.c.l.b16 %v8525_v59  ;;  %v6884_v8 = vunpack.c.l.b16 %v8526_v27  ;;  %v6885_v9 = vunpack.c.l.b16 %v8527_v61  ;;  %v6529_v13 = vsel %vm12456_vm10, %v6528_v48, %v6527_v6  ;;  %v7586_v48 = vld [vmem:[%s9982_s14 + $0xc] sm:$0x8] }
 0x322   : > { %v6165_v52 = vsel %vm2072_vm11, %v6160_v42, 0  ;;  %v6886_v14 = vrot.slane %v6878_v62, 5  ;;  %v6887_v15 = vrot.slane %v6879_v19, 4  ;;  %v6889_v16 = vrot.slane %v6880_v1, 3  ;;  %v7590_v27 = vld [vmem:[%s9982_s14 + $0x2c] sm:$0x8] }
 0x323   : > { %8937 = vmatpush3.bf16.msra.mxu0 %v6165_v52  ;;  %v6530_v18 = vpack.c.b16 %v6529_v13, %v6529_v13  ;;  %v6891_v20 = vrot.slane %v6881_v2, 2  ;;  %v6893_v21 = vrot.slane %v6882_v3, 1  ;;  %v6896_v22 = vrot.slane %v6884_v8, 7 }
 0x324   : > { %8948 = vmatprep.subr.bf16.mxu0 %v9716_v63  ;;  %v6888_v24 = vsel %vm12461_vm4, %v6887_v15, %v6886_v14  ;;  %v6898_v25 = vrot.slane %v6885_v9, 6  ;;  %v8537_v28 = vcombine.low %v7215_v4, %v7215_v4  ;;  %v8538_v29 = vcombine.low %v7216_v5, %v7216_v5  ;;  %v6853_v9 = vld [vmem:[#allocation14] sm:$0x3] }
 0x325   : > { %v6535_v30 = vsel %vm2072_vm11, %v6530_v18, 0  ;;  %v6890_v31 = vsel %vm12460_vm5, %v6889_v16, %v6888_v24  ;;  %v8539_v32 = vcombine.low %v7217_v10, %v7217_v10  ;;  %v8540_v33 = vcombine.low %v7218_v11, %v7218_v11  ;;  %v7592_v11 = vld [vmem:[%s9982_s14 + $0x3c] sm:$0x8] }
 0x326   : > { %8939 = vmatmul.mubr.msk.bf16.vlgmr.msra.gmra.mxu0 %vm2068_vm13, %v6113_v56  ;;  %v6892_v35 = vsel %vm12457_vm6, %v6891_v20, %v6890_v31  ;;  %v8541_v36 = vcombine.low %v7219_v12, %v7219_v12  ;;  %v8542_v37 = vcombine.low %v7220_v17, %v7220_v17  ;;  %v8543_v38 = vcombine.low %v7221_v23, %v7221_v23 }
 0x327   : > { %8950 = vmatprep.mubr.msk.bf16.mxu0 %vm9717_vm12, %v9716_v63  ;;  %8949 = vmatpush3.bf16.msra.mxu0 %v6535_v30  ;;  %v6894_v39 = vsel %vm12455_vm7, %v6893_v21, %v6892_v35  ;;  %v8544_v40 = vcombine.low %v7222_v26, %v7222_v26  ;;  %v7248_v41 = vunpack.c.l.b16 %v8537_v28  ;;  %v7249_v42 = vunpack.c.l.b16 %v8538_v29 }
 0x328   : > { %8960 = vmatprep.subr.bf16.mxu0 %v9716_v63  ;;  %v6895_v43 = vsel %vm12459_vm8, %v6883_v7, %v6894_v39  ;;  %v7250_v44 = vunpack.c.l.b16 %v8539_v32  ;;  %v7251_v45 = vunpack.c.l.b16 %v8540_v33  ;;  %v7252_v46 = vunpack.c.l.b16 %v8541_v36 }
 0x329   : > { %v6897_v49 = vsel %vm12458_vm9, %v6896_v22, %v6895_v43  ;;  %v7253_v50 = vunpack.c.l.b16 %v8542_v37  ;;  %v7254_v51 = vunpack.c.l.b16 %v8543_v38  ;;  %v7255_v52 = vunpack.c.l.b16 %v8544_v40  ;;  %v7223_v40 = vld [vmem:[#allocation14] sm:$0x3] }
 0x32a   : > { %v6899_v56 = vsel %vm12456_vm10, %v6898_v25, %v6897_v49  ;;  %v7256_v57 = vrot.slane %v7248_v41, 6  ;;  %v7257_v58 = vrot.slane %v7249_v42, 5  ;;  %v7259_v59 = vrot.slane %v7250_v44, 4  ;;  %v7593_v49 = vld [vmem:[#allocation14] sm:$0x3] }
 0x32b   : > { %v6900_v60 = vpack.c.b16 %v6899_v56, %v6899_v56  ;;  %v7261_v61 = vrot.slane %v7251_v45, 3  ;;  %v7263_v62 = vrot.slane %v7252_v46, 2  ;;  %v7265_v19 = vrot.slane %v7253_v50, 1  ;;  %v1996_v50 = vld [vmem:[%s1995_s27] sm:$0xf]  ;;  %s12519_s27 = ssub.f32 1.0, %s10568_s23 }
 0x32c   : > { %v7258_v1 = vsel %vm12461_vm4, %v7257_v58, %v7256_v57  ;;  %v7268_v2 = vrot.slane %v7255_v52, 7  ;;  %v8554_v3 = vcombine.low %v7585_v47, %v7585_v47  ;;  %v8555_v4 = vcombine.low %v7586_v48, %v7586_v48  ;;  %v2001_v52 = vld [vmem:[%s2000_s3] sm:$0xf]  ;;  %s3866_s3 = ssub.f32 1.0, %s10613_s2 }
 0x32d   : > { %v6905_v5 = vsel %vm2072_vm11, %v6900_v60, 0  ;;  %v7260_v6 = vsel %vm12460_vm5, %v7259_v59, %v7258_v1  ;;  %v8556_v7 = vcombine.low %v7587_v53, %v7587_v53  ;;  %v8557_v8 = vcombine.low %v7588_v54, %v7588_v54  ;;  %v9365_v54 = vld [vmem:[%s9982_s14 + $0x8] sm:$0x1]  ;;  %v2379_v56 = vld [vmem:[%s2378_s0] sm:$0xf]  ;;  %s10658_s0 = sadd.s32 8, %s10556_s16 }
 0x32e   : > { %8951 = vmatmul.mubr.msk.bf16.vlgmr.msra.gmra.mxu0 %vm2068_vm13, %v6483_v34  ;;  %v7262_v10 = vsel %vm12457_vm6, %v7261_v61, %v7260_v6  ;;  %v8558_v12 = vcombine.low %v7589_v55, %v7589_v55  ;;  %v8559_v13 = vcombine.low %v7590_v27, %v7590_v27  ;;  %v8560_v14 = vcombine.low %v7591_v0, %v7591_v0  ;;  %v2756_v61 = vld [vmem:[%s2755_s17] sm:$0xf]  ;;  %v9366_v1 = vld [vmem:[%s9982_s14 + $0x10] sm:$0x1]  ;;  %s12530_s17 = sshll.u32 %s10602_s8, 2 }
 0x32f   : > { %8962 = vmatprep.mubr.msk.bf16.mxu0 %vm9717_vm12, %v9716_v63  ;;  %8961 = vmatpush3.bf16.msra.mxu0 %v6905_v5  ;;  %v7264_v15 = vsel %vm12455_vm7, %v7263_v62, %v7262_v10  ;;  %v7618_v16 = vunpack.c.l.b16 %v8554_v3  ;;  %v7619_v17 = vunpack.c.l.b16 %v8555_v4  ;;  %v7620_v20 = vunpack.c.l.b16 %v8556_v7  ;;  %v9367_v5 = vld [vmem:[%s9982_s14] sm:$0x1] }
 0x330   : > { %8972 = vmatprep.subr.bf16.mxu0 %v9716_v63  ;;  %v7266_v18 = vsel %vm12459_vm8, %v7265_v19, %v7264_v15  ;;  %v7621_v21 = vunpack.c.l.b16 %v8557_v8  ;;  %v7622_v22 = vunpack.c.l.b16 %v8558_v12  ;;  %v8561_v24 = vcombine.low %v7592_v11, %v7592_v11  ;;  %v9368_v15 = vld [vmem:[%s9982_s14 + $0x18] sm:$0x1] }
 0x331   : > { %v7267_v23 = vsel %vm12458_vm9, %v7254_v51, %v7266_v18  ;;  %v7623_v25 = vunpack.c.l.b16 %v8559_v13  ;;  %v7624_v26 = vunpack.c.l.b16 %v8560_v14  ;;  %v7626_v29 = vrot.slane %v7618_v16, 7 }
 0x332   : > { %v7269_v28 = vsel %vm12456_vm10, %v7268_v2, %v7267_v23  ;;  %v7627_v30 = vrot.slane %v7619_v17, 6  ;;  %v7629_v31 = vrot.slane %v7620_v20, 5  ;;  %v7631_v33 = vrot.slane %v7621_v21, 4 }
 0x333   : > { %v7270_v32 = vpack.c.b16 %v7269_v28, %v7269_v28  ;;  %v7633_v34 = vrot.slane %v7622_v22, 3  ;;  %v7635_v36 = vrot.slane %v7623_v25, 2  ;;  %v7637_v39 = vrot.slane %v7624_v26, 1  ;;  %v9369_v22 = vld [vmem:[%s9982_s14] sm:$0x1] }
 0x334   : > { %v7628_v35 = vsel %vm12461_vm4, %v7627_v30, %v7626_v29  ;;  %v7625_v41 = vunpack.c.l.b16 %v8561_v24  ;;  %v1997_v51 = vstv %s12516_s4  ;;  %v2002_v53 = vstv %s10566_s12  ;;  %s12520_s4 = sshll.u32 %s10574_s28, 2  ;;  %s12521_s12 = sshll.u32 %s10576_s13, 2 }
 0x335   : > { %v7275_v37 = vsel %vm2072_vm11, %v7270_v32, 0  ;;  %v7630_v38 = vsel %vm12460_vm5, %v7629_v31, %v7628_v35  ;;  %v2142_v55 = vunpack.c.l.bf16 %v9365_v54  ;;  %v2380_v57 = vstv %s12519_s27  ;;  %s2383_s11 = scalar_lea.vmem [#allocation2], %s12520_s4  ;;  %s2750_s20 = scalar_lea.vmem [#allocation2], %s12521_s12 }
 0x336   : > { %8963 = vmatmul.mubr.msk.bf16.vlgmr.msra.gmra.mxu0 %vm2068_vm13, %v6853_v9  ;;  %v7632_v42 = vsel %vm12457_vm6, %v7631_v33, %v7630_v38  ;;  %v2384_v58 = vld [vmem:[%s2383_s11] sm:$0xf]  ;;  %v2385_v59 = vstv %s10568_s23  ;;  %v2752_v60 = vstv %s12522_s21  ;;  %v2757_v62 = vstv %s10578_s9  ;;  %s10655_s28 = sld [smem:[#allocation8 + %s10626_s10]]  ;;  %s12525_s13 = sshll.u32 %s10587_s7, 2 }
 0x337   : > { %8974 = vmatprep.mubr.msk.bf16.mxu0 %vm9717_vm12, %v9716_v63  ;;  %8973 = vmatpush3.bf16.msra.mxu0 %v7275_v37  ;;  %v7634_v43 = vsel %vm12455_vm7, %v7633_v34, %v7632_v42  ;;  %v2751_v27 = vld [vmem:[%s2750_s20] sm:$0xf]  ;;  %v1998_v19 = vmul.f32 %v1997_v51, %v1996_v50  ;;  %v2003_v0 = vmul.f32 %v2002_v53, %v2001_v52  ;;  %s10661_s23 = sld [smem:[#allocation4 + %s10626_s10]]  ;;  %v2143_v2 = vunpack.c.l.bf16 %v9366_v1  ;;  %s3123_s9 = scalar_lea.vmem [#allocation2], %s12525_s13  ;;  %v9373_v51 = vld [vmem:[%s9982_s14 + $0x28] sm:$0x1] }
 0x338   : > { %8984 = vmatprep.subr.bf16.mxu0 %v9716_v63  ;;  %v7636_v44 = vsel %vm12459_vm8, %v7635_v36, %v7634_v43  ;;  %v2381_v3 = vmul.f32 %v2380_v57, %v2379_v56  ;;  %v2386_v4 = vmul.f32 %v2385_v59, %v2384_v58  ;;  %v2141_v6 = vunpack.c.l.bf16 %v9367_v5  ;;  %s12524_s21 = sld [smem:[#allocation45_spill]]  ;;  %v3124_v10 = vld [vmem:[%s3123_s9] sm:$0xf]  ;;  %s12527_s27 = sshll.u32 %s10592_s19, 2  ;;  %v9374_v57 = vld [vmem:[%s9982_s14 + $0x18] sm:$0x1] }
 0x339   : > { %v7638_v45 = vsel %vm12458_vm9, %v7637_v39, %v7636_v44  ;;  %v2157_v7 = vrot.slane %v2142_v55, 7  ;;  %v2753_v8 = vmul.f32 %v2752_v60, %v2751_v27  ;;  %v2758_v9 = vmul.f32 %v2757_v62, %v2756_v61  ;;  %s12526_s20 = ssub.f32 1.0, %s10599_s5  ;;  %s3128_s4 = scalar_lea.vmem [#allocation2], %s12527_s27  ;;  %v9370_v34 = vld [vmem:[%s9982_s14 + $0x20] sm:$0x1] }
 0x33a   : > { %v7639_v46 = vsel %vm12456_vm10, %v7625_v41, %v7638_v45  ;;  %v3129_v12 = vld [vmem:[%s3128_s4] sm:$0xf]  ;;  %v3130_v13 = vstv %s10599_s5  ;;  %s10676_s10 = sld [smem:[#allocation4 + %s10658_s0]]  ;;  %v10679_v14 = vstv %s10590_s15  ;;  %s8399_s11 = sshll.u32 %s10618_s1, 2  ;;  %v2144_v16 = vunpack.c.l.bf16 %v9368_v15  ;;  %v9372_v44 = vld [vmem:[%s9982_s14 + $0x8] sm:$0x1] }
 0x33b   : > { %v7640_v47 = vpack.c.b16 %v7639_v46, %v7639_v46  ;;  %v3125_v11 = vstv %s12526_s20  ;;  %s10684_s7 = sld [smem:[#allocation8 + %s10658_s0]]  ;;  %v10686_v17 = vadd.f32 %v2003_v0, %v1998_v19  ;;  %v3497_v20 = vstv %s12529_s30  ;;  %s8400_s15 = sshll.u32 %s10621_s29, 2  ;;  %v9375_v60 = vld [vmem:[%s9982_s14] sm:$0x2]  ;;  %v9376_v62 = vld [vmem:[%s9982_s14 + $0x8] sm:$0x2] }
 0x33c   : > { %s4238_s5 = ssub.f32 1.0, %s10623_s25  ;;  %v2159_v21 = vrot.slane %v2143_v2, 6  ;;  %v2514_v23 = vunpack.c.l.bf16 %v9369_v22  ;;  %v3126_v24 = vmul.f32 %v3125_v11, %v3124_v10  ;;  %v3131_v25 = vmul.f32 %v3130_v13, %v3129_v12  ;;  %s3500_s13 = scalar_lea.vmem [#allocation2], %s12530_s17  ;;  %v9377_v2 = vld [vmem:[%s9982_s14 + $0x30] sm:$0x1] }
 0x33d   : > { %v7645_v48 = vsel %vm2072_vm11, %v7640_v47, 0  ;;  %v3501_v26 = vld [vmem:[%s3500_s13] sm:$0xf]  ;;  %v3502_v28 = vstv %s10604_s22  ;;  %v2158_v29 = vsel %vm12461_vm4, %v2157_v7, %v2141_v6  ;;  %v10702_v30 = vadd.f32 %v2386_v4, %v2381_v3  ;;  %s12531_s9 = sshll.u32 %s10607_s26, 2  ;;  %s3873_s22 = scalar_lea.vmem [#allocation2], %s8383_s18 }
 0x33e   : > { %8975 = vmatmul.mubr.msk.bf16.vlgmr.msra.gmra.mxu0 %vm2068_vm13, %v7223_v40  ;;  %s12528_s12 = sshll.u32 %s12524_s21, 2  ;;  %s10700_s21 = sld [smem:[#allocation10 + %s10658_s0]]  ;;  %v10704_v31 = vadd.f32 %v2758_v9, %v2753_v8  ;;  %v3870_v33 = vstv %s3866_s3  ;;  %v2145_v35 = vunpack.c.l.bf16 %v9370_v34  ;;  %v3874_v37 = vld [vmem:[%s3873_s22] sm:$0xf]  ;;  %v3875_v38 = vstv %s10613_s2  ;;  %v9371_v40 = vld [vmem:[%s9982_s14 + $0x10] sm:$0x1] }
 0x33f   : > { %8986 = vmatprep.mubr.msk.bf16.mxu0 %vm9717_vm12, %v9716_v63  ;;  %8985 = vmatpush3.bf16.msra.mxu0 %v7645_v48  ;;  %s3495_s19 = scalar_lea.vmem [#allocation2], %s12528_s12  ;;  %s3868_s20 = scalar_lea.vmem [#allocation2], %s12531_s9  ;;  %v2161_v39 = vrot.slane %v2144_v16, 5  ;;  %v2516_v41 = vunpack.c.l.bf16 %v9371_v40  ;;  %v3503_v42 = vmul.f32 %v3502_v28, %v3501_v26  ;;  %v2160_v43 = vsel %vm12460_vm5, %v2159_v21, %v2158_v29  ;;  %v9378_v9 = vld [vmem:[%s9982_s14 + $0x20] sm:$0x1] }
 0x340   : > { %v3496_v18 = vld [vmem:[%s3495_s19] sm:$0xf]  ;;  %s8417_s8 = sshll.u32 %s10655_s28, 2  ;;  %v2515_v45 = vunpack.c.l.bf16 %v9372_v44  ;;  %v2530_v46 = vrot.slane %v2514_v23, 1  ;;  %v10721_v47 = vadd.f32 %v3131_v25, %v3126_v24  ;;  %s4240_s2 = scalar_lea.vmem [#allocation2], %s8399_s11  ;;  %v4242_v50 = vstv %s4238_s5 }
 0x341   : > { %v3869_v32 = vld [vmem:[%s3868_s20] sm:$0xf]  ;;  %v3498_v36 = vmul.f32 %v3497_v20, %v3496_v18  ;;  %s4611_s26 = ssub.f32 1.0, %s10665_s6  ;;  %s8416_s3 = sshll.u32 %s10661_s23, 2  ;;  %v2146_v52 = vunpack.c.l.bf16 %v9373_v51  ;;  %v3876_v53 = vmul.f32 %v3875_v38, %v3874_v37  ;;  %v4247_v55 = vstv %s10623_s25  ;;  %v9379_v12 = vld [vmem:[%s9982_s14 + $0x38] sm:$0x1] }
 0x342   : > { %v3871_v48 = vmul.f32 %v3870_v33, %v3869_v32  ;;  %s4245_s18 = scalar_lea.vmem [#allocation2], %s8400_s15  ;;  %v2163_v56 = vrot.slane %v2145_v35, 4  ;;  %s8433_s1 = sshll.u32 %s10676_s10, 2  ;;  %v2517_v58 = vunpack.c.l.bf16 %v9374_v57  ;;  %v2162_v59 = vsel %vm12457_vm6, %v2161_v39, %v2160_v43  ;;  %v9380_v28 = vld [vmem:[%s9982_s14 + $0x28] sm:$0x1] }
 0x343   : > { %v4246_v54 = vld [vmem:[%s4245_s18] sm:$0xf]  ;;  %s8434_s0 = sshll.u32 %s10684_s7, 2  ;;  %v2532_v27 = vrot.slane %v2516_v41, 7  ;;  %s10738_s27 = sld [smem:[#allocation8 + %s10719_s24]]  ;;  %v2886_v61 = vunpack.c.l.bf16 %v9375_v60  ;;  %v2887_v19 = vunpack.c.l.bf16 %v9376_v62  ;;  %v10742_v0 = vadd.f32 %v3503_v42, %v3498_v36 }
 0x344   : > { %v2147_v3 = vunpack.c.l.bf16 %v9377_v2  ;;  %v2531_v4 = vsel %vm12461_vm4, %v2515_v45, %v2530_v46  ;;  %v4248_v5 = vmul.f32 %v4247_v55, %v4246_v54  ;;  %s4618_s25 = scalar_lea.vmem [#allocation2], %s8417_s8  ;;  %v4620_v7 = vstv %s10665_s6  ;;  %s4983_s29 = ssub.f32 1.0, %s10700_s21  ;;  %v9381_v37 = vld [vmem:[%s9982_s14 + $0x18] sm:$0x2]  ;;  %v9382_v42 = vld [vmem:[%s9982_s14 + $0x10] sm:$0x2] }
 0x345   : > { %v4619_v6 = vld [vmem:[%s4618_s25] sm:$0xf]  ;;  %v2165_v8 = vrot.slane %v2146_v52, 3  ;;  %v2518_v10 = vunpack.c.l.bf16 %v9378_v9  ;;  %v10753_v11 = vadd.f32 %v3876_v53, %v3871_v48  ;;  %v2148_v13 = vunpack.c.l.bf16 %v9379_v12  ;;  %s10758_s28 = sld [smem:[#allocation4 + %s10719_s24]]  ;;  %s4613_s4 = scalar_lea.vmem [#allocation2], %s8416_s3 }
 0x346   : > { %8987 = vmatmul.mubr.msk.bf16.vlgmr.msra.gmra.mxu0 %vm2068_vm13, %v7593_v49  ;;  %v4241_v49 = vld [vmem:[%s4240_s2] sm:$0xf]  ;;  %v2164_v15 = vsel %vm12455_vm7, %v2163_v56, %v2162_v59  ;;  %v2534_v16 = vrot.slane %v2517_v58, 6  ;;  %v4615_v20 = vstv %s4611_s26  ;;  %v2533_v21 = vsel %vm12460_vm5, %v2532_v27, %v2531_v4  ;;  %s10768_s11 = sld [smem:[#allocation10 + %s10719_s24]]  ;;  %s4985_s23 = scalar_lea.vmem [#allocation2], %s8433_s1 }
 0x347   : > { %v10744_v1 = vmul.f32 %v4242_v50, %v4241_v49  ;;  %v4614_v18 = vld [vmem:[%s4613_s4] sm:$0xf]  ;;  %v2902_v22 = vrot.slane %v2886_v61, 2  ;;  %v2903_v23 = vrot.slane %v2887_v19, 1  ;;  %v4621_v24 = vmul.f32 %v4620_v7, %v4619_v6  ;;  %s4990_s6 = scalar_lea.vmem [#allocation2], %s8434_s0  ;;  %s10777_s12 = sadd.s32 10, %s10556_s16 }
 0x348   : > { %v2167_v25 = vrot.slane %v2147_v3, 2  ;;  %v4992_v26 = vstv %s10700_s21  ;;  %v2519_v29 = vunpack.c.l.bf16 %v9380_v28  ;;  %v2166_v32 = vsel %vm12459_vm8, %v2165_v8, %v2164_v15  ;;  %v4986_v33 = vld [vmem:[%s4985_s23] sm:$0xf]  ;;  %v9383_v44 = vld [vmem:[%s9982_s14 + $0x30] sm:$0x1]  ;;  %s10788_s7 = sld [smem:[#allocation8 + %s10777_s12]] }
 0x349   : > { %v4987_v34 = vstv %s4983_s29  ;;  %v4991_v35 = vld [vmem:[%s4990_s6] sm:$0xf]  ;;  %v2536_v36 = vrot.slane %v2518_v10, 5  ;;  %v2889_v38 = vunpack.c.l.bf16 %v9381_v37  ;;  %v4616_v39 = vmul.f32 %v4615_v20, %v4614_v18  ;;  %s8451_s10 = sshll.u32 %s10738_s27, 2  ;;  %v9385_v50 = vld [vmem:[%s9982_s14 + $0x8] sm:$0x2] }
 0x34a   : > { %v2169_v40 = vrot.slane %v2148_v13, 1  ;;  %v2535_v41 = vsel %vm12457_vm6, %v2534_v16, %v2533_v21  ;;  %v2888_v43 = vunpack.c.l.bf16 %v9382_v42  ;;  %vm2124_vm14 = vcmask 519168   ;;  %v9384_v48 = vld [vmem:[%s9982_s14] sm:$0x2]  ;;  %v9386_v56 = vld [vmem:[%s9982_s14 + $0x38] sm:$0x1] }
 0x34b   : > { %v2520_v45 = vunpack.c.l.bf16 %v9383_v44  ;;  %v2904_v46 = vsel %vm12461_vm4, %v2903_v23, %v2902_v22  ;;  %v3259_v49 = vunpack.c.l.bf16 %v9384_v48  ;;  %v3260_v51 = vunpack.c.l.bf16 %v9385_v50  ;;  %v9387_v59 = vld [vmem:[%s9982_s14 + $0x20] sm:$0x2]  ;;  %s10794_s19 = sld [smem:[#allocation4 + %s10777_s12]]  ;;  %s8450_s30 = sshll.u32 %s10758_s28, 2  ;;  %v9388_v2 = vld [vmem:[%s9982_s14 + $0x10] sm:$0x2] }
 0x34c   : > { %v2168_v52 = vsel %vm12458_vm9, %v2167_v25, %v2166_v32  ;;  %v4988_v53 = vmul.f32 %v4987_v34, %v4986_v33  ;;  %v4993_v54 = vmul.f32 %v4992_v26, %v4991_v35  ;;  %v2538_v55 = vrot.slane %v2519_v29, 4  ;;  %s10808_s5 = sld [smem:[#allocation10 + %s10777_s12]]  ;;  %s10811_s15 = sadd.s32 11, %s10556_s16  ;;  %v9389_v12 = vld [vmem:[%s9982_s14 + $0x28] sm:$0x2]  ;;  %v2121_v29 = vpop.permute.xlu0 %2120 }
 0x34d   : > { %v2521_v57 = vunpack.c.l.bf16 %v9386_v56  ;;  %v2537_v58 = vsel %vm12455_vm7, %v2536_v36, %v2535_v41  ;;  %v2890_v27 = vunpack.c.l.bf16 %v9387_v59  ;;  %v2906_v60 = vrot.slane %v2889_v38, 7  ;;  %s5353_s17 = ssub.f32 1.0, %s10768_s11  ;;  %s5360_s13 = scalar_lea.vmem [#allocation2], %s8451_s10  ;;  %v9391_v26 = vld [vmem:[%s9982_s14 + $0x8] sm:$0x4] }
 0x34e   : > { %v10797_v61 = vadd.f32 %v4248_v5, %v10744_v1  ;;  %v10799_v62 = vadd.f32 %v4621_v24, %v4616_v39  ;;  %v2905_v19 = vsel %vm12460_vm5, %v2888_v43, %v2904_v46  ;;  %v3261_v3 = vunpack.c.l.bf16 %v9388_v2  ;;  %s10824_s21 = sld [smem:[#allocation8 + %s10811_s15]]  ;;  %v9390_v24 = vld [vmem:[%s9982_s14] sm:$0x4]  ;;  %v9392_v34 = vld [vmem:[%s9982_s14 + $0x30] sm:$0x2]  ;;  %s5355_s20 = scalar_lea.vmem [#allocation2], %s8450_s30 }
 0x34f   : > { %v10805_v6 = vsel %vm12456_vm10, %v2169_v40, %v2168_v52  ;;  %v2540_v7 = vrot.slane %v2520_v45, 3  ;;  %v3275_v1 = vrot.slane %v3259_v49, 3  ;;  %v3276_v5 = vrot.slane %v3260_v51, 2  ;;  %v9393_v36 = vld [vmem:[%s9982_s14 + $0x38] sm:$0x2]  ;;  %s10833_s9 = sld [smem:[#allocation4 + %s10811_s15]] }
 0x350   : > { %v10814_v9 = vadd.f32 %v4993_v54, %v4988_v53  ;;  %v2539_v10 = vsel %vm12459_vm8, %v2538_v55, %v2537_v58  ;;  %v2891_v13 = vunpack.c.l.bf16 %v9389_v12  ;;  %v2542_v16 = vrot.slane %v2521_v57, 2  ;;  %v5356_v40 = vld [vmem:[%s5355_s20] sm:$0xf]  ;;  %s8468_s22 = sshll.u32 %s10788_s7, 2  ;;  %s10840_s8 = sld [smem:[#allocation10 + %s10811_s15]] }
 0x351   : > { %v5362_v18 = vstv %s10768_s11  ;;  %v2907_v20 = vsel %vm12457_vm6, %v2906_v60, %v2905_v19  ;;  %v2908_v21 = vrot.slane %v2890_v27, 6  ;;  %v3278_v23 = vrot.slane %v3261_v3, 1  ;;  %v9394_v43 = vld [vmem:[%s9982_s14 + $0x20] sm:$0x2]  ;;  %s8467_s24 = sshll.u32 %s10794_s19, 2  ;;  %s5730_s26 = scalar_lea.vmem [#allocation2], %s8468_s22 }
 0x352   : > { %v3631_v25 = vunpack.c.l.bf16 %v9390_v24  ;;  %v3632_v28 = vunpack.c.l.bf16 %v9391_v26  ;;  %v2541_v33 = vsel %vm12458_vm9, %v2540_v7, %v2539_v10  ;;  %v2892_v35 = vunpack.c.l.bf16 %v9392_v34  ;;  %v9395_v49 = vld [vmem:[%s9982_s14 + $0x18] sm:$0x2]  ;;  %v9396_v51 = vld [vmem:[%s9982_s14 + $0x10] sm:$0x4]  ;;  %s5723_s2 = ssub.f32 1.0, %s10808_s5  ;;  %s5725_s18 = scalar_lea.vmem [#allocation2], %s8467_s24  ;;  %v2495_v34 = vpop.permute.xlu0 %2494 }
 0x353   : > { %v2893_v37 = vunpack.c.l.bf16 %v9393_v36  ;;  %v3277_v38 = vsel %vm12461_vm4, %v3276_v5, %v3275_v1  ;;  %v5357_v41 = vstv %s5353_s17  ;;  %v2910_v42 = vrot.slane %v2891_v13, 5  ;;  %v9397_v27 = vld [vmem:[%s9982_s14 + $0x28] sm:$0x2]  ;;  %s10876_s27 = sadd.s32 12, %s10556_s16  ;;  %s10930_s12 = sadd.s32 13, %s10556_s16 }
 0x354   : > { %v3263_v44 = vunpack.c.l.bf16 %v9394_v43  ;;  %v2909_v48 = vsel %vm12455_vm7, %v2908_v21, %v2907_v20  ;;  %v3262_v50 = vunpack.c.l.bf16 %v9395_v49  ;;  %v3633_v52 = vunpack.c.l.bf16 %v9396_v51  ;;  %v9400_v20 = vld [vmem:[%s9982_s14 + $0x38] sm:$0x2]  ;;  %s8485_s3 = sshll.u32 %s10824_s21, 2  ;;  %s10889_s28 = sld [smem:[#allocation4 + %s10876_s27]] }
 0x355   : > { %v3279_v54 = vsel %vm12460_vm5, %v3278_v23, %v3277_v38  ;;  %v3647_v55 = vrot.slane %v3631_v25, 4  ;;  %v3648_v56 = vrot.slane %v3632_v28, 3  ;;  %v10849_v58 = vsel %vm12456_vm10, %v2542_v16, %v2541_v33  ;;  %v5731_v16 = vld [vmem:[%s5730_s26] sm:$0xf]  ;;  %s8484_s1 = sshll.u32 %s10833_s9, 2  ;;  %s6100_s25 = scalar_lea.vmem [#allocation2], %s8485_s3 }
 0x356   : > { %v5358_v59 = vmul.f32 %v5357_v41, %v5356_v40  ;;  %v3264_v60 = vunpack.c.l.bf16 %v9397_v27  ;;  %v2911_v19 = vsel %vm12459_vm8, %v2910_v42, %v2909_v48  ;;  %v2912_v2 = vrot.slane %v2892_v35, 4  ;;  %v5726_v25 = vld [vmem:[%s5725_s18] sm:$0xf]  ;;  %s6093_s0 = ssub.f32 1.0, %s10840_s8  ;;  %s6095_s29 = scalar_lea.vmem [#allocation2], %s8484_s1 }
 0x357   : > { %v3281_v3 = vrot.slane %v3263_v44, 7  ;;  %v3280_v12 = vsel %vm12457_vm6, %v3262_v50, %v3279_v54  ;;  %v3650_v13 = vrot.slane %v3633_v52, 2  ;;  %v3266_v21 = vunpack.c.l.bf16 %v9400_v20  ;;  %v9401_v48 = vld [vmem:[%s9982_s14 + $0x20] sm:$0x4]  ;;  %v9402_v50 = vld [vmem:[%s9982_s14 + $0x28] sm:$0x4] }
 0x358   : > { %v5727_v26 = vstv %s5723_s2  ;;  %v3283_v28 = vrot.slane %v3264_v60, 6  ;;  %v2913_v38 = vsel %vm12458_vm9, %v2912_v2, %v2911_v19  ;;  %v3635_v49 = vunpack.c.l.bf16 %v9401_v48  ;;  %v6101_v54 = vld [vmem:[%s6100_s25] sm:$0xf]  ;;  %s10899_s4 = sld [smem:[#allocation8 + %s10876_s27]]  ;;  %s11000_s22 = sadd.s32 14, %s10556_s16 }
 0x359   : > { %v5728_v42 = vmul.f32 %v5727_v26, %v5726_v25  ;;  %v3287_v43 = vrot.slane %v3266_v21, 4  ;;  %v3636_v51 = vunpack.c.l.bf16 %v9402_v50  ;;  %v6096_v60 = vld [vmem:[%s6095_s29] sm:$0xf]  ;;  %v2867_v25 = vpop.permute.xlu1 %2866  ;;  %s10904_s11 = sld [smem:[#allocation10 + %s10876_s27]]  ;;  %vm2341_vm15 = vcmask 516096  }
 0x35a   : > { %v9403_v19 = vld [vmem:[%s9982_s14] sm:$0x4]  ;;  %s8501_s23 = sshll.u32 %s10889_s28, 2  ;;  %s10946_s19 = sld [smem:[#allocation4 + %s10930_s12]]  ;;  %vm2342_vm0 = vsmask.f32 256 }
 0x35b   : > { %v4004_v2 = vunpack.c.l.bf16 %v9403_v19  ;;  %v3655_v20 = vrot.slane %v3636_v51, 7  ;;  %v9411_v19 = vld [vmem:[%s9982_s14 + $0x38] sm:$0x4]  ;;  %s6465_s7 = scalar_lea.vmem [#allocation2], %s8501_s23  ;;  %s10952_s30 = sld [smem:[#allocation8 + %s10930_s12]]  ;;  %vm11029_vm2 = vmand %vm2341_vm15, %vm2342_vm0  ;;  %vm3086_vm3 = vcmask 517121  }
 0x35c   : > { %s10961_s17 = sld [smem:[#allocation10 + %s10930_s12]]  ;;  %vm2714_vm1 = vsmask.f32 7938  ;;  %vm3087_vm0 = vsmask.f32 1280  ;;  %s11081_s28 = sadd.s32 15, %s10556_s16 }
 0x35d   : > { %s11011_s24 = sld [smem:[#allocation8 + %s11000_s22]] }
 0x35e   : > { %s8502_s6 = sshll.u32 %s10899_s4, 2  ;;  %s11017_s2 = sld [smem:[#allocation4 + %s11000_s22]] }
 0x35f   : > { %s6463_s10 = ssub.f32 1.0, %s10904_s11  ;;  %s6470_s15 = scalar_lea.vmem [#allocation2], %s8502_s6 }
 0x360   : > { %s8518_s21 = sshll.u32 %s10946_s19, 2  ;;  %s12532_s26 = sld [smem:[#allocation44_spill]] }
 0x361   : > { %s11021_s3 = sld [smem:[#allocation10 + %s11000_s22]] }
 0x362   : > { %s6833_s9 = ssub.f32 1.0, %s10961_s17 }
 0x363   : > { %s8536_s27 = sshll.u32 %s11011_s24, 2  ;;  %s11125_s12 = sld [smem:[#allocation10 + %s11081_s28]] }
 0x364   : > { %s8535_s25 = sshll.u32 %s11017_s2, 2  ;;  %s7210_s4 = scalar_lea.vmem [#allocation2], %s8536_s27 }
 0x365   : > { %s7205_s16 = scalar_lea.vmem [#allocation2], %s8535_s25 }
 0x367   : > { %s7203_s29 = ssub.f32 1.0, %s11021_s3 }
 0x387   : > { %v2110_v4 = vpop.f32.mrf.mxu0 }
 0x388   : > { %v2111_v8 = vadd.f32 %v2110_v4, %v10686_v17  ;;  %v5361_v17 = vld [vmem:[%s5360_s13] sm:$0xf]  ;;  %v9398_v4 = vld [vmem:[%s9982_s14 + $0x18] sm:$0x4]  ;;  %s8519_s13 = sshll.u32 %s10952_s30, 2 }
 0x389   : > { %v8808_v15 = vpop.f32.mrf.mxu0  ;;  %v5363_v46 = vmul.f32 %v5362_v18, %v5361_v17  ;;  %v3634_v7 = vunpack.c.l.bf16 %v9398_v4  ;;  %v5732_v18 = vstv %s10808_s5  ;;  %s10954_s5 = sld [smem:[#allocation3]]  ;;  %s6840_s20 = scalar_lea.vmem [#allocation2], %s8519_s13 }
 0x38a   : > { %v2116_v22 = vmax.f32 %v2111_v8, 0.0  ;;  %v9399_v8 = vld [vmem:[%s9982_s14 + $0x30] sm:$0x2] }
 0x38b   : > { %v2113_v32 = vpop.f32.mrf.mxu0  ;;  %v3265_v10 = vunpack.c.l.bf16 %v9399_v8  ;;  %v10864_v24 = vadd.f32 %v5363_v46, %v5358_v59  ;;  %v3652_v33 = vrot.slane %v3634_v7, 1 }
 0x38c   : > { %v2123_v39 = vmul.f32 %v2121_v29, %v2116_v22  ;;  %v3649_v22 = vsel %vm12461_vm4, %v3648_v56, %v3647_v55  ;;  %v10869_v29 = vrot.slane %v2893_v37, 3  ;;  %v3282_v32 = vsel %vm12455_vm7, %v3281_v3, %v3280_v12  ;;  %v9404_v3 = vld [vmem:[%s9982_s14 + $0x8] sm:$0x4] }
 0x38d   : > { %v8809_v45 = vpop.f32.mrf.mxu0  ;;  %v3651_v40 = vsel %vm12460_vm5, %v3650_v13, %v3649_v22  ;;  %v3285_v37 = vrot.slane %v3265_v10, 5  ;;  %v3284_v46 = vsel %vm12459_vm8, %v3283_v28, %v3282_v32  ;;  %v6102_v55 = vstv %s10840_s8  ;;  %v9406_v10 = vld [vmem:[%s9982_s14 + $0x38] sm:$0x4]  ;;  %s6835_s8 = scalar_lea.vmem [#allocation2], %s8518_s21 }
 0x38e   : > { %v2125_v53 = vsel %vm2124_vm14, %v2123_v39, 0.0  ;;  %v5733_v39 = vmul.f32 %v5732_v18, %v5731_v16  ;;  %v3653_v56 = vsel %vm12457_vm6, %v3652_v33, %v3651_v40  ;;  %v4005_v4 = vunpack.c.l.bf16 %v9404_v3 }
 0x38f   : > { %v2126_v57 = vrot.slane %v2125_v53, 4  ;;  %v3638_v12 = vunpack.c.l.bf16 %v9406_v10  ;;  %v6103_v18 = vmul.f32 %v6102_v55, %v6101_v54  ;;  %v4020_v32 = vrot.slane %v4004_v2, 5  ;;  %v3240_v10 = vpop.permute.xlu1 %3239 }
 0x390   : > { %v4021_v33 = vrot.slane %v4005_v4, 4  ;;  %v4011_v2 = vunpack.c.l.bf16 %v9411_v19 }
 0x391   : > { %v2127_v1 = vadd.f32 %v2126_v57, %v2125_v53  ;;  %v2484_v5 = vpop.f32.mrf.mxu0  ;;  %v6097_v53 = vstv %s6093_s0  ;;  %s12535_s0 = sld [smem:[#allocation56_spill]] }
 0x392   : > { %v2485_v15 = vadd.f32 %v2484_v5, %v10702_v30  ;;  %v9405_v5 = vld [vmem:[%s9982_s14 + $0x30] sm:$0x4]  ;;  %v6098_v22 = vmul.f32 %v6097_v53, %v6096_v60 }
 0x393   : > { %v2128_v17 = vrot.slane %v2127_v1, 2  ;;  %v8820_v23 = vpop.f32.mrf.mxu0  ;;  %v3637_v8 = vunpack.c.l.bf16 %v9405_v5  ;;  %v9413_v5 = vld [vmem:[%s9982_s14 + $0x8] sm:$0x8] }
 0x394   : > { %v2490_v30 = vmax.f32 %v2485_v15, 0.0  ;;  %v10918_v51 = vadd.f32 %v6103_v18, %v6098_v22  ;;  %v9414_v18 = vld [vmem:[%s9982_s14 + $0x28] sm:$0x4]  ;;  %v6472_v22 = vstv %s10904_s11  ;;  %s11097_s11 = sld [smem:[#allocation8 + %s11081_s28]] }
 0x395   : > { %v2129_v35 = vadd.f32 %v2128_v17, %v2127_v1  ;;  %v2487_v36 = vpop.f32.mrf.mxu0  ;;  %v3286_v1 = vsel %vm12458_vm9, %v3285_v37, %v3284_v46  ;;  %v3654_v17 = vsel %vm12455_vm7, %v3635_v49, %v3653_v56  ;;  %v3657_v40 = vrot.slane %v3637_v8, 6  ;;  %v9410_v56 = vld [vmem:[%s9982_s14 + $0x30] sm:$0x4] }
 0x396   : > { %v2497_v41 = vmul.f32 %v2495_v34, %v2490_v30  ;;  %v10910_v36 = vadd.f32 %v5733_v39, %v5728_v42  ;;  %v10916_v49 = vsel %vm12456_vm10, %v3287_v43, %v3286_v1  ;;  %v9409_v43 = vld [vmem:[%s9982_s14 + $0x20] sm:$0x4]  ;;  %v4377_v8 = vunpack.c.l.bf16 %v9413_v5 }
 0x397   : > { %v2130_v44 = vrot.slane %v2129_v35, 1  ;;  %v8821_v45 = vpop.f32.mrf.mxu0  ;;  %v4008_v55 = vunpack.c.l.bf16 %v9409_v43 }
 0x398   : > { %v2498_v52 = vsel %vm2124_vm14, %v2497_v41, 0.0  ;;  %v9408_v45 = vld [vmem:[%s9982_s14 + $0x18] sm:$0x4] }
 0x399   : > { %v2131_v57 = vadd.f32 %v2130_v44, %v2129_v35  ;;  %v2499_v59 = vrot.slane %v2498_v52, 4  ;;  %v2856_v27 = vpop.f32.mrf.mxu0  ;;  %v10908_v35 = vsel %vm12456_vm10, %v10869_v29, %v2913_v38  ;;  %v3656_v44 = vsel %vm12459_vm8, %v3655_v20, %v3654_v17 }
 0x39a   : > { %v2857_v7 = vadd.f32 %v2856_v27, %v10704_v31  ;;  %v9407_v31 = vld [vmem:[%s9982_s14 + $0x10] sm:$0x4]  ;;  %v4007_v46 = vunpack.c.l.bf16 %v9408_v45  ;;  %v3659_v29 = vrot.slane %v3638_v12, 5  ;;  %v3658_v54 = vsel %vm12458_vm9, %v3657_v40, %v3656_v44 }
 0x39b   : > { %v2134_v13 = vadd.f32 %v10679_v14, %v2131_v57  ;;  %v2500_v15 = vadd.f32 %v2499_v59, %v2498_v52  ;;  %v8832_v16 = vpop.f32.mrf.mxu0  ;;  %v4006_v23 = vunpack.c.l.bf16 %v9407_v31  ;;  %v4022_v52 = vsel %vm12461_vm4, %v4021_v33, %v4020_v32  ;;  %v9415_v31 = vld [vmem:[%s9982_s14 + $0x10] sm:$0x8] }
 0x39c   : > { %v2862_v21 = vmax.f32 %v2857_v7, 0.0  ;;  %v4010_v57 = vunpack.c.l.bf16 %v9410_v56  ;;  %v4025_v3 = vrot.slane %v4007_v46, 2  ;;  %v9412_v7 = vld [vmem:[%s9982_s14] sm:$0x8]  ;;  %v10936_v16 = vsel %vm12456_vm10, %v3659_v29, %v3658_v54  ;;  %v9418_v56 = vld [vmem:[%s9982_s14 + $0x28] sm:$0x8] }
 0x39d   : > { %v8308_v26 = vmul.f32 -1.442695, %v2134_v13  ;;  %v2501_v28 = vrot.slane %v2500_v15, 2  ;;  %v2859_v30 = vpop.f32.mrf.mxu0  ;;  %v4023_v38 = vrot.slane %v4006_v23, 3  ;;  %v4376_v1 = vunpack.c.l.bf16 %v9412_v7  ;;  %v6471_v29 = vld [vmem:[%s6470_s15] sm:$0xf] }
 0x39e   : > { %v2869_v34 = vmul.f32 %v2867_v25, %v2862_v21  ;;  %v4009_v20 = vunpack.c.l.bf16 %v9414_v18  ;;  %v4027_v17 = vrot.slane %v4008_v55, 1  ;;  %v4378_v23 = vunpack.c.l.bf16 %v9415_v31  ;;  %v6466_v30 = vld [vmem:[%s6465_s7] sm:$0xf]  ;;  %s8553_s7 = sshll.u32 %s11097_s11, 2  ;;  %s7573_s15 = ssub.f32 1.0, %s11125_s12 }
 0x39f   : > { %9301 = vpow2.f32 %v8308_v26  ;;  %v2502_v41 = vadd.f32 %v2501_v28, %v2500_v15  ;;  %v8833_v37 = vpop.f32.mrf.mxu0  ;;  %v4030_v33 = vrot.slane %v4010_v57, 7  ;;  %v10949_v40 = vrot.slane %v4011_v2, 6 }
 0x3a0   : > { %v2870_v48 = vsel %vm2124_vm14, %v2869_v34, 0.0  ;;  %v4393_v37 = vrot.slane %v4377_v8, 5  ;;  %v4381_v57 = vunpack.c.l.bf16 %v9418_v56 }
 0x3a1   : > { %v2503_v39 = vrot.slane %v2502_v41, 1  ;;  %v2871_v42 = vrot.slane %v2870_v48, 4  ;;  %v3229_v50 = vpop.f32.mrf.mxu0 }
 0x3a2   : > { %v3230_v53 = vadd.f32 %v3229_v50, %v10721_v47  ;;  %v4024_v47 = vsel %vm12460_vm5, %v4023_v38, %v4022_v52  ;;  %v9417_v52 = vld [vmem:[%s9982_s14 + $0x20] sm:$0x8] }
 0x3a3   : > { %v2504_v59 = vadd.f32 %v2503_v39, %v2502_v41  ;;  %v2872_v27 = vadd.f32 %v2871_v42, %v2870_v48  ;;  %v8844_v60 = vpop.f32.mrf.mxu0  ;;  %v4026_v32 = vsel %vm12457_vm6, %v4025_v3, %v4024_v47  ;;  %v4392_v41 = vrot.slane %v4376_v1, 6  ;;  %v9416_v42 = vld [vmem:[%s9982_s14 + $0x18] sm:$0x8]  ;;  %v3612_v3 = vpop.permute.xlu0 %3611 }
 0x3a4   : > { %v3235_v4 = vmax.f32 %v3230_v53, 0.0  ;;  %v6467_v48 = vstv %s6463_s10  ;;  %v4028_v39 = vsel %vm12455_vm7, %v4027_v17, %v4026_v32  ;;  %v4379_v50 = vunpack.c.l.bf16 %v9416_v42  ;;  %v9423_v42 = vld [vmem:[%s9982_s14 + $0x10] sm:$0x8]  ;;  %s11136_s10 = sld [smem:[#allocation4 + %s11081_s28]] }
 0x3a5   : > { %v2507_v12 = vadd.f32 %v2504_v59, %v10679_v14  ;;  %v2873_v13 = vrot.slane %v2872_v27, 2  ;;  %v3232_v15 = vpop.f32.mrf.mxu0  ;;  %v4380_v53 = vunpack.c.l.bf16 %v9417_v52  ;;  %v4395_v59 = vrot.slane %v4378_v23, 4 }
 0x3a6   : > { %v3242_v21 = vmul.f32 %v3240_v10, %v3235_v4  ;;  %v6468_v19 = vmul.f32 %v6467_v48, %v6466_v30  ;;  %v4394_v2 = vsel %vm12461_vm4, %v4393_v37, %v4392_v41  ;;  %v4029_v5 = vsel %vm12459_vm8, %v4009_v20, %v4028_v39  ;;  %v10970_v10 = vld [vmem:[%s9982_s14 + $0x30] sm:$0x8] }
 0x3a7   : > { %v8325_v25 = vmul.f32 -1.442695, %v2507_v12  ;;  %v2874_v26 = vadd.f32 %v2873_v13, %v2872_v27  ;;  %v8845_v28 = vpop.f32.mrf.mxu0  ;;  %v4382_v12 = vunpack.c.l.bf16 %v10970_v10  ;;  %v9420_v13 = vld [vmem:[%s9982_s14 + $0x38] sm:$0x8]  ;;  %v4397_v18 = vrot.slane %v4379_v50, 3 }
 0x3a8   : > { %v3243_v34 = vsel %vm2124_vm14, %v3242_v21, 0.0  ;;  %v4383_v15 = vunpack.c.l.bf16 %v9420_v13  ;;  %v4396_v31 = vsel %vm12460_vm5, %v4395_v59, %v4394_v2  ;;  %v4031_v20 = vsel %vm12458_vm9, %v4030_v33, %v4029_v5  ;;  %v9422_v28 = vld [vmem:[%s9982_s14 + $0x8] sm:$0x8]  ;;  %v6841_v2 = vld [vmem:[%s6840_s20] sm:$0xf] }
 0x3a9   : > { %9303 = vpow2.f32 %v8325_v25  ;;  %v2875_v44 = vrot.slane %v2874_v26, 1  ;;  %v3244_v45 = vrot.slane %v3243_v34, 4  ;;  %v3601_v46 = vpop.f32.mrf.mxu0  ;;  %v9421_v25 = vld [vmem:[%s9982_s14] sm:$0x8]  ;;  %v4750_v30 = vunpack.c.l.bf16 %v9422_v28 }
 0x3aa   : > { %v3602_v38 = vadd.f32 %v3601_v46, %v10742_v0  ;;  %v6473_v0 = vmul.f32 %v6472_v22, %v6471_v29  ;;  %v4399_v37 = vrot.slane %v4380_v53, 2  ;;  %v4398_v46 = vsel %vm12457_vm6, %v4397_v18, %v4396_v31 }
 0x3ab   : > { %v2876_v54 = vadd.f32 %v2875_v44, %v2874_v26  ;;  %v3245_v43 = vadd.f32 %v3244_v45, %v3243_v34  ;;  %v8856_v55 = vpop.f32.mrf.mxu0  ;;  %v4749_v26 = vunpack.c.l.bf16 %v9421_v25  ;;  %v10983_v45 = vstv %s10954_s5  ;;  %s7580_s5 = scalar_lea.vmem [#allocation2], %s8553_s7 }
 0x3ac   : > { %v9302_v27 = vpop.eup %9301  ;;  %v3607_v60 = vmax.f32 %v3602_v38, 0.0  ;;  %v10985_v33 = vadd.f32 %v6473_v0, %v6468_v19  ;;  %v10991_v39 = vsel %vm12456_vm10, %v10949_v40, %v4031_v20  ;;  %v4401_v52 = vrot.slane %v4381_v57, 1 }
 0x3ad   : > { %v2138_v4 = vadd.f32 1.0, %v9302_v27  ;;  %v2879_v47 = vadd.f32 %v2876_v54, %v10679_v14  ;;  %v3246_v7 = vrot.slane %v3245_v43, 2  ;;  %v3604_v1 = vpop.f32.mrf.mxu0  ;;  %v4765_v53 = vrot.slane %v4749_v26, 7 }
 0x3ae   : > { %v3614_v8 = vmul.f32 %v3612_v3, %v3607_v60  ;;  %v4766_v54 = vrot.slane %v4750_v30, 6  ;;  %v6842_v27 = vstv %s10961_s17  ;;  %v4400_v60 = vsel %vm12455_vm7, %v4399_v37, %v4398_v46  ;;  %v9424_v3 = vld [vmem:[%s9982_s14 + $0x18] sm:$0x8]  ;;  %s8552_s17 = sshll.u32 %s11136_s10, 2 }
 0x3af   : > { %v8342_v21 = vmul.f32 -1.442695, %v2879_v47  ;;  %v3247_v22 = vadd.f32 %v3246_v7, %v3245_v43  ;;  %v8857_v17 = vpop.f32.mrf.mxu0  ;;  %9305 = vrcp.f32 %v2138_v4  ;;  %v3985_v43 = vpop.permute.xlu1 %3984  ;;  %v6837_v0 = vstv %s6833_s9  ;;  %s7575_s9 = scalar_lea.vmem [#allocation2], %s8552_s17  ;;  %s12594_s17 = sld [smem:[#allocation42_spill]] }
 0x3b0   : > { %v3615_v23 = vsel %vm2124_vm14, %v3614_v8, 0.0  ;;  %v4404_v57 = vrot.slane %v4383_v15, 7  ;;  %v4752_v4 = vunpack.c.l.bf16 %v9424_v3  ;;  %v6836_v8 = vld [vmem:[%s6835_s8] sm:$0xf]  ;;  %v4767_v15 = vsel %vm12461_vm4, %v4766_v54, %v4765_v53 }
 0x3b1   : > { %9307 = vpow2.f32 %v8342_v21  ;;  %v3248_v32 = vrot.slane %v3247_v22, 1  ;;  %v3616_v34 = vrot.slane %v3615_v23, 4  ;;  %v3974_v41 = vpop.f32.mrf.mxu0  ;;  %v4402_v21 = vsel %vm12459_vm8, %v4401_v52, %v4400_v60 }
 0x3b2   : > { %v3975_v44 = vadd.f32 %v3974_v41, %v10753_v11  ;;  %v4751_v11 = vunpack.c.l.bf16 %v9423_v42  ;;  %v6843_v25 = vmul.f32 %v6842_v27, %v6841_v2  ;;  %v6838_v28 = vmul.f32 %v6837_v0, %v6836_v8 }
 0x3b3   : > { %v3249_v48 = vadd.f32 %v3248_v32, %v3247_v22  ;;  %v3617_v29 = vadd.f32 %v3616_v34, %v3615_v23  ;;  %v8868_v38 = vpop.f32.mrf.mxu0  ;;  %v9425_v22 = vld [vmem:[%s9982_s14 + $0x20] sm:$0x8]  ;;  %v4770_v30 = vrot.slane %v4752_v4, 4  ;;  %v4403_v37 = vsel %vm12458_vm9, %v4382_v12, %v4402_v21 }
 0x3b4   : > { %v3980_v50 = vmax.f32 %v3975_v44, 0.0  ;;  %v4768_v13 = vrot.slane %v4751_v11, 5  ;;  %v4753_v17 = vunpack.c.l.bf16 %v9425_v22  ;;  %v9427_v38 = vld [vmem:[%s9982_s14 + $0x30] sm:$0x8]  ;;  %v11034_v27 = vadd.f32 %v6843_v25, %v6838_v28  ;;  %v2174_v22 = vld [vmem:[%s12535_s0] sm:$0xf] }
 0x3b5   : > { %v3252_v55 = vadd.f32 %v3249_v48, %v10679_v14  ;;  %v3618_v56 = vrot.slane %v3617_v29, 2  ;;  %v3977_v59 = vpop.f32.mrf.mxu0  ;;  %v9426_v48 = vld [vmem:[%s9982_s14 + $0x28] sm:$0x8]  ;;  %v4755_v42 = vunpack.c.l.bf16 %v9427_v38  ;;  %v11037_v60 = vsel %vm12456_vm10, %v4404_v57, %v4403_v37  ;;  %v9432_v37 = vld [vmem:[%s9982_s14 + $0x1c] sm:$0x1]  ;;  %s7940_s13 = scalar_lea.sflag [#allocation6], %s12594_s17 }
 0x3b6   : > { %v9304_v40 = vpop.eup %9303  ;;  %v3987_v19 = vmul.f32 %v3985_v43, %v3980_v50  ;;  %v4769_v44 = vsel %vm12460_vm5, %v4768_v13, %v4767_v15  ;;  %v4772_v11 = vrot.slane %v4753_v17, 3  ;;  %v4357_v50 = vpop.permute.xlu0 %4356  ;;  %v9429_v15 = vld [vmem:[%s9982_s14 + $0x14] sm:$0x1]  ;;  %s7945_s21 = scalar_lea.sflag [#allocation17], %s12594_s17 }
 0x3b7   : > { %v2511_v47 = vadd.f32 1.0, %v9304_v40  ;;  %v8359_v7 = vmul.f32 -1.442695, %v3252_v55  ;;  %v3619_v1 = vadd.f32 %v3618_v56, %v3617_v29  ;;  %v8869_v5 = vpop.f32.mrf.mxu0  ;;  %v4754_v29 = vunpack.c.l.bf16 %v9426_v48  ;;  %v2369_v55 = vld [vmem:[%s12532_s26] sm:$0x1] }
 0x3b8   : > { %v3988_v18 = vsel %vm2124_vm14, %v3987_v19, 0.0  ;;  %v4771_v40 = vsel %vm12457_vm6, %v4770_v30, %v4769_v44  ;;  %v4776_v28 = vrot.slane %v4755_v42, 1  ;;  %v5124_v44 = vunpack.c.l.bf16 %v9432_v37 }
 0x3b9   : > { %9309 = vrcp.f32 %v2511_v47  ;;  %v3620_v31 = vrot.slane %v3619_v1, 1  ;;  %v3989_v23 = vrot.slane %v3988_v18, 4  ;;  %v4346_v20 = vpop.f32.mrf.mxu0  ;;  %v4773_v17 = vsel %vm12455_vm7, %v4772_v11, %v4771_v40  ;;  %v11067_v11 = vld [vmem:[%s9982_s14 + $0x24] sm:$0x1]  ;;  %vm11072_vm7 = vmand %vm2341_vm15, %vm2714_vm1 }
 0x3ba   : > { %9311 = vpow2.f32 %v8359_v7  ;;  %v4347_v26 = vadd.f32 %v4346_v20, %v10797_v61  ;;  %v4774_v7 = vrot.slane %v4754_v29, 2  ;;  %v5125_v42 = vunpack.c.l.bf16 %v11067_v11  ;;  %vm11114_vm1 = vmand %vm3086_vm3, %vm3087_vm0  ;;  %v3114_v11 = vld [vmem:[%s12532_s26] sm:$0x2] }
 0x3bb   : > { %v3621_v32 = vadd.f32 %v3620_v31, %v3619_v1  ;;  %v3990_v34 = vadd.f32 %v3989_v23, %v3988_v18  ;;  %v8880_v41 = vpop.f32.mrf.mxu0  ;;  %v9428_v1 = vld [vmem:[%s9982_s14 + $0xc] sm:$0x1]  ;;  %v5123_v31 = vunpack.c.l.bf16 %v9429_v15  ;;  %vm3459_vm15 = vsmask.f32 7942 }
 0x3bc   : > { %v9306_v46 = vpop.eup %9305  ;;  %v4352_v61 = vmax.f32 %v4347_v26, 0.0  ;;  %v5122_v5 = vunpack.c.l.bf16 %v9428_v1  ;;  %v4775_v38 = vsel %vm12459_vm8, %v4774_v7, %v4773_v17  ;;  %v7211_v7 = vld [vmem:[%s7210_s4] sm:$0xf]  ;;  %vm12540_vm0 = vcmask 1044484  }
 0x3bd   : > { %v3624_v52 = vadd.f32 %v3621_v32, %v10679_v14  ;;  %v3991_v10 = vrot.slane %v3990_v34, 2  ;;  %v4349_v53 = vpop.f32.mrf.mxu0  ;;  %v2172_v12 = vmul.f32 %v9306_v46, %v10805_v6  ;;  %v2368_v43 = vpack.c.bf16 %v9306_v46, %v9306_v46  ;;  %v4730_v46 = vpop.permute.xlu1 %4729 }
 0x3be   : > { %v9308_v56 = vpop.eup %9307  ;;  %v4359_v59 = vmul.f32 %v4357_v50, %v4352_v61  ;;  %v7212_v32 = vstv %s11021_s3  ;;  %v9434_v53 = vld [vmem:[%s9982_s14 + $0x2c] sm:$0x1]  ;;  %v4777_v1 = vsel %vm12458_vm9, %v4776_v28, %v4775_v38 }
 0x3bf   : > { %v2883_v6 = vadd.f32 1.0, %v9308_v56  ;;  %v8376_v19 = vmul.f32 -1.442695, %v3624_v52  ;;  %v3992_v0 = vadd.f32 %v3991_v10, %v3990_v34  ;;  %v8881_v2 = vpop.f32.mrf.mxu0  ;;  %v2173_v3 = vpack.c.bf16 %v2172_v12, %v2172_v12  ;;  %v9431_v34 = vld [vmem:[%s9982_s14 + $0x4] sm:$0x1] }
 0x3c0   : > { %v4360_v4 = vsel %vm2124_vm14, %v4359_v59, 0.0  ;;  %v2370_v47 = vsel %vm11029_vm2, %v2368_v43, %v2369_v55  ;;  %v5121_v41 = vunpack.c.l.bf16 %v9431_v34  ;;  %v5126_v12 = vunpack.c.l.bf16 %v9434_v53  ;;  %v9435_v34 = vld [vmem:[%s9982_s14 + $0x34] sm:$0x1] }
 0x3c1   : > { %9313 = vrcp.f32 %v2883_v6  ;;  %v3993_v57 = vrot.slane %v3992_v0, 1  ;;  %v4361_v8 = vrot.slane %v4360_v4, 4  ;;  %v4719_v13 = vpop.f32.mrf.mxu0  ;;  %v2179_v18 = vsel %vm2072_vm11, %v2173_v3, 0  ;;  %2371 = vst [vmem:[%s12532_s26] sm:$0x1] %v2370_v47 }
 0x3c2   : > { %9315 = vpow2.f32 %v8376_v19  ;;  %v4720_v21 = vadd.f32 %v4719_v13, %v10799_v62  ;;  %8811 = vmatpush3.bf16.msra.mxu1 %v2179_v18  ;;  %v11056_v62 = vld [vmem:[%s9982_s14 + $0x38] sm:$0x8]  ;;  %v5137_v43 = vrot.slane %v5122_v5, 7  ;;  %v5139_v55 = vrot.slane %v5123_v31, 6  ;;  %v7206_v13 = vld [vmem:[%s7205_s16] sm:$0xf] }
 0x3c3   : > { %v3994_v23 = vadd.f32 %v3993_v57, %v3992_v0  ;;  %v4362_v20 = vadd.f32 %v4361_v8, %v4360_v4  ;;  %v8892_v25 = vpop.f32.mrf.mxu0  ;;  %8822 = vmatprep.subr.bf16.mxu1 %v9716_v63  ;;  %v4756_v26 = vunpack.c.l.bf16 %v11056_v62  ;;  %v7207_v47 = vstv %s7203_s29 }
 0x3c4   : > { %v4725_v30 = vmax.f32 %v4720_v21, 0.0  ;;  %v5127_v37 = vunpack.c.l.bf16 %v9435_v34  ;;  %v5143_v53 = vrot.slane %v5125_v42, 4 }
 0x3c5   : > { %v3997_v61 = vadd.f32 %v3994_v23, %v10679_v14  ;;  %v4363_v48 = vrot.slane %v4362_v20, 2  ;;  %v4722_v29 = vpop.f32.mrf.mxu0  ;;  %8813 = vmatmul.mubr.msk.bf16.vlgmr.msra.gmra.mxu1 %vm2068_vm13, %v2174_v22  ;;  %v5138_v22 = vsel %vm12461_vm4, %v5137_v43, %v5121_v41  ;;  %v7213_v23 = vmul.f32 %v7212_v32, %v7211_v7  ;;  %v2547_v32 = vld [vmem:[%s12535_s0] sm:$0xf] }
 0x3c6   : > { %v9310_v50 = vpop.eup %9309  ;;  %v4732_v52 = vmul.f32 %v4730_v46, %v4725_v30  ;;  %8824 = vmatprep.mubr.msk.bf16.mxu1 %vm9717_vm12, %v9716_v63  ;;  %v7208_v30 = vmul.f32 %v7207_v47, %v7206_v13 }
 0x3c7   : > { %v9312_v56 = vpop.eup %9311  ;;  %v2740_v59 = vpack.c.bf16 %v9310_v50, %v9310_v50  ;;  %v8393_v40 = vmul.f32 -1.442695, %v3997_v61  ;;  %v4364_v6 = vadd.f32 %v4363_v48, %v4362_v20  ;;  %v8893_v19 = vpop.f32.mrf.mxu0  ;;  %v2545_v0 = vmul.f32 %v9310_v50, %v10849_v58 }
 0x3c8   : > { %v3256_v2 = vadd.f32 1.0, %v9312_v56  ;;  %v4733_v3 = vsel %vm2124_vm14, %v4732_v52, 0.0  ;;  %v2741_v4 = vld [vmem:[%s12532_s26] sm:$0x1]  ;;  %v5141_v20 = vrot.slane %v5124_v44, 5  ;;  %v11109_v44 = vsel %vm12456_vm10, %v4756_v26, %v4777_v1 }
 0x3c9   : > { %9317 = vpow2.f32 %v8393_v40  ;;  %v4365_v5 = vrot.slane %v4364_v6, 1  ;;  %v4734_v57 = vrot.slane %v4733_v3, 4  ;;  %v2742_v58 = vsel %vm11072_vm7, %v2740_v59, %v2741_v4  ;;  %v5091_v8 = vpop.f32.mrf.mxu0  ;;  %v9436_v52 = vld [vmem:[%s9982_s14 + $0x3c] sm:$0x1] }
 0x3ca   : > { %9319 = vrcp.f32 %v3256_v2  ;;  %2743 = vst [vmem:[%s12532_s26] sm:$0x1] %v2742_v58  ;;  %v5092_v18 = vadd.f32 %v5091_v8, %v10814_v9  ;;  %v2546_v21 = vpack.c.bf16 %v2545_v0, %v2545_v0  ;;  %v5102_v9 = vpop.permute.xlu0 %5101  ;;  %v5140_v48 = vsel %vm12460_vm5, %v5139_v55, %v5138_v22 }
 0x3cb   : > { %v4366_v17 = vadd.f32 %v4365_v5, %v4364_v6  ;;  %v4735_v15 = vadd.f32 %v4734_v57, %v4733_v3  ;;  %v8904_v31 = vpop.f32.mrf.mxu0  ;;  %v5128_v62 = vunpack.c.l.bf16 %v9436_v52  ;;  %v5145_v26 = vrot.slane %v5126_v12, 3  ;;  %v9437_v12 = vld [vmem:[%s9982_s14 + $0x4] sm:$0x1] }
 0x3cc   : > { %v5097_v25 = vmax.f32 %v5092_v18, 0.0  ;;  %v2552_v28 = vsel %vm2072_vm11, %v2546_v21, 0  ;;  %v5142_v42 = vsel %vm12457_vm6, %v5141_v20, %v5140_v48  ;;  %v5491_v2 = vunpack.c.l.bf16 %v9437_v12  ;;  %v5472_v31 = vpop.permute.xlu1 %5471 }
 0x3cd   : > { %v4369_v46 = vadd.f32 %v4366_v17, %v10679_v14  ;;  %v4736_v61 = vrot.slane %v4735_v15, 2  ;;  %8823 = vmatpush3.bf16.msra.mxu1 %v2552_v28  ;;  %v5094_v41 = vpop.f32.mrf.mxu0  ;;  %v11139_v5 = vrot.slane %v5127_v37, 2  ;;  %v11141_v13 = vadd.f32 %v7213_v23, %v7208_v30  ;;  %v9438_v17 = vld [vmem:[%s9982_s14 + $0x14] sm:$0x1]  ;;  %v2919_v28 = vld [vmem:[%s12535_s0] sm:$0xf] }
 0x3ce   : > { %v9314_v29 = vpop.eup %9313  ;;  %v5104_v50 = vmul.f32 %v5102_v9, %v5097_v25  ;;  %8834 = vmatprep.subr.bf16.mxu1 %v9716_v63  ;;  %v5144_v18 = vsel %vm12540_vm0, %v5143_v53, %v5142_v42  ;;  %vm3831_vm10 = vcmask 518146   ;;  %vm3832_vm6 = vsmask.f32 2304  ;;  %v9439_v30 = vld [vmem:[%s9982_s14 + $0xc] sm:$0x1]  ;;  %vm11159_vm0 = vmand %vm3086_vm3, %vm3459_vm15 }
 0x3cf   : > { %v9316_v43 = vpop.eup %9315  ;;  %v3113_v56 = vpack.c.bf16 %v9314_v29, %v9314_v29  ;;  %v8410_v55 = vmul.f32 -1.442695, %v4369_v46  ;;  %v4737_v59 = vadd.f32 %v4736_v61, %v4735_v15  ;;  %v8905_v40 = vpop.f32.mrf.mxu0  ;;  %v2917_v6 = vmul.f32 %v9314_v29, %v10908_v35  ;;  %vm11195_vm15 = vmand %vm3831_vm10, %vm3832_vm6 }
 0x3d0   : > { %v3628_v19 = vadd.f32 1.0, %v9316_v43  ;;  %v5105_v0 = vsel %vm2124_vm14, %v5104_v50, 0.0  ;;  %8825 = vmatmul.mubr.msk.bf16.vlgmr.msra.gmra.mxu1 %vm2068_vm13, %v2547_v32  ;;  %v5493_v15 = vunpack.c.l.bf16 %v9438_v17  ;;  %v5492_v34 = vunpack.c.l.bf16 %v9439_v30  ;;  %v9440_v32 = vld [vmem:[%s9982_s14 + $0x1c] sm:$0x1]  ;;  %v9441_v43 = vld [vmem:[%s9982_s14 + $0x24] sm:$0x1] }
 0x3d1   : > { %v3115_v3 = vsel %vm11114_vm1, %v3113_v56, %v3114_v11  ;;  %9321 = vpow2.f32 %v8410_v55  ;;  %v4738_v4 = vrot.slane %v4737_v59, 1  ;;  %v5106_v47 = vrot.slane %v5105_v0, 4  ;;  %8836 = vmatprep.mubr.msk.bf16.mxu1 %vm9717_vm12, %v9716_v63  ;;  %v7581_v40 = vld [vmem:[%s7580_s5] sm:$0xf] }
 0x3d2   : > { %3116 = vst [vmem:[%s12532_s26] sm:$0x2] %v3115_v3  ;;  %9323 = vrcp.f32 %v3628_v19  ;;  %v2918_v1 = vpack.c.bf16 %v2917_v6, %v2917_v6  ;;  %v5507_v37 = vrot.slane %v5491_v2, 1  ;;  %v7582_v61 = vstv %s11125_s12 }
 0x3d3   : > { %v4739_v57 = vadd.f32 %v4738_v4, %v4737_v59  ;;  %v5107_v58 = vadd.f32 %v5106_v47, %v5105_v0  ;;  %v5146_v41 = vsel %vm12459_vm8, %v5145_v26, %v5144_v18  ;;  %v5494_v48 = vunpack.c.l.bf16 %v9440_v32 }
 0x3d4   : > { %v2924_v22 = vsel %vm2072_vm11, %v2918_v1, 0  ;;  %v5495_v56 = vunpack.c.l.bf16 %v9441_v43  ;;  %v5509_v6 = vrot.slane %v5493_v15, 7  ;;  %v5508_v2 = vsel %vm12461_vm4, %v5492_v34, %v5507_v37 }
 0x3d5   : > { %v5461_v35 = vpop.f32.mrf.mxu0  ;;  %v4742_v20 = vadd.f32 %v4739_v57, %v10679_v14  ;;  %v5108_v25 = vrot.slane %v5107_v58, 2  ;;  %8835 = vmatpush3.bf16.msra.mxu1 %v2924_v22  ;;  %v11179_v1 = vmul.f32 %v7582_v61, %v7581_v40  ;;  %v5511_v57 = vrot.slane %v5494_v48, 6 }
 0x3d6   : > { %v5462_v7 = vadd.f32 %v5461_v35, %v10864_v24  ;;  %v11145_v24 = vrot.slane %v5128_v62, 1  ;;  %v9318_v9 = vpop.eup %9317  ;;  %8846 = vmatprep.subr.bf16.mxu1 %v9716_v63  ;;  %v5510_v18 = vsel %vm12460_vm5, %v5509_v6, %v5508_v2  ;;  %vm4204_vm3 = vsmask.f32 7946 }
 0x3d7   : > { %v8916_v8 = vpop.f32.mrf.mxu0  ;;  %v9320_v29 = vpop.eup %9319  ;;  %v4001_v50 = vadd.f32 1.0, %v9318_v9  ;;  %v8427_v52 = vmul.f32 -1.442695, %v4742_v20  ;;  %v5109_v62 = vadd.f32 %v5108_v25, %v5107_v58  ;;  %v3292_v20 = vld [vmem:[%s12535_s0] sm:$0xf]  ;;  %v5148_v25 = vsel %vm12458_vm9, %v11139_v5, %v5146_v41 }
 0x3d8   : > { %v5467_v21 = vmax.f32 %v5462_v7, 0.0  ;;  %v3485_v55 = vpack.c.bf16 %v9320_v29, %v9320_v29  ;;  %8837 = vmatmul.mubr.msk.bf16.vlgmr.msra.gmra.mxu1 %vm2068_vm13, %v2919_v28  ;;  %v3290_v26 = vmul.f32 %v9320_v29, %v10916_v49  ;;  %v7577_v37 = vstv %s7573_s15  ;;  %v9444_v9 = vld [vmem:[%s9982_s14 + $0x2c] sm:$0x1]  ;;  %v3859_v29 = vld [vmem:[%s12532_s26] sm:$0x4]  ;;  %s12593_s15 = sld [smem:[#allocation43_spill]] }
 0x3d9   : > { %v5464_v23 = vpop.f32.mrf.mxu0  ;;  %v3486_v19 = vld [vmem:[%s12532_s26] sm:$0x2]  ;;  %9325 = vrcp.f32 %v4001_v50  ;;  %v5110_v0 = vrot.slane %v5109_v62, 1  ;;  %8848 = vmatprep.mubr.msk.bf16.mxu1 %vm9717_vm12, %v9716_v63  ;;  %v5513_v61 = vrot.slane %v5495_v56, 5  ;;  %vm12545_vm9 = vcmask 1043459  }
 0x3da   : > { %v5474_v46 = vmul.f32 %v5472_v31, %v5467_v21  ;;  %v3487_v49 = vsel %vm11159_vm0, %v3485_v55, %v3486_v19  ;;  %9327 = vpow2.f32 %v8427_v52  ;;  %v3291_v4 = vpack.c.bf16 %v3290_v26, %v3290_v26  ;;  %v9442_v21 = vld [vmem:[%s9982_s14 + $0x4] sm:$0x2]  ;;  %v9443_v23 = vld [vmem:[%s9982_s14 + $0xc] sm:$0x2]  ;;  %v7576_v55 = vld [vmem:[%s7575_s9] sm:$0xf] }
 0x3db   : > { %v8917_v53 = vpop.f32.mrf.mxu0  ;;  %3488 = vst [vmem:[%s12532_s26] sm:$0x2] %v3487_v49  ;;  %v5111_v47 = vadd.f32 %v5110_v0, %v5109_v62  ;;  %v5861_v22 = vunpack.c.l.bf16 %v9442_v21  ;;  %v5862_v28 = vunpack.c.l.bf16 %v9443_v23  ;;  %v5512_v62 = vsel %vm12545_vm9, %v5511_v57, %v5510_v18  ;;  %v9448_v23 = vld [vmem:[%s9982_s14 + $0x1c] sm:$0x2] }
 0x3dc   : > { %v5475_v59 = vsel %vm2124_vm14, %v5474_v46, 0.0  ;;  %v3297_v8 = vsel %vm2072_vm11, %v3291_v4, 0  ;;  %v5496_v46 = vunpack.c.l.bf16 %v9444_v9  ;;  %vm4576_vm6 = vcmask 519171  }
 0x3dd   : > { %v5476_v42 = vrot.slane %v5475_v59, 4  ;;  %v5831_v12 = vpop.f32.mrf.mxu0  ;;  %v5114_v17 = vadd.f32 %v5111_v47, %v10679_v14  ;;  %8847 = vmatpush3.bf16.msra.mxu1 %v3297_v8  ;;  %v5878_v19 = vrot.slane %v5862_v28, 1  ;;  %vm4577_vm9 = vsmask.f32 3328  ;;  %v6212_v8 = vpop.permute.xlu1 %6211 }
 0x3de   : > { %v5832_v3 = vadd.f32 %v5831_v12, %v10910_v36  ;;  %v5842_v36 = vpop.permute.xlu0 %5841  ;;  %v9322_v30 = vpop.eup %9321  ;;  %8858 = vmatprep.subr.bf16.mxu1 %v9716_v63  ;;  %vm12546_vm8 = vcmask 1047559  }
 0x3df   : > { %v5477_v35 = vadd.f32 %v5476_v42, %v5475_v59  ;;  %v8928_v7 = vpop.f32.mrf.mxu0  ;;  %v9324_v32 = vpop.eup %9323  ;;  %v4373_v5 = vadd.f32 1.0, %v9322_v30  ;;  %v8444_v41 = vmul.f32 -1.442695, %v5114_v17  ;;  %v5877_v59 = vrot.slane %v5861_v22, 2 }
 0x3e0   : > { %v5837_v58 = vmax.f32 %v5832_v3, 0.0  ;;  %v3858_v53 = vpack.c.bf16 %v9324_v32, %v9324_v32  ;;  %8849 = vmatmul.mubr.msk.bf16.vlgmr.msra.gmra.mxu1 %vm2068_vm13, %v3292_v20  ;;  %v3662_v56 = vmul.f32 %v9324_v32, %v10936_v16  ;;  %v7578_v3 = vmul.f32 %v7577_v37, %v7576_v55  ;;  %v9445_v7 = vld [vmem:[%s9982_s14 + $0x34] sm:$0x1]  ;;  %v9447_v20 = vld [vmem:[%s9982_s14 + $0x14] sm:$0x2] }
 0x3e1   : > { %v5478_v15 = vrot.slane %v5477_v35, 2  ;;  %v5834_v31 = vpop.f32.mrf.mxu0  ;;  %9329 = vrcp.f32 %v4373_v5  ;;  %8860 = vmatprep.mubr.msk.bf16.mxu1 %vm9717_vm12, %v9716_v63  ;;  %v11214_v4 = vsel %vm12546_vm8, %v11145_v24, %v5148_v25  ;;  %v5497_v57 = vunpack.c.l.bf16 %v9445_v7  ;;  %v3664_v24 = vld [vmem:[%s12535_s0] sm:$0xf] }
 0x3e2   : > { %v5844_v34 = vmul.f32 %v5842_v36, %v5837_v58  ;;  %v3860_v0 = vsel %vm11195_vm15, %v3858_v53, %v3859_v29  ;;  %9331 = vpow2.f32 %v8444_v41  ;;  %v3663_v42 = vpack.c.bf16 %v3662_v56, %v3662_v56  ;;  %v9449_v41 = vld [vmem:[%s9982_s14 + $0x24] sm:$0x2] }
 0x3e3   : > { %v5479_v50 = vadd.f32 %v5478_v15, %v5477_v35  ;;  %v8929_v52 = vpop.f32.mrf.mxu0  ;;  %3861 = vst [vmem:[%s12532_s26] sm:$0x4] %v3860_v0  ;;  %vm12547_vm8 = vcmask 1044484   ;;  %v5515_v17 = vrot.slane %v5496_v46, 4  ;;  %v5863_v25 = vunpack.c.l.bf16 %v9447_v20 }
 0x3e4   : > { %v5845_v43 = vsel %vm2124_vm14, %v5844_v34, 0.0  ;;  %v3669_v35 = vsel %vm2072_vm11, %v3663_v42, 0  ;;  %v5514_v36 = vsel %vm12547_vm8, %v5513_v61, %v5512_v62  ;;  %v5879_v28 = vsel %vm12461_vm4, %v5878_v19, %v5877_v59  ;;  %vm11231_vm8 = vmand %vm3831_vm10, %vm4204_vm3  ;;  %v9450_v52 = vld [vmem:[%s9982_s14 + $0x2c] sm:$0x2] }
 0x3e5   : > { %v5480_v26 = vrot.slane %v5479_v50, 1  ;;  %v5846_v40 = vrot.slane %v5845_v43, 4  ;;  %8859 = vmatpush3.bf16.msra.mxu1 %v3669_v35  ;;  %v5866_v62 = vunpack.c.l.bf16 %v9450_v52  ;;  %vm4949_vm10 = vsmask.f32 7950  ;;  %v9454_v52 = vld [vmem:[%s9982_s14 + $0x14] sm:$0x2] }
 0x3e6   : > { %v6201_v6 = vpop.f32.mrf.mxu0  ;;  %v9326_v15 = vpop.eup %9325  ;;  %8870 = vmatprep.subr.bf16.mxu1 %v9716_v63  ;;  %vm12550_vm3 = vcmask 1045509   ;;  %vm12553_vm4 = vcmask 1043459  }
 0x3e7   : > { %v6202_v16 = vadd.f32 %v6201_v6, %v10918_v51  ;;  %v5481_v12 = vadd.f32 %v5480_v26, %v5479_v50  ;;  %v5847_v2 = vadd.f32 %v5846_v40, %v5845_v43  ;;  %v9446_v51 = vld [vmem:[%s9982_s14 + $0x3c] sm:$0x1]  ;;  %v9328_v30 = vpop.eup %9327  ;;  %v4230_v34 = vpack.c.bf16 %v9326_v15, %v9326_v15 }
 0x3e8   : > { %v8940_v49 = vpop.f32.mrf.mxu0  ;;  %v5498_v58 = vunpack.c.l.bf16 %v9446_v51  ;;  %v4035_v46 = vmul.f32 %v9326_v15, %v10991_v39  ;;  %v4746_v29 = vadd.f32 1.0, %v9328_v30  ;;  %8861 = vmatmul.mubr.msk.bf16.vlgmr.msra.gmra.mxu1 %vm2068_vm13, %v3664_v24  ;;  %v5865_v50 = vunpack.c.l.bf16 %v9449_v41 }
 0x3e9   : > { %v6207_v47 = vmax.f32 %v6202_v16, 0.0  ;;  %v5484_v18 = vadd.f32 %v5481_v12, %v10679_v14  ;;  %v5848_v21 = vrot.slane %v5847_v2, 2  ;;  %v5864_v14 = vunpack.c.l.bf16 %v9448_v23  ;;  %8872 = vmatprep.mubr.msk.bf16.mxu1 %vm9717_vm12, %v9716_v63 }
 0x3ea   : > { %v6204_v22 = vpop.f32.mrf.mxu0  ;;  %v4036_v56 = vpack.c.bf16 %v4035_v46, %v4035_v46  ;;  %v4231_v55 = vld [vmem:[%s12532_s26] sm:$0x4]  ;;  %v5880_v26 = vsel %vm12460_vm5, %v5863_v25, %v5879_v28  ;;  %v11251_v49 = vrot.slane %v5498_v58, 2  ;;  %vm11262_vm5 = vmand %vm4576_vm6, %vm4577_vm9  ;;  %v5883_v15 = vrot.slane %v5865_v50, 6 }
 0x3eb   : > { %v6214_v31 = vmul.f32 %v6212_v8, %v6207_v47  ;;  %v8461_v37 = vmul.f32 -1.442695, %v5484_v18  ;;  %v5849_v9 = vadd.f32 %v5848_v21, %v5847_v2  ;;  %v5881_v40 = vrot.slane %v5864_v14, 7  ;;  %v6582_v47 = vpop.permute.xlu0 %6581  ;;  %v4037_v8 = vld [vmem:[%s12535_s0] sm:$0xf] }
 0x3ec   : > { %v8941_v32 = vpop.f32.mrf.mxu0  ;;  %v4232_v6 = vsel %vm11231_vm8, %v4230_v34, %v4231_v55  ;;  %v4042_v42 = vsel %vm2072_vm11, %v4036_v56, 0  ;;  %v11249_v2 = vadd.f32 %v11179_v1, %v7578_v3  ;;  %v5516_v18 = vsel %vm12550_vm3, %v5515_v17, %v5514_v36  ;;  %v9451_v21 = vld [vmem:[%s9982_s14 + $0x34] sm:$0x2]  ;;  %v9452_v34 = vld [vmem:[%s9982_s14 + $0x4] sm:$0x2] }
 0x3ed   : > { %v6215_v5 = vsel %vm2124_vm14, %v6214_v31, 0.0  ;;  %9333 = vpow2.f32 %v8461_v37  ;;  %v5850_v53 = vrot.slane %v5849_v9, 1  ;;  %4233 = vst [vmem:[%s12532_s26] sm:$0x4] %v4232_v6  ;;  %8871 = vmatpush3.bf16.msra.mxu1 %v4042_v42  ;;  %v5867_v22 = vunpack.c.l.bf16 %v9451_v21  ;;  %v4409_v42 = vld [vmem:[%s12535_s0] sm:$0xf] }
 0x3ee   : > { %v6216_v43 = vrot.slane %v6215_v5, 4  ;;  %v6571_v39 = vpop.f32.mrf.mxu0  ;;  %9335 = vrcp.f32 %v4746_v29  ;;  %8882 = vmatprep.subr.bf16.mxu1 %v9716_v63  ;;  %v9330_v1 = vpop.eup %9329  ;;  %v5882_v24 = vsel %vm12553_vm4, %v5881_v40, %v5880_v26  ;;  %v5885_v31 = vrot.slane %v5866_v62, 5 }
 0x3ef   : > { %v6572_v59 = vadd.f32 %v6571_v39, %v10985_v33  ;;  %v5851_v19 = vadd.f32 %v5850_v53, %v5849_v9  ;;  %v5517_v33 = vrot.slane %v5497_v57, 3  ;;  %v4604_v57 = vld [vmem:[%s12532_s26] sm:$0x8]  ;;  %v9332_v20 = vpop.eup %9331  ;;  %v4603_v25 = vpack.c.bf16 %v9330_v1, %v9330_v1  ;;  %v9453_v9 = vld [vmem:[%s9982_s14 + $0xc] sm:$0x2] }
 0x3f0   : > { %v6217_v0 = vadd.f32 %v6216_v43, %v6215_v5  ;;  %v8952_v16 = vpop.f32.mrf.mxu0  ;;  %v4407_v14 = vmul.f32 %v9330_v1, %v11037_v60  ;;  %v5118_v28 = vadd.f32 1.0, %v9332_v20  ;;  %8873 = vmatmul.mubr.msk.bf16.vlgmr.msra.gmra.mxu1 %vm2068_vm13, %v4037_v8  ;;  %v6231_v37 = vunpack.c.l.bf16 %v9452_v34  ;;  %v9456_v8 = vld [vmem:[%s9982_s14 + $0x24] sm:$0x2]  ;;  %v9457_v20 = vld [vmem:[%s9982_s14 + $0x1c] sm:$0x2] }
 0x3f1   : > { %v6577_v12 = vmax.f32 %v6572_v59, 0.0  ;;  %v5854_v35 = vadd.f32 %v10983_v45, %v5851_v19  ;;  %v6232_v32 = vunpack.c.l.bf16 %v9453_v9  ;;  %v4605_v46 = vsel %vm11262_vm5, %v4603_v25, %v4604_v57  ;;  %8884 = vmatprep.mubr.msk.bf16.mxu1 %vm9717_vm12, %v9716_v63  ;;  %v6952_v19 = vpop.permute.xlu1 %6951 }
 0x3f2   : > { %v6218_v7 = vrot.slane %v6217_v0, 2  ;;  %v6574_v51 = vpop.f32.mrf.mxu0  ;;  %4606 = vst [vmem:[%s12532_s26] sm:$0x8] %v4605_v46  ;;  %v4408_v50 = vpack.c.bf16 %v4407_v14, %v4407_v14  ;;  %v6233_v62 = vunpack.c.l.bf16 %v9454_v52  ;;  %vm12554_vm4 = vcmask 1046534  }
 0x3f3   : > { %v6584_v58 = vmul.f32 %v6582_v47, %v6577_v12  ;;  %v8478_v36 = vmul.f32 -1.442695, %v5854_v35  ;;  %v11281_v56 = vsel %vm12554_vm4, %v5517_v33, %v5516_v18  ;;  %vm12555_vm9 = vcmask 1044484   ;;  %v9455_v12 = vld [vmem:[%s9982_s14 + $0x3c] sm:$0x2]  ;;  %vm11295_vm4 = vmand %vm4576_vm6, %vm4949_vm10 }
 0x3f4   : > { %v6219_v17 = vadd.f32 %v6218_v7, %v6217_v0  ;;  %v8953_v23 = vpop.f32.mrf.mxu0  ;;  %v5884_v55 = vsel %vm12555_vm9, %v5883_v15, %v5882_v24  ;;  %v4414_v26 = vsel %vm2072_vm11, %v4408_v50, 0  ;;  %v6247_v40 = vrot.slane %v6231_v37, 3  ;;  %v9458_v37 = vld [vmem:[%s9982_s14 + $0x2c] sm:$0x2] }
 0x3f5   : > { %v6585_v30 = vsel %vm2124_vm14, %v6584_v58, 0.0  ;;  %9337 = vpow2.f32 %v8478_v36  ;;  %v6248_v6 = vrot.slane %v6232_v32, 2  ;;  %8883 = vmatpush3.bf16.msra.mxu1 %v4414_v26  ;;  %v5868_v33 = vunpack.c.l.bf16 %v9455_v12 }
 0x3f6   : > { %v6220_v29 = vrot.slane %v6219_v17, 1  ;;  %v6586_v5 = vrot.slane %v6585_v30, 4  ;;  %v6941_v41 = vpop.f32.mrf.mxu0  ;;  %9339 = vrcp.f32 %v5118_v28  ;;  %v5887_v47 = vrot.slane %v5867_v22, 4  ;;  %8894 = vmatprep.subr.bf16.mxu1 %v9716_v63 }
 0x3f7   : > { %v6942_v60 = vadd.f32 %v6941_v41, %v11034_v27  ;;  %v5886_v51 = vsel %vm12550_vm3, %v5885_v31, %v5884_v55  ;;  %v6235_v18 = vunpack.c.l.bf16 %v9456_v8  ;;  %v6250_v21 = vrot.slane %v6233_v62, 1  ;;  %v7322_v55 = vpop.permute.xlu0 %7321 }
 0x3f8   : > { %v6221_v53 = vadd.f32 %v6220_v29, %v6219_v17  ;;  %v6587_v43 = vadd.f32 %v6586_v5, %v6585_v30  ;;  %v8964_v39 = vpop.f32.mrf.mxu0  ;;  %v6234_v25 = vunpack.c.l.bf16 %v9457_v20  ;;  %8885 = vmatmul.mubr.msk.bf16.vlgmr.msra.gmra.mxu1 %vm2068_vm13, %v4409_v42  ;;  %vm12558_vm9 = vcmask 1041409  }
 0x3f9   : > { %v6947_v59 = vmax.f32 %v6942_v60, 0.0  ;;  %v6249_v23 = vsel %vm12558_vm9, %v6248_v6, %v6247_v40  ;;  %v4976_v14 = vld [vmem:[%s12532_s26] sm:$0x8]  ;;  %8896 = vmatprep.mubr.msk.bf16.mxu1 %vm9717_vm12, %v9716_v63  ;;  %v6236_v9 = vunpack.c.l.bf16 %v9458_v37  ;;  %v5889_v60 = vrot.slane %v5868_v33, 3  ;;  %v9460_v6 = vld [vmem:[%s9982_s14 + $0x34] sm:$0x2] }
 0x3fa   : > { %v6224_v27 = vadd.f32 %v6221_v53, %v10983_v45  ;;  %v6588_v0 = vrot.slane %v6587_v43, 2  ;;  %v6944_v16 = vpop.f32.mrf.mxu0  ;;  %v9334_v35 = vpop.eup %9333  ;;  %vm12559_vm6 = vcmask 1042434   ;;  %vm12560_vm10 = vcmask 1046534   ;;  %v4782_v40 = vld [vmem:[%s12535_s0] sm:$0xf] }
 0x3fb   : > { %v6954_v7 = vmul.f32 %v6952_v19, %v6947_v59  ;;  %v9336_v1 = vpop.eup %9335  ;;  %v5488_v58 = vadd.f32 1.0, %v9334_v35  ;;  %v6251_v50 = vsel %vm12559_vm6, %v6250_v21, %v6249_v23  ;;  %v5888_v53 = vsel %vm12560_vm10, %v5887_v47, %v5886_v51 }
 0x3fc   : > { %v8495_v24 = vmul.f32 -1.442695, %v6224_v27  ;;  %v6589_v22 = vadd.f32 %v6588_v0, %v6587_v43  ;;  %v8965_v15 = vpop.f32.mrf.mxu0  ;;  %v4975_v36 = vpack.c.bf16 %v9336_v1, %v9336_v1  ;;  %v4780_v17 = vmul.f32 %v9336_v1, %v11109_v44  ;;  %v9459_v43 = vld [vmem:[%s9982_s14 + $0x4] sm:$0x4]  ;;  %v9461_v27 = vld [vmem:[%s9982_s14 + $0xc] sm:$0x4] }
 0x3fd   : > { %v6955_v31 = vsel %vm2124_vm14, %v6954_v7, 0.0  ;;  %9341 = vrcp.f32 %v5488_v58  ;;  %v6601_v39 = vunpack.c.l.bf16 %v9459_v43  ;;  %v6237_v19 = vunpack.c.l.bf16 %v9460_v6  ;;  %v5346_v7 = vld [vmem:[%s12532_s26 + $0x4] sm:$0x1]  ;;  %v9462_v58 = vld [vmem:[%s9982_s14 + $0x14] sm:$0x4] }
 0x3fe   : > { %v6590_v28 = vrot.slane %v6589_v22, 1  ;;  %v6956_v30 = vrot.slane %v6955_v31, 4  ;;  %v7311_v34 = vpop.f32.mrf.mxu0  ;;  %v4977_v32 = vsel %vm11295_vm4, %v4975_v36, %v4976_v14  ;;  %9343 = vpow2.f32 %v8495_v24 }
 0x3ff   : > { %v7312_v46 = vadd.f32 %v7311_v34, %v11141_v13  ;;  %v4781_v44 = vpack.c.bf16 %v4780_v17, %v4780_v17  ;;  %4978 = vst [vmem:[%s12532_s26] sm:$0x8] %v4977_v32  ;;  %v6602_v0 = vunpack.c.l.bf16 %v9461_v27  ;;  %vm12561_vm3 = vcmask 1043459  }
 0x400   : > { %v6591_v29 = vadd.f32 %v6590_v28, %v6589_v22  ;;  %v6957_v5 = vadd.f32 %v6956_v30, %v6955_v31  ;;  %v8976_v41 = vpop.f32.mrf.mxu0  ;;  %v6252_v12 = vsel %vm12561_vm3, %v6234_v25, %v6251_v50  ;;  %v6253_v33 = vrot.slane %v6235_v18, 7 }
 0x401   : > { %v7317_v52 = vmax.f32 %v7312_v46, 0.0  ;;  %v4787_v62 = vsel %vm2072_vm11, %v4781_v44, 0  ;;  %v6255_v47 = vrot.slane %v6236_v9, 6  ;;  %v6603_v24 = vunpack.c.l.bf16 %v9462_v58  ;;  %v9467_v58 = vld [vmem:[%s9982_s14 + $0xc] sm:$0x4] }
 0x402   : > { %v6594_v13 = vadd.f32 %v6591_v29, %v10983_v45  ;;  %v6958_v59 = vrot.slane %v6957_v5, 2  ;;  %8895 = vmatpush3.bf16.msra.mxu1 %v4787_v62  ;;  %v7314_v26 = vpop.f32.mrf.mxu0  ;;  %v9338_v16 = vpop.eup %9337  ;;  %v6617_v36 = vrot.slane %v6601_v39, 4  ;;  %v6618_v17 = vrot.slane %v6602_v0, 3  ;;  %v9463_v29 = vld [vmem:[%s9982_s14 + $0x1c] sm:$0x4] }
 0x403   : > { %v7324_v42 = vmul.f32 %v7322_v55, %v7317_v52  ;;  %8906 = vmatprep.subr.bf16.mxu1 %v9716_v63  ;;  %v9340_v35 = vpop.eup %9339  ;;  %v5858_v51 = vadd.f32 1.0, %v9338_v16  ;;  %vm12562_vm9 = vcmask 1047559   ;;  %vm12563_vm6 = vcmask 1044484  }
 0x404   : > { %v8512_v8 = vmul.f32 -1.442695, %v6594_v13  ;;  %v6959_v21 = vadd.f32 %v6958_v59, %v6957_v5  ;;  %v8977_v1 = vpop.f32.mrf.mxu0  ;;  %v5345_v22 = vpack.c.bf16 %v9340_v35, %v9340_v35  ;;  %v5152_v20 = vmul.f32 %v9340_v35, %v11214_v4  ;;  %vm12564_vm10 = vmmov %vm12562_vm9  ;;  %v7692_v5 = vpop.permute.xlu1 %7691 }
 0x405   : > { %v7325_v15 = vsel %vm2124_vm14, %v7324_v42, 0.0  ;;  %8897 = vmatmul.mubr.msk.bf16.vlgmr.msra.gmra.mxu1 %vm2068_vm13, %v4782_v40  ;;  %9345 = vrcp.f32 %v5858_v51  ;;  %v5520_v37 = vsel %vm12562_vm9, %v11251_v49, %v11281_v56  ;;  %v6254_v9 = vsel %vm12563_vm6, %v6253_v33, %v6252_v12  ;;  %v5154_v49 = vld [vmem:[%s12535_s0] sm:$0xf]  ;;  %v9464_v56 = vld [vmem:[%s9982_s14 + $0x3c] sm:$0x2] }
 0x406   : > { %v6960_v18 = vrot.slane %v6959_v21, 1  ;;  %v7326_v25 = vrot.slane %v7325_v15, 4  ;;  %v7681_v31 = vpop.f32.mrf.mxu0  ;;  %8908 = vmatprep.mubr.msk.bf16.mxu1 %vm9717_vm12, %v9716_v63  ;;  %v5347_v23 = vsel %vm11029_vm2, %v5345_v22, %v5346_v7  ;;  %9347 = vpow2.f32 %v8512_v8  ;;  %v9465_v42 = vld [vmem:[%s9982_s14 + $0x2c] sm:$0x4] }
 0x407   : > { %v7682_v14 = vadd.f32 %v7681_v31, %v11249_v2  ;;  %v5153_v28 = vpack.c.bf16 %v5152_v20, %v5152_v20  ;;  %5348 = vst [vmem:[%s12532_s26 + $0x4] sm:$0x1] %v5347_v23  ;;  %v11341_v44 = vsel %vm12564_vm10, %v5889_v60, %v5888_v53  ;;  %v6604_v2 = vunpack.c.l.bf16 %v9463_v29  ;;  %v9468_v31 = vld [vmem:[%s9982_s14 + $0x24] sm:$0x4]  ;;  %v9469_v23 = vld [vmem:[%s9982_s14 + $0x14] sm:$0x4] }
 0x408   : > { %v6961_v30 = vadd.f32 %v6960_v18, %v6959_v21  ;;  %v7327_v4 = vadd.f32 %v7326_v25, %v7325_v15  ;;  %v8988_v34 = vpop.f32.mrf.mxu0  ;;  %v6238_v62 = vunpack.c.l.bf16 %v9464_v56  ;;  %v6257_v43 = vrot.slane %v6237_v19, 5  ;;  %v9466_v21 = vld [vmem:[%s9982_s14 + $0x4] sm:$0x4]  ;;  %v9471_v29 = vld [vmem:[%s9982_s14 + $0x3c] sm:$0x4] }
 0x409   : > { %v7687_v32 = vmax.f32 %v7682_v14, 0.0  ;;  %v5159_v46 = vsel %vm2072_vm11, %v5153_v28, 0  ;;  %vm12565_vm3 = vcmask 1045509   ;;  %vm12566_vm9 = vcmask 1041409   ;;  %v9470_v34 = vld [vmem:[%s9982_s14 + $0x34] sm:$0x4] }
 0x40a   : > { %v6964_v41 = vadd.f32 %v6961_v30, %v10983_v45  ;;  %v7328_v50 = vrot.slane %v7327_v4, 2  ;;  %8907 = vmatpush3.bf16.msra.mxu1 %v5159_v46  ;;  %v7684_v52 = vpop.f32.mrf.mxu0  ;;  %v9342_v39 = vpop.eup %9341  ;;  %v6256_v60 = vsel %vm12565_vm3, %v6255_v47, %v6254_v9  ;;  %v6619_v53 = vsel %vm12566_vm9, %v6618_v17, %v6617_v36  ;;  %v6086_v46 = vld [vmem:[%s12532_s26 + $0x4] sm:$0x2] }
 0x40b   : > { %v7694_v55 = vmul.f32 %v7692_v5, %v7687_v32  ;;  %8918 = vmatprep.subr.bf16.mxu1 %v9716_v63  ;;  %v6620_v13 = vrot.slane %v6603_v24, 2  ;;  %v9344_v59 = vpop.eup %9343  ;;  %v5715_v26 = vpack.c.bf16 %v9342_v39, %v9342_v39  ;;  %v5522_v0 = vmul.f32 %v9342_v39, %v5520_v37 }
 0x40c   : > { %v8529_v40 = vmul.f32 -1.442695, %v6964_v41  ;;  %v7329_v6 = vadd.f32 %v7328_v50, %v7327_v4  ;;  %v8989_v27 = vpop.f32.mrf.mxu0  ;;  %v6228_v16 = vadd.f32 1.0, %v9344_v59  ;;  %v6606_v12 = vunpack.c.l.bf16 %v9465_v42  ;;  %v5524_v4 = vld [vmem:[%s12535_s0] sm:$0xf] }
 0x40d   : > { %v7695_v19 = vsel %vm2124_vm14, %v7694_v55, 0.0  ;;  %8909 = vmatmul.mubr.msk.bf16.vlgmr.msra.gmra.mxu1 %vm2068_vm13, %v5154_v49  ;;  %v6622_v33 = vrot.slane %v6604_v2, 1  ;;  %v5523_v7 = vpack.c.bf16 %v5522_v0, %v5522_v0  ;;  %vm12567_vm6 = vcmask 1042434   ;;  %v9474_v0 = vld [vmem:[%s9982_s14 + $0xc] sm:$0x8] }
 0x40e   : > { %9349 = vpow2.f32 %v8529_v40  ;;  %v7330_v47 = vrot.slane %v7329_v6, 1  ;;  %v7696_v35 = vrot.slane %v7695_v19, 4  ;;  %8920 = vmatprep.mubr.msk.bf16.mxu1 %vm9717_vm12, %v9716_v63  ;;  %v5716_v51 = vld [vmem:[%s12532_s26 + $0x4] sm:$0x1]  ;;  %v6621_v8 = vsel %vm12567_vm6, %v6620_v13, %v6619_v53 }
 0x40f   : > { %9351 = vrcp.f32 %v6228_v16  ;;  %v6971_v1 = vunpack.c.l.bf16 %v9466_v21  ;;  %v6972_v24 = vunpack.c.l.bf16 %v9467_v58  ;;  %v5717_v22 = vsel %vm11072_vm7, %v5715_v26, %v5716_v51  ;;  %v9476_v58 = vld [vmem:[%s9982_s14 + $0x14] sm:$0x8] }
 0x410   : > { %v7331_v15 = vadd.f32 %v7330_v47, %v7329_v6  ;;  %v7697_v20 = vadd.f32 %v7696_v35, %v7695_v19  ;;  %v5529_v36 = vsel %vm2072_vm11, %v5523_v7, 0  ;;  %5718 = vst [vmem:[%s12532_s26 + $0x4] sm:$0x1] %v5717_v22  ;;  %vm12568_vm14 = vcmask 1046534   ;;  %v9473_v6 = vld [vmem:[%s9982_s14 + $0x4] sm:$0x8] }
 0x411   : > { %8919 = vmatpush3.bf16.msra.mxu1 %v5529_v36  ;;  %v6258_v18 = vsel %vm12568_vm14, %v6257_v43, %v6256_v60  ;;  %v6259_v25 = vrot.slane %v6238_v62, 4  ;;  %v6605_v17 = vunpack.c.l.bf16 %v9468_v31  ;;  %v6973_v14 = vunpack.c.l.bf16 %v9469_v23  ;;  %v9472_v60 = vld [vmem:[%s9982_s14 + $0x1c] sm:$0x4] }
 0x412   : > { %v7334_v28 = vadd.f32 %v7331_v15, %v10983_v45  ;;  %v7698_v30 = vrot.slane %v7697_v20, 2  ;;  %8930 = vmatprep.subr.bf16.mxu1 %v9716_v63  ;;  %v6607_v37 = vunpack.c.l.bf16 %v9470_v34  ;;  %vm12569_vm10 = vcmask 1043459   ;;  %v9346_v32 = vpop.eup %9345 }
 0x413   : > { %v6623_v9 = vsel %vm12569_vm10, %v6622_v33, %v6621_v8  ;;  %v6608_v2 = vunpack.c.l.bf16 %v9471_v29  ;;  %v6625_v5 = vrot.slane %v6606_v12, 7  ;;  %v6987_v41 = vrot.slane %v6971_v1, 5  ;;  %v9348_v52 = vpop.eup %9347  ;;  %v9475_v33 = vld [vmem:[%s9982_s14 + $0x24] sm:$0x4]  ;;  %v5894_v8 = vld [vmem:[%s12535_s0] sm:$0xf] }
 0x414   : > { %v6988_v50 = vrot.slane %v6972_v24, 4  ;;  %v6085_v49 = vpack.c.bf16 %v9346_v32, %v9346_v32  ;;  %v8546_v56 = vmul.f32 -1.442695, %v7334_v28  ;;  %v7699_v62 = vadd.f32 %v7698_v30, %v7697_v20  ;;  %v9477_v30 = vld [vmem:[%s9982_s14 + $0x1c] sm:$0x8] }
 0x415   : > { %v5892_v43 = vmul.f32 %v9346_v32, %v11341_v44  ;;  %v6598_v39 = vadd.f32 1.0, %v9348_v52  ;;  %8921 = vmatmul.mubr.msk.bf16.vlgmr.msra.gmra.mxu1 %vm2068_vm13, %v5524_v4  ;;  %vm12570_vm3 = vcmask 1044484   ;;  %v6974_v53 = vunpack.c.l.bf16 %v9472_v60  ;;  %v9479_v32 = vld [vmem:[%s9982_s14 + $0x34] sm:$0x4]  ;;  %v9480_v52 = vld [vmem:[%s9982_s14 + $0x24] sm:$0x8] }
 0x416   : > { %v6624_v55 = vsel %vm12570_vm3, %v6605_v17, %v6623_v9  ;;  %v6990_v13 = vrot.slane %v6973_v14, 3  ;;  %v6087_v59 = vsel %vm11114_vm1, %v6085_v49, %v6086_v46  ;;  %9353 = vpow2.f32 %v8546_v56  ;;  %8932 = vmatprep.mubr.msk.bf16.mxu1 %vm9717_vm12, %v9716_v63  ;;  %v9481_v56 = vld [vmem:[%s9982_s14 + $0x4] sm:$0x8]  ;;  %v9483_v60 = vld [vmem:[%s9982_s14 + $0x3c] sm:$0x4] }
 0x417   : > { %v7700_v26 = vrot.slane %v7699_v62, 1  ;;  %v5893_v40 = vpack.c.bf16 %v5892_v43, %v5892_v43  ;;  %6088 = vst [vmem:[%s12532_s26 + $0x4] sm:$0x2] %v6087_v59  ;;  %9355 = vrcp.f32 %v6598_v39  ;;  %v6989_v44 = vsel %vm12566_vm9, %v6988_v50, %v6987_v41  ;;  %v9482_v43 = vld [vmem:[%s9982_s14 + $0xc] sm:$0x8] }
 0x418   : > { %v7341_v27 = vunpack.c.l.bf16 %v9473_v6  ;;  %v7342_v16 = vunpack.c.l.bf16 %v9474_v0  ;;  %v6627_v12 = vrot.slane %v6607_v37, 6  ;;  %v6975_v47 = vunpack.c.l.bf16 %v9475_v33  ;;  %v9478_v37 = vld [vmem:[%s9982_s14 + $0x2c] sm:$0x4]  ;;  %v6264_v59 = vld [vmem:[%s12535_s0] sm:$0xf] }
 0x419   : > { %v7701_v19 = vadd.f32 %v7700_v26, %v7699_v62  ;;  %v5899_v42 = vsel %vm2072_vm11, %v5893_v40, 0  ;;  %vm12571_vm6 = vcmask 1045509   ;;  %v6992_v7 = vrot.slane %v6974_v53, 2  ;;  %v9484_v0 = vld [vmem:[%s9982_s14 + $0x2c] sm:$0x8] }
 0x41a   : > { %8931 = vmatpush3.bf16.msra.mxu1 %v5899_v42  ;;  %v6626_v35 = vsel %vm12571_vm6, %v6625_v5, %v6624_v55  ;;  %vm12572_vm14 = vcmask 1047559   ;;  %vm12573_vm10 = vcmask 1042434   ;;  %v7343_v24 = vunpack.c.l.bf16 %v9476_v58  ;;  %v6826_v33 = vld [vmem:[%s12532_s26 + $0x4] sm:$0x4] }
 0x41b   : > { %v7704_v51 = vadd.f32 %v7701_v19, %v10983_v45  ;;  %8942 = vmatprep.subr.bf16.mxu1 %v9716_v63  ;;  %v6260_v21 = vsel %vm12572_vm14, %v6259_v25, %v6258_v18  ;;  %v6991_v1 = vsel %vm12573_vm10, %v6990_v13, %v6989_v44  ;;  %v9350_v22 = vpop.eup %9349  ;;  %v6629_v15 = vrot.slane %v6608_v2, 5  ;;  %v9485_v19 = vld [vmem:[%s9982_s14 + $0x14] sm:$0x8] }
 0x41c   : > { %v7357_v20 = vrot.slane %v7341_v27, 6  ;;  %v7358_v36 = vrot.slane %v7342_v16, 5  ;;  %v9352_v45 = vpop.eup %9351  ;;  %v6968_v31 = vadd.f32 1.0, %v9350_v22  ;;  %vm12574_vm3 = vcmask 1046534   ;;  %v9486_v22 = vld [vmem:[%s9982_s14 + $0x1c] sm:$0x8] }
 0x41d   : > { %v8563_v17 = vmul.f32 -1.442695, %v7704_v51  ;;  %v6628_v23 = vsel %vm12574_vm3, %v6627_v12, %v6626_v35  ;;  %v6994_v14 = vrot.slane %v6975_v47, 1  ;;  %v6455_v28 = vpack.c.bf16 %v9352_v45, %v9352_v45  ;;  %8933 = vmatmul.mubr.msk.bf16.vlgmr.msra.gmra.mxu1 %vm2068_vm13, %v5894_v8 }
 0x41e   : > { %v6262_v18 = vmul.f32 %v9352_v45, %v6260_v21  ;;  %vm12575_vm9 = vcmask 1043459   ;;  %v7344_v4 = vunpack.c.l.bf16 %v9477_v30  ;;  %v6456_v34 = vld [vmem:[%s12532_s26 + $0x4] sm:$0x2]  ;;  %9357 = vrcp.f32 %v6968_v31  ;;  %8944 = vmatprep.mubr.msk.bf16.mxu1 %vm9717_vm12, %v9716_v63  ;;  %v9488_v30 = vld [vmem:[%s9982_s14 + $0x24] sm:$0x8] }
 0x41f   : > { %v6993_v25 = vsel %vm12575_vm9, %v6992_v7, %v6991_v1  ;;  %v6976_v9 = vunpack.c.l.bf16 %v9478_v37  ;;  %v6977_v46 = vunpack.c.l.bf16 %v9479_v32  ;;  %v7360_v29 = vrot.slane %v7343_v24, 4  ;;  %v9489_v37 = vld [vmem:[%s9982_s14 + $0x34] sm:$0x8] }
 0x420   : > { %v6457_v2 = vsel %vm11159_vm0, %v6455_v28, %v6456_v34  ;;  %9359 = vpow2.f32 %v8563_v17  ;;  %v6263_v5 = vpack.c.bf16 %v6262_v18, %v6262_v18  ;;  %vm12576_vm6 = vcmask 1041409   ;;  %v9487_v18 = vld [vmem:[%s9982_s14 + $0x3c] sm:$0x8]  ;;  %v6634_v34 = vld [vmem:[%s12535_s0] sm:$0xf] }
 0x421   : > { %v7359_v41 = vsel %vm12576_vm6, %v7358_v36, %v7357_v20  ;;  %6458 = vst [vmem:[%s12532_s26 + $0x4] sm:$0x2] %v6457_v2  ;;  %vm12577_vm14 = vcmask 1044484   ;;  %v7345_v49 = vunpack.c.l.bf16 %v9480_v52  ;;  %v7711_v62 = vunpack.c.l.bf16 %v9481_v56  ;;  %v9490_v52 = vld [vmem:[%s9982_s14 + $0x2c] sm:$0x8] }
 0x422   : > { %v6995_v50 = vsel %vm12577_vm14, %v6994_v14, %v6993_v25  ;;  %v7712_v39 = vunpack.c.l.bf16 %v9482_v43  ;;  %v6269_v55 = vsel %vm2072_vm11, %v6263_v5, 0  ;;  %v6978_v53 = vunpack.c.l.bf16 %v9483_v60 }
 0x423   : > { %v7362_v13 = vrot.slane %v7344_v4, 3  ;;  %8943 = vmatpush3.bf16.msra.mxu1 %v6269_v55  ;;  %vm12578_vm10 = vcmask 1047559   ;;  %v6997_v40 = vrot.slane %v6977_v46, 7  ;;  %vm12579_vm3 = vcmask 1042434   ;;  %v9354_v6 = vpop.eup %9353 }
 0x424   : > { %v6630_v26 = vsel %vm12578_vm10, %v6629_v15, %v6628_v23  ;;  %v7361_v44 = vsel %vm12579_vm3, %v7360_v29, %v7359_v41  ;;  %8954 = vmatprep.subr.bf16.mxu1 %v9716_v63  ;;  %vm12580_vm9 = vcmask 1045509   ;;  %v7346_v16 = vunpack.c.l.bf16 %v9484_v0  ;;  %v9356_v12 = vpop.eup %9355  ;;  %v7004_v0 = vld [vmem:[%s12535_s0] sm:$0xf] }
 0x425   : > { %v6996_v27 = vsel %vm12580_vm9, %v6976_v9, %v6995_v50  ;;  %v7713_v42 = vunpack.c.l.bf16 %v9485_v19  ;;  %v7338_v47 = vadd.f32 1.0, %v9354_v6  ;;  %v7364_v35 = vrot.slane %v7345_v49, 2  ;;  %v7566_v19 = vld [vmem:[%s12532_s26 + $0x4] sm:$0x8] }
 0x426   : > { %v7727_v7 = vrot.slane %v7711_v62, 7  ;;  %v7728_v51 = vrot.slane %v7712_v39, 6  ;;  %v6825_v8 = vpack.c.bf16 %v9356_v12, %v9356_v12  ;;  %8945 = vmatmul.mubr.msk.bf16.vlgmr.msra.gmra.mxu1 %vm2068_vm13, %v6264_v59  ;;  %v6632_v21 = vmul.f32 %v9356_v12, %v6630_v26 }
 0x427   : > { %v6999_v1 = vrot.slane %v6978_v53, 6  ;;  %vm12581_vm6 = vcmask 1043459   ;;  %9361 = vrcp.f32 %v7338_v47  ;;  %8956 = vmatprep.mubr.msk.bf16.mxu1 %vm9717_vm12, %v9716_v63  ;;  %vm12582_vm14 = vcmask 1046534  }
 0x428   : > { %v7363_v58 = vsel %vm12581_vm6, %v7362_v13, %v7361_v44  ;;  %v6998_v24 = vsel %vm12582_vm14, %v6997_v40, %v6996_v27  ;;  %v7714_v15 = vunpack.c.l.bf16 %v9486_v22  ;;  %v6827_v20 = vsel %vm11195_vm15, %v6825_v8, %v6826_v33  ;;  %v9491_v13 = vld [vmem:[%s9982_s14 + $0x34] sm:$0x8] }
 0x429   : > { %v6633_v36 = vpack.c.bf16 %v6632_v21, %v6632_v21  ;;  %v7366_v45 = vrot.slane %v7346_v16, 1  ;;  %v7730_v31 = vrot.slane %v7713_v42, 5  ;;  %6828 = vst [vmem:[%s12532_s26 + $0x4] sm:$0x4] %v6827_v20  ;;  %vm12583_vm10 = vcmask 1044484  }
 0x42a   : > { %v7365_v17 = vsel %vm12583_vm10, %v7364_v35, %v7363_v58  ;;  %vm12584_vm3 = vcmask 1041409   ;;  %vm12585_vm9 = vcmask 1047559   ;;  %v7348_v25 = vunpack.c.l.bf16 %v9487_v18  ;;  %v7374_v58 = vld [vmem:[%s12535_s0] sm:$0xf] }
 0x42b   : > { %v7729_v23 = vsel %vm12584_vm3, %v7728_v51, %v7727_v7  ;;  %v6639_v14 = vsel %vm2072_vm11, %v6633_v36, 0  ;;  %v7000_v28 = vsel %vm12585_vm9, %v6999_v1, %v6998_v24  ;;  %v7715_v4 = vunpack.c.l.bf16 %v9488_v30  ;;  %v9358_v46 = vpop.eup %9357  ;;  %v9492_v51 = vld [vmem:[%s9982_s14 + $0x3c] sm:$0x8] }
 0x42c   : > { %8955 = vmatpush3.bf16.msra.mxu1 %v6639_v14  ;;  %v7347_v9 = vunpack.c.l.bf16 %v9489_v37  ;;  %v7732_v32 = vrot.slane %v7714_v15, 4  ;;  %vm12586_vm6 = vcmask 1045509   ;;  %vm12587_vm14 = vcmask 1042434   ;;  %v2225_v14 = vpop.permute.xlu0 %2224 }
 0x42d   : > { %8966 = vmatprep.subr.bf16.mxu1 %v9716_v63  ;;  %v7367_v29 = vsel %vm12586_vm6, %v7366_v45, %v7365_v17  ;;  %v7731_v2 = vsel %vm12587_vm14, %v7730_v31, %v7729_v23  ;;  %v9360_v5 = vpop.eup %9359  ;;  %v7195_v41 = vpack.c.bf16 %v9358_v46, %v9358_v46  ;;  %v7002_v50 = vmul.f32 %v9358_v46, %v7000_v28  ;;  %v7744_v23 = vld [vmem:[%s12535_s0] sm:$0xf] }
 0x42e   : > { %v7716_v49 = vunpack.c.l.bf16 %v9490_v52  ;;  %v7708_v56 = vadd.f32 1.0, %v9360_v5  ;;  %v7369_v62 = vrot.slane %v7348_v25, 7  ;;  %v7734_v43 = vrot.slane %v7715_v4, 3 }
 0x42f   : > { %8957 = vmatmul.mubr.msk.bf16.vlgmr.msra.gmra.mxu1 %vm2068_vm13, %v6634_v34  ;;  %v7003_v39 = vpack.c.bf16 %v7002_v50, %v7002_v50  ;;  %vm12588_vm10 = vcmask 1046534   ;;  %vm12589_vm3 = vcmask 1043459   ;;  %v7717_v59 = vunpack.c.l.bf16 %v9491_v13 }
 0x430   : > { %8968 = vmatprep.mubr.msk.bf16.mxu1 %vm9717_vm12, %v9716_v63  ;;  %v7368_v55 = vsel %vm12588_vm10, %v7347_v9, %v7367_v29  ;;  %v7733_v60 = vsel %vm12589_vm3, %v7732_v32, %v7731_v2  ;;  %v7196_v53 = vld [vmem:[%s12532_s26 + $0x4] sm:$0x4]  ;;  %9363 = vrcp.f32 %v7708_v56  ;;  %v7736_v44 = vrot.slane %v7716_v49, 2  ;;  %vm12592_vm3 = vmmov %vm12585_vm9  ;;  %v2598_v28 = vpop.permute.xlu0 %2597 }
 0x431   : > { %v7197_v26 = vsel %vm11231_vm8, %v7195_v41, %v7196_v53  ;;  %v7009_v40 = vsel %vm2072_vm11, %v7003_v39, 0  ;;  %v7370_v6 = vsel %vm12585_vm9, %v7369_v62, %v7368_v55  ;;  %vm12590_vm6 = vcmask 1044484  }
 0x432   : > { %7198 = vst [vmem:[%s12532_s26 + $0x4] sm:$0x4] %v7197_v26  ;;  %8967 = vmatpush3.bf16.msra.mxu1 %v7009_v40  ;;  %v7735_v27 = vsel %vm12590_vm6, %v7734_v43, %v7733_v60  ;;  %v7738_v42 = vrot.slane %v7717_v59, 1  ;;  %vm12591_vm14 = vcmask 1045509   ;;  %v7718_v8 = vunpack.c.l.bf16 %v9492_v51 }
 0x433   : > { %8978 = vmatprep.subr.bf16.mxu1 %v9716_v63  ;;  %v7737_v47 = vsel %vm12591_vm14, %v7736_v44, %v7735_v27  ;;  %v9718_v34 = vmov 1966171168   ;;  %v2240_v9 = vlaneseq  ;;  %v9719_v50 = vmov 286326784  }
 0x434   : > { %v9362_v16 = vpop.eup %9361  ;;  %v7739_v21 = vsel %vm12588_vm10, %v7738_v42, %v7737_v47  ;;  %v11497_v18 = vpop.permute.xlu0 %2969  ;;  %v2238_v37 = vunpack.c.l.s4 %v9718_v34  ;;  %v2278_v52 = vunpack.c.l.s4 %v9719_v50 }
 0x435   : > { %v7565_v12 = vpack.c.bf16 %v9362_v16, %v9362_v16  ;;  %v7372_v33 = vmul.f32 %v9362_v16, %v7370_v6  ;;  %v7740_v24 = vsel %vm12592_vm3, %v7718_v8, %v7739_v21  ;;  %v2241_v2 = vshrl.u32 %v2240_v9, 7  ;;  %v2344_v8 = vld [vmem:[%s12593_s15] sm:$0x1]  ;;  %v2353_v9 = vld [vmem:[%s12593_s15 + $0x18] sm:$0x1] }
 0x436   : > { %v2239_v29 = vunpack.c.0.s8 %v2238_v37  ;;  %v2279_v53 = vunpack.c.0.s8 %v2278_v52 }
 0x437   : > { %8969 = vmatmul.mubr.msk.bf16.vlgmr.msra.gmra.mxu1 %vm2068_vm13, %v7004_v0  ;;  %v7567_v35 = vsel %vm11262_vm5, %v7565_v12, %v7566_v19  ;;  %v7373_v7 = vpack.c.bf16 %v7372_v33, %v7372_v33 }
 0x438   : > { %8980 = vmatprep.mubr.msk.bf16.mxu1 %vm9717_vm12, %v9716_v63  ;;  %7568 = vst [vmem:[%s12532_s26 + $0x4] sm:$0x8] %v7567_v35  ;;  %v11499_v25 = vpop.permute.xlu0 %3342  ;;  %v11509_v43 = vsub.s32 %v2239_v29, %v2241_v2  ;;  %v11517_v6 = vsub.s32 %v2279_v53, %v2241_v2  ;;  %v2359_v29 = vld [vmem:[%s12593_s15 + $0x28] sm:$0x1]  ;;  %v2362_v2 = vld [vmem:[%s12593_s15 + $0x30] sm:$0x1] }
 0x439   : > { %v7379_v1 = vsel %vm2072_vm11, %v7373_v7, 0 }
 0x43a   : > { %8979 = vmatpush3.bf16.msra.mxu1 %v7379_v1 }
 0x43b   : > { %8990 = vmatprep.subr.bf16.mxu1 %v9716_v63 }
 0x43c   : > { %v11501_v30 = vpop.permute.xlu0 %3714 }
 0x43d   : > { %v9364_v22 = vpop.eup %9363 }
 0x43e   : > { %v7935_v15 = vpack.c.bf16 %v9364_v22, %v9364_v22  ;;  %v7742_v20 = vmul.f32 %v9364_v22, %v7740_v24 }
 0x43f   : > { %8981 = vmatmul.mubr.msk.bf16.vlgmr.msra.gmra.mxu1 %vm2068_vm13, %v7374_v58  ;;  %v7936_v36 = vld [vmem:[%s12532_s26 + $0x4] sm:$0x8] }
 0x440   : > { %8992 = vmatprep.mubr.msk.bf16.mxu1 %vm9717_vm12, %v9716_v63  ;;  %v7937_v45 = vsel %vm11295_vm4, %v7935_v15, %v7936_v36  ;;  %v7743_v31 = vpack.c.bf16 %v7742_v20, %v7742_v20  ;;  %v2232_v63 = vpop.permute.xlu1 %2231  ;;  %v11503_v32 = vpop.permute.xlu0 %5204 }
 0x441   : > { %7938 = vst [vmem:[%s12532_s26 + $0x4] sm:$0x8] %v7937_v45 }
 0x442   : > { %v7749_v17 = vsel %vm2072_vm11, %v7743_v31, 0 }
 0x443   : > { %8991 = vmatpush3.bf16.msra.mxu1 %v7749_v17  ;;  %v2347_v17 = vld [vmem:[%s12593_s15 + $0x8] sm:$0x1] }
 0x444   : > { %v2605_v4 = vpop.permute.xlu1 %2604  ;;  %v11507_v56 = vpop.permute.xlu0 %6684 }
 0x447   : > { %8993 = vmatmul.mubr.msk.bf16.vlgmr.msra.gmra.mxu1 %vm2068_vm13, %v7744_v23  ;;  %v2350_v23 = vld [vmem:[%s12593_s15 + $0x10] sm:$0x1] }
 0x448   : > { %v11505_v46 = vpop.permute.xlu1 %2976  ;;  %v11514_v26 = vpop.permute.xlu0 %3721 }
 0x44c   : > { %v11511_v55 = vpop.permute.xlu1 %3349  ;;  %v11524_v15 = vpop.permute.xlu0 %5211 }
 0x450   : > { %v11519_v27 = vpop.permute.xlu1 %4459 }
 0x485   : > { %v2215_v5 = vpop.f32.mrf.mxu1 }
 0x486   : > { %v2227_v41 = vmul.f32 %v2225_v14, %v2215_v5  ;;  %v2356_v14 = vld [vmem:[%s12593_s15 + $0x20] sm:$0x1]  ;;  %v11537_v5 = vpop.permute.xlu1 %5944 }
 0x487   : > { %v8814_v49 = vpop.f32.mrf.mxu1 }
 0x488   : > { %v2234_v62 = vadd.f32 %v2232_v63, %v2227_v41 }
 0x489   : > { %v2218_v39 = vpop.f32.mrf.mxu1 }
 0x48a   : > { %v2235_v60 = vpack.c.bf16 %v2234_v62, %v2234_v62 }
 0x48b   : > { %v8815_v13 = vpop.f32.mrf.mxu1 }
 0x48c   : > { %v2243_v59 = vrot.slane %v2235_v60, %v11509_v43  ;;  %v2365_v13 = vld [vmem:[%s12593_s15 + $0x38] sm:$0x1] }
 0x48e   : > { %v2244_v40 = vcombine.high %v2243_v59, %v2243_v59  ;;  %v2251_v44 = vrot.slane %v2243_v59, %v11509_v43 }
 0x490   : > { %v2258_v0 = vrot.slane %v2244_v40, %v11509_v43  ;;  %v2259_v16 = vcombine.high %v2251_v44, %v2251_v44  ;;  %v2262_v19 = vunpack.i.h.s16 %v2251_v44  ;;  %v8310_v42 = vpack.i.b16 %v2251_v44, %v2251_v44  ;;  %v2588_v12 = vpop.f32.mrf.mxu1 }
 0x491   : > { %v2600_v33 = vmul.f32 %v2598_v28, %v2588_v12 }
 0x492   : > { %v2260_v47 = vcombine.high %v2258_v0, %v2258_v0  ;;  %v2264_v35 = vunpack.i.h.s16 %v2258_v0  ;;  %v2266_v7 = vunpack.i.h.s16 %v2259_v16  ;;  %v2270_v51 = vpack.i.b16 %v2262_v19, %v2262_v19  ;;  %v8826_v21 = vpop.f32.mrf.mxu1 }
 0x493   : > { %v8311_v1 = vpack.i.b16 %v2258_v0, %v2258_v0  ;;  %v8312_v58 = vpack.i.b16 %v2259_v16, %v2259_v16  ;;  %v2283_v24 = vrot.slane %v8310_v42, %v11517_v6  ;;  %v2607_v22 = vadd.f32 %v2605_v4, %v2600_v33  ;;  %v11565_v33 = vpop.permute.xlu0 %6691  ;;  %v11572_v21 = vpop.permute.xlu1 %7424 }
 0x494   : > { %v2268_v20 = vunpack.i.h.s16 %v2260_v47  ;;  %v2272_v36 = vpack.i.b16 %v2264_v35, %v2264_v35  ;;  %v2274_v45 = vpack.i.b16 %v2266_v7, %v2266_v7  ;;  %v8313_v31 = vpack.i.b16 %v2260_v47, %v2260_v47  ;;  %v2591_v28 = vpop.f32.mrf.mxu1 }
 0x495   : > { %v2290_v63 = vrot.slane %v2270_v51, %v11517_v6  ;;  %v2297_v34 = vrot.slane %v8311_v1, %v11517_v6  ;;  %v2311_v37 = vrot.slane %v8312_v58, %v11517_v6  ;;  %v2345_v4 = vsel %vm11029_vm2, %v2283_v24, %v2344_v8 }
 0x496   : > { %v2276_v41 = vpack.i.b16 %v2268_v20, %v2268_v20  ;;  %v2304_v50 = vrot.slane %v2272_v36, %v11517_v6  ;;  %v2318_v52 = vrot.slane %v2274_v45, %v11517_v6  ;;  %v2325_v49 = vrot.slane %v8313_v31, %v11517_v6  ;;  %2346 = vst [vmem:[%s12593_s15] sm:$0x1] %v2345_v4  ;;  %v8827_v62 = vpop.f32.mrf.mxu1 }
 0x497   : > { %v2348_v39 = vsel %vm11029_vm2, %v2290_v63, %v2347_v17  ;;  %v2351_v60 = vsel %vm11029_vm2, %v2297_v34, %v2350_v23  ;;  %v2357_v53 = vsel %vm11029_vm2, %v2311_v37, %v2356_v14  ;;  %v2608_v59 = vpack.c.bf16 %v2607_v22, %v2607_v22  ;;  %v11576_v28 = vpop.permute.xlu0 %4087  ;;  %v11583_v62 = vpop.permute.xlu1 %4466 }
 0x498   : > { %v2332_v40 = vrot.slane %v2276_v41, %v11517_v6  ;;  %2349 = vst [vmem:[%s12593_s15 + $0x8] sm:$0x1] %v2348_v39  ;;  %2352 = vst [vmem:[%s12593_s15 + $0x10] sm:$0x1] %v2351_v60  ;;  %v2354_v44 = vsel %vm11029_vm2, %v2304_v50, %v2353_v9  ;;  %v2360_v0 = vsel %vm11029_vm2, %v2318_v52, %v2359_v29  ;;  %v2960_v19 = vpop.f32.mrf.mxu1 }
 0x499   : > { %2358 = vst [vmem:[%s12593_s15 + $0x20] sm:$0x1] %v2357_v53  ;;  %v2363_v16 = vsel %vm11029_vm2, %v2325_v49, %v2362_v2  ;;  %2355 = vst [vmem:[%s12593_s15 + $0x18] sm:$0x1] %v2354_v44  ;;  %v2616_v42 = vrot.slane %v2608_v59, %v11509_v43  ;;  %v2972_v12 = vmul.f32 %v11497_v18, %v2960_v19 }
 0x49a   : > { %2361 = vst [vmem:[%s12593_s15 + $0x28] sm:$0x1] %v2360_v0  ;;  %2364 = vst [vmem:[%s12593_s15 + $0x30] sm:$0x1] %v2363_v16  ;;  %v2366_v47 = vsel %vm11029_vm2, %v2332_v40, %v2365_v13  ;;  %v8838_v35 = vpop.f32.mrf.mxu1 }
 0x49b   : > { %2367 = vst [vmem:[%s12593_s15 + $0x38] sm:$0x1] %v2366_v47  ;;  %v2617_v7 = vcombine.high %v2616_v42, %v2616_v42  ;;  %v2624_v51 = vrot.slane %v2616_v42, %v11509_v43  ;;  %v2979_v8 = vadd.f32 %v11505_v46, %v2972_v12 }
 0x49c   : > { %v2963_v1 = vpop.f32.mrf.mxu1 }
 0x49d   : > { %v2631_v58 = vrot.slane %v2617_v7, %v11509_v43  ;;  %v2632_v24 = vcombine.high %v2624_v51, %v2624_v51  ;;  %v2635_v18 = vunpack.i.h.s16 %v2624_v51  ;;  %v8327_v22 = vpack.i.b16 %v2624_v51, %v2624_v51  ;;  %v2716_v14 = vld [vmem:[%s12593_s15] sm:$0x1] }
 0x49e   : > { %v2980_v20 = vpack.c.bf16 %v2979_v8, %v2979_v8  ;;  %v8839_v36 = vpop.f32.mrf.mxu1 }
 0x49f   : > { %v2633_v45 = vcombine.high %v2631_v58, %v2631_v58  ;;  %v2637_v31 = vunpack.i.h.s16 %v2631_v58  ;;  %v2639_v17 = vunpack.i.h.s16 %v2632_v24  ;;  %v2643_v23 = vpack.i.b16 %v2635_v18, %v2635_v18  ;;  %v2719_v50 = vld [vmem:[%s12593_s15 + $0x8] sm:$0x1]  ;;  %v2722_v52 = vld [vmem:[%s12593_s15 + $0x10] sm:$0x1] }
 0x4a0   : > { %v8328_v46 = vpack.i.b16 %v2631_v58, %v2631_v58  ;;  %v8329_v63 = vpack.i.b16 %v2632_v24, %v2632_v24  ;;  %v2656_v34 = vrot.slane %v8327_v22, %v11517_v6  ;;  %v2988_v37 = vrot.slane %v2980_v20, %v11509_v43  ;;  %v3333_v4 = vpop.f32.mrf.mxu1  ;;  %v2728_v49 = vld [vmem:[%s12593_s15 + $0x20] sm:$0x1]  ;;  %v2725_v59 = vld [vmem:[%s12593_s15 + $0x18] sm:$0x1]  ;;  %v11614_v20 = vpop.permute.xlu0 %5574 }
 0x4a1   : > { %v2641_v9 = vunpack.i.h.s16 %v2633_v45  ;;  %v2645_v29 = vpack.i.b16 %v2637_v31, %v2637_v31  ;;  %v2647_v2 = vpack.i.b16 %v2639_v17, %v2639_v17  ;;  %v8330_v41 = vpack.i.b16 %v2633_v45, %v2633_v45  ;;  %v2731_v40 = vld [vmem:[%s12593_s15 + $0x28] sm:$0x1]  ;;  %v2734_v44 = vld [vmem:[%s12593_s15 + $0x30] sm:$0x1] }
 0x4a2   : > { %v2663_v39 = vrot.slane %v2643_v23, %v11517_v6  ;;  %v2670_v60 = vrot.slane %v8328_v46, %v11517_v6  ;;  %v2684_v53 = vrot.slane %v8329_v63, %v11517_v6  ;;  %v2717_v13 = vsel %vm11072_vm7, %v2656_v34, %v2716_v14  ;;  %v8850_v0 = vpop.f32.mrf.mxu1  ;;  %v2737_v51 = vld [vmem:[%s12593_s15 + $0x38] sm:$0x1]  ;;  %v11624_v14 = vpop.permute.xlu1 %5951 }
 0x4a3   : > { %v2649_v16 = vpack.i.b16 %v2641_v9, %v2641_v9  ;;  %v2677_v19 = vrot.slane %v2645_v29, %v11517_v6  ;;  %v2691_v42 = vrot.slane %v2647_v2, %v11517_v6  ;;  %v2698_v12 = vrot.slane %v8330_v41, %v11517_v6  ;;  %2718 = vst [vmem:[%s12593_s15] sm:$0x1] %v2717_v13  ;;  %v3098_v0 = vld [vmem:[%s12593_s15 + $0x18] sm:$0x2] }
 0x4a4   : > { %v2720_v47 = vsel %vm11072_vm7, %v2663_v39, %v2719_v50  ;;  %v2723_v35 = vsel %vm11072_vm7, %v2670_v60, %v2722_v52  ;;  %v2729_v7 = vsel %vm11072_vm7, %v2684_v53, %v2728_v49  ;;  %v2989_v8 = vcombine.high %v2988_v37, %v2988_v37  ;;  %v3336_v1 = vpop.f32.mrf.mxu1  ;;  %v3089_v39 = vld [vmem:[%s12593_s15] sm:$0x2]  ;;  %v3095_v60 = vld [vmem:[%s12593_s15 + $0x10] sm:$0x2] }
 0x4a5   : > { %v2705_v58 = vrot.slane %v2649_v16, %v11517_v6  ;;  %2721 = vst [vmem:[%s12593_s15 + $0x8] sm:$0x1] %v2720_v47  ;;  %2724 = vst [vmem:[%s12593_s15 + $0x10] sm:$0x1] %v2723_v35  ;;  %v2726_v24 = vsel %vm11072_vm7, %v2677_v19, %v2725_v59  ;;  %v2732_v18 = vsel %vm11072_vm7, %v2691_v42, %v2731_v40  ;;  %v3101_v47 = vld [vmem:[%s12593_s15 + $0x20] sm:$0x2] }
 0x4a6   : > { %2730 = vst [vmem:[%s12593_s15 + $0x20] sm:$0x1] %v2729_v7  ;;  %v2735_v22 = vsel %vm11072_vm7, %v2698_v12, %v2734_v44  ;;  %2727 = vst [vmem:[%s12593_s15 + $0x18] sm:$0x1] %v2726_v24  ;;  %v2996_v36 = vrot.slane %v2988_v37, %v11509_v43  ;;  %v3003_v45 = vrot.slane %v2989_v8, %v11509_v43  ;;  %v8851_v17 = vpop.f32.mrf.mxu1  ;;  %v3107_v35 = vld [vmem:[%s12593_s15 + $0x30] sm:$0x2] }
 0x4a7   : > { %2733 = vst [vmem:[%s12593_s15 + $0x28] sm:$0x1] %v2732_v18  ;;  %2736 = vst [vmem:[%s12593_s15 + $0x30] sm:$0x1] %v2735_v22  ;;  %v3345_v31 = vmul.f32 %v11499_v25, %v3333_v4  ;;  %v2738_v23 = vsel %vm11072_vm7, %v2705_v58, %v2737_v51  ;;  %v3104_v24 = vld [vmem:[%s12593_s15 + $0x28] sm:$0x2]  ;;  %v11649_v22 = vpop.permute.xlu1 %7431 }
 0x4a8   : > { %2739 = vst [vmem:[%s12593_s15 + $0x38] sm:$0x1] %v2738_v23  ;;  %v3004_v46 = vcombine.high %v2996_v36, %v2996_v36  ;;  %v3005_v63 = vcombine.high %v3003_v45, %v3003_v45  ;;  %v3007_v34 = vunpack.i.h.s16 %v2996_v36  ;;  %v3009_v9 = vunpack.i.h.s16 %v3003_v45  ;;  %v3705_v29 = vpop.f32.mrf.mxu1  ;;  %v3110_v18 = vld [vmem:[%s12593_s15 + $0x38] sm:$0x2] }
 0x4a9   : > { %v8344_v37 = vpack.i.b16 %v2996_v36, %v2996_v36  ;;  %v8345_v2 = vpack.i.b16 %v3003_v45, %v3003_v45  ;;  %v3352_v25 = vadd.f32 %v11511_v55, %v3345_v31  ;;  %v3717_v4 = vmul.f32 %v11501_v30, %v3705_v29  ;;  %v3092_v55 = vld [vmem:[%s12593_s15 + $0x8] sm:$0x2]  ;;  %v11635_v30 = vpop.permute.xlu0 %7054 }
 0x4aa   : > { %v3011_v41 = vunpack.i.h.s16 %v3004_v46  ;;  %v3013_v50 = vunpack.i.h.s16 %v3005_v63  ;;  %v3015_v52 = vpack.i.b16 %v3007_v34, %v3007_v34  ;;  %v3017_v49 = vpack.i.b16 %v3009_v9, %v3009_v9  ;;  %v8862_v53 = vpop.f32.mrf.mxu1 }
 0x4ab   : > { %v8346_v13 = vpack.i.b16 %v3004_v46, %v3004_v46  ;;  %v8347_v59 = vpack.i.b16 %v3005_v63, %v3005_v63  ;;  %v3028_v40 = vrot.slane %v8344_v37, %v11517_v6  ;;  %v3042_v44 = vrot.slane %v8345_v2, %v11517_v6  ;;  %v11680_v53 = vpop.permute.xlu1 %4832 }
 0x4ac   : > { %v3019_v16 = vpack.i.b16 %v3011_v41, %v3011_v41  ;;  %v3021_v19 = vpack.i.b16 %v3013_v50, %v3013_v50  ;;  %v3035_v42 = vrot.slane %v3015_v52, %v11517_v6  ;;  %v3049_v12 = vrot.slane %v3017_v49, %v11517_v6  ;;  %v3708_v7 = vpop.f32.mrf.mxu1 }
 0x4ad   : > { %v3056_v51 = vrot.slane %v8346_v13, %v11517_v6  ;;  %v3070_v8 = vrot.slane %v8347_v59, %v11517_v6  ;;  %v3090_v1 = vsel %vm11114_vm1, %v3028_v40, %v3089_v39  ;;  %v3096_v58 = vsel %vm11114_vm1, %v3042_v44, %v3095_v60  ;;  %v4095_v49 = vpop.permute.xlu0 %4094 }
 0x4ae   : > { %v3063_v36 = vrot.slane %v3019_v16, %v11517_v6  ;;  %v3077_v45 = vrot.slane %v3021_v19, %v11517_v6  ;;  %3091 = vst [vmem:[%s12593_s15] sm:$0x2] %v3090_v1  ;;  %v3093_v31 = vsel %vm11114_vm1, %v3035_v42, %v3092_v55  ;;  %3097 = vst [vmem:[%s12593_s15 + $0x10] sm:$0x2] %v3096_v58  ;;  %v8863_v23 = vpop.f32.mrf.mxu1 }
 0x4af   : > { %v3099_v17 = vsel %vm11114_vm1, %v3049_v12, %v3098_v0  ;;  %3094 = vst [vmem:[%s12593_s15 + $0x8] sm:$0x2] %v3093_v31  ;;  %v3102_v46 = vsel %vm11114_vm1, %v3056_v51, %v3101_v47  ;;  %v3108_v63 = vsel %vm11114_vm1, %v3070_v8, %v3107_v35  ;;  %v3353_v34 = vpack.c.bf16 %v3352_v25, %v3352_v25 }
 0x4b0   : > { %3100 = vst [vmem:[%s12593_s15 + $0x18] sm:$0x2] %v3099_v17  ;;  %v3724_v9 = vadd.f32 %v11514_v26, %v3717_v4  ;;  %3103 = vst [vmem:[%s12593_s15 + $0x20] sm:$0x2] %v3102_v46  ;;  %v3105_v29 = vsel %vm11114_vm1, %v3063_v36, %v3104_v24  ;;  %v3111_v37 = vsel %vm11114_vm1, %v3077_v45, %v3110_v18  ;;  %v4078_v2 = vpop.f32.mrf.mxu1 }
 0x4b1   : > { %3109 = vst [vmem:[%s12593_s15 + $0x30] sm:$0x2] %v3108_v63  ;;  %3106 = vst [vmem:[%s12593_s15 + $0x28] sm:$0x2] %v3105_v29  ;;  %v3361_v41 = vrot.slane %v3353_v34, %v11509_v43  ;;  %v4090_v52 = vmul.f32 %v11576_v28, %v4078_v2  ;;  %v11696_v63 = vpop.permute.xlu1 %6314 }
 0x4b2   : > { %3112 = vst [vmem:[%s12593_s15 + $0x38] sm:$0x2] %v3111_v37  ;;  %v3725_v50 = vpack.c.bf16 %v3724_v9, %v3724_v9  ;;  %v8874_v25 = vpop.f32.mrf.mxu1 }
 0x4b3   : > { %v3362_v39 = vcombine.high %v3361_v41, %v3361_v41  ;;  %v3369_v26 = vrot.slane %v3361_v41, %v11509_v43  ;;  %v11678_v60 = vadd.f32 %v4095_v49, %v4090_v52 }
 0x4b4   : > { %v3733_v4 = vrot.slane %v3725_v50, %v11509_v43  ;;  %v4081_v13 = vpop.f32.mrf.mxu1 }
 0x4b5   : > { %v3376_v59 = vrot.slane %v3362_v39, %v11509_v43  ;;  %v3377_v40 = vcombine.high %v3369_v26, %v3369_v26  ;;  %v3380_v44 = vunpack.i.h.s16 %v3369_v26  ;;  %v8361_v55 = vpack.i.b16 %v3369_v26, %v3369_v26  ;;  %v3461_v7 = vld [vmem:[%s12593_s15] sm:$0x2]  ;;  %v3467_v23 = vld [vmem:[%s12593_s15 + $0x10] sm:$0x2] }
 0x4b6   : > { %v3734_v0 = vcombine.high %v3733_v4, %v3733_v4  ;;  %v11684_v28 = vrot.slane %v3733_v4, %v11509_v43  ;;  %v4098_v16 = vpack.c.bf16 %v11678_v60, %v11678_v60  ;;  %v8875_v19 = vpop.f32.mrf.mxu1  ;;  %v3464_v17 = vld [vmem:[%s12593_s15 + $0x8] sm:$0x2] }
 0x4b7   : > { %v3378_v42 = vcombine.high %v3376_v59, %v3376_v59  ;;  %v3382_v12 = vunpack.i.h.s16 %v3376_v59  ;;  %v3384_v47 = vunpack.i.h.s16 %v3377_v40  ;;  %v3388_v35 = vpack.i.b16 %v3380_v44, %v3380_v44  ;;  %v3473_v46 = vld [vmem:[%s12593_s15 + $0x20] sm:$0x2]  ;;  %v3470_v2 = vld [vmem:[%s12593_s15 + $0x18] sm:$0x2] }
 0x4b8   : > { %v8362_v51 = vpack.i.b16 %v3376_v59, %v3376_v59  ;;  %v8363_v8 = vpack.i.b16 %v3377_v40, %v3377_v40  ;;  %v3401_v1 = vrot.slane %v8361_v55, %v11517_v6  ;;  %v3748_v58 = vrot.slane %v3734_v0, %v11509_v43  ;;  %v11691_v24 = vpop.f32.mrf.mxu1  ;;  %v3476_v41 = vld [vmem:[%s12593_s15 + $0x28] sm:$0x2]  ;;  %v3479_v50 = vld [vmem:[%s12593_s15 + $0x30] sm:$0x2] }
 0x4b9   : > { %v3386_v18 = vunpack.i.h.s16 %v3378_v42  ;;  %v3390_v36 = vpack.i.b16 %v3382_v12, %v3382_v12  ;;  %v3392_v45 = vpack.i.b16 %v3384_v47, %v3384_v47  ;;  %v8364_v31 = vpack.i.b16 %v3378_v42, %v3378_v42  ;;  %v3482_v40 = vld [vmem:[%s12593_s15 + $0x38] sm:$0x2] }
 0x4ba   : > { %v3408_v34 = vrot.slane %v3388_v35, %v11517_v6  ;;  %v3415_v9 = vrot.slane %v8362_v51, %v11517_v6  ;;  %v3429_v29 = vrot.slane %v8363_v8, %v11517_v6  ;;  %v3462_v37 = vsel %vm11159_vm0, %v3401_v1, %v3461_v7  ;;  %v8886_v52 = vpop.f32.mrf.mxu1 }
 0x4bb   : > { %v3394_v49 = vpack.i.b16 %v3386_v18, %v3386_v18  ;;  %v3422_v25 = vrot.slane %v3390_v36, %v11517_v6  ;;  %v3436_v39 = vrot.slane %v3392_v45, %v11517_v6  ;;  %v3443_v26 = vrot.slane %v8364_v31, %v11517_v6  ;;  %3463 = vst [vmem:[%s12593_s15] sm:$0x2] %v3462_v37  ;;  %v11737_v31 = vpop.permute.xlu1 %7794  ;;  %v3846_v37 = vld [vmem:[%s12593_s15 + $0x20] sm:$0x4]  ;;  %v3837_v52 = vld [vmem:[%s12593_s15 + $0x8] sm:$0x4] }
 0x4bc   : > { %v3465_v4 = vsel %vm11159_vm0, %v3408_v34, %v3464_v17  ;;  %v3468_v13 = vsel %vm11159_vm0, %v3415_v9, %v3467_v23  ;;  %v3474_v59 = vsel %vm11159_vm0, %v3429_v29, %v3473_v46  ;;  %v3749_v44 = vcombine.high %v11684_v28, %v11684_v28  ;;  %v4453_v55 = vpop.f32.mrf.mxu1  ;;  %v3834_v9 = vld [vmem:[%s12593_s15] sm:$0x4]  ;;  %v3840_v29 = vld [vmem:[%s12593_s15 + $0x10] sm:$0x4] }
 0x4bd   : > { %v3450_v0 = vrot.slane %v3394_v49, %v11517_v6  ;;  %3466 = vst [vmem:[%s12593_s15 + $0x8] sm:$0x2] %v3465_v4  ;;  %3469 = vst [vmem:[%s12593_s15 + $0x10] sm:$0x2] %v3468_v13  ;;  %v3471_v19 = vsel %vm11159_vm0, %v3422_v25, %v3470_v2  ;;  %v3477_v42 = vsel %vm11159_vm0, %v3436_v39, %v3476_v41  ;;  %v3752_v35 = vunpack.i.h.s16 %v11684_v28  ;;  %v3843_v49 = vld [vmem:[%s12593_s15 + $0x18] sm:$0x4] }
 0x4be   : > { %3475 = vst [vmem:[%s12593_s15 + $0x20] sm:$0x2] %v3474_v59  ;;  %v3480_v12 = vsel %vm11159_vm0, %v3443_v26, %v3479_v50  ;;  %3472 = vst [vmem:[%s12593_s15 + $0x18] sm:$0x2] %v3471_v19  ;;  %v3750_v47 = vcombine.high %v3748_v58, %v3748_v58  ;;  %v3754_v7 = vunpack.i.h.s16 %v3748_v58  ;;  %v3756_v51 = vunpack.i.h.s16 %v3749_v44  ;;  %v8887_v8 = vpop.f32.mrf.mxu1  ;;  %v3849_v25 = vld [vmem:[%s12593_s15 + $0x28] sm:$0x4] }
 0x4bf   : > { %3478 = vst [vmem:[%s12593_s15 + $0x28] sm:$0x2] %v3477_v42  ;;  %3481 = vst [vmem:[%s12593_s15 + $0x30] sm:$0x2] %v3480_v12  ;;  %v3483_v1 = vsel %vm11159_vm0, %v3450_v0, %v3482_v40  ;;  %v8378_v18 = vpack.i.b16 %v11684_v28, %v11684_v28  ;;  %v8379_v36 = vpack.i.b16 %v3748_v58, %v3748_v58  ;;  %v3852_v59 = vld [vmem:[%s12593_s15 + $0x30] sm:$0x4] }
 0x4c0   : > { %v8380_v45 = vpack.i.b16 %v3749_v44, %v3749_v44  ;;  %3484 = vst [vmem:[%s12593_s15 + $0x38] sm:$0x2] %v3483_v1  ;;  %v3758_v17 = vunpack.i.h.s16 %v3750_v47  ;;  %v3760_v23 = vpack.i.b16 %v3752_v35, %v3752_v35  ;;  %v3762_v46 = vpack.i.b16 %v3754_v7, %v3754_v7  ;;  %v3855_v42 = vld [vmem:[%s12593_s15 + $0x38] sm:$0x4] }
 0x4c1   : > { %v3764_v34 = vpack.i.b16 %v3756_v51, %v3756_v51  ;;  %v8381_v41 = vpack.i.b16 %v3750_v47, %v3750_v47  ;;  %v3773_v28 = vrot.slane %v8378_v18, %v11517_v6  ;;  %v3787_v58 = vrot.slane %v8379_v36, %v11517_v6 }
 0x4c2   : > { %v3801_v50 = vrot.slane %v8380_v45, %v11517_v6  ;;  %v3766_v39 = vpack.i.b16 %v3758_v17, %v3758_v17  ;;  %v3780_v26 = vrot.slane %v3760_v23, %v11517_v6  ;;  %v3794_v4 = vrot.slane %v3762_v46, %v11517_v6  ;;  %v4840_v45 = vpop.permute.xlu1 %4839 }
 0x4c3   : > { %v3808_v13 = vrot.slane %v3764_v34, %v11517_v6  ;;  %v3815_v44 = vrot.slane %v8381_v41, %v11517_v6  ;;  %v3835_v55 = vsel %vm11195_vm15, %v3773_v28, %v3834_v9  ;;  %v3841_v0 = vsel %vm11195_vm15, %v3787_v58, %v3840_v29 }
 0x4c4   : > { %v3847_v19 = vsel %vm11195_vm15, %v3801_v50, %v3846_v37  ;;  %v3822_v12 = vrot.slane %v3766_v39, %v11517_v6  ;;  %3836 = vst [vmem:[%s12593_s15] sm:$0x4] %v3835_v55  ;;  %v3838_v47 = vsel %vm11195_vm15, %v3780_v26, %v3837_v52  ;;  %3842 = vst [vmem:[%s12593_s15 + $0x10] sm:$0x4] %v3841_v0 }
 0x4c5   : > { %v4823_v2 = vpop.f32.mrf.mxu1  ;;  %v3844_v35 = vsel %vm11195_vm15, %v3794_v4, %v3843_v49  ;;  %3848 = vst [vmem:[%s12593_s15 + $0x20] sm:$0x4] %v3847_v19  ;;  %v3850_v7 = vsel %vm11195_vm15, %v3808_v13, %v3849_v25  ;;  %3839 = vst [vmem:[%s12593_s15 + $0x8] sm:$0x4] %v3838_v47  ;;  %v3853_v8 = vsel %vm11195_vm15, %v3815_v44, %v3852_v59 }
 0x4c6   : > { %3845 = vst [vmem:[%s12593_s15 + $0x18] sm:$0x4] %v3844_v35  ;;  %3851 = vst [vmem:[%s12593_s15 + $0x28] sm:$0x4] %v3850_v7  ;;  %v4106_v1 = vrot.slane %v4098_v16, %v11509_v43  ;;  %v4462_v18 = vmul.f32 %v11519_v27, %v11691_v24  ;;  %v4835_v36 = vmul.f32 %v11680_v53, %v4823_v2 }
 0x4c7   : > { %v8898_v40 = vpop.f32.mrf.mxu1  ;;  %3854 = vst [vmem:[%s12593_s15 + $0x30] sm:$0x4] %v3853_v8  ;;  %v3856_v17 = vsel %vm11195_vm15, %v3822_v12, %v3855_v42 }
 0x4c8   : > { %3857 = vst [vmem:[%s12593_s15 + $0x38] sm:$0x4] %v3856_v17  ;;  %v4107_v46 = vcombine.high %v4106_v1, %v4106_v1  ;;  %v4114_v34 = vrot.slane %v4106_v1, %v11509_v43  ;;  %v4469_v9 = vadd.f32 %v11583_v62, %v4462_v18  ;;  %v4842_v60 = vadd.f32 %v4840_v45, %v4835_v36 }
 0x4c9   : > { %v4826_v51 = vpop.f32.mrf.mxu1 }
 0x4ca   : > { %v4121_v29 = vrot.slane %v4107_v46, %v11509_v43  ;;  %v4122_v27 = vcombine.high %v4114_v34, %v4114_v34  ;;  %v4125_v24 = vunpack.i.h.s16 %v4114_v34  ;;  %v8395_v53 = vpack.i.b16 %v4114_v34, %v4114_v34 }
 0x4cb   : > { %v8899_v23 = vpop.f32.mrf.mxu1  ;;  %v4470_v37 = vpack.c.bf16 %v4469_v9, %v4469_v9  ;;  %v4843_v2 = vpack.c.bf16 %v4842_v60, %v4842_v60  ;;  %v4206_v62 = vld [vmem:[%s12593_s15] sm:$0x4]  ;;  %v4212_v0 = vld [vmem:[%s12593_s15 + $0x10] sm:$0x4] }
 0x4cc   : > { %v4123_v58 = vcombine.high %v4121_v29, %v4121_v29  ;;  %v4127_v50 = vunpack.i.h.s16 %v4121_v29  ;;  %v4129_v52 = vunpack.i.h.s16 %v4122_v27  ;;  %v4133_v49 = vpack.i.b16 %v4125_v24, %v4125_v24  ;;  %v4209_v55 = vld [vmem:[%s12593_s15 + $0x8] sm:$0x4]  ;;  %v4218_v19 = vld [vmem:[%s12593_s15 + $0x20] sm:$0x4] }
 0x4cd   : > { %v5195_v16 = vpop.f32.mrf.mxu1  ;;  %v8396_v25 = vpack.i.b16 %v4121_v29, %v4121_v29  ;;  %v8397_v39 = vpack.i.b16 %v4122_v27, %v4122_v27  ;;  %v4146_v26 = vrot.slane %v8395_v53, %v11517_v6  ;;  %v4478_v4 = vrot.slane %v4470_v37, %v11509_v43  ;;  %v4215_v7 = vld [vmem:[%s12593_s15 + $0x18] sm:$0x4]  ;;  %v4221_v51 = vld [vmem:[%s12593_s15 + $0x28] sm:$0x4] }
 0x4ce   : > { %v5207_v41 = vmul.f32 %v11503_v32, %v5195_v16  ;;  %v4131_v32 = vunpack.i.h.s16 %v4123_v58  ;;  %v4135_v59 = vpack.i.b16 %v4127_v50, %v4127_v50  ;;  %v4137_v40 = vpack.i.b16 %v4129_v52, %v4129_v52  ;;  %v4224_v8 = vld [vmem:[%s12593_s15 + $0x30] sm:$0x4] }
 0x4cf   : > { %v8910_v28 = vpop.f32.mrf.mxu1  ;;  %v8398_v44 = vpack.i.b16 %v4123_v58, %v4123_v58  ;;  %v4153_v42 = vrot.slane %v4133_v49, %v11517_v6  ;;  %v4160_v12 = vrot.slane %v8396_v25, %v11517_v6  ;;  %v4174_v47 = vrot.slane %v8397_v39, %v11517_v6  ;;  %v4227_v9 = vld [vmem:[%s12593_s15 + $0x38] sm:$0x4] }
 0x4d0   : > { %v4207_v35 = vsel %vm11231_vm8, %v4146_v26, %v4206_v62  ;;  %v4139_v18 = vpack.i.b16 %v4131_v32, %v4131_v32  ;;  %v4167_v36 = vrot.slane %v4135_v59, %v11517_v6  ;;  %v4181_v45 = vrot.slane %v4137_v40, %v11517_v6 }
 0x4d1   : > { %v5198_v13 = vpop.f32.mrf.mxu1  ;;  %v4188_v17 = vrot.slane %v8398_v44, %v11517_v6  ;;  %4208 = vst [vmem:[%s12593_s15] sm:$0x4] %v4207_v35  ;;  %v4210_v23 = vsel %vm11231_vm8, %v4153_v42, %v4209_v55  ;;  %v4213_v46 = vsel %vm11231_vm8, %v4160_v12, %v4212_v0  ;;  %v4219_v34 = vsel %vm11231_vm8, %v4174_v47, %v4218_v19  ;;  %v4579_v55 = vld [vmem:[%s12593_s15] sm:$0x8]  ;;  %v4585_v0 = vld [vmem:[%s12593_s15 + $0x10] sm:$0x8] }
 0x4d2   : > { %v4479_v60 = vcombine.high %v4478_v4, %v4478_v4  ;;  %v4195_v29 = vrot.slane %v4139_v18, %v11517_v6  ;;  %4211 = vst [vmem:[%s12593_s15 + $0x8] sm:$0x4] %v4210_v23  ;;  %4214 = vst [vmem:[%s12593_s15 + $0x10] sm:$0x4] %v4213_v46  ;;  %v4216_v27 = vsel %vm11231_vm8, %v4167_v36, %v4215_v7  ;;  %v4582_v7 = vld [vmem:[%s12593_s15 + $0x8] sm:$0x8] }
 0x4d3   : > { %v8911_v1 = vpop.f32.mrf.mxu1  ;;  %4220 = vst [vmem:[%s12593_s15 + $0x20] sm:$0x4] %v4219_v34  ;;  %v4222_v24 = vsel %vm11231_vm8, %v4181_v45, %v4221_v51  ;;  %v4225_v53 = vsel %vm11231_vm8, %v4188_v17, %v4224_v8  ;;  %4217 = vst [vmem:[%s12593_s15 + $0x18] sm:$0x4] %v4216_v27  ;;  %v4486_v37 = vrot.slane %v4478_v4, %v11509_v43  ;;  %v4588_v51 = vld [vmem:[%s12593_s15 + $0x18] sm:$0x8] }
 0x4d4   : > { %4223 = vst [vmem:[%s12593_s15 + $0x28] sm:$0x4] %v4222_v24  ;;  %4226 = vst [vmem:[%s12593_s15 + $0x30] sm:$0x4] %v4225_v53  ;;  %v4493_v28 = vrot.slane %v4479_v60, %v11509_v43  ;;  %v4851_v58 = vrot.slane %v4843_v2, %v11509_v43  ;;  %v4228_v52 = vsel %vm11231_vm8, %v4195_v29, %v4227_v9  ;;  %v4591_v45 = vld [vmem:[%s12593_s15 + $0x20] sm:$0x8] }
 0x4d5   : > { %v5565_v16 = vpop.f32.mrf.mxu1  ;;  %v11835_v49 = vadd.f32 %v11524_v15, %v5207_v41  ;;  %4229 = vst [vmem:[%s12593_s15 + $0x38] sm:$0x4] %v4228_v52  ;;  %v4494_v25 = vcombine.high %v4486_v37, %v4486_v37  ;;  %v4497_v26 = vunpack.i.h.s16 %v4486_v37  ;;  %v8412_v2 = vpack.i.b16 %v4486_v37, %v4486_v37  ;;  %v4597_v17 = vld [vmem:[%s12593_s15 + $0x30] sm:$0x8]  ;;  %v4600_v29 = vld [vmem:[%s12593_s15 + $0x38] sm:$0x8] }
 0x4d6   : > { %v11838_v62 = vmul.f32 %v11614_v20, %v5565_v16  ;;  %v4495_v39 = vcombine.high %v4493_v28, %v4493_v28  ;;  %v4499_v4 = vunpack.i.h.s16 %v4493_v28  ;;  %v8413_v32 = vpack.i.b16 %v4493_v28, %v4493_v28  ;;  %v4594_v16 = vld [vmem:[%s12593_s15 + $0x28] sm:$0x8] }
 0x4d7   : > { %v8922_v50 = vpop.f32.mrf.mxu1  ;;  %v4852_v59 = vcombine.high %v4851_v58, %v4851_v58  ;;  %v4859_v40 = vrot.slane %v4851_v58, %v11509_v43  ;;  %v4501_v15 = vunpack.i.h.s16 %v4494_v25  ;;  %v4505_v44 = vpack.i.b16 %v4497_v26, %v4497_v26 }
 0x4d8   : > { %v4503_v41 = vunpack.i.h.s16 %v4495_v39  ;;  %v4507_v20 = vpack.i.b16 %v4499_v4, %v4499_v4  ;;  %v8414_v42 = vpack.i.b16 %v4494_v25, %v4494_v25  ;;  %v8415_v12 = vpack.i.b16 %v4495_v39, %v4495_v39 }
 0x4d9   : > { %v5568_v13 = vpop.f32.mrf.mxu1  ;;  %v4518_v47 = vrot.slane %v8412_v2, %v11517_v6  ;;  %v4532_v35 = vrot.slane %v8413_v32, %v11517_v6  ;;  %v4509_v8 = vpack.i.b16 %v4501_v15, %v4501_v15  ;;  %v4525_v18 = vrot.slane %v4505_v44, %v11517_v6 }
 0x4da   : > { %v4511_v1 = vpack.i.b16 %v4503_v41, %v4503_v41  ;;  %v4539_v36 = vrot.slane %v4507_v20, %v11517_v6  ;;  %v4546_v46 = vrot.slane %v8414_v42, %v11517_v6  ;;  %v4560_v34 = vrot.slane %v8415_v12, %v11517_v6 }
 0x4db   : > { %v8923_v19 = vpop.f32.mrf.mxu1  ;;  %v4580_v9 = vsel %vm11262_vm5, %v4518_v47, %v4579_v55  ;;  %v4586_v60 = vsel %vm11262_vm5, %v4532_v35, %v4585_v0  ;;  %v4553_v27 = vrot.slane %v4509_v8, %v11517_v6  ;;  %v4583_v53 = vsel %vm11262_vm5, %v4525_v18, %v4582_v7 }
 0x4dc   : > { %v4567_v24 = vrot.slane %v4511_v1, %v11517_v6  ;;  %4581 = vst [vmem:[%s12593_s15] sm:$0x8] %v4580_v9  ;;  %4587 = vst [vmem:[%s12593_s15 + $0x10] sm:$0x8] %v4586_v60  ;;  %v4589_v37 = vsel %vm11262_vm5, %v4539_v36, %v4588_v51  ;;  %v4592_v58 = vsel %vm11262_vm5, %v4546_v46, %v4591_v45  ;;  %v4870_v4 = vunpack.i.h.s16 %v4859_v40 }
 0x4dd   : > { %v11852_v23 = vpop.f32.mrf.mxu1  ;;  %4584 = vst [vmem:[%s12593_s15 + $0x8] sm:$0x8] %v4583_v53  ;;  %4590 = vst [vmem:[%s12593_s15 + $0x18] sm:$0x8] %v4589_v37  ;;  %v4598_v50 = vsel %vm11262_vm5, %v4560_v34, %v4597_v17  ;;  %v4866_v52 = vrot.slane %v4852_v59, %v11509_v43  ;;  %v4867_v25 = vcombine.high %v4859_v40, %v4859_v40  ;;  %v5582_v34 = vpop.permute.xlu0 %5581 }
 0x4de   : > { %4593 = vst [vmem:[%s12593_s15 + $0x20] sm:$0x8] %v4592_v58  ;;  %v4595_v39 = vsel %vm11262_vm5, %v4553_v27, %v4594_v16  ;;  %4599 = vst [vmem:[%s12593_s15 + $0x30] sm:$0x8] %v4598_v50  ;;  %v4601_v26 = vsel %vm11262_vm5, %v4567_v24, %v4600_v29  ;;  %v8429_v13 = vpack.i.b16 %v4859_v40, %v4859_v40 }
 0x4df   : > { %v8934_v28 = vpop.f32.mrf.mxu1  ;;  %4596 = vst [vmem:[%s12593_s15 + $0x28] sm:$0x8] %v4595_v39  ;;  %4602 = vst [vmem:[%s12593_s15 + $0x38] sm:$0x8] %v4601_v26  ;;  %v4868_v32 = vcombine.high %v4866_v52, %v4866_v52  ;;  %v4872_v15 = vunpack.i.h.s16 %v4866_v52  ;;  %v4874_v41 = vunpack.i.h.s16 %v4867_v25  ;;  %v8430_v44 = vpack.i.b16 %v4866_v52, %v4866_v52 }
 0x4e0   : > { %v4878_v20 = vpack.i.b16 %v4870_v4, %v4870_v4  ;;  %v8431_v59 = vpack.i.b16 %v4867_v25, %v4867_v25  ;;  %v4891_v55 = vrot.slane %v8429_v13, %v11517_v6  ;;  %v5215_v0 = vpack.c.bf16 %v11835_v49, %v11835_v49 }
 0x4e1   : > { %v5938_v2 = vpop.f32.mrf.mxu1  ;;  %v4876_v42 = vunpack.i.h.s16 %v4868_v32  ;;  %v4880_v12 = vpack.i.b16 %v4872_v15, %v4872_v15  ;;  %v4882_v40 = vpack.i.b16 %v4874_v41, %v4874_v41  ;;  %v8432_v47 = vpack.i.b16 %v4868_v32, %v4868_v32 }
 0x4e2   : > { %v4898_v35 = vrot.slane %v4878_v20, %v11517_v6  ;;  %v4905_v7 = vrot.slane %v8430_v44, %v11517_v6  ;;  %v4919_v51 = vrot.slane %v8431_v59, %v11517_v6  ;;  %v5223_v8 = vrot.slane %v5215_v0, %v11509_v43 }
 0x4e3   : > { %v8935_v19 = vpop.f32.mrf.mxu1  ;;  %v4884_v49 = vpack.i.b16 %v4876_v42, %v4876_v42  ;;  %v4912_v18 = vrot.slane %v4880_v12, %v11517_v6  ;;  %v4926_v36 = vrot.slane %v4882_v40, %v11517_v6  ;;  %v4933_v45 = vrot.slane %v8432_v47, %v11517_v6  ;;  %v4951_v17 = vld [vmem:[%s12593_s15] sm:$0x8]  ;;  %v4957_v46 = vld [vmem:[%s12593_s15 + $0x10] sm:$0x8]  ;;  %v5321_v42 = vld [vmem:[%s12593_s15 + $0x4] sm:$0x1] }
 0x4e4   : > { %v4952_v9 = vsel %vm11295_vm4, %v4891_v55, %v4951_v17  ;;  %v4954_v60 = vld [vmem:[%s12593_s15 + $0x8] sm:$0x8]  ;;  %v4958_v16 = vsel %vm11295_vm4, %v4905_v7, %v4957_v46  ;;  %v4960_v29 = vld [vmem:[%s12593_s15 + $0x18] sm:$0x8]  ;;  %v5224_v27 = vcombine.high %v5223_v8, %v5223_v8  ;;  %v5231_v24 = vrot.slane %v5223_v8, %v11509_v43  ;;  %v5333_v17 = vld [vmem:[%s12593_s15 + $0x24] sm:$0x1] }
 0x4e5   : > { %v4940_v37 = vrot.slane %v4884_v49, %v11517_v6  ;;  %4953 = vst [vmem:[%s12593_s15] sm:$0x8] %v4952_v9  ;;  %v4955_v28 = vsel %vm11295_vm4, %v4898_v35, %v4954_v60  ;;  %4959 = vst [vmem:[%s12593_s15 + $0x10] sm:$0x8] %v4958_v16  ;;  %v4961_v58 = vsel %vm11295_vm4, %v4912_v18, %v4960_v29  ;;  %v4963_v50 = vld [vmem:[%s12593_s15 + $0x20] sm:$0x8] }
 0x4e6   : > { %v11892_v1 = vpop.f32.mrf.mxu1  ;;  %v4969_v52 = vld [vmem:[%s12593_s15 + $0x30] sm:$0x8]  ;;  %v5584_v25 = vadd.f32 %v5582_v34, %v11838_v62  ;;  %4956 = vst [vmem:[%s12593_s15 + $0x8] sm:$0x8] %v4955_v28  ;;  %4962 = vst [vmem:[%s12593_s15 + $0x18] sm:$0x8] %v4961_v58  ;;  %v4964_v39 = vsel %vm11295_vm4, %v4919_v51, %v4963_v50  ;;  %v5238_v2 = vrot.slane %v5224_v27, %v11509_v43  ;;  %v5242_v44 = vunpack.i.h.s16 %v5231_v24 }
 0x4e7   : > { %v4966_v26 = vld [vmem:[%s12593_s15 + $0x28] sm:$0x8]  ;;  %v4970_v4 = vsel %vm11295_vm4, %v4933_v45, %v4969_v52  ;;  %v4972_v13 = vld [vmem:[%s12593_s15 + $0x38] sm:$0x8]  ;;  %v5239_v32 = vcombine.high %v5231_v24, %v5231_v24  ;;  %4965 = vst [vmem:[%s12593_s15 + $0x20] sm:$0x8] %v4964_v39  ;;  %v8446_v20 = vpack.i.b16 %v5231_v24, %v5231_v24 }
 0x4e8   : > { %v8946_v53 = vpop.f32.mrf.mxu1  ;;  %v4967_v62 = vsel %vm11295_vm4, %v4926_v36, %v4966_v26  ;;  %4971 = vst [vmem:[%s12593_s15 + $0x30] sm:$0x8] %v4970_v4  ;;  %v4973_v41 = vsel %vm11295_vm4, %v4940_v37, %v4972_v13  ;;  %v5240_v59 = vcombine.high %v5238_v2, %v5238_v2  ;;  %v5244_v55 = vunpack.i.h.s16 %v5238_v2  ;;  %v5324_v36 = vld [vmem:[%s12593_s15 + $0xc] sm:$0x1]  ;;  %v5327_v45 = vld [vmem:[%s12593_s15 + $0x14] sm:$0x1] }
 0x4e9   : > { %4968 = vst [vmem:[%s12593_s15 + $0x28] sm:$0x8] %v4967_v62  ;;  %4974 = vst [vmem:[%s12593_s15 + $0x38] sm:$0x8] %v4973_v41  ;;  %v5246_v0 = vunpack.i.h.s16 %v5239_v32  ;;  %v8447_v19 = vpack.i.b16 %v5238_v2, %v5238_v2  ;;  %v5250_v40 = vpack.i.b16 %v5242_v44, %v5242_v44  ;;  %v8448_v47 = vpack.i.b16 %v5239_v32, %v5239_v32  ;;  %v5330_v29 = vld [vmem:[%s12593_s15 + $0x1c] sm:$0x1] }
 0x4ea   : > { %v6308_v15 = vpop.f32.mrf.mxu1  ;;  %v5263_v35 = vrot.slane %v8446_v20, %v11517_v6  ;;  %v5585_v7 = vpack.c.bf16 %v5584_v25, %v5584_v25  ;;  %v5248_v51 = vunpack.i.h.s16 %v5240_v59  ;;  %v5252_v8 = vpack.i.b16 %v5244_v55, %v5244_v55  ;;  %v5336_v27 = vld [vmem:[%s12593_s15 + $0x2c] sm:$0x1]  ;;  %v5339_v24 = vld [vmem:[%s12593_s15 + $0x34] sm:$0x1]  ;;  %v5342_v26 = vld [vmem:[%s12593_s15 + $0x3c] sm:$0x1] }
 0x4eb   : > { %v5254_v49 = vpack.i.b16 %v5246_v0, %v5246_v0  ;;  %v8449_v18 = vpack.i.b16 %v5240_v59, %v5240_v59  ;;  %v5270_v34 = vrot.slane %v5250_v40, %v11517_v6  ;;  %v5277_v9 = vrot.slane %v8447_v19, %v11517_v6 }
 0x4ec   : > { %v8947_v12 = vpop.f32.mrf.mxu1  ;;  %v5291_v60 = vrot.slane %v8448_v47, %v11517_v6  ;;  %v5322_v16 = vsel %vm11029_vm2, %v5263_v35, %v5321_v42  ;;  %v5256_v53 = vpack.i.b16 %v5248_v51, %v5248_v51  ;;  %v5284_v37 = vrot.slane %v5252_v8, %v11517_v6  ;;  %v6322_v42 = vpop.permute.xlu1 %6321 }
 0x4ed   : > { %v5298_v28 = vrot.slane %v5254_v49, %v11517_v6  ;;  %v5305_v58 = vrot.slane %v8449_v18, %v11517_v6  ;;  %5323 = vst [vmem:[%s12593_s15 + $0x4] sm:$0x1] %v5322_v16  ;;  %v5325_v52 = vsel %vm11029_vm2, %v5270_v34, %v5324_v36  ;;  %v5328_v25 = vsel %vm11029_vm2, %v5277_v9, %v5327_v45 }
 0x4ee   : > { %v5334_v39 = vsel %vm11029_vm2, %v5291_v60, %v5333_v17  ;;  %v5593_v4 = vrot.slane %v5585_v7, %v11509_v43  ;;  %v5312_v13 = vrot.slane %v5256_v53, %v11517_v6  ;;  %5326 = vst [vmem:[%s12593_s15 + $0xc] sm:$0x1] %v5325_v52  ;;  %5329 = vst [vmem:[%s12593_s15 + $0x14] sm:$0x1] %v5328_v25 }
 0x4ef   : > { %v6675_v46 = vpop.f32.mrf.mxu1  ;;  %v5331_v2 = vsel %vm11029_vm2, %v5284_v37, %v5330_v29  ;;  %5335 = vst [vmem:[%s12593_s15 + $0x24] sm:$0x1] %v5334_v39  ;;  %v5337_v32 = vsel %vm11029_vm2, %v5298_v28, %v5336_v27  ;;  %v5340_v15 = vsel %vm11029_vm2, %v5305_v58, %v5339_v24  ;;  %v5947_v20 = vmul.f32 %v11537_v5, %v11852_v23 }
 0x4f0   : > { %5332 = vst [vmem:[%s12593_s15 + $0x1c] sm:$0x1] %v5331_v2  ;;  %5338 = vst [vmem:[%s12593_s15 + $0x2c] sm:$0x1] %v5337_v32  ;;  %v5594_v41 = vcombine.high %v5593_v4, %v5593_v4  ;;  %v5601_v44 = vrot.slane %v5593_v4, %v11509_v43  ;;  %v6317_v59 = vmul.f32 %v11696_v63, %v11892_v1 }
 0x4f1   : > { %v8958_v50 = vpop.f32.mrf.mxu1  ;;  %5341 = vst [vmem:[%s12593_s15 + $0x34] sm:$0x1] %v5340_v15  ;;  %v5343_v55 = vsel %vm11029_vm2, %v5312_v13, %v5342_v26  ;;  %v6687_v0 = vmul.f32 %v11507_v56, %v6675_v46  ;;  %v5954_v7 = vadd.f32 %v11624_v14, %v5947_v20 }
 0x4f2   : > { %5344 = vst [vmem:[%s12593_s15 + $0x3c] sm:$0x1] %v5343_v55  ;;  %v5608_v12 = vrot.slane %v5594_v41, %v11509_v43  ;;  %v5609_v40 = vcombine.high %v5601_v44, %v5601_v44  ;;  %v5612_v47 = vunpack.i.h.s16 %v5601_v44  ;;  %v8463_v35 = vpack.i.b16 %v5601_v44, %v5601_v44 }
 0x4f3   : > { %v6678_v62 = vpop.f32.mrf.mxu1  ;;  %v11982_v5 = vadd.f32 %v6322_v42, %v6317_v59  ;;  %v11985_v63 = vadd.f32 %v11565_v33, %v6687_v0  ;;  %v5955_v36 = vpack.c.bf16 %v5954_v7, %v5954_v7  ;;  %v7062_v7 = vpop.permute.xlu0 %7061 }
 0x4f4   : > { %v5610_v56 = vcombine.high %v5608_v12, %v5608_v12  ;;  %v5614_v23 = vunpack.i.h.s16 %v5608_v12  ;;  %v5616_v1 = vunpack.i.h.s16 %v5609_v40  ;;  %v5620_v51 = vpack.i.b16 %v5612_v47, %v5612_v47  ;;  %v5691_v8 = vld [vmem:[%s12593_s15 + $0x4] sm:$0x1] }
 0x4f5   : > { %v8959_v19 = vpop.f32.mrf.mxu1  ;;  %v8464_v49 = vpack.i.b16 %v5608_v12, %v5608_v12  ;;  %v8465_v18 = vpack.i.b16 %v5609_v40, %v5609_v40  ;;  %v5633_v14 = vrot.slane %v8463_v35, %v11517_v6  ;;  %v5694_v9 = vld [vmem:[%s12593_s15 + $0xc] sm:$0x1]  ;;  %v5697_v60 = vld [vmem:[%s12593_s15 + $0x14] sm:$0x1]  ;;  %v5963_v15 = vrot.slane %v5955_v36, %v11509_v43 }
 0x4f6   : > { %v5618_v33 = vunpack.i.h.s16 %v5610_v56  ;;  %v5622_v17 = vpack.i.b16 %v5614_v23, %v5614_v23  ;;  %v5624_v46 = vpack.i.b16 %v5616_v1, %v5616_v1  ;;  %v8466_v34 = vpack.i.b16 %v5610_v56, %v5610_v56  ;;  %v5703_v16 = vld [vmem:[%s12593_s15 + $0x24] sm:$0x1] }
 0x4f7   : > { %v7045_v54 = vpop.f32.mrf.mxu1  ;;  %v5640_v29 = vrot.slane %v5620_v51, %v11517_v6  ;;  %v5647_v27 = vrot.slane %v8464_v49, %v11517_v6  ;;  %v5661_v24 = vrot.slane %v8465_v18, %v11517_v6  ;;  %v5692_v53 = vsel %vm11072_vm7, %v5633_v14, %v5691_v8  ;;  %v5700_v37 = vld [vmem:[%s12593_s15 + $0x1c] sm:$0x1]  ;;  %v5706_v28 = vld [vmem:[%s12593_s15 + $0x2c] sm:$0x1]  ;;  %v6061_v14 = vld [vmem:[%s12593_s15 + $0x4] sm:$0x2] }
 0x4f8   : > { %v5709_v58 = vld [vmem:[%s12593_s15 + $0x34] sm:$0x1]  ;;  %v5626_v52 = vpack.i.b16 %v5618_v33, %v5618_v33  ;;  %v5654_v25 = vrot.slane %v5622_v17, %v11517_v6  ;;  %v5668_v39 = vrot.slane %v5624_v46, %v11517_v6  ;;  %v5675_v26 = vrot.slane %v8466_v34, %v11517_v6  ;;  %5693 = vst [vmem:[%s12593_s15 + $0x4] sm:$0x1] %v5692_v53 }
 0x4f9   : > { %v8970_v45 = vpop.f32.mrf.mxu1  ;;  %v5695_v4 = vsel %vm11072_vm7, %v5640_v29, %v5694_v9  ;;  %v5698_v13 = vsel %vm11072_vm7, %v5647_v27, %v5697_v60  ;;  %v5704_v2 = vsel %vm11072_vm7, %v5661_v24, %v5703_v16  ;;  %v5712_v32 = vld [vmem:[%s12593_s15 + $0x3c] sm:$0x1]  ;;  %v5964_v55 = vcombine.high %v5963_v15, %v5963_v15  ;;  %v6064_v16 = vld [vmem:[%s12593_s15 + $0xc] sm:$0x2]  ;;  %v6067_v29 = vld [vmem:[%s12593_s15 + $0x14] sm:$0x2] }
 0x4fa   : > { %v5682_v41 = vrot.slane %v5626_v52, %v11517_v6  ;;  %5696 = vst [vmem:[%s12593_s15 + $0xc] sm:$0x1] %v5695_v4  ;;  %5699 = vst [vmem:[%s12593_s15 + $0x14] sm:$0x1] %v5698_v13  ;;  %v5701_v44 = vsel %vm11072_vm7, %v5654_v25, %v5700_v37  ;;  %v5707_v20 = vsel %vm11072_vm7, %v5668_v39, %v5706_v28  ;;  %v6073_v27 = vld [vmem:[%s12593_s15 + $0x24] sm:$0x2] }
 0x4fb   : > { %v7048_v50 = vpop.f32.mrf.mxu1  ;;  %5705 = vst [vmem:[%s12593_s15 + $0x24] sm:$0x1] %v5704_v2  ;;  %v5710_v59 = vsel %vm11072_vm7, %v5675_v26, %v5709_v58  ;;  %5702 = vst [vmem:[%s12593_s15 + $0x1c] sm:$0x1] %v5701_v44  ;;  %v5971_v0 = vrot.slane %v5963_v15, %v11509_v43  ;;  %v6325_v19 = vpack.c.bf16 %v11982_v5, %v11982_v5  ;;  %v6076_v52 = vld [vmem:[%s12593_s15 + $0x2c] sm:$0x2] }
 0x4fc   : > { %5708 = vst [vmem:[%s12593_s15 + $0x2c] sm:$0x1] %v5707_v20  ;;  %5711 = vst [vmem:[%s12593_s15 + $0x34] sm:$0x1] %v5710_v59  ;;  %v6695_v42 = vpack.c.bf16 %v11985_v63, %v11985_v63  ;;  %v5713_v40 = vsel %vm11072_vm7, %v5682_v41, %v5712_v32  ;;  %v7057_v47 = vmul.f32 %v11635_v30, %v7045_v54  ;;  %v6070_v50 = vld [vmem:[%s12593_s15 + $0x1c] sm:$0x2] }
 0x4fd   : > { %v8971_v62 = vpop.f32.mrf.mxu1  ;;  %5714 = vst [vmem:[%s12593_s15 + $0x3c] sm:$0x1] %v5713_v40  ;;  %v5978_v56 = vrot.slane %v5964_v55, %v11509_v43  ;;  %v5979_v23 = vcombine.high %v5971_v0, %v5971_v0  ;;  %v5982_v1 = vunpack.i.h.s16 %v5971_v0  ;;  %v8480_v51 = vpack.i.b16 %v5971_v0, %v5971_v0  ;;  %v6079_v25 = vld [vmem:[%s12593_s15 + $0x34] sm:$0x2]  ;;  %v6082_v41 = vld [vmem:[%s12593_s15 + $0x3c] sm:$0x2] }
 0x4fe   : > { %v6333_v8 = vrot.slane %v6325_v19, %v11509_v43  ;;  %v12038_v63 = vrot.slane %v6695_v42, %v11509_v43  ;;  %v12040_v10 = vadd.f32 %v7062_v7, %v7057_v47 }
 0x4ff   : > { %v7415_v12 = vpop.f32.mrf.mxu1  ;;  %v5984_v54 = vunpack.i.h.s16 %v5978_v56  ;;  %v5986_v49 = vunpack.i.h.s16 %v5979_v23  ;;  %v5990_v18 = vpack.i.b16 %v5982_v1, %v5982_v1  ;;  %v8481_v45 = vpack.i.b16 %v5978_v56, %v5978_v56 }
 0x500   : > { %v7427_v35 = vmul.f32 %v11572_v21, %v7415_v12  ;;  %v5980_v21 = vcombine.high %v5978_v56, %v5978_v56  ;;  %v8482_v33 = vpack.i.b16 %v5979_v23, %v5979_v23  ;;  %v6003_v17 = vrot.slane %v8480_v51, %v11517_v6 }
 0x501   : > { %v8982_v5 = vpop.f32.mrf.mxu1  ;;  %v6334_v46 = vcombine.high %v6333_v8, %v6333_v8  ;;  %v5992_v9 = vpack.i.b16 %v5984_v54, %v5984_v54  ;;  %v6010_v53 = vrot.slane %v5990_v18, %v11517_v6  ;;  %v6017_v37 = vrot.slane %v8481_v45, %v11517_v6 }
 0x502   : > { %v12043_v30 = vadd.f32 %v11649_v22, %v7427_v35  ;;  %v5988_v34 = vunpack.i.h.s16 %v5980_v21  ;;  %v5994_v22 = vpack.i.b16 %v5986_v49, %v5986_v49  ;;  %v8483_v60 = vpack.i.b16 %v5980_v21, %v5980_v21 }
 0x503   : > { %v7418_v36 = vpop.f32.mrf.mxu1  ;;  %v6031_v28 = vrot.slane %v8482_v33, %v11517_v6  ;;  %v6062_v58 = vsel %vm11114_vm1, %v6003_v17, %v6061_v14  ;;  %v6024_v26 = vrot.slane %v5992_v9, %v11517_v6  ;;  %v6065_v32 = vsel %vm11114_vm1, %v6010_v53, %v6064_v16 }
 0x504   : > { %v5996_v39 = vpack.i.b16 %v5988_v34, %v5988_v34  ;;  %v6038_v4 = vrot.slane %v5994_v22, %v11517_v6  ;;  %v6045_v13 = vrot.slane %v8483_v60, %v11517_v6  ;;  %6063 = vst [vmem:[%s12593_s15 + $0x4] sm:$0x2] %v6062_v58  ;;  %v6068_v15 = vsel %vm11114_vm1, %v6017_v37, %v6067_v29 }
 0x505   : > { %v8983_v24 = vpop.f32.mrf.mxu1  ;;  %v6074_v62 = vsel %vm11114_vm1, %v6031_v28, %v6073_v27  ;;  %v6341_v44 = vrot.slane %v6333_v8, %v11509_v43  ;;  %6066 = vst [vmem:[%s12593_s15 + $0xc] sm:$0x2] %v6065_v32  ;;  %6069 = vst [vmem:[%s12593_s15 + $0x14] sm:$0x2] %v6068_v15  ;;  %v6071_v59 = vsel %vm11114_vm1, %v6024_v26, %v6070_v50 }
 0x506   : > { %v6052_v20 = vrot.slane %v5996_v39, %v11517_v6  ;;  %6075 = vst [vmem:[%s12593_s15 + $0x24] sm:$0x2] %v6074_v62  ;;  %v6077_v55 = vsel %vm11114_vm1, %v6038_v4, %v6076_v52  ;;  %v6080_v0 = vsel %vm11114_vm1, %v6045_v13, %v6079_v25  ;;  %6072 = vst [vmem:[%s12593_s15 + $0x1c] sm:$0x2] %v6071_v59 }
 0x507   : > { %v12062_v2 = vpop.f32.mrf.mxu1  ;;  %6078 = vst [vmem:[%s12593_s15 + $0x2c] sm:$0x2] %v6077_v55  ;;  %6081 = vst [vmem:[%s12593_s15 + $0x34] sm:$0x2] %v6080_v0  ;;  %v6348_v42 = vrot.slane %v6334_v46, %v11509_v43  ;;  %v6349_v12 = vcombine.high %v6341_v44, %v6341_v44  ;;  %v6352_v40 = vunpack.i.h.s16 %v6341_v44  ;;  %v8497_v47 = vpack.i.b16 %v6341_v44, %v6341_v44 }
 0x508   : > { %v6083_v35 = vsel %vm11114_vm1, %v6052_v20, %v6082_v41  ;;  %v6704_v7 = vcombine.high %v12038_v63, %v12038_v63  ;;  %v12092_v56 = vrot.slane %v12038_v63, %v11509_v43  ;;  %v7065_v23 = vpack.c.bf16 %v12040_v10, %v12040_v10 }
 0x509   : > { %v8994_v19 = vpop.f32.mrf.mxu1  ;;  %6084 = vst [vmem:[%s12593_s15 + $0x3c] sm:$0x2] %v6083_v35  ;;  %v6350_v51 = vcombine.high %v6348_v42, %v6348_v42  ;;  %v6354_v5 = vunpack.i.h.s16 %v6348_v42  ;;  %v6356_v8 = vunpack.i.h.s16 %v6349_v12  ;;  %v6360_v21 = vpack.i.b16 %v6352_v40, %v6352_v40 }
 0x50a   : > { %v8498_v54 = vpack.i.b16 %v6348_v42, %v6348_v42  ;;  %v8499_v38 = vpack.i.b16 %v6349_v12, %v6349_v12  ;;  %v6373_v49 = vrot.slane %v8497_v47, %v11517_v6  ;;  %v6718_v18 = vrot.slane %v6704_v7, %v11509_v43  ;;  %v6801_v7 = vld [vmem:[%s12593_s15 + $0x4] sm:$0x4] }
 0x50b   : > { %v7788_v1 = vpop.f32.mrf.mxu1  ;;  %v6358_v14 = vunpack.i.h.s16 %v6350_v51  ;;  %v6362_v36 = vpack.i.b16 %v6354_v5, %v6354_v5  ;;  %v6364_v45 = vpack.i.b16 %v6356_v8, %v6356_v8  ;;  %v8500_v33 = vpack.i.b16 %v6350_v51, %v6350_v51  ;;  %v6431_v17 = vld [vmem:[%s12593_s15 + $0x4] sm:$0x2]  ;;  %v6813_v51 = vld [vmem:[%s12593_s15 + $0x24] sm:$0x4] }
 0x50c   : > { %v6380_v46 = vrot.slane %v6360_v21, %v11517_v6  ;;  %v6387_v34 = vrot.slane %v8498_v54, %v11517_v6  ;;  %v6401_v9 = vrot.slane %v8499_v38, %v11517_v6  ;;  %v6432_v22 = vsel %vm11159_vm0, %v6373_v49, %v6431_v17  ;;  %v6434_v24 = vld [vmem:[%s12593_s15 + $0xc] sm:$0x2]  ;;  %v6437_v53 = vld [vmem:[%s12593_s15 + $0x14] sm:$0x2]  ;;  %v6807_v1 = vld [vmem:[%s12593_s15 + $0x14] sm:$0x4] }
 0x50d   : > { %v8995_v63 = vpop.f32.mrf.mxu1  ;;  %v6366_v60 = vpack.i.b16 %v6358_v14, %v6358_v14  ;;  %v6394_v16 = vrot.slane %v6362_v36, %v11517_v6  ;;  %v6408_v29 = vrot.slane %v6364_v45, %v11517_v6  ;;  %v6415_v27 = vrot.slane %v8500_v33, %v11517_v6  ;;  %6433 = vst [vmem:[%s12593_s15 + $0x4] sm:$0x2] %v6432_v22  ;;  %v6443_v37 = vld [vmem:[%s12593_s15 + $0x24] sm:$0x2]  ;;  %v6440_v50 = vld [vmem:[%s12593_s15 + $0x1c] sm:$0x2] }
 0x50e   : > { %v6435_v28 = vsel %vm11159_vm0, %v6380_v46, %v6434_v24  ;;  %v6438_v58 = vsel %vm11159_vm0, %v6387_v34, %v6437_v53  ;;  %v6444_v52 = vsel %vm11159_vm0, %v6401_v9, %v6443_v37  ;;  %v6446_v25 = vld [vmem:[%s12593_s15 + $0x2c] sm:$0x2]  ;;  %v6449_v39 = vld [vmem:[%s12593_s15 + $0x34] sm:$0x2]  ;;  %v6719_v26 = vcombine.high %v12092_v56, %v12092_v56  ;;  %v6804_v21 = vld [vmem:[%s12593_s15 + $0xc] sm:$0x4]  ;;  %v7802_v37 = vpop.permute.xlu1 %7801 }
 0x50f   : > { %v6422_v4 = vrot.slane %v6366_v60, %v11517_v6  ;;  %6436 = vst [vmem:[%s12593_s15 + $0xc] sm:$0x2] %v6435_v28  ;;  %6439 = vst [vmem:[%s12593_s15 + $0x14] sm:$0x2] %v6438_v58  ;;  %v6441_v13 = vsel %vm11159_vm0, %v6394_v16, %v6440_v50  ;;  %v6447_v32 = vsel %vm11159_vm0, %v6408_v29, %v6446_v25  ;;  %v6722_v44 = vunpack.i.h.s16 %v12092_v56  ;;  %v6810_v54 = vld [vmem:[%s12593_s15 + $0x1c] sm:$0x4] }
 0x510   : > { %6445 = vst [vmem:[%s12593_s15 + $0x24] sm:$0x2] %v6444_v52  ;;  %v6450_v15 = vsel %vm11159_vm0, %v6415_v27, %v6449_v39  ;;  %6442 = vst [vmem:[%s12593_s15 + $0x1c] sm:$0x2] %v6441_v13  ;;  %v6452_v62 = vld [vmem:[%s12593_s15 + $0x3c] sm:$0x2]  ;;  %v6720_v41 = vcombine.high %v6718_v18, %v6718_v18  ;;  %v6724_v20 = vunpack.i.h.s16 %v6718_v18  ;;  %v6726_v59 = vunpack.i.h.s16 %v6719_v26 }
 0x511   : > { %6448 = vst [vmem:[%s12593_s15 + $0x2c] sm:$0x2] %v6447_v32  ;;  %6451 = vst [vmem:[%s12593_s15 + $0x34] sm:$0x2] %v6450_v15  ;;  %v6453_v55 = vsel %vm11159_vm0, %v6422_v4, %v6452_v62  ;;  %v8514_v0 = vpack.i.b16 %v12092_v56, %v12092_v56  ;;  %v8515_v19 = vpack.i.b16 %v6718_v18, %v6718_v18  ;;  %v6816_v38 = vld [vmem:[%s12593_s15 + $0x2c] sm:$0x4] }
 0x512   : > { %v8516_v42 = vpack.i.b16 %v6719_v26, %v6719_v26  ;;  %6454 = vst [vmem:[%s12593_s15 + $0x3c] sm:$0x2] %v6453_v55  ;;  %v6728_v12 = vunpack.i.h.s16 %v6720_v41  ;;  %v6730_v40 = vpack.i.b16 %v6722_v44, %v6722_v44  ;;  %v6732_v47 = vpack.i.b16 %v6724_v20, %v6724_v20  ;;  %v6819_v36 = vld [vmem:[%s12593_s15 + $0x34] sm:$0x4]  ;;  %v6822_v34 = vld [vmem:[%s12593_s15 + $0x3c] sm:$0x4] }
 0x513   : > { %v6734_v35 = vpack.i.b16 %v6726_v59, %v6726_v59  ;;  %v8517_v5 = vpack.i.b16 %v6720_v41, %v6720_v41  ;;  %v6743_v11 = vrot.slane %v8514_v0, %v11517_v6  ;;  %v6757_v8 = vrot.slane %v8515_v19, %v11517_v6 }
 0x514   : > { %v6771_v56 = vrot.slane %v8516_v42, %v11517_v6  ;;  %v6736_v49 = vpack.i.b16 %v6728_v12, %v6728_v12  ;;  %v6750_v18 = vrot.slane %v6730_v40, %v11517_v6  ;;  %v6764_v63 = vrot.slane %v6732_v47, %v11517_v6 }
 0x515   : > { %v6778_v14 = vrot.slane %v6734_v35, %v11517_v6  ;;  %v6785_v45 = vrot.slane %v8517_v5, %v11517_v6  ;;  %v6802_v33 = vsel %vm11195_vm15, %v6743_v11, %v6801_v7  ;;  %v6808_v17 = vsel %vm11195_vm15, %v6757_v8, %v6807_v1 }
 0x516   : > { %v6814_v46 = vsel %vm11195_vm15, %v6771_v56, %v6813_v51  ;;  %v6792_v9 = vrot.slane %v6736_v49, %v11517_v6  ;;  %6803 = vst [vmem:[%s12593_s15 + $0x4] sm:$0x4] %v6802_v33  ;;  %v6805_v22 = vsel %vm11195_vm15, %v6750_v18, %v6804_v21  ;;  %6809 = vst [vmem:[%s12593_s15 + $0x14] sm:$0x4] %v6808_v17 }
 0x517   : > { %v6811_v60 = vsel %vm11195_vm15, %v6764_v63, %v6810_v54  ;;  %6815 = vst [vmem:[%s12593_s15 + $0x24] sm:$0x4] %v6814_v46  ;;  %v6817_v16 = vsel %vm11195_vm15, %v6778_v14, %v6816_v38  ;;  %6806 = vst [vmem:[%s12593_s15 + $0xc] sm:$0x4] %v6805_v22  ;;  %v6820_v29 = vsel %vm11195_vm15, %v6785_v45, %v6819_v36 }
 0x518   : > { %6812 = vst [vmem:[%s12593_s15 + $0x1c] sm:$0x4] %v6811_v60  ;;  %6818 = vst [vmem:[%s12593_s15 + $0x2c] sm:$0x4] %v6817_v16  ;;  %v7073_v27 = vrot.slane %v7065_v23, %v11509_v43  ;;  %v7435_v24 = vpack.c.bf16 %v12043_v30, %v12043_v30  ;;  %v7797_v53 = vmul.f32 %v11737_v31, %v12062_v2 }
 0x519   : > { %6821 = vst [vmem:[%s12593_s15 + $0x34] sm:$0x4] %v6820_v29  ;;  %v6823_v28 = vsel %vm11195_vm15, %v6792_v9, %v6822_v34 }
 0x51a   : > { %6824 = vst [vmem:[%s12593_s15 + $0x3c] sm:$0x4] %v6823_v28  ;;  %v7074_v58 = vcombine.high %v7073_v27, %v7073_v27  ;;  %v7081_v50 = vrot.slane %v7073_v27, %v11509_v43  ;;  %v7443_v52 = vrot.slane %v7435_v24, %v11509_v43  ;;  %v12193_v10 = vadd.f32 %v7802_v37, %v7797_v53 }
 0x51c   : > { %v7088_v23 = vrot.slane %v7074_v58, %v11509_v43  ;;  %v7089_v30 = vcombine.high %v7081_v50, %v7081_v50  ;;  %v7092_v25 = vunpack.i.h.s16 %v7081_v50  ;;  %v8531_v39 = vpack.i.b16 %v7081_v50, %v7081_v50  ;;  %v7541_v58 = vld [vmem:[%s12593_s15 + $0x4] sm:$0x8]  ;;  %v7547_v50 = vld [vmem:[%s12593_s15 + $0x14] sm:$0x8] }
 0x51d   : > { %v7444_v31 = vcombine.high %v7443_v52, %v7443_v52  ;;  %v12197_v2 = vrot.slane %v7443_v52, %v11509_v43  ;;  %v7805_v48 = vpack.c.bf16 %v12193_v10, %v12193_v10  ;;  %v7171_v15 = vld [vmem:[%s12593_s15 + $0x4] sm:$0x4]  ;;  %v7177_v12 = vld [vmem:[%s12593_s15 + $0x14] sm:$0x4]  ;;  %v7553_v52 = vld [vmem:[%s12593_s15 + $0x24] sm:$0x8] }
 0x51e   : > { %v7090_v26 = vcombine.high %v7088_v23, %v7088_v23  ;;  %v7094_v4 = vunpack.i.h.s16 %v7088_v23  ;;  %v7096_v13 = vunpack.i.h.s16 %v7089_v30  ;;  %v7100_v32 = vpack.i.b16 %v7092_v25, %v7092_v25  ;;  %v7174_v42 = vld [vmem:[%s12593_s15 + $0xc] sm:$0x4]  ;;  %v7183_v40 = vld [vmem:[%s12593_s15 + $0x24] sm:$0x4] }
 0x51f   : > { %v8532_v62 = vpack.i.b16 %v7088_v23, %v7088_v23  ;;  %v8533_v41 = vpack.i.b16 %v7089_v30, %v7089_v30  ;;  %v7113_v44 = vrot.slane %v8531_v39, %v11517_v6  ;;  %v7458_v20 = vrot.slane %v7444_v31, %v11509_v43  ;;  %v7180_v51 = vld [vmem:[%s12593_s15 + $0x1c] sm:$0x4]  ;;  %v7186_v5 = vld [vmem:[%s12593_s15 + $0x2c] sm:$0x4]  ;;  %v7544_v39 = vld [vmem:[%s12593_s15 + $0xc] sm:$0x8] }
 0x520   : > { %v7098_v59 = vunpack.i.h.s16 %v7090_v26  ;;  %v7102_v55 = vpack.i.b16 %v7094_v4, %v7094_v4  ;;  %v7104_v0 = vpack.i.b16 %v7096_v13, %v7096_v13  ;;  %v8534_v19 = vpack.i.b16 %v7090_v26, %v7090_v26  ;;  %v7189_v11 = vld [vmem:[%s12593_s15 + $0x34] sm:$0x4]  ;;  %v7550_v31 = vld [vmem:[%s12593_s15 + $0x1c] sm:$0x8] }
 0x521   : > { %v7120_v47 = vrot.slane %v7100_v32, %v11517_v6  ;;  %v7127_v35 = vrot.slane %v8532_v62, %v11517_v6  ;;  %v7141_v7 = vrot.slane %v8533_v41, %v11517_v6  ;;  %v7172_v1 = vsel %vm11231_vm8, %v7113_v44, %v7171_v15  ;;  %v7192_v63 = vld [vmem:[%s12593_s15 + $0x3c] sm:$0x4]  ;;  %v7559_v15 = vld [vmem:[%s12593_s15 + $0x34] sm:$0x8] }
 0x522   : > { %v7106_v8 = vpack.i.b16 %v7098_v59, %v7098_v59  ;;  %v7134_v56 = vrot.slane %v7102_v55, %v11517_v6  ;;  %v7148_v21 = vrot.slane %v7104_v0, %v11517_v6  ;;  %v7155_v54 = vrot.slane %v8534_v19, %v11517_v6  ;;  %7173 = vst [vmem:[%s12593_s15 + $0x4] sm:$0x4] %v7172_v1  ;;  %v7562_v59 = vld [vmem:[%s12593_s15 + $0x3c] sm:$0x8] }
 0x523   : > { %v7175_v38 = vsel %vm11231_vm8, %v7120_v47, %v7174_v42  ;;  %v7178_v49 = vsel %vm11231_vm8, %v7127_v35, %v7177_v12  ;;  %v7184_v18 = vsel %vm11231_vm8, %v7141_v7, %v7183_v40  ;;  %v7459_v14 = vcombine.high %v12197_v2, %v12197_v2 }
 0x524   : > { %v7162_v36 = vrot.slane %v7106_v8, %v11517_v6  ;;  %7176 = vst [vmem:[%s12593_s15 + $0xc] sm:$0x4] %v7175_v38  ;;  %7179 = vst [vmem:[%s12593_s15 + $0x14] sm:$0x4] %v7178_v49  ;;  %v7181_v45 = vsel %vm11231_vm8, %v7134_v56, %v7180_v51  ;;  %v7187_v33 = vsel %vm11231_vm8, %v7148_v21, %v7186_v5  ;;  %v7462_v34 = vunpack.i.h.s16 %v12197_v2 }
 0x525   : > { %7185 = vst [vmem:[%s12593_s15 + $0x24] sm:$0x4] %v7184_v18  ;;  %v7190_v17 = vsel %vm11231_vm8, %v7155_v54, %v7189_v11  ;;  %7182 = vst [vmem:[%s12593_s15 + $0x1c] sm:$0x4] %v7181_v45  ;;  %v7460_v46 = vcombine.high %v7458_v20, %v7458_v20  ;;  %v7464_v9 = vunpack.i.h.s16 %v7458_v20  ;;  %v7466_v22 = vunpack.i.h.s16 %v7459_v14 }
 0x526   : > { %7188 = vst [vmem:[%s12593_s15 + $0x2c] sm:$0x4] %v7187_v33  ;;  %7191 = vst [vmem:[%s12593_s15 + $0x34] sm:$0x4] %v7190_v17  ;;  %v7193_v60 = vsel %vm11231_vm8, %v7162_v36, %v7192_v63  ;;  %v8548_v16 = vpack.i.b16 %v12197_v2, %v12197_v2  ;;  %v8549_v29 = vpack.i.b16 %v7458_v20, %v7458_v20  ;;  %v7556_v2 = vld [vmem:[%s12593_s15 + $0x2c] sm:$0x8] }
 0x527   : > { %v8550_v27 = vpack.i.b16 %v7459_v14, %v7459_v14  ;;  %7194 = vst [vmem:[%s12593_s15 + $0x3c] sm:$0x4] %v7193_v60  ;;  %v7468_v24 = vunpack.i.h.s16 %v7460_v46  ;;  %v7470_v53 = vpack.i.b16 %v7462_v34, %v7462_v34  ;;  %v7472_v37 = vpack.i.b16 %v7464_v9, %v7464_v9 }
 0x528   : > { %v7474_v28 = vpack.i.b16 %v7466_v22, %v7466_v22  ;;  %v8551_v23 = vpack.i.b16 %v7460_v46, %v7460_v46  ;;  %v7483_v61 = vrot.slane %v8548_v16, %v11517_v6  ;;  %v7497_v30 = vrot.slane %v8549_v29, %v11517_v6 }
 0x529   : > { %v7511_v25 = vrot.slane %v8550_v27, %v11517_v6  ;;  %v7476_v26 = vpack.i.b16 %v7468_v24, %v7468_v24  ;;  %v7490_v4 = vrot.slane %v7470_v53, %v11517_v6  ;;  %v7504_v13 = vrot.slane %v7472_v37, %v11517_v6 }
 0x52a   : > { %v7518_v32 = vrot.slane %v7474_v28, %v11517_v6  ;;  %v7525_v62 = vrot.slane %v8551_v23, %v11517_v6  ;;  %v7542_v41 = vsel %vm11262_vm5, %v7483_v61, %v7541_v58  ;;  %v7548_v44 = vsel %vm11262_vm5, %v7497_v30, %v7547_v50 }
 0x52b   : > { %v7554_v20 = vsel %vm11262_vm5, %v7511_v25, %v7553_v52  ;;  %v7532_v55 = vrot.slane %v7476_v26, %v11517_v6  ;;  %7543 = vst [vmem:[%s12593_s15 + $0x4] sm:$0x8] %v7542_v41  ;;  %v7545_v0 = vsel %vm11262_vm5, %v7490_v4, %v7544_v39  ;;  %7549 = vst [vmem:[%s12593_s15 + $0x14] sm:$0x8] %v7548_v44 }
 0x52c   : > { %v7551_v19 = vsel %vm11262_vm5, %v7504_v13, %v7550_v31  ;;  %7555 = vst [vmem:[%s12593_s15 + $0x24] sm:$0x8] %v7554_v20  ;;  %v7557_v42 = vsel %vm11262_vm5, %v7518_v32, %v7556_v2  ;;  %7546 = vst [vmem:[%s12593_s15 + $0xc] sm:$0x8] %v7545_v0  ;;  %v7560_v12 = vsel %vm11262_vm5, %v7525_v62, %v7559_v15 }
 0x52d   : > { %7552 = vst [vmem:[%s12593_s15 + $0x1c] sm:$0x8] %v7551_v19  ;;  %7558 = vst [vmem:[%s12593_s15 + $0x2c] sm:$0x8] %v7557_v42  ;;  %v7813_v40 = vrot.slane %v7805_v48, %v11509_v43  ;;  %v7563_v47 = vsel %vm11262_vm5, %v7532_v55, %v7562_v59 }
 0x52e   : > { %7561 = vst [vmem:[%s12593_s15 + $0x34] sm:$0x8] %v7560_v12  ;;  %7564 = vst [vmem:[%s12593_s15 + $0x3c] sm:$0x8] %v7563_v47 }
 0x52f   : > { %v7814_v35 = vcombine.high %v7813_v40, %v7813_v40  ;;  %v7821_v7 = vrot.slane %v7813_v40, %v11509_v43 }
 0x531   : > { %v7828_v1 = vrot.slane %v7814_v35, %v11509_v43  ;;  %v7829_v51 = vcombine.high %v7821_v7, %v7821_v7  ;;  %v7832_v5 = vunpack.i.h.s16 %v7821_v7  ;;  %v8565_v11 = vpack.i.b16 %v7821_v7, %v7821_v7 }
 0x532   : > { %v7911_v21 = vld [vmem:[%s12593_s15 + $0x4] sm:$0x8]  ;;  %v7917_v36 = vld [vmem:[%s12593_s15 + $0x14] sm:$0x8] }
 0x533   : > { %v7830_v8 = vcombine.high %v7828_v1, %v7828_v1  ;;  %v7834_v56 = vunpack.i.h.s16 %v7828_v1  ;;  %v7836_v10 = vunpack.i.h.s16 %v7829_v51  ;;  %v7840_v48 = vpack.i.b16 %v7832_v5, %v7832_v5  ;;  %v7914_v14 = vld [vmem:[%s12593_s15 + $0xc] sm:$0x8]  ;;  %v7923_v45 = vld [vmem:[%s12593_s15 + $0x24] sm:$0x8] }
 0x534   : > { %v8566_v3 = vpack.i.b16 %v7828_v1, %v7828_v1  ;;  %v8567_v54 = vpack.i.b16 %v7829_v51, %v7829_v51  ;;  %v7853_v38 = vrot.slane %v8565_v11, %v11517_v6  ;;  %v7920_v9 = vld [vmem:[%s12593_s15 + $0x1c] sm:$0x8]  ;;  %v7926_v22 = vld [vmem:[%s12593_s15 + $0x2c] sm:$0x8] }
 0x535   : > { %v7838_v49 = vunpack.i.h.s16 %v7830_v8  ;;  %v7842_v43 = vpack.i.b16 %v7834_v56, %v7834_v56  ;;  %v7844_v18 = vpack.i.b16 %v7836_v10, %v7836_v10  ;;  %v8568_v63 = vpack.i.b16 %v7830_v8, %v7830_v8  ;;  %v7929_v60 = vld [vmem:[%s12593_s15 + $0x34] sm:$0x8]  ;;  %v7932_v58 = vld [vmem:[%s12593_s15 + $0x3c] sm:$0x8] }
 0x536   : > { %v7860_v33 = vrot.slane %v7840_v48, %v11517_v6  ;;  %v7867_v17 = vrot.slane %v8566_v3, %v11517_v6  ;;  %v7881_v46 = vrot.slane %v8567_v54, %v11517_v6  ;;  %v7912_v34 = vsel %vm11295_vm4, %v7853_v38, %v7911_v21 }
 0x537   : > { %v7846_v16 = vpack.i.b16 %v7838_v49, %v7838_v49  ;;  %v7874_v29 = vrot.slane %v7842_v43, %v11517_v6  ;;  %v7888_v27 = vrot.slane %v7844_v18, %v11517_v6  ;;  %v7895_v24 = vrot.slane %v8568_v63, %v11517_v6  ;;  %7913 = vst [vmem:[%s12593_s15 + $0x4] sm:$0x8] %v7912_v34 }
 0x538   : > { %v7915_v53 = vsel %vm11295_vm4, %v7860_v33, %v7914_v14  ;;  %v7918_v37 = vsel %vm11295_vm4, %v7867_v17, %v7917_v36  ;;  %v7924_v28 = vsel %vm11295_vm4, %v7881_v46, %v7923_v45 }
 0x539   : > { %v7902_v50 = vrot.slane %v7846_v16, %v11517_v6  ;;  %7916 = vst [vmem:[%s12593_s15 + $0xc] sm:$0x8] %v7915_v53  ;;  %7919 = vst [vmem:[%s12593_s15 + $0x14] sm:$0x8] %v7918_v37  ;;  %v7921_v52 = vsel %vm11295_vm4, %v7874_v29, %v7920_v9  ;;  %v7927_v23 = vsel %vm11295_vm4, %v7888_v27, %v7926_v22 }
 0x53a   : > { %7925 = vst [vmem:[%s12593_s15 + $0x24] sm:$0x8] %v7924_v28  ;;  %v7930_v61 = vsel %vm11295_vm4, %v7895_v24, %v7929_v60  ;;  %7922 = vst [vmem:[%s12593_s15 + $0x1c] sm:$0x8] %v7921_v52 }
 0x53b   : > { %7928 = vst [vmem:[%s12593_s15 + $0x2c] sm:$0x8] %v7927_v23  ;;  %7931 = vst [vmem:[%s12593_s15 + $0x34] sm:$0x8] %v7930_v61  ;;  %v7933_v30 = vsel %vm11295_vm4, %v7902_v50, %v7932_v58 }
 0x53c   : > { %7934 = vst [vmem:[%s12593_s15 + $0x3c] sm:$0x8] %v7933_v30 }
 0x53d   : > { %s12595_s9 = sld [smem:[#allocation32_spill]]  ;;  %s7970_s3 = sshll.u32 %s12593_s15, 4  ;;  %s7971_s3 = int_to_ptr.vmem [resolvable:$true] %s7970_s3 }
 0x53e   : > { %s12596_s20 = sld [smem:[#allocation33_spill]]  ;;  %s9720_s28 = smov 128  }
 0x53f   : > { %s12597_s22 = sld [smem:[#allocation39_spill]]  ;;  %s9721_s4 = smov 256  }
 0x540   : > { %s12598_s25 = sld [smem:[#allocation59_spill]]  ;;  %s9722_s16 = smov 2  }
 0x541   : > { %s9723_s11 = smov 64   ;;  %s9724_s23 = smov 4  }
 0x542   : > { %s9725_s6 = smov 131072   ;;  %s9726_s12 = smov 0  }
 0x543   : > { %s8571_s8 = sshll.u32 %s12595_s9, 1  ;;  %s8001_s7 = sshll.u32 %s12532_s26, 4  ;;  %s12357_s7 = int_to_ptr.vmem [resolvable:$true] %s8001_s7 }
 0x544   : > { %s8572_s24 = sshll.u32 %s12596_s20, 5  ;;  %s8575_s10 = sshll.u32 %s12596_s20, 2 }
 0x545   : > { %s7957_s2 = sadd.s32 %s8572_s24, %s8571_s8  ;;  %p12599_p6 = scmp.ne.s32.totalorder %s12597_s22, 0 }
 0x546   : > { %s8573_s18 = sshll.u32 %s7957_s2, 6  ;;  %s7998_s19 = sadd.s32 %s8575_s10, %s8571_s8 }
 0x547   : > { %s7959_s29 = scalar_lea.hbm %s12598_s25, %s8573_s18  ;;  %9025 = sst [smem:[#allocation21]] (%p12599_p6), %s9720_s28 }
 0x548   : > { %9026 = sst [smem:[#allocation21 + $0x1]] (%p12599_p6), %s9721_s4  ;;  %s8576_s30 = sshll.u32 %s7998_s19, 6 }
 0x549   : > { %9027 = sst [smem:[#allocation21 + $0x2]] (%p12599_p6), %s9722_s16  ;;  %s9578_s24 = scalar_lea.vmem %s12357_s7, 128 }
 0x54a   : > { %9028 = sst [smem:[#allocation21 + $0x3]] (%p12599_p6), %s9723_s11  ;;  %p9579_p9 = scmp.ne.s32.totalorder %s12357_s7, %s9578_s24 }
 0x54b   : > { %9029 = sst [smem:[#allocation21 + $0x4]] (%p12599_p6), %s9723_s11 }
 0x54c   : > { %9030 = sst [smem:[#allocation21 + $0x5]] (%p12599_p6), %s9724_s23  ;;  %p9580_p2 = pnand %p9579_p9, %p12599_p6 }
 0x54d   : > { %9031 = dma.general (%p12599_p6), %s7971_s3, 1024, %s7959_s29, %s7940_s13, %s9725_s6, [#allocation21], %s9726_s12, 0  }
 0x54e   : > { %s12600_s15 = sld [smem:[#allocation60_spill]]  ;;  %p9581_p4 = pneg %p9580_p2 }
 0x54f   : > { %s9727_s13 = smov [#allocation16]  }
 0x550   : > { %s9582_s20 = sshll.u32 %s9727_s13, 4  ;;  %s9583_s20 = int_to_ptr.vmem [resolvable:$false] %s9582_s20 }
 0x551   : > { %s9584_s26 = scalar_lea.vmem %s9583_s20, 256  ;;  %p9585_p5 = scmp.lt.s32.totalorder %s12357_s7, %s9583_s20 }
 0x552   : > { %p9586_p13 = scmp.lt.s32.totalorder %s9584_s26, %s9578_s24 }
 0x554   : > { %s12362_s9 = scalar_lea.hbm %s12600_s15, %s8576_s30  ;;  %p9587_p7 = por %p9586_p13, %p9585_p5 }
 0x556   : > { %p9588_p10 = pnand %p9587_p7, %p9581_p4 }
 0x558   : > { %9591 = shalt.err (!%p9588_p10)
}
 0x559   : > { %s9592_s8 = scalar_lea.hbm %s12362_s9, 128  ;;  %s9596_s18 = scalar_lea.hbm %s12600_s15, 512 }
 0x55a   : > { %p9593_p11 = scmp.ne.s32.totalorder %s12362_s9, %s9592_s8  ;;  %p9597_p1 = scmp.lt.s32.totalorder %s12362_s9, %s12600_s15 }
 0x55b   : > { %p9598_p3 = scmp.lt.s32.totalorder %s9596_s18, %s9592_s8 }
 0x55c   : > { %p9594_p12 = pnand %p9593_p11, %p12599_p6 }
 0x55d   : > { %p9599_p8 = por %p9598_p3, %p9597_p1 }
 0x55e   : > { %p9595_p0 = pneg %p9594_p12 }
 0x560   : > { %p9600_p9 = pnand %p9599_p8, %p9595_p0 }
 0x562   : > { %9603 = shalt.err (!%p9600_p9)
}
 0x563   : > { %s9728_s25 = smov 64   ;;  %s9729_s29 = smov 4  }
 0x564   : > { %9032 = dma.vmem_to_hbm [thread:$0]  (%p12599_p6), %s12357_s7, 128, %s12362_s9, %s7945_s21, %s9728_s25, %s9728_s25, %s9729_s29  }
 0x565 PF: > { %s12601_s28 = sld [smem:[#allocation36_spill]] }
 0x566   : > { %s12602_s4 = sld [smem:[#allocation29_spill]] }
 0x567   : > { %s12603_s16 = sld [smem:[#allocation40_spill]] }
 0x56b   : > { %p9068_p2 = scmp.ge.s32.totalorder %s12601_s28, 2 }
 0x56c   : > { %s8016_s11 = sand.u32 1, %s12602_s4  }
 0x56d   : > { %p12604_p4 = scmp.ne.s32.totalorder %s12603_s16, 0  ;;  %s8017_s23 = scalar_lea.sflag [#allocation6], %s8016_s11 }
 0x56f   : > { %p9052_p5 = pnand %p9068_p2, %p12604_p4 }
 0x571   : > { %p9053_p13 = pneg %p9052_p5 }
 0x573   : > { %9653 = dma.done.wait (%p9053_p13), %s8017_s23, 1024  }
 0x574   : > { %9655 = vsyncadd (%p9053_p13), %s8017_s23, 4294966272  ;;  %s8026_s6 = scalar_lea.sflag [#allocation17], %s8016_s11 }
 0x575   : > { %9657 = dma.done.wait (%p9053_p13), %s8026_s6, 128  }
 0x576   : > { %9659 = vsyncadd (%p9053_p13), %s8026_s6, 4294967168  ;;  %s39_s26 = sadd.s32 1, %s12601_s28   ;;  %s12605_s20 = sld [smem:[#allocation30_spill]] }
 0x577   : > { %p36_p7 = scmp.ge.s32.totalorder %s39_s26, 6   ;;  %s12606_s21 = sld [smem:[#allocation31_spill]] }
 0x578   : > { %s12607_s22 = sld [smem:[#allocation41_spill]] }
 0x579   : > { %s12608_s23 = sld [smem:[#allocation34_spill]]  ;;  %38 = sbr.rel (!%p36_p7) target bundleno = 29 (0x1d), region = 223 }
 0x57a   : > { %s12609_s24 = sld [smem:[#allocation35_spill]] }
 0x57b   : > { %s12610_s3 = sld [smem:[#allocation37_spill]] }
 0x57c   : > { %s12611_s25 = sld [smem:[#allocation38_spill]] }
 0x57e   :  { %8031 = vsyncpa [#allocation5], 1 }
 0x57f   :  { %8033 = vsyncpa [#allocation5 + $0x1], 1 }
 0x580   :  { %8034 = vsyncpa [#allocation13], 1 }
 0x581   :  { %8035 = vsyncpa [#allocation6], 1 }
 0x582   :  { %8037 = vsyncpa [#allocation6 + $0x1], 1 }
 0x583   :  { %8038 = vsyncpa [#allocation17], 1 }
 0x584   :  { %8040 = vsyncpa [#allocation17 + $0x1], 1 }
 0x585   :  { %8041 = vsyncpa [#allocation7], 1 }
 0x586   :  { %8043 = vsyncpa [#allocation7 + $0x1], 1 }
 0x587   :  { %8044 = vsyncpa [#allocation9], 1 }

</bundles_post_ra>
